<compile_context>
chip_gen: v5e
topology: v5e:2x2
jax: 0.10.0
libtpu: 0.0.40
codegen_flags: <defaults>
</compile_context>

<pallas_src>
import jax
import jax.numpy as jnp
from jax.experimental import pallas as pl
from jax.experimental.pallas import tpu as pltpu


# ----------------------------------------------------------------------------- helpers
def _swish(x):
    # PhiSNet 'swish' activation (SiLU). TODO(synk): learnable swish params fixed at defaults.
    return x * jax.nn.sigmoid(x)


# ----------------------------------------------------------------------------- fused kernel
def _make_fused_kernel(offsets):
    """Build the fused ModularBlock kernel. `offsets` maps stack name -> (start, count)
    into the stacked residual-weight tensors (static Python ints)."""

    def kernel(x_ref, rbf_ref, idxj_ref, idxi_ref,
               w1_ref, b1_ref, w2_ref, b2_ref, wrbf_ref,
               xout_ref, yout_ref,
               xi_sc, xj_sc, v_sc):
        p = pl.program_id(0)
        n_p = pl.num_programs(0)

        # ---- residual block: out = x + W2 @ swish(W1 @ swish(x) + b1) + b2 ----
        # (SphericalLinear at order 0 == dense layer). bf16 MXU path, f32 accumulate.
        def res_block(x, k):
            h = _swish(x)
            h = jnp.dot(h.astype(jnp.bfloat16), w1_ref[k],
                        preferred_element_type=jnp.float32) + b1_ref[k]
            h = _swish(h)
            h = jnp.dot(h.astype(jnp.bfloat16), w2_ref[k],
                        preferred_element_type=jnp.float32) + b2_ref[k]
            return x + h

        def res_stack(x, name):
            start, count = offsets[name]
            for k in range(start, start + count):          # static loop (tiny stacks)
                x = res_block(x, k)
            return x

        # ---- first P step: atom-side pre-stacks, run once, kept in VMEM scratch ----
        @pl.when(p == 0)
        def _():
            x = res_stack(x_ref[...], "pre_x")             # xs = residual_pre_x(xs)
            xi_sc[...] = res_stack(x, "pre_vi")
            xj_sc[...] = res_stack(x, "pre_vj").astype(jnp.bfloat16)  # matmul RHS
            v_sc[...] = jnp.zeros_like(v_sc)

        # ---- every P step: one tile of the interaction message passing ----
        N = xi_sc.shape[0]
        PT = rbf_ref.shape[0]

        # radial modulation (Y00 already folded into the bf16 rbf stream on host)
        g = jnp.dot(rbf_ref[...], wrbf_ref[...],
                    preferred_element_type=jnp.float32)                     # [PT, F]

        # one-hot gather of x_j[idx_j] on the MXU: onehot_j is (PT, N) — idx_j is a
        # (PT, 1) column so the compare lane-broadcasts it (natural LHS orientation).
        atom_lane = jax.lax.broadcasted_iota(jnp.int32, (PT, N), 1)
        onehot_j = (atom_lane == idxj_ref[...]).astype(jnp.bfloat16)        # [PT, N]
        xj_g = jnp.dot(onehot_j, xj_sc[...],
                       preferred_element_type=jnp.float32)                  # [PT, F]

        # PairMixing at L=0: message = g * x_j[idx_j]  (Y00 folded into g)
        m = (g * xj_g).astype(jnp.bfloat16)                                 # [PT, F]

        # scatter-add over receiving atom i: build the one-hot already transposed
        # (N, PT) from the (1, PT) idx_i row, then a plain MXU dot (no vxpose).
        atom_sub = jax.lax.broadcasted_iota(jnp.int32, (N, PT), 0)
        onehot_iT = (atom_sub == idxi_ref[...]).astype(jnp.bfloat16)        # [N, PT]
        v_sc[...] += jnp.dot(onehot_iT, m,
                             preferred_element_type=jnp.float32)            # [N, F]

        # ---- last P step: atom-side post-stacks + lane-dense output stores ----
        @pl.when(p == n_p - 1)
        def _():
            x = xi_sc[...] + v_sc[...]
            x = res_stack(x, "post_v")
            x = res_stack(x, "post_x")                     # xs = residual_post_x(xs)
            y = res_stack(x, "output")                     # ys = residual_out(xs)
            xout_ref[...] = x.astype(xout_ref.dtype)
            yout_ref[...] = y.astype(yout_ref.dtype)

    return kernel


def modular_block_fused_call(params, x, rbf_eff, idx_i, idx_j, *, p_tile=128):
    N, F = x.shape
    P, B = rbf_eff.shape
    T = params["w1"].shape[0]

    # ---- pad the pair axis to a multiple of p_tile (see padding convention above) ----
    n_pt = max(1, pl.cdiv(P, p_tile))
    P_pad = n_pt * p_tile
    if P_pad != P:
        pad = P_pad - P
        rbf_eff = jnp.concatenate([rbf_eff, jnp.zeros((pad, B), rbf_eff.dtype)], 0)
        idx_i = jnp.concatenate([idx_i, jnp.full((pad,), N, jnp.int32)], 0)
        idx_j = jnp.concatenate([idx_j, jnp.full((pad,), N, jnp.int32)], 0)

    idx_j_col = idx_j.reshape(P_pad, 1)     # gather one-hot: pair-major sublanes
    idx_i_row = idx_i.reshape(1, P_pad)     # scatter one-hot generated transposed

    args = (x, rbf_eff, idx_j_col, idx_i_row,
            params["w1"], params["b1"], params["w2"], params["b2"], params["w_rbf"])

    in_specs = [
        pl.BlockSpec((N, F), lambda p: (0, 0)),            # x: resident, read at step 0
        pl.BlockSpec((p_tile, B), lambda p: (p, 0)),        # rbf (bf16): streamed over P
        pl.BlockSpec((p_tile, 1), lambda p: (p, 0)),        # idx_j column tile
        pl.BlockSpec((1, p_tile), lambda p: (0, p)),        # idx_i row tile
        pl.BlockSpec((T, F, F), lambda p: (0, 0, 0)),       # w1 stack: resident
        pl.BlockSpec((T, 1, F), lambda p: (0, 0, 0)),       # b1 stack
        pl.BlockSpec((T, F, F), lambda p: (0, 0, 0)),       # w2 stack
        pl.BlockSpec((T, 1, F), lambda p: (0, 0, 0)),       # b2 stack
        pl.BlockSpec((B, F), lambda p: (0, 0)),             # w_rbf: resident
    ]
    out_specs = (pl.BlockSpec((N, F), lambda p: (0, 0)),
                 pl.BlockSpec((N, F), lambda p: (0, 0)))

    flops = T * 4 * N * F * F + 2 * P_pad * B * F + 4 * P_pad * N * F
    transcendentals = 2 * T * N * F
    bytes_accessed = int(sum(int(a.size) * a.dtype.itemsize for a in args) + 2 * N * F * 4)

    kernel = _make_fused_kernel(params["offsets"])
    return pl.pallas_call(
        kernel,
        out_shape=(jax.ShapeDtypeStruct((N, F), jnp.float32),
                   jax.ShapeDtypeStruct((N, F), jnp.float32)),
        grid_spec=pltpu.PrefetchScalarGridSpec(
            num_scalar_prefetch=0,
            grid=(n_pt,),
            in_specs=in_specs,
            out_specs=out_specs,
            scratch_shapes=[pltpu.VMEM((N, F), jnp.float32),     # xi  (persists over P)
                            pltpu.VMEM((N, F), jnp.bfloat16),    # xj  (gather RHS)
                            pltpu.VMEM((N, F), jnp.float32)]),   # v   (scatter accumulator)
        compiler_params=pltpu.CompilerParams(
            # single grid axis = the P reduction -> sequential accumulate.
            dimension_semantics=("arbitrary",),
            # explicit scoped-VMEM limit: raises v5e's 16 MiB default, matches
            # v6e/v7x defaults; re-size against v7x's 64 MiB physical as tiles grow.
            vmem_limit_bytes=32 * 1024 * 1024),
        cost_estimate=pl.CostEstimate(flops=flops,
                                      transcendentals=transcendentals,
                                      bytes_accessed=bytes_accessed),
    )(*args)


# ----------------------------------------------------------------------------- params
_STACK_NAMES = ("pre_x", "pre_vi", "pre_vj", "post_v", "post_x", "output")


def init_modular_block(key, F, B, nres):
    counts = [nres[n] for n in _STACK_NAMES]
    T = sum(counts)
    offsets, start = {}, 0
    for n, c in zip(_STACK_NAMES, counts):
        offsets[n] = (start, c)
        start += c

    key, k1, k2, kw = jax.random.split(key, 4)
    w1 = (jax.random.normal(k1, (T, F, F), jnp.float32) / jnp.sqrt(F)).astype(jnp.bfloat16)
    # second linear is zero-init in PhiSNet; small random values keep the forward
    # pass non-trivial while remaining deterministic (intentional, not a fidelity bug).
    w2 = (0.1 * jax.random.normal(k2, (T, F, F), jnp.float32) / jnp.sqrt(F)).astype(jnp.bfloat16)
    b1 = jnp.zeros((T, 1, F), jnp.float32)
    b2 = jnp.zeros((T, 1, F), jnp.float32)
    w_rbf = (jax.random.normal(kw, (B, F), jnp.float32) / jnp.sqrt(B)).astype(jnp.bfloat16)
    return {"w1": w1, "b1": b1, "w2": w2, "b2": b2, "w_rbf": w_rbf, "offsets": offsets}


# ----------------------------------------------------------------------------- forward
def modular_block_forward(params, xs, rbf, sph, idx_i, idx_j, *, p_tile=128):
    """ModularBlock.forward at order = 0. Returns (xs, ys), each a list of [N, F, 1]."""
    x = xs[0][..., 0]                               # [N, F]
    sph0 = sph[0][:, 0, :]                          # [P, 1] (Y00 per pair at L=0)
    # Fold the per-pair Y00 into the rbf stream and cast to bf16 on the host:
    # halves HBM traffic of the largest streaming input, drops one (P,F) multiply.
    rbf_eff = (rbf * sph0).astype(jnp.bfloat16)     # [P, B]
    x_out, y_out = modular_block_fused_call(
        params, x, rbf_eff,
        idx_i.astype(jnp.int32), idx_j.astype(jnp.int32), p_tile=p_tile)
    return [x_out[..., None]], [y_out[..., None]]


# ----------------------------------------------------------------------------- pure-JAX reference
def modular_block_reference(params, xs, rbf, sph, idx_i, idx_j):
    x = xs[0][..., 0]
    sph0 = sph[0][:, 0, :]
    N = x.shape[0]
    w1, b1, w2, b2 = params["w1"], params["b1"], params["w2"], params["b2"]

    def res_block(x, k):
        h = _swish(x)
        h = jnp.dot(h.astype(jnp.bfloat16), w1[k], preferred_element_type=jnp.float32) + b1[k]
        h = _swish(h)
        h = jnp.dot(h.astype(jnp.bfloat16), w2[k], preferred_element_type=jnp.float32) + b2[k]
        return x + h

    def res_stack(x, name):
        s, c = params["offsets"][name]
        for k in range(s, s + c):
            x = res_block(x, k)
        return x

    x = res_stack(x, "pre_x")
    xi = res_stack(x, "pre_vi")
    xj = res_stack(x, "pre_vj")
    rbf_eff = (rbf * sph0).astype(jnp.bfloat16)           # mirror host-side folding/cast
    g = jnp.dot(rbf_eff, params["w_rbf"], preferred_element_type=jnp.float32)
    xj_g = xj.astype(jnp.bfloat16).astype(jnp.float32)[idx_j]
    m = g * xj_g
    v = jax.ops.segment_sum(m.astype(jnp.bfloat16).astype(jnp.float32), idx_i, num_segments=N)
    x = xi + v
    x = res_stack(x, "post_v")
    x = res_stack(x, "post_x")
    y = res_stack(x, "output")
    return [x[..., None]], [y[..., None]]


# ----------------------------------------------------------------------------- main
if __name__ == "__main__":
    key = jax.random.PRNGKey(0)
    # Lane-dense F and B (multiples of 128); N_ATOMS = 128 fills the MXU M dim;
    # P = 256 with P_TILE = 128 exercises a 2-step pair-axis grid + accumulator.
    N_ATOMS, F, B, P = 128, 128, 128, 256
    P_TILE = 128
    ORDER = 0
    NRES = dict(pre_x=1, post_x=1, pre_vi=1, pre_vj=1, post_v=1, output=1)

    kx, krbf, ki, kj, kp = jax.random.split(key, 5)
    xs_in = [jax.random.normal(kx, (N_ATOMS, F, 1), jnp.float32)]
    rbf_in = jax.random.normal(krbf, (P, B), jnp.float32)
    sph_in = [jnp.full((P, 1, 1), 0.28209479177387814, jnp.float32)]   # Y_00
    idx_i = jax.random.randint(ki, (P,), 0, N_ATOMS, jnp.int32)
    idx_j = jax.random.randint(kj, (P,), 0, N_ATOMS, jnp.int32)

    params = init_modular_block(kp, F, B, NRES)

    xs_out, ys_out = modular_block_forward(params, xs_in, rbf_in, sph_in, idx_i, idx_j,
                                           p_tile=P_TILE)
    jax.block_until_ready((xs_out, ys_out))

    assert xs_out[0].shape == (N_ATOMS, F, 2 * ORDER + 1)
    assert ys_out[0].shape == (N_ATOMS, F, 2 * ORDER + 1)

    # Correctness vs. a pure-JAX reference that mirrors the bf16 matmul casts.
    xs_ref, ys_ref = modular_block_reference(params, xs_in, rbf_in, sph_in, idx_i, idx_j)
    err_x = float(jnp.max(jnp.abs(xs_out[0] - xs_ref[0])))
    err_y = float(jnp.max(jnp.abs(ys_out[0] - ys_ref[0])))
    assert err_x < 5e-2 and err_y < 5e-2, (err_x, err_y)

    print("KERNEL_OK")
</pallas_src>

<mosaic_0001>
module attributes {stable_mosaic.version = 11 : i64} {
  func.func @kernel(%arg0: i32, %arg1: memref<128x128xf32, #tpu.memory_space<vmem>>, %arg2: memref<128x128xbf16, #tpu.memory_space<vmem>>, %arg3: memref<128x1xi32, #tpu.memory_space<vmem>>, %arg4: memref<1x128xi32, #tpu.memory_space<vmem>>, %arg5: memref<6x128x128xbf16, #tpu.memory_space<vmem>>, %arg6: memref<6x1x128xf32, #tpu.memory_space<vmem>>, %arg7: memref<6x128x128xbf16, #tpu.memory_space<vmem>>, %arg8: memref<6x1x128xf32, #tpu.memory_space<vmem>>, %arg9: memref<128x128xbf16, #tpu.memory_space<vmem>>, %arg10: memref<128x128xf32, #tpu.memory_space<vmem>>, %arg11: memref<128x128xf32, #tpu.memory_space<vmem>>, %arg12: memref<128x128xf32, #tpu.memory_space<vmem>>, %arg13: memref<128x128xbf16, #tpu.memory_space<vmem>>, %arg14: memref<128x128xf32, #tpu.memory_space<vmem>>) attributes {dimension_semantics = [#tpu.dimension_semantics<arbitrary>], iteration_bounds = array<i64: 2>, scalar_prefetch = 0 : i64, scratch_operands = 3 : i64, tpu.core_type = #tpu.core_type<tc>, window_params = [{pipeline_mode = #tpu.pipeline_mode<synchronous>, transform_indices = @transform_0, window_bounds = array<i64: 128, 128>}, {transform_indices = @transform_1, window_bounds = array<i64: 128, 128>}, {transform_indices = @transform_2, window_bounds = array<i64: 128, 1>}, {transform_indices = @transform_3, window_bounds = array<i64: 1, 128>}, {pipeline_mode = #tpu.pipeline_mode<synchronous>, transform_indices = @transform_4, window_bounds = array<i64: 6, 128, 128>}, {pipeline_mode = #tpu.pipeline_mode<synchronous>, transform_indices = @transform_5, window_bounds = array<i64: 6, 1, 128>}, {pipeline_mode = #tpu.pipeline_mode<synchronous>, transform_indices = @transform_6, window_bounds = array<i64: 6, 128, 128>}, {pipeline_mode = #tpu.pipeline_mode<synchronous>, transform_indices = @transform_7, window_bounds = array<i64: 6, 1, 128>}, {pipeline_mode = #tpu.pipeline_mode<synchronous>, transform_indices = @transform_8, window_bounds = array<i64: 128, 128>}, {pipeline_mode = #tpu.pipeline_mode<synchronous>, transform_indices = @transform_9, window_bounds = array<i64: 128, 128>}, {pipeline_mode = #tpu.pipeline_mode<synchronous>, transform_indices = @transform_10, window_bounds = array<i64: 128, 128>}]} {
    %c0_i32 = arith.constant 0 : i32
    %0 = arith.cmpi eq, %arg0, %c0_i32 : i32
    %1 = arith.extui %0 : i1 to i32
    %c0_i32_0 = arith.constant 0 : i32
    %2 = arith.cmpi ne, %1, %c0_i32_0 : i32
    scf.if %2 {
      %c0_17 = arith.constant 0 : index
      %c0_18 = arith.constant 0 : index
      %31 = vector.load %arg1[%c0_17, %c0_18] : memref<128x128xf32, #tpu.memory_space<vmem>>, vector<128x128xf32>
      %32 = arith.negf %31 : vector<128x128xf32>
      %33 = math.exp %32 : vector<128x128xf32>
      %cst_19 = arith.constant 1.000000e+00 : f32
      %34 = vector.broadcast %cst_19 : f32 to vector<128x128xf32>
      %35 = arith.addf %34, %33 : vector<128x128xf32>
      %36 = arith.divf %34, %35 : vector<128x128xf32>
      %37 = arith.mulf %31, %36 : vector<128x128xf32>
      %38 = arith.truncf %37 : vector<128x128xf32> to vector<128x128xbf16>
      %c0_20 = arith.constant 0 : index
      %c0_21 = arith.constant 0 : index
      %c0_22 = arith.constant 0 : index
      %39 = vector.load %arg5[%c0_20, %c0_21, %c0_22] : memref<6x128x128xbf16, #tpu.memory_space<vmem>>, vector<1x128x128xbf16>
      %40 = vector.shape_cast %39 : vector<1x128x128xbf16> to vector<128x128xbf16>
      %cst_23 = arith.constant dense<0.000000e+00> : vector<128x128xf32>
      %41 = tpu.matmul %38, %40, %cst_23 {dimension_numbers = #tpu.dot_dimension_numbers<[1], [0], [0], [1], [0, 0, 1, 1], [], []>} : vector<128x128xbf16>, vector<128x128xbf16>, vector<128x128xf32> -> vector<128x128xf32>
      %c0_24 = arith.constant 0 : index
      %c0_25 = arith.constant 0 : index
      %c0_26 = arith.constant 0 : index
      %42 = vector.load %arg6[%c0_24, %c0_25, %c0_26] : memref<6x1x128xf32, #tpu.memory_space<vmem>>, vector<1x1x128xf32>
      %43 = vector.shape_cast %42 : vector<1x1x128xf32> to vector<1x128xf32>
      %44 = vector.broadcast %43 : vector<1x128xf32> to vector<128x128xf32>
      %45 = arith.addf %41, %44 : vector<128x128xf32>
      %46 = arith.negf %45 : vector<128x128xf32>
      %47 = math.exp %46 : vector<128x128xf32>
      %cst_27 = arith.constant 1.000000e+00 : f32
      %48 = vector.broadcast %cst_27 : f32 to vector<128x128xf32>
      %49 = arith.addf %48, %47 : vector<128x128xf32>
      %50 = arith.divf %48, %49 : vector<128x128xf32>
      %51 = arith.mulf %45, %50 : vector<128x128xf32>
      %52 = arith.truncf %51 : vector<128x128xf32> to vector<128x128xbf16>
      %c0_28 = arith.constant 0 : index
      %c0_29 = arith.constant 0 : index
      %c0_30 = arith.constant 0 : index
      %53 = vector.load %arg7[%c0_28, %c0_29, %c0_30] : memref<6x128x128xbf16, #tpu.memory_space<vmem>>, vector<1x128x128xbf16>
      %54 = vector.shape_cast %53 : vector<1x128x128xbf16> to vector<128x128xbf16>
      %cst_31 = arith.constant dense<0.000000e+00> : vector<128x128xf32>
      %55 = tpu.matmul %52, %54, %cst_31 {dimension_numbers = #tpu.dot_dimension_numbers<[1], [0], [0], [1], [0, 0, 1, 1], [], []>} : vector<128x128xbf16>, vector<128x128xbf16>, vector<128x128xf32> -> vector<128x128xf32>
      %c0_32 = arith.constant 0 : index
      %c0_33 = arith.constant 0 : index
      %c0_34 = arith.constant 0 : index
      %56 = vector.load %arg8[%c0_32, %c0_33, %c0_34] : memref<6x1x128xf32, #tpu.memory_space<vmem>>, vector<1x1x128xf32>
      %57 = vector.shape_cast %56 : vector<1x1x128xf32> to vector<1x128xf32>
      %58 = vector.broadcast %57 : vector<1x128xf32> to vector<128x128xf32>
      %59 = arith.addf %55, %58 : vector<128x128xf32>
      %60 = arith.addf %31, %59 : vector<128x128xf32>
      %61 = arith.negf %60 : vector<128x128xf32>
      %62 = math.exp %61 : vector<128x128xf32>
      %cst_35 = arith.constant 1.000000e+00 : f32
      %63 = vector.broadcast %cst_35 : f32 to vector<128x128xf32>
      %64 = arith.addf %63, %62 : vector<128x128xf32>
      %65 = arith.divf %63, %64 : vector<128x128xf32>
      %66 = arith.mulf %60, %65 : vector<128x128xf32>
      %67 = arith.truncf %66 : vector<128x128xf32> to vector<128x128xbf16>
      %c1 = arith.constant 1 : index
      %c0_36 = arith.constant 0 : index
      %c0_37 = arith.constant 0 : index
      %68 = vector.load %arg5[%c1, %c0_36, %c0_37] : memref<6x128x128xbf16, #tpu.memory_space<vmem>>, vector<1x128x128xbf16>
      %69 = vector.shape_cast %68 : vector<1x128x128xbf16> to vector<128x128xbf16>
      %cst_38 = arith.constant dense<0.000000e+00> : vector<128x128xf32>
      %70 = tpu.matmul %67, %69, %cst_38 {dimension_numbers = #tpu.dot_dimension_numbers<[1], [0], [0], [1], [0, 0, 1, 1], [], []>} : vector<128x128xbf16>, vector<128x128xbf16>, vector<128x128xf32> -> vector<128x128xf32>
      %c1_39 = arith.constant 1 : index
      %c0_40 = arith.constant 0 : index
      %c0_41 = arith.constant 0 : index
      %71 = vector.load %arg6[%c1_39, %c0_40, %c0_41] : memref<6x1x128xf32, #tpu.memory_space<vmem>>, vector<1x1x128xf32>
      %72 = vector.shape_cast %71 : vector<1x1x128xf32> to vector<1x128xf32>
      %73 = vector.broadcast %72 : vector<1x128xf32> to vector<128x128xf32>
      %74 = arith.addf %70, %73 : vector<128x128xf32>
      %75 = arith.negf %74 : vector<128x128xf32>
      %76 = math.exp %75 : vector<128x128xf32>
      %cst_42 = arith.constant 1.000000e+00 : f32
      %77 = vector.broadcast %cst_42 : f32 to vector<128x128xf32>
      %78 = arith.addf %77, %76 : vector<128x128xf32>
      %79 = arith.divf %77, %78 : vector<128x128xf32>
      %80 = arith.mulf %74, %79 : vector<128x128xf32>
      %81 = arith.truncf %80 : vector<128x128xf32> to vector<128x128xbf16>
      %c1_43 = arith.constant 1 : index
      %c0_44 = arith.constant 0 : index
      %c0_45 = arith.constant 0 : index
      %82 = vector.load %arg7[%c1_43, %c0_44, %c0_45] : memref<6x128x128xbf16, #tpu.memory_space<vmem>>, vector<1x128x128xbf16>
      %83 = vector.shape_cast %82 : vector<1x128x128xbf16> to vector<128x128xbf16>
      %cst_46 = arith.constant dense<0.000000e+00> : vector<128x128xf32>
      %84 = tpu.matmul %81, %83, %cst_46 {dimension_numbers = #tpu.dot_dimension_numbers<[1], [0], [0], [1], [0, 0, 1, 1], [], []>} : vector<128x128xbf16>, vector<128x128xbf16>, vector<128x128xf32> -> vector<128x128xf32>
      %c1_47 = arith.constant 1 : index
      %c0_48 = arith.constant 0 : index
      %c0_49 = arith.constant 0 : index
      %85 = vector.load %arg8[%c1_47, %c0_48, %c0_49] : memref<6x1x128xf32, #tpu.memory_space<vmem>>, vector<1x1x128xf32>
      %86 = vector.shape_cast %85 : vector<1x1x128xf32> to vector<1x128xf32>
      %87 = vector.broadcast %86 : vector<1x128xf32> to vector<128x128xf32>
      %88 = arith.addf %84, %87 : vector<128x128xf32>
      %89 = arith.addf %60, %88 : vector<128x128xf32>
      %c0_50 = arith.constant 0 : index
      %c0_51 = arith.constant 0 : index
      %90 = vector.load %arg12[%c0_50, %c0_51] : memref<128x128xf32, #tpu.memory_space<vmem>>, vector<128x128xf32>
      tpu.vector_store %arg12[%c0_50, %c0_51], %89 {strides = array<i32>} : memref<128x128xf32, #tpu.memory_space<vmem>>, vector<128x128xf32>,
      %91 = arith.negf %60 : vector<128x128xf32>
      %92 = math.exp %91 : vector<128x128xf32>
      %cst_52 = arith.constant 1.000000e+00 : f32
      %93 = vector.broadcast %cst_52 : f32 to vector<128x128xf32>
      %94 = arith.addf %93, %92 : vector<128x128xf32>
      %95 = arith.divf %93, %94 : vector<128x128xf32>
      %96 = arith.mulf %60, %95 : vector<128x128xf32>
      %97 = arith.truncf %96 : vector<128x128xf32> to vector<128x128xbf16>
      %c2 = arith.constant 2 : index
      %c0_53 = arith.constant 0 : index
      %c0_54 = arith.constant 0 : index
      %98 = vector.load %arg5[%c2, %c0_53, %c0_54] : memref<6x128x128xbf16, #tpu.memory_space<vmem>>, vector<1x128x128xbf16>
      %99 = vector.shape_cast %98 : vector<1x128x128xbf16> to vector<128x128xbf16>
      %cst_55 = arith.constant dense<0.000000e+00> : vector<128x128xf32>
      %100 = tpu.matmul %97, %99, %cst_55 {dimension_numbers = #tpu.dot_dimension_numbers<[1], [0], [0], [1], [0, 0, 1, 1], [], []>} : vector<128x128xbf16>, vector<128x128xbf16>, vector<128x128xf32> -> vector<128x128xf32>
      %c2_56 = arith.constant 2 : index
      %c0_57 = arith.constant 0 : index
      %c0_58 = arith.constant 0 : index
      %101 = vector.load %arg6[%c2_56, %c0_57, %c0_58] : memref<6x1x128xf32, #tpu.memory_space<vmem>>, vector<1x1x128xf32>
      %102 = vector.shape_cast %101 : vector<1x1x128xf32> to vector<1x128xf32>
      %103 = vector.broadcast %102 : vector<1x128xf32> to vector<128x128xf32>
      %104 = arith.addf %100, %103 : vector<128x128xf32>
      %105 = arith.negf %104 : vector<128x128xf32>
      %106 = math.exp %105 : vector<128x128xf32>
      %cst_59 = arith.constant 1.000000e+00 : f32
      %107 = vector.broadcast %cst_59 : f32 to vector<128x128xf32>
      %108 = arith.addf %107, %106 : vector<128x128xf32>
      %109 = arith.divf %107, %108 : vector<128x128xf32>
      %110 = arith.mulf %104, %109 : vector<128x128xf32>
      %111 = arith.truncf %110 : vector<128x128xf32> to vector<128x128xbf16>
      %c2_60 = arith.constant 2 : index
      %c0_61 = arith.constant 0 : index
      %c0_62 = arith.constant 0 : index
      %112 = vector.load %arg7[%c2_60, %c0_61, %c0_62] : memref<6x128x128xbf16, #tpu.memory_space<vmem>>, vector<1x128x128xbf16>
      %113 = vector.shape_cast %112 : vector<1x128x128xbf16> to vector<128x128xbf16>
      %cst_63 = arith.constant dense<0.000000e+00> : vector<128x128xf32>
      %114 = tpu.matmul %111, %113, %cst_63 {dimension_numbers = #tpu.dot_dimension_numbers<[1], [0], [0], [1], [0, 0, 1, 1], [], []>} : vector<128x128xbf16>, vector<128x128xbf16>, vector<128x128xf32> -> vector<128x128xf32>
      %c2_64 = arith.constant 2 : index
      %c0_65 = arith.constant 0 : index
      %c0_66 = arith.constant 0 : index
      %115 = vector.load %arg8[%c2_64, %c0_65, %c0_66] : memref<6x1x128xf32, #tpu.memory_space<vmem>>, vector<1x1x128xf32>
      %116 = vector.shape_cast %115 : vector<1x1x128xf32> to vector<1x128xf32>
      %117 = vector.broadcast %116 : vector<1x128xf32> to vector<128x128xf32>
      %118 = arith.addf %114, %117 : vector<128x128xf32>
      %119 = arith.addf %60, %118 : vector<128x128xf32>
      %120 = arith.truncf %119 : vector<128x128xf32> to vector<128x128xbf16>
      %c0_67 = arith.constant 0 : index
      %c0_68 = arith.constant 0 : index
      %121 = vector.load %arg13[%c0_67, %c0_68] : memref<128x128xbf16, #tpu.memory_space<vmem>>, vector<128x128xbf16>
      tpu.vector_store %arg13[%c0_67, %c0_68], %120 {strides = array<i32>} : memref<128x128xbf16, #tpu.memory_space<vmem>>, vector<128x128xbf16>,
      %cst_69 = arith.constant 0.000000e+00 : f32
      %122 = vector.broadcast %cst_69 : f32 to vector<128x128xf32>
      %c0_70 = arith.constant 0 : index
      %c0_71 = arith.constant 0 : index
      %123 = vector.load %arg14[%c0_70, %c0_71] : memref<128x128xf32, #tpu.memory_space<vmem>>, vector<128x128xf32>
      tpu.vector_store %arg14[%c0_70, %c0_71], %122 {strides = array<i32>} : memref<128x128xf32, #tpu.memory_space<vmem>>, vector<128x128xf32>,
    } else {
    }
    %c0 = arith.constant 0 : index
    %c0_1 = arith.constant 0 : index
    %3 = vector.load %arg2[%c0, %c0_1] : memref<128x128xbf16, #tpu.memory_space<vmem>>, vector<128x128xbf16>
    %c0_2 = arith.constant 0 : index
    %c0_3 = arith.constant 0 : index
    %4 = vector.load %arg9[%c0_2, %c0_3] : memref<128x128xbf16, #tpu.memory_space<vmem>>, vector<128x128xbf16>
    %cst = arith.constant dense<0.000000e+00> : vector<128x128xf32>
    %5 = tpu.matmul %3, %4, %cst {dimension_numbers = #tpu.dot_dimension_numbers<[1], [0], [0], [1], [0, 0, 1, 1], [], []>} : vector<128x128xbf16>, vector<128x128xbf16>, vector<128x128xf32> -> vector<128x128xf32>
    %6 = tpu.iota {dimensions = array<i32: 1>} : vector<128x128xi32>
    %c0_4 = arith.constant 0 : index
    %c0_5 = arith.constant 0 : index
    %7 = vector.load %arg3[%c0_4, %c0_5] : memref<128x1xi32, #tpu.memory_space<vmem>>, vector<128x1xi32>
    %8 = vector.broadcast %7 : vector<128x1xi32> to vector<128x128xi32>
    %9 = arith.cmpi eq, %6, %8 : vector<128x128xi32>
    %10 = arith.extui %9 : vector<128x128xi1> to vector<128x128xi32>
    %11 = arith.sitofp %10 : vector<128x128xi32> to vector<128x128xf32>
    %12 = arith.truncf %11 : vector<128x128xf32> to vector<128x128xbf16>
    %c0_6 = arith.constant 0 : index
    %c0_7 = arith.constant 0 : index
    %13 = vector.load %arg13[%c0_6, %c0_7] : memref<128x128xbf16, #tpu.memory_space<vmem>>, vector<128x128xbf16>
    %cst_8 = arith.constant dense<0.000000e+00> : vector<128x128xf32>
    %14 = tpu.matmul %12, %13, %cst_8 {dimension_numbers = #tpu.dot_dimension_numbers<[1], [0], [0], [1], [0, 0, 1, 1], [], []>} : vector<128x128xbf16>, vector<128x128xbf16>, vector<128x128xf32> -> vector<128x128xf32>
    %15 = arith.mulf %5, %14 : vector<128x128xf32>
    %16 = arith.truncf %15 : vector<128x128xf32> to vector<128x128xbf16>
    %17 = tpu.iota {dimensions = array<i32: 0>} : vector<128x128xi32>
    %c0_9 = arith.constant 0 : index
    %c0_10 = arith.constant 0 : index
    %18 = vector.load %arg4[%c0_9, %c0_10] : memref<1x128xi32, #tpu.memory_space<vmem>>, vector<1x128xi32>
    %19 = vector.broadcast %18 : vector<1x128xi32> to vector<128x128xi32>
    %20 = arith.cmpi eq, %17, %19 : vector<128x128xi32>
    %21 = arith.extui %20 : vector<128x128xi1> to vector<128x128xi32>
    %22 = arith.sitofp %21 : vector<128x128xi32> to vector<128x128xf32>
    %23 = arith.truncf %22 : vector<128x128xf32> to vector<128x128xbf16>
    %c0_11 = arith.constant 0 : index
    %c0_12 = arith.constant 0 : index
    %24 = vector.load %arg14[%c0_11, %c0_12] : memref<128x128xf32, #tpu.memory_space<vmem>>, vector<128x128xf32>
    %cst_13 = arith.constant dense<0.000000e+00> : vector<128x128xf32>
    %25 = tpu.matmul %23, %16, %cst_13 {dimension_numbers = #tpu.dot_dimension_numbers<[1], [0], [0], [1], [0, 0, 1, 1], [], []>} : vector<128x128xbf16>, vector<128x128xbf16>, vector<128x128xf32> -> vector<128x128xf32>
    %26 = arith.addf %24, %25 : vector<128x128xf32>
    %c0_14 = arith.constant 0 : index
    %c0_15 = arith.constant 0 : index
    %27 = vector.load %arg14[%c0_14, %c0_15] : memref<128x128xf32, #tpu.memory_space<vmem>>, vector<128x128xf32>
    tpu.vector_store %arg14[%c0_14, %c0_15], %26 {strides = array<i32>} : memref<128x128xf32, #tpu.memory_space<vmem>>, vector<128x128xf32>,
    %c1_i32 = arith.constant 1 : i32
    %28 = arith.cmpi eq, %arg0, %c1_i32 : i32
    %29 = arith.extui %28 : i1 to i32
    %c0_i32_16 = arith.constant 0 : i32
    %30 = arith.cmpi ne, %29, %c0_i32_16 : i32
    scf.if %30 {
      %c0_17 = arith.constant 0 : index
      %c0_18 = arith.constant 0 : index
      %31 = vector.load %arg12[%c0_17, %c0_18] : memref<128x128xf32, #tpu.memory_space<vmem>>, vector<128x128xf32>
      %c0_19 = arith.constant 0 : index
      %c0_20 = arith.constant 0 : index
      %32 = vector.load %arg14[%c0_19, %c0_20] : memref<128x128xf32, #tpu.memory_space<vmem>>, vector<128x128xf32>
      %33 = arith.addf %31, %32 : vector<128x128xf32>
      %34 = arith.negf %33 : vector<128x128xf32>
      %35 = math.exp %34 : vector<128x128xf32>
      %cst_21 = arith.constant 1.000000e+00 : f32
      %36 = vector.broadcast %cst_21 : f32 to vector<128x128xf32>
      %37 = arith.addf %36, %35 : vector<128x128xf32>
      %38 = arith.divf %36, %37 : vector<128x128xf32>
      %39 = arith.mulf %33, %38 : vector<128x128xf32>
      %40 = arith.truncf %39 : vector<128x128xf32> to vector<128x128xbf16>
      %c3 = arith.constant 3 : index
      %c0_22 = arith.constant 0 : index
      %c0_23 = arith.constant 0 : index
      %41 = vector.load %arg5[%c3, %c0_22, %c0_23] : memref<6x128x128xbf16, #tpu.memory_space<vmem>>, vector<1x128x128xbf16>
      %42 = vector.shape_cast %41 : vector<1x128x128xbf16> to vector<128x128xbf16>
      %cst_24 = arith.constant dense<0.000000e+00> : vector<128x128xf32>
      %43 = tpu.matmul %40, %42, %cst_24 {dimension_numbers = #tpu.dot_dimension_numbers<[1], [0], [0], [1], [0, 0, 1, 1], [], []>} : vector<128x128xbf16>, vector<128x128xbf16>, vector<128x128xf32> -> vector<128x128xf32>
      %c3_25 = arith.constant 3 : index
      %c0_26 = arith.constant 0 : index
      %c0_27 = arith.constant 0 : index
      %44 = vector.load %arg6[%c3_25, %c0_26, %c0_27] : memref<6x1x128xf32, #tpu.memory_space<vmem>>, vector<1x1x128xf32>
      %45 = vector.shape_cast %44 : vector<1x1x128xf32> to vector<1x128xf32>
      %46 = vector.broadcast %45 : vector<1x128xf32> to vector<128x128xf32>
      %47 = arith.addf %43, %46 : vector<128x128xf32>
      %48 = arith.negf %47 : vector<128x128xf32>
      %49 = math.exp %48 : vector<128x128xf32>
      %cst_28 = arith.constant 1.000000e+00 : f32
      %50 = vector.broadcast %cst_28 : f32 to vector<128x128xf32>
      %51 = arith.addf %50, %49 : vector<128x128xf32>
      %52 = arith.divf %50, %51 : vector<128x128xf32>
      %53 = arith.mulf %47, %52 : vector<128x128xf32>
      %54 = arith.truncf %53 : vector<128x128xf32> to vector<128x128xbf16>
      %c3_29 = arith.constant 3 : index
      %c0_30 = arith.constant 0 : index
      %c0_31 = arith.constant 0 : index
      %55 = vector.load %arg7[%c3_29, %c0_30, %c0_31] : memref<6x128x128xbf16, #tpu.memory_space<vmem>>, vector<1x128x128xbf16>
      %56 = vector.shape_cast %55 : vector<1x128x128xbf16> to vector<128x128xbf16>
      %cst_32 = arith.constant dense<0.000000e+00> : vector<128x128xf32>
      %57 = tpu.matmul %54, %56, %cst_32 {dimension_numbers = #tpu.dot_dimension_numbers<[1], [0], [0], [1], [0, 0, 1, 1], [], []>} : vector<128x128xbf16>, vector<128x128xbf16>, vector<128x128xf32> -> vector<128x128xf32>
      %c3_33 = arith.constant 3 : index
      %c0_34 = arith.constant 0 : index
      %c0_35 = arith.constant 0 : index
      %58 = vector.load %arg8[%c3_33, %c0_34, %c0_35] : memref<6x1x128xf32, #tpu.memory_space<vmem>>, vector<1x1x128xf32>
      %59 = vector.shape_cast %58 : vector<1x1x128xf32> to vector<1x128xf32>
      %60 = vector.broadcast %59 : vector<1x128xf32> to vector<128x128xf32>
      %61 = arith.addf %57, %60 : vector<128x128xf32>
      %62 = arith.addf %33, %61 : vector<128x128xf32>
      %63 = arith.negf %62 : vector<128x128xf32>
      %64 = math.exp %63 : vector<128x128xf32>
      %cst_36 = arith.constant 1.000000e+00 : f32
      %65 = vector.broadcast %cst_36 : f32 to vector<128x128xf32>
      %66 = arith.addf %65, %64 : vector<128x128xf32>
      %67 = arith.divf %65, %66 : vector<128x128xf32>
      %68 = arith.mulf %62, %67 : vector<128x128xf32>
      %69 = arith.truncf %68 : vector<128x128xf32> to vector<128x128xbf16>
      %c4 = arith.constant 4 : index
      %c0_37 = arith.constant 0 : index
      %c0_38 = arith.constant 0 : index
      %70 = vector.load %arg5[%c4, %c0_37, %c0_38] : memref<6x128x128xbf16, #tpu.memory_space<vmem>>, vector<1x128x128xbf16>
      %71 = vector.shape_cast %70 : vector<1x128x128xbf16> to vector<128x128xbf16>
      %cst_39 = arith.constant dense<0.000000e+00> : vector<128x128xf32>
      %72 = tpu.matmul %69, %71, %cst_39 {dimension_numbers = #tpu.dot_dimension_numbers<[1], [0], [0], [1], [0, 0, 1, 1], [], []>} : vector<128x128xbf16>, vector<128x128xbf16>, vector<128x128xf32> -> vector<128x128xf32>
      %c4_40 = arith.constant 4 : index
      %c0_41 = arith.constant 0 : index
      %c0_42 = arith.constant 0 : index
      %73 = vector.load %arg6[%c4_40, %c0_41, %c0_42] : memref<6x1x128xf32, #tpu.memory_space<vmem>>, vector<1x1x128xf32>
      %74 = vector.shape_cast %73 : vector<1x1x128xf32> to vector<1x128xf32>
      %75 = vector.broadcast %74 : vector<1x128xf32> to vector<128x128xf32>
      %76 = arith.addf %72, %75 : vector<128x128xf32>
      %77 = arith.negf %76 : vector<128x128xf32>
      %78 = math.exp %77 : vector<128x128xf32>
      %cst_43 = arith.constant 1.000000e+00 : f32
      %79 = vector.broadcast %cst_43 : f32 to vector<128x128xf32>
      %80 = arith.addf %79, %78 : vector<128x128xf32>
      %81 = arith.divf %79, %80 : vector<128x128xf32>
      %82 = arith.mulf %76, %81 : vector<128x128xf32>
      %83 = arith.truncf %82 : vector<128x128xf32> to vector<128x128xbf16>
      %c4_44 = arith.constant 4 : index
      %c0_45 = arith.constant 0 : index
      %c0_46 = arith.constant 0 : index
      %84 = vector.load %arg7[%c4_44, %c0_45, %c0_46] : memref<6x128x128xbf16, #tpu.memory_space<vmem>>, vector<1x128x128xbf16>
      %85 = vector.shape_cast %84 : vector<1x128x128xbf16> to vector<128x128xbf16>
      %cst_47 = arith.constant dense<0.000000e+00> : vector<128x128xf32>
      %86 = tpu.matmul %83, %85, %cst_47 {dimension_numbers = #tpu.dot_dimension_numbers<[1], [0], [0], [1], [0, 0, 1, 1], [], []>} : vector<128x128xbf16>, vector<128x128xbf16>, vector<128x128xf32> -> vector<128x128xf32>
      %c4_48 = arith.constant 4 : index
      %c0_49 = arith.constant 0 : index
      %c0_50 = arith.constant 0 : index
      %87 = vector.load %arg8[%c4_48, %c0_49, %c0_50] : memref<6x1x128xf32, #tpu.memory_space<vmem>>, vector<1x1x128xf32>
      %88 = vector.shape_cast %87 : vector<1x1x128xf32> to vector<1x128xf32>
      %89 = vector.broadcast %88 : vector<1x128xf32> to vector<128x128xf32>
      %90 = arith.addf %86, %89 : vector<128x128xf32>
      %91 = arith.addf %62, %90 : vector<128x128xf32>
      %92 = arith.negf %91 : vector<128x128xf32>
      %93 = math.exp %92 : vector<128x128xf32>
      %cst_51 = arith.constant 1.000000e+00 : f32
      %94 = vector.broadcast %cst_51 : f32 to vector<128x128xf32>
      %95 = arith.addf %94, %93 : vector<128x128xf32>
      %96 = arith.divf %94, %95 : vector<128x128xf32>
      %97 = arith.mulf %91, %96 : vector<128x128xf32>
      %98 = arith.truncf %97 : vector<128x128xf32> to vector<128x128xbf16>
      %c5 = arith.constant 5 : index
      %c0_52 = arith.constant 0 : index
      %c0_53 = arith.constant 0 : index
      %99 = vector.load %arg5[%c5, %c0_52, %c0_53] : memref<6x128x128xbf16, #tpu.memory_space<vmem>>, vector<1x128x128xbf16>
      %100 = vector.shape_cast %99 : vector<1x128x128xbf16> to vector<128x128xbf16>
      %cst_54 = arith.constant dense<0.000000e+00> : vector<128x128xf32>
      %101 = tpu.matmul %98, %100, %cst_54 {dimension_numbers = #tpu.dot_dimension_numbers<[1], [0], [0], [1], [0, 0, 1, 1], [], []>} : vector<128x128xbf16>, vector<128x128xbf16>, vector<128x128xf32> -> vector<128x128xf32>
      %c5_55 = arith.constant 5 : index
      %c0_56 = arith.constant 0 : index
      %c0_57 = arith.constant 0 : index
      %102 = vector.load %arg6[%c5_55, %c0_56, %c0_57] : memref<6x1x128xf32, #tpu.memory_space<vmem>>, vector<1x1x128xf32>
      %103 = vector.shape_cast %102 : vector<1x1x128xf32> to vector<1x128xf32>
      %104 = vector.broadcast %103 : vector<1x128xf32> to vector<128x128xf32>
      %105 = arith.addf %101, %104 : vector<128x128xf32>
      %106 = arith.negf %105 : vector<128x128xf32>
      %107 = math.exp %106 : vector<128x128xf32>
      %cst_58 = arith.constant 1.000000e+00 : f32
      %108 = vector.broadcast %cst_58 : f32 to vector<128x128xf32>
      %109 = arith.addf %108, %107 : vector<128x128xf32>
      %110 = arith.divf %108, %109 : vector<128x128xf32>
      %111 = arith.mulf %105, %110 : vector<128x128xf32>
      %112 = arith.truncf %111 : vector<128x128xf32> to vector<128x128xbf16>
      %c5_59 = arith.constant 5 : index
      %c0_60 = arith.constant 0 : index
      %c0_61 = arith.constant 0 : index
      %113 = vector.load %arg7[%c5_59, %c0_60, %c0_61] : memref<6x128x128xbf16, #tpu.memory_space<vmem>>, vector<1x128x128xbf16>
      %114 = vector.shape_cast %113 : vector<1x128x128xbf16> to vector<128x128xbf16>
      %cst_62 = arith.constant dense<0.000000e+00> : vector<128x128xf32>
      %115 = tpu.matmul %112, %114, %cst_62 {dimension_numbers = #tpu.dot_dimension_numbers<[1], [0], [0], [1], [0, 0, 1, 1], [], []>} : vector<128x128xbf16>, vector<128x128xbf16>, vector<128x128xf32> -> vector<128x128xf32>
      %c5_63 = arith.constant 5 : index
      %c0_64 = arith.constant 0 : index
      %c0_65 = arith.constant 0 : index
      %116 = vector.load %arg8[%c5_63, %c0_64, %c0_65] : memref<6x1x128xf32, #tpu.memory_space<vmem>>, vector<1x1x128xf32>
      %117 = vector.shape_cast %116 : vector<1x1x128xf32> to vector<1x128xf32>
      %118 = vector.broadcast %117 : vector<1x128xf32> to vector<128x128xf32>
      %119 = arith.addf %115, %118 : vector<128x128xf32>
      %120 = arith.addf %91, %119 : vector<128x128xf32>
      %c0_66 = arith.constant 0 : index
      %c0_67 = arith.constant 0 : index
      %121 = vector.load %arg10[%c0_66, %c0_67] : memref<128x128xf32, #tpu.memory_space<vmem>>, vector<128x128xf32>
      tpu.vector_store %arg10[%c0_66, %c0_67], %91 {strides = array<i32>} : memref<128x128xf32, #tpu.memory_space<vmem>>, vector<128x128xf32>,
      %c0_68 = arith.constant 0 : index
      %c0_69 = arith.constant 0 : index
      %122 = vector.load %arg11[%c0_68, %c0_69] : memref<128x128xf32, #tpu.memory_space<vmem>>, vector<128x128xf32>
      tpu.vector_store %arg11[%c0_68, %c0_69], %120 {strides = array<i32>} : memref<128x128xf32, #tpu.memory_space<vmem>>, vector<128x128xf32>,
    } else {
    }
    return
  }
  func.func @transform_0(%arg0: i32) -> (i32, i32) {
    %c0_i32 = arith.constant 0 : i32
    %c0_i32_0 = arith.constant 0 : i32
    %c0_i32_1 = arith.constant 0 : i32
    return %c0_i32, %c0_i32_0 : i32, i32
  }
  func.func @transform_1(%arg0: i32) -> (i32, i32) {
    %c0_i32 = arith.constant 0 : i32
    %c0_i32_0 = arith.constant 0 : i32
    return %arg0, %c0_i32 : i32, i32
  }
  func.func @transform_2(%arg0: i32) -> (i32, i32) {
    %c0_i32 = arith.constant 0 : i32
    %c0_i32_0 = arith.constant 0 : i32
    return %arg0, %c0_i32 : i32, i32
  }
  func.func @transform_3(%arg0: i32) -> (i32, i32) {
    %c0_i32 = arith.constant 0 : i32
    %c0_i32_0 = arith.constant 0 : i32
    return %c0_i32, %arg0 : i32, i32
  }
  func.func @transform_4(%arg0: i32) -> (i32, i32, i32) {
    %c0_i32 = arith.constant 0 : i32
    %c0_i32_0 = arith.constant 0 : i32
    %c0_i32_1 = arith.constant 0 : i32
    %c0_i32_2 = arith.constant 0 : i32
    return %c0_i32, %c0_i32_0, %c0_i32_1 : i32, i32, i32
  }
  func.func @transform_5(%arg0: i32) -> (i32, i32, i32) {
    %c0_i32 = arith.constant 0 : i32
    %c0_i32_0 = arith.constant 0 : i32
    %c0_i32_1 = arith.constant 0 : i32
    %c0_i32_2 = arith.constant 0 : i32
    return %c0_i32, %c0_i32_0, %c0_i32_1 : i32, i32, i32
  }
  func.func @transform_6(%arg0: i32) -> (i32, i32, i32) {
    %c0_i32 = arith.constant 0 : i32
    %c0_i32_0 = arith.constant 0 : i32
    %c0_i32_1 = arith.constant 0 : i32
    %c0_i32_2 = arith.constant 0 : i32
    return %c0_i32, %c0_i32_0, %c0_i32_1 : i32, i32, i32
  }
  func.func @transform_7(%arg0: i32) -> (i32, i32, i32) {
    %c0_i32 = arith.constant 0 : i32
    %c0_i32_0 = arith.constant 0 : i32
    %c0_i32_1 = arith.constant 0 : i32
    %c0_i32_2 = arith.constant 0 : i32
    return %c0_i32, %c0_i32_0, %c0_i32_1 : i32, i32, i32
  }
  func.func @transform_8(%arg0: i32) -> (i32, i32) {
    %c0_i32 = arith.constant 0 : i32
    %c0_i32_0 = arith.constant 0 : i32
    %c0_i32_1 = arith.constant 0 : i32
    return %c0_i32, %c0_i32_0 : i32, i32
  }
  func.func @transform_9(%arg0: i32) -> (i32, i32) {
    %c0_i32 = arith.constant 0 : i32
    %c0_i32_0 = arith.constant 0 : i32
    %c0_i32_1 = arith.constant 0 : i32
    return %c0_i32, %c0_i32_0 : i32, i32
  }
  func.func @transform_10(%arg0: i32) -> (i32, i32) {
    %c0_i32 = arith.constant 0 : i32
    %c0_i32_0 = arith.constant 0 : i32
    %c0_i32_1 = arith.constant 0 : i32
    return %c0_i32, %c0_i32_0 : i32, i32
  }
}

</mosaic_0001>

<bundles_post_ra>
// kernel: tpu_custom_call.1
= control target key start
LH: loop header
LB: loop body
LE: loop exit
PB: predicated region body
PF: predicated region fallthrough
CT: control target
= control target key end

     0   :  { %16 = vsyncpa [#allocation6], 0  ;;  %s12211_s0 = inlined_call_operand.vmem [shape: f32[128,128], index: 0, kind: input, shape index: {}]   ;;  %s12212_s1 = inlined_call_operand.vmem [shape: bf16[256,128], index: 1, kind: input, shape index: {}]   ;;  %s12213_s2 = inlined_call_operand.vmem [shape: s32[256,1], index: 2, kind: input, shape index: {}]   ;;  %s12214_s3 = inlined_call_operand.hbm [shape: s32[1,256], index: 3, kind: input, shape index: {}]   ;;  %s12215_s4 = inlined_call_operand.hbm [shape: bf16[6,128,128], index: 4, kind: input, shape index: {}]   ;;  %s12216_s5 = inlined_call_operand.hbm [shape: f32[6,1,128], index: 5, kind: input, shape index: {}]   ;;  %s12217_s6 = inlined_call_operand.hbm [shape: bf16[6,128,128], index: 6, kind: input, shape index: {}]   ;;  %s12218_s7 = inlined_call_operand.vmem [shape: f32[6,1,128], index: 7, kind: input, shape index: {}]   ;;  %s12219_s8 = inlined_call_operand.hbm [shape: bf16[128,128], index: 8, kind: input, shape index: {}]   ;;  %s12220_s9 = inlined_call_operand.hbm [shape: f32[128,128], index: 9, kind: output, shape index: {0}]   ;;  %s12221_s10 = inlined_call_operand.hbm [shape: f32[128,128], index: 10, kind: output, shape index: {1}]  }
   0x1   :  { %18 = vsyncpa [#allocation6 + $0x1], 0 }
   0x2   :  { %19 = vsyncpa [#allocation9], 0 }
   0x3   :  { %20 = vsyncpa [#allocation12], 0 }
   0x4   :  { %21 = vsyncpa [#allocation7], 0 }
   0x5   :  { %22 = vsyncpa [#allocation16], 0  ;;  %s8676_s13 = smov 0   ;;  %s8678_s14 = smov 0  }
   0x6   :  { %s8680_s15 = smov 0   ;;  %s8682_s16 = smov 0  }
   0x7 LB: > { %s293_s19 = sshll.u32 %s12215_s4, 4  ;;  %s8700_s20 = sadd.s32 4294967295, %s8604_s16   ;;  %s8604_s16 = sphi %s8682_s16, %s12531_s16   ;;  %s8600_s15 = sphi %s8680_s15, %s12530_s15   ;;  %s8596_s14 = sphi %s8678_s14, %s12529_s14   ;;  %s8592_s13 = sphi %s8676_s13, %s12528_s13   ;;  %s294_s19 = int_to_ptr.hbm [resolvable:$true] %s293_s19 }
   0x8   : > { %p6520_p0 = scmp.ge.s32.totalorder %s8604_s16, 1  ;;  %p122_p1 = scmp.eq.s32.totalorder %s8700_s20, 0 }
   0x9   : > { %p279_p2 = scmp.lt.s32.totalorder %s8604_s16, 3  ;;  %p6521_p3 = scmp.ne.s32.totalorder %s8700_s20, 0 }
   0xa   : > { %s8606_s22 = smov [#allocation8]   ;;  %s321_s26 = sshll.u32 %s12217_s6, 4  ;;  %s322_s26 = int_to_ptr.hbm [resolvable:$true] %s321_s26 }
   0xb   : > { %p8706_p4 = pnand %p6520_p0, %p279_p2  ;;  %s295_s23 = sshll.u32 %s8606_s22, 4  ;;  %s296_s23 = int_to_ptr.vmem [resolvable:$true] %s295_s23 }
   0xc   : > { %s307_s30 = sshll.u32 %s12216_s5, 4  ;;  %s8607_s11 = smov [#allocation11]   ;;  %s308_s30 = int_to_ptr.hbm [resolvable:$true] %s307_s30 }
   0xd   : > { %p7517_p5 = pneg %p8706_p4  ;;  %s323_s12 = sshll.u32 %s8607_s11, 4  ;;  %s324_s12 = int_to_ptr.vmem [resolvable:$true] %s323_s12 }
   0xe   : > { %s8608_s17 = smov 64   ;;  %s8609_s18 = smov 4  }
   0xf   : > { %p8717_p6 = pnand %p7517_p5, %p122_p1  ;;  %s8610_s22 = smov [#allocation10]  }
  0x10   : > { %s309_s24 = sshll.u32 %s8610_s22, 4  ;;  %s338_s29 = sshll.u32 %s12219_s8, 4  ;;  %s310_s24 = int_to_ptr.vmem [resolvable:$true] %s309_s24  ;;  %s339_s29 = int_to_ptr.hbm [resolvable:$true] %s338_s29 }
  0x11   : > { %7520 = dma.hbm_to_vmem [thread:$0]  (!%p8717_p6), %s294_s19, 6144, %s296_s23, [#allocation9], %s8608_s17, %s8608_s17, %s8609_s18  }
  0x12   : > { %7526 = dma.hbm_to_vmem [thread:$0]  (!%p8717_p6), %s322_s26, 6144, %s324_s12, [#allocation12], %s8608_s17, %s8608_s17, %s8609_s18  }
  0x13   : > { %s8611_s19 = smov 16   ;;  %s8612_s23 = smov 1  }
  0x14   : > { %7523 = dma.hbm_to_vmem [thread:$0]  (!%p8717_p6), %s308_s30, 96, %s310_s24, [#allocation9], %s8611_s19, %s8611_s19, %s8612_s23  }
  0x15   : > { %s8613_s26 = smov [#allocation13]   ;;  %s8736_s12 = sadd.s32 1, %s8604_s16  }
  0x16   : > { %s340_s11 = sshll.u32 %s8613_s26, 4  ;;  %s108_s22 = sadd.s32 1, %s8600_s15  ;;  %s341_s11 = int_to_ptr.vmem [resolvable:$true] %s340_s11 }
  0x17   : > { %7529 = dma.hbm_to_vmem [thread:$0]  (!%p8717_p6), %s339_s29, 1024, %s341_s11, [#allocation12], %s8608_s17, %s8608_s17, %s8609_s18  }
  0x18   : > { %s105_s25 = ssub.s32 %s8604_s16, %s8736_s12  ;;  %p115_p7 = scmp.ne.s32.totalorder %s8600_s15, %s8596_s14 }
  0x19   : > { %p106_p8 = scmp.eq.s32.totalorder %s105_s25, 0  ;;  %p116_p9 = scmp.eq.s32.totalorder %s8604_s16, 0 }
  0x1a   : > { %p121_p10 = scmp.ne.s32.totalorder %s8596_s14, %s8592_s13  ;;  %p7538_p11 = scmp.lt.s32.totalorder %s8604_s16, 2 }
  0x1b   : > { %s8748_s30 = scalar_select %p106_p8, %s8600_s15, %s108_s22  }
  0x1c   : > { %p117_p12 = por %p116_p9, %p115_p7  ;;  %p8752_p13 = por %p122_p1, %p121_p10 }
  0x1d   : > { %s372_s27 = sand.u32 1, %s8600_s15   ;;  %s378_s28 = scalar_lea.hbm %s12214_s3, %s8604_s16 }
  0x1e   : > { %s380_s29 = sshll.u32 %s378_s28, 4  ;;  %s375_s19 = scalar_lea.vmem [#allocation5], %s372_s27  ;;  %s381_s29 = int_to_ptr.hbm [resolvable:$true] %s380_s29 }
  0x1f   : > { %s382_s23 = sshll.u32 %s375_s19, 4  ;;  %p8761_p0 = pnand %p7538_p11, %p117_p12  ;;  %s383_s23 = int_to_ptr.vmem [resolvable:$true] %s382_s23 }
  0x20   : > { %s373_s26 = scalar_lea.sflag [#allocation6], %s372_s27  ;;  %s8468_s11 = sshra.s32 %s381_s29, 4  ;;  %s8469_s11 = int_to_ptr.hbm [resolvable:$true] %s8468_s11 }
  0x21   : > { %s8470_s22 = scalar_lea.hbm %s8469_s11, 1  ;;  %p8472_p5 = pneg %p8761_p0 }
  0x22   : > { %p8471_p2 = scmp.ne.s32.totalorder %s8469_s11, %s8470_s22  ;;  %s8475_s17 = scalar_lea.hbm %s12214_s3, 2 }
  0x23   : > { %p8476_p8 = scmp.lt.s32.totalorder %s8469_s11, %s12214_s3  ;;  %p8477_p9 = scmp.lt.s32.totalorder %s8475_s17, %s8470_s22 }
  0x24   : > { %p8473_p6 = pnand %p8472_p5, %p8471_p2 }
  0x25   : > { %p8478_p10 = por %p8477_p9, %p8476_p8 }
  0x26   : > { %p8474_p7 = pneg %p8473_p6 }
  0x28   : > { %p8479_p11 = pnand %p8478_p10, %p8474_p7 }
  0x2a   : > { %8482 = shalt.err (!%p8479_p11)
}
  0x2b   : > { %7533 = dma.hbm_to_vmem [thread:$0]  (!%p8761_p0), %s381_s29, 16, %s383_s23, %s373_s26  }
  0x2c   : > { %391 = sbr.rel (%p8706_p4) target bundleno = 2637 (0xa4d), region = 56  ;;  %s393_s27 = sand.u32 (!%p8706_p4), 1, %s8596_s14  }
  0x2d   : > { %s394_s19 = scalar_lea.sflag (!%p8706_p4), [#allocation6], %s393_s27  ;;  %s8778_s16 = scalar_lea.vmem (!%p8706_p4), [#allocation5], %s393_s27 }
  0x31   : > { %8571 = dma.done.wait (%p8752_p13), %s394_s19, 16  }
  0x32   : > { %8573 = vsyncadd (%p8752_p13), %s394_s19, 4294967280 }
  0x33   : > { %8575 = dma.done.wait (%p122_p1), [#allocation9], 6240  }
  0x34   : > { %8577 = vsyncadd (%p122_p1), [#allocation9], 4294961056 }
  0x35   : > { %8579 = dma.done.wait (%p122_p1), [#allocation12], 7168  }
  0x36   : > { %8581 = vsyncadd (%p122_p1), [#allocation12], 4294960128  ;;  %s6531_s21 = sshll.u32 %s8700_s20, 4 }
  0x37   : > { %p459_p4 = scmp.lt.s32.totalorder %s6531_s21, 31  ;;  %473 = sbr.rel (%p6521_p3) target bundleno = 882 (0x372), region = 80 }
  0x39   : > { %s12533_s21 = smov (!%p459_p4, %s6531_s21), 31 }
  0x3a   : > { %s6532_s29 = sshll.u32 %s12533_s21, 2  ;;  %s6534_s23 = sshll.u32 %s12533_s21, 3 }
  0x3b   : > { %s8796_s26 = scalar_lea.vmem %s12212_s1, %s6532_s29  ;;  %s8801_s25 = scalar_lea.vmem %s12213_s2, %s6534_s23 }
  0x3c   : > { %v7275_v0 = vld [vmem:[#allocation8 + $0x38] sm:$0xff]  ;;  %v7274_v1 = vld [vmem:[#allocation8 + $0x30] sm:$0xff]  ;;  %v8813_v3 = vld [vmem:[%s12211_s0 + $0x8] sm:$0xff] }
  0x3d   : > { %886 = vmatpush.bf16.msra.mxu0 %v7275_v0  ;;  %7435 = vmatpush.bf16.msra.mxu2 %v7275_v0  ;;  %v8808_v2 = vld [vmem:[%s12211_s0] sm:$0xff]  ;;  %v8824_v6 = vld [vmem:[%s12211_s0 + $0x48] sm:$0xff]  ;;  %v6537_v7 = vmul.f32 -1.442695, %v8813_v3  ;;  %v8832_v10 = vld [vmem:[%s12211_s0 + $0x10] sm:$0xff] }
  0x3e   : > { %v6536_v4 = vmul.f32 -1.442695, %v8808_v2  ;;  %v8819_v5 = vld [vmem:[%s12211_s0 + $0x40] sm:$0xff]  ;;  %v6545_v9 = vmul.f32 -1.442695, %v8824_v6  ;;  %v8837_v11 = vld [vmem:[%s12211_s0 + $0x18] sm:$0xff] }
  0x3f   : > { %v6544_v8 = vmul.f32 -1.442695, %v8819_v5  ;;  %v7273_v12 = vld [vmem:[#allocation8 + $0x28] sm:$0xff]  ;;  %v6538_v13 = vmul.f32 -1.442695, %v8832_v10  ;;  %v8849_v16 = vld [vmem:[%s12211_s0 + $0x58] sm:$0xff] }
  0x40   : > { %7600 = vpow2.f32 %v6536_v4  ;;  %v6539_v14 = vmul.f32 -1.442695, %v8837_v11  ;;  %v8844_v15 = vld [vmem:[%s12211_s0 + $0x50] sm:$0xff]  ;;  %v7272_v18 = vld [vmem:[#allocation8 + $0x20] sm:$0xff]  ;;  %v6547_v23 = vmul.f32 -1.442695, %v8849_v16 }
  0x41   : > { %887 = vmatpush.bf16.msra.mxu0 %v7274_v1  ;;  %7436 = vmatpush.bf16.msra.mxu2 %v7274_v1  ;;  %7602 = vpow2.f32 %v6537_v7  ;;  %v6546_v17 = vmul.f32 -1.442695, %v8844_v15  ;;  %v8855_v19 = vld [vmem:[%s12211_s0 + $0x20] sm:$0xff]  ;;  %v8863_v24 = vld [vmem:[%s12211_s0 + $0x28] sm:$0xff]  ;;  %v7270_v40 = vld [vmem:[#allocation8 + $0x10] sm:$0xff] }
  0x42   : > { %7604 = vpow2.f32 %v6544_v8  ;;  %v6540_v27 = vmul.f32 -1.442695, %v8855_v19  ;;  %v7271_v29 = vld [vmem:[#allocation8 + $0x18] sm:$0xff]  ;;  %v8872_v32 = vmul.f32 -1.442695, %v8863_v24  ;;  %v7269_v55 = vld [vmem:[#allocation8 + $0x8] sm:$0xff] }
  0x43   : > { %7606 = vpow2.f32 %v6545_v9 }
  0x44   : > { %7608 = vpow2.f32 %v6538_v13 }
  0x45   : > { %888 = vmatpush.bf16.msra.mxu0 %v7273_v12  ;;  %7437 = vmatpush.bf16.msra.mxu2 %v7273_v12  ;;  %7610 = vpow2.f32 %v6539_v14  ;;  %v7268_v14 = vld [vmem:[#allocation8] sm:$0xff] }
  0x46   : > { %v7601_v20 = vpop.eup %7600  ;;  %7612 = vpow2.f32 %v6546_v17 }
  0x47   : > { %v7603_v21 = vpop.eup %7602  ;;  %v8857_v22 = vadd.f32 1.0, %v7601_v20 }
  0x48   : > { %v7605_v25 = vpop.eup %7604  ;;  %v8865_v26 = vadd.f32 1.0, %v7603_v21 }
  0x49   : > { %v7607_v28 = vpop.eup %7606  ;;  %889 = vmatpush.bf16.msra.mxu0 %v7272_v18  ;;  %7438 = vmatpush.bf16.msra.mxu2 %v7272_v18  ;;  %7614 = vrcp.f32 %v8857_v22  ;;  %v563_v31 = vand.u32 2147483647, %v8857_v22  ;;  %v565_v34 = vand.u32 2147483648, %v8857_v22  ;;  %v8875_v35 = vadd.f32 1.0, %v7605_v25 }
  0x4a   : > { %v7609_v30 = vpop.eup %7608  ;;  %7616 = vrcp.f32 %v8865_v26  ;;  %v8877_v36 = vadd.f32 1.0, %v7607_v28  ;;  %v578_v37 = vand.u32 2147483647, %v8865_v26  ;;  %v580_v38 = vand.u32 2147483648, %v8865_v26 }
  0x4b   : > { %v7611_v33 = vpop.eup %7610  ;;  %7618 = vpow2.f32 %v6547_v23  ;;  %v8881_v39 = vadd.f32 1.0, %v7609_v30  ;;  %vm559_vm0 = vweird.f32 %v8857_v22  ;;  %vm574_vm1 = vweird.f32 %v8865_v26 }
  0x4c   : > { %7620 = vpow2.f32 %v6540_v27  ;;  %v685_v41 = vand.u32 2147483648, %v8875_v35  ;;  %v7613_v42 = vpop.eup %7612  ;;  %vm8887_vm2 = vcmp.eq.f32.partialorder %v563_v31, 8.507059e+37  ;;  %v683_v44 = vand.u32 2147483647, %v8875_v35 }
  0x4d   : > { %890 = vmatpush.bf16.msra.mxu0 %v7271_v29  ;;  %7439 = vmatpush.bf16.msra.mxu2 %v7271_v29  ;;  %7622 = vrcp.f32 %v8875_v35  ;;  %v8893_v45 = vadd.f32 1.0, %v7611_v33  ;;  %v566_v47 = vor.u32 1.1754944e-38, %v565_v34  ;;  %v698_v48 = vand.u32 2147483647, %v8877_v36 }
  0x4e   : > { %7624 = vrcp.f32 %v8877_v36  ;;  %v700_v49 = vand.u32 2147483648, %v8877_v36  ;;  %vm8899_vm3 = vcmp.eq.f32.partialorder %v578_v37, 8.507059e+37  ;;  %v581_v53 = vor.u32 1.1754944e-38, %v580_v38 }
  0x4f   : > { %v7615_v46 = vpop.eup %7614  ;;  %7626 = vrcp.f32 %v8881_v39  ;;  %vm679_vm4 = vweird.f32 %v8875_v35  ;;  %v8907_v57 = vor.u32 1.1754944e-38, %v685_v41  ;;  %vm694_vm5 = vweird.f32 %v8877_v36 }
  0x50   : > { %v7617_v50 = vpop.eup %7616  ;;  %v555_v51 = vmul.f32 %v7615_v46, %v8857_v22  ;;  %v595_v58 = vand.u32 2147483648, %v8881_v39  ;;  %vm560_vm6 = vweird.f32 %v7615_v46  ;;  %vm8913_vm7 = vcmp.eq.f32.partialorder %v683_v44, 8.507059e+37 }
  0x51   : > { %v8904_v54 = vpop.eup %7618  ;;  %891 = vmatpush.bf16.msra.mxu0 %v7270_v40  ;;  %7440 = vmatpush.bf16.msra.mxu2 %v7270_v40  ;;  %v570_v56 = vmul.f32 %v7617_v50, %v8865_v26  ;;  %vm589_vm8 = vweird.f32 %v8881_v39  ;;  %7628 = vrcp.f32 %v8893_v45  ;;  %vm575_vm9 = vweird.f32 %v7617_v50  ;;  %vm8931_vm11 = vmor %vm559_vm0, %vm560_vm6 }
  0x52   : > { %v8911_v59 = vpop.eup %7620  ;;  %v556_v60 = vsub.f32 1.0, %v555_v51  ;;  %vm8919_vm10 = vcmp.eq.f32.partialorder %v698_v48, 8.507059e+37  ;;  %v701_v1 = vor.u32 1.1754944e-38, %v700_v49  ;;  %v593_v9 = vand.u32 2147483647, %v8881_v39  ;;  %vm8941_vm13 = vmor %vm574_vm1, %vm575_vm9 }
  0x53   : > { %v7623_v62 = vpop.eup %7622  ;;  %v571_v63 = vsub.f32 1.0, %v570_v56  ;;  %v608_v12 = vand.u32 2147483647, %v8893_v45  ;;  %v596_v21 = vor.u32 1.1754944e-38, %v595_v58  ;;  %vm604_vm12 = vweird.f32 %v8893_v45 }
  0x54   : > { %v7625_v4 = vpop.eup %7624  ;;  %v557_v7 = vmul.f32 %v7615_v46, %v556_v60  ;;  %v675_v8 = vmul.f32 %v7623_v62, %v8875_v35  ;;  %v610_v23 = vand.u32 2147483648, %v8893_v45  ;;  %vm680_vm14 = vweird.f32 %v7623_v62 }
  0x55   : > { %v8926_v13 = vpop.eup %7626  ;;  %892 = vmatpush.bf16.msra.mxu0 %v7269_v55  ;;  %7441 = vmatpush.bf16.msra.mxu2 %v7269_v55  ;;  %v572_v18 = vmul.f32 %v7617_v50, %v571_v63  ;;  %v690_v20 = vmul.f32 %v7625_v4, %v8877_v36  ;;  %vm695_vm15 = vweird.f32 %v7625_v4  ;;  %v8947_v31 = vadd.f32 1.0, %v7613_v42  ;;  %vm8959_vm1 = vmor %vm679_vm4, %vm680_vm14 }
  0x56   : > { %v558_v25 = vadd.f32 %v7615_v46, %v557_v7  ;;  %v676_v22 = vsub.f32 1.0, %v675_v8  ;;  %v585_v28 = vmul.f32 %v8926_v13, %v8881_v39  ;;  %vm590_vm0 = vweird.f32 %v8926_v13  ;;  %v8995_v39 = vld [vmem:[%s12211_s0 + $0x60] sm:$0xff] }
  0x57   : > { %v573_v29 = vadd.f32 %v7617_v50, %v572_v18  ;;  %v691_v30 = vsub.f32 1.0, %v690_v20  ;;  %v7629_v33 = vpop.eup %7628  ;;  %7630 = vpow2.f32 %v8872_v32  ;;  %v611_v0 = vor.u32 1.1754944e-38, %v610_v23 }
  0x58   : > { %v562_v34 = vsel %vm8931_vm11, %v7615_v46, %v558_v25  ;;  %v677_v37 = vmul.f32 %v7623_v62, %v676_v22  ;;  %v586_v26 = vsub.f32 1.0, %v585_v28  ;;  %7632 = vrcp.f32 %v8947_v31 }
  0x59   : > { %893 = vmatpush.bf16.msra.mxu0 %v7268_v14  ;;  %7442 = vmatpush.bf16.msra.mxu2 %v7268_v14  ;;  %v567_v38 = vsel %vm8887_vm2, %v566_v47, %v562_v34  ;;  %v577_v40 = vsel %vm8941_vm13, %v7617_v50, %v573_v29  ;;  %v692_v42 = vmul.f32 %v7625_v4, %v691_v30  ;;  %vm8970_vm2 = vmor %vm694_vm5, %vm695_vm15  ;;  %vm605_vm4 = vweird.f32 %v7629_v33  ;;  %v9033_v14 = vld [vmem:[%s12211_s0 + $0x68] sm:$0xff] }
  0x5a   : > { %v582_v44 = vsel %vm8899_vm3, %v581_v53, %v577_v40  ;;  %v794_v46 = vmul.f32 %v567_v38, %v8808_v2  ;;  %v678_v43 = vadd.f32 %v7623_v62, %v677_v37  ;;  %v587_v35 = vmul.f32 %v8926_v13, %v586_v26  ;;  %vm8980_vm3 = vmor %vm589_vm8, %vm590_vm0  ;;  %v9074_v40 = vld [vmem:[%s12211_s0 + $0x38] sm:$0xff] }
  0x5b   : > { %v795_v48 = vmul.f32 %v582_v44, %v8813_v3  ;;  %v693_v49 = vadd.f32 %v7625_v4, %v692_v42  ;;  %v600_v2 = vmul.f32 %v7629_v33, %v8893_v45  ;;  %v8990_v3 = vadd.f32 1.0, %v8904_v54  ;;  %vm9013_vm6 = vmor %vm604_vm12, %vm605_vm4 }
  0x5c   : > { %v682_v36 = vsel %vm8959_vm1, %v7623_v62, %v678_v43  ;;  %v588_v50 = vadd.f32 %v8926_v13, %v587_v35  ;;  %vm594_vm5 = vcmp.eq.f32.partialorder %v593_v9, 8.507059e+37  ;;  %vm709_vm8 = vweird.f32 %v8947_v31 }
  0x5d   : > { %v810_v51 = vpack.c.bf16 %v795_v48, %v794_v46  ;;  %v687_v52 = vsel %vm8913_vm7, %v8907_v57, %v682_v36  ;;  %v697_v53 = vsel %vm8970_vm2, %v7625_v4, %v693_v49  ;;  %v601_v55 = vsub.f32 1.0, %v600_v2  ;;  %v7631_v60 = vpop.eup %7630  ;;  %v9086_v48 = vld [vmem:[%s12211_s0 + $0x70] sm:$0xff] }
  0x5e   : > { %v702_v56 = vsel %vm8919_vm10, %v701_v1, %v697_v53  ;;  %v802_v54 = vmul.f32 %v687_v52, %v8819_v5  ;;  %v592_v58 = vsel %vm8980_vm3, %v8926_v13, %v588_v50  ;;  %v6548_v57 = vmul.f32 -1.442695, %v8995_v39  ;;  %v9113_v5 = vld [vmem:[%s12211_s0 + $0x78] sm:$0xff] }
  0x5f   : > { %894 = vmatmul.bf16.vlgmr.msra.gmra.mxu0 %v810_v51  ;;  %v803_v62 = vmul.f32 %v702_v56, %v8824_v6  ;;  %v602_v61 = vmul.f32 %v7629_v33, %v601_v55  ;;  %vm9017_vm7 = vcmp.eq.f32.partialorder %v608_v12, 8.507059e+37  ;;  %7634 = vrcp.f32 %v8990_v3  ;;  %v7633_v6 = vpop.eup %7632 }
  0x60   : > { %v597_v4 = vsel %vm594_vm5, %v596_v21, %v592_v58  ;;  %v713_v8 = vand.u32 2147483647, %v8947_v31  ;;  %v705_v45 = vmul.f32 %v7633_v6, %v8947_v31  ;;  %v715_v9 = vand.u32 2147483648, %v8947_v31 }
  0x61   : > { %v814_v1 = vpack.c.bf16 %v803_v62, %v802_v54  ;;  %v603_v7 = vadd.f32 %v7629_v33, %v602_v61  ;;  %v728_v12 = vand.u32 2147483647, %v8990_v3  ;;  %v9028_v13 = vadd.f32 1.0, %v8911_v59 }
  0x62   : > { %v730_v18 = vand.u32 2147483648, %v8990_v3  ;;  %v9038_v20 = vadd.f32 1.0, %v7631_v60  ;;  %7636 = vpow2.f32 %v6548_v57  ;;  %v706_v23 = vsub.f32 1.0, %v705_v45 }
  0x63   : > { %914 = vmatmul.bf16.vlgmr.msra.gmra.mxu2 %v814_v1  ;;  %v607_v17 = vsel %vm9013_vm6, %v7629_v33, %v603_v7  ;;  %vm710_vm9 = vweird.f32 %v7633_v6  ;;  %7638 = vrcp.f32 %v9028_v13  ;;  %vm9043_vm10 = vcmp.eq.f32.partialorder %v713_v8, 8.507059e+37 }
  0x64   : > { %v612_v21 = vsel %vm9017_vm7, %v611_v0, %v607_v17  ;;  %7640 = vrcp.f32 %v9038_v20  ;;  %v6549_v25 = vmul.f32 -1.442695, %v9033_v14  ;;  %v796_v22 = vmul.f32 %v597_v4, %v8832_v10  ;;  %vm9054_vm12 = vmor %vm709_vm8, %vm710_vm9  ;;  %v9066_v10 = vld [vmem:[%s12211_s0 + $0x30] sm:$0xff] }
  0x65   : > { %v7635_v27 = vpop.eup %7634  ;;  %v707_v28 = vmul.f32 %v7633_v6, %v706_v23  ;;  %v716_v29 = vor.u32 1.1754944e-38, %v715_v9  ;;  %vm724_vm11 = vweird.f32 %v8990_v3  ;;  %v797_v30 = vmul.f32 %v612_v21, %v8837_v11 }
  0x66   : > { %v720_v34 = vmul.f32 %v7635_v27, %v8990_v3  ;;  %vm9059_vm13 = vcmp.eq.f32.partialorder %v728_v12, 8.507059e+37  ;;  %v731_v26 = vor.u32 1.1754944e-38, %v730_v18  ;;  %vm619_vm14 = vweird.f32 %v9028_v13 }
  0x67   : > { %v708_v38 = vadd.f32 %v7633_v6, %v707_v28  ;;  %v623_v11 = vand.u32 2147483647, %v9028_v13  ;;  %v625_v31 = vand.u32 2147483648, %v9028_v13  ;;  %vm725_vm15 = vweird.f32 %v7635_v27 }
  0x68   : > { %v7637_v41 = vpop.eup %7636  ;;  %v721_v42 = vsub.f32 1.0, %v720_v34  ;;  %vm634_vm0 = vweird.f32 %v9038_v20  ;;  %7642 = vpow2.f32 %v6549_v25  ;;  %v638_v43 = vand.u32 2147483647, %v9038_v20  ;;  %vm9095_vm1 = vmor %vm724_vm11, %vm725_vm15 }
  0x69   : > { %v7639_v44 = vpop.eup %7638  ;;  %v712_v46 = vsel %vm9054_vm12, %v7633_v6, %v708_v38  ;;  %v9080_v47 = vadd.f32 1.0, %v7637_v41  ;;  %v6542_v35 = vmul.f32 -1.442695, %v9066_v10  ;;  %v811_v32 = vpack.c.bf16 %v797_v30, %v796_v22 }
  0x6a   : > { %v7641_v49 = vpop.eup %7640  ;;  %v722_v2 = vmul.f32 %v7635_v27, %v721_v42  ;;  %v615_v36 = vmul.f32 %v7639_v44, %v9028_v13  ;;  %v6543_v50 = vmul.f32 -1.442695, %v9074_v40  ;;  %v717_v51 = vsel %vm9043_vm10, %v716_v29, %v712_v46 }
  0x6b   : > { %v630_v53 = vmul.f32 %v7641_v49, %v9038_v20  ;;  %v640_v55 = vand.u32 2147483648, %v9038_v20  ;;  %7644 = vrcp.f32 %v9080_v47  ;;  %vm620_vm2 = vweird.f32 %v7639_v44 }
  0x6c   : > { %v723_v56 = vadd.f32 %v7635_v27, %v722_v2  ;;  %v616_v54 = vsub.f32 1.0, %v615_v36  ;;  %v6550_v58 = vmul.f32 -1.442695, %v9086_v48  ;;  %vm9103_vm3 = vcmp.eq.f32.partialorder %v623_v11, 8.507059e+37  ;;  %vm9119_vm5 = vmor %vm619_vm14, %vm620_vm2  ;;  %v7283_v2 = vld [vmem:[#allocation11 + $0x38] sm:$0xff] }
  0x6d   : > { %v631_v3 = vsub.f32 1.0, %v630_v53  ;;  %vm635_vm4 = vweird.f32 %v7641_v49  ;;  %7646 = vpow2.f32 %v6542_v35  ;;  %v804_v57 = vmul.f32 %v717_v51, %v8844_v15  ;;  %1331 = vmatpush.bf16.msra.mxu1 %v7283_v2  ;;  %7443 = vmatpush.bf16.msra.mxu3 %v7283_v2 }
  0x6e   : > { %v7643_v62 = vpop.eup %7642  ;;  %v727_v61 = vsel %vm9095_vm1, %v7635_v27, %v723_v56  ;;  %v617_v63 = vmul.f32 %v7639_v44, %v616_v54  ;;  %7648 = vpow2.f32 %v6543_v50  ;;  %v626_v1 = vor.u32 1.1754944e-38, %v625_v31  ;;  %vm9127_vm6 = vmor %vm634_vm0, %vm635_vm4 }
  0x6f   : > { %899 = vmatmul.bf16.gmra.mxu0 %v811_v32  ;;  %v732_v0 = vsel %vm9059_vm13, %v731_v26, %v727_v61  ;;  %v632_v4 = vmul.f32 %v7641_v49, %v631_v3  ;;  %v551_v7 = vadd.f32 1.0, %v7643_v62  ;;  %v641_v9 = vor.u32 1.1754944e-38, %v640_v55 }
  0x70   : > { %v805_v15 = vmul.f32 %v732_v0, %v8849_v16  ;;  %v618_v8 = vadd.f32 %v7639_v44, %v617_v63  ;;  %7650 = vpow2.f32 %v6550_v58  ;;  %vm639_vm7 = vcmp.eq.f32.partialorder %v638_v43, 8.507059e+37 }
  0x71   : > { %v7645_v12 = vpop.eup %7644  ;;  %v633_v13 = vadd.f32 %v7641_v49, %v632_v4  ;;  %7652 = vrcp.f32 %v551_v7  ;;  %v6551_v17 = vmul.f32 -1.442695, %v9113_v5  ;;  %vm739_vm8 = vweird.f32 %v9080_v47 }
  0x72   : > { %v815_v18 = vpack.c.bf16 %v805_v15, %v804_v57  ;;  %v622_v16 = vsel %vm9119_vm5, %v7639_v44, %v618_v8  ;;  %v735_v21 = vmul.f32 %v7645_v12, %v9080_v47  ;;  %vm740_vm9 = vweird.f32 %v7645_v12 }
  0x73   : > { %v7647_v23 = vpop.eup %7646  ;;  %v627_v20 = vsel %vm9103_vm3, %v626_v1, %v622_v16  ;;  %v637_v59 = vsel %vm9127_vm6, %v7641_v49, %v633_v13  ;;  %v743_v29 = vand.u32 2147483647, %v9080_v47  ;;  %v745_v30 = vand.u32 2147483648, %v9080_v47  ;;  %vm9146_vm10 = vmor %vm739_vm8, %vm740_vm9 }
  0x74   : > { %v7649_v25 = vpop.eup %7648  ;;  %919 = vmatmul.bf16.gmra.mxu2 %v815_v18  ;;  %v642_v27 = vsel %vm639_vm7, %v641_v9, %v637_v59  ;;  %v736_v22 = vsub.f32 1.0, %v735_v21  ;;  %v544_v28 = vadd.f32 1.0, %v7647_v23  ;;  %7654 = vpow2.f32 %v6551_v17 }
  0x75   : > { %v545_v33 = vadd.f32 1.0, %v7649_v25  ;;  %v798_v37 = vmul.f32 %v627_v20, %v8855_v19  ;;  %v799_v26 = vmul.f32 %v642_v27, %v8863_v24  ;;  %v758_v41 = vand.u32 2147483647, %v551_v7 }
  0x76   : > { %v7651_v34 = vpop.eup %7650  ;;  %v737_v38 = vmul.f32 %v7645_v12, %v736_v22  ;;  %7656 = vrcp.f32 %v544_v28  ;;  %v760_v42 = vand.u32 2147483648, %v551_v7  ;;  %vm9150_vm11 = vcmp.eq.f32.partialorder %v743_v29, 8.507059e+37 }
  0x77   : > { %v7653_v11 = vpop.eup %7652  ;;  %7658 = vrcp.f32 %v545_v33  ;;  %v746_v19 = vor.u32 1.1754944e-38, %v745_v30  ;;  %vm754_vm12 = vweird.f32 %v551_v7  ;;  %v9154_v24 = vadd.f32 1.0, %v7651_v34 }
  0x78   : > { %v738_v44 = vadd.f32 %v7645_v12, %v737_v38  ;;  %v750_v46 = vmul.f32 %v7653_v11, %v551_v7  ;;  %v812_v35 = vpack.c.bf16 %v799_v26, %v798_v37  ;;  %vm755_vm13 = vweird.f32 %v7653_v11 }
  0x79   : > { %vm9158_vm14 = vcmp.eq.f32.partialorder %v758_v41, 8.507059e+37  ;;  %v761_v36 = vor.u32 1.1754944e-38, %v760_v42  ;;  %v653_v50 = vand.u32 2147483647, %v544_v28  ;;  %7660 = vrcp.f32 %v9154_v24  ;;  %vm9168_vm0 = vmor %vm754_vm12, %vm755_vm13 }
  0x7a   : > { %v742_v47 = vsel %vm9146_vm10, %v7645_v12, %v738_v44  ;;  %v751_v49 = vsub.f32 1.0, %v750_v46  ;;  %v7655_v32 = vpop.eup %7654  ;;  %vm649_vm15 = vweird.f32 %v544_v28  ;;  %v655_v53 = vand.u32 2147483648, %v544_v28 }
  0x7b   : > { %v9163_v55 = vadd.f32 1.0, %v7655_v32  ;;  %v747_v54 = vsel %vm9150_vm11, %v746_v19, %v742_v47  ;;  %vm664_vm1 = vweird.f32 %v545_v33  ;;  %v668_v3 = vand.u32 2147483647, %v545_v33 }
  0x7c   : > { %v7657_v51 = vpop.eup %7656  ;;  %v752_v52 = vmul.f32 %v7653_v11, %v751_v49  ;;  %v670_v57 = vand.u32 2147483648, %v545_v33  ;;  %vm9173_vm3 = vcmp.eq.f32.partialorder %v653_v50, 8.507059e+37  ;;  %v775_v6 = vand.u32 2147483648, %v9154_v24  ;;  %v7281_v50 = vld [vmem:[#allocation11 + $0x28] sm:$0xff] }
  0x7d   : > { %v7659_v56 = vpop.eup %7658  ;;  %v645_v60 = vmul.f32 %v7657_v51, %v544_v28  ;;  %7662 = vrcp.f32 %v9163_v55  ;;  %vm650_vm2 = vweird.f32 %v7657_v51  ;;  %v806_v4 = vmul.f32 %v747_v54, %v8995_v39 }
  0x7e   : > { %v753_v62 = vadd.f32 %v7653_v11, %v752_v52  ;;  %v660_v61 = vmul.f32 %v7659_v56, %v545_v33  ;;  %vm665_vm4 = vweird.f32 %v7659_v56  ;;  %v656_v9 = vor.u32 1.1754944e-38, %v655_v53  ;;  %vm9189_vm6 = vmor %vm649_vm15, %vm650_vm2  ;;  %v7280_v52 = vld [vmem:[#allocation11 + $0x20] sm:$0xff] }
  0x7f   : > { %904 = vmatmul.bf16.gmra.mxu0 %v812_v35  ;;  %v646_v63 = vsub.f32 1.0, %v645_v60  ;;  %v7661_v15 = vpop.eup %7660  ;;  %vm9183_vm5 = vcmp.eq.f32.partialorder %v668_v3, 8.507059e+37  ;;  %v671_v18 = vor.u32 1.1754944e-38, %v670_v57  ;;  %vm9195_vm7 = vmor %vm664_vm1, %vm665_vm4  ;;  %vm769_vm8 = vweird.f32 %v9154_v24  ;;  %v7277_v3 = vld [vmem:[#allocation11 + $0x8] sm:$0xff] }
  0x80   : > { %v757_v1 = vsel %vm9168_vm0, %v7653_v11, %v753_v62  ;;  %v661_v7 = vsub.f32 1.0, %v660_v61  ;;  %v765_v16 = vmul.f32 %v7661_v15, %v9154_v24  ;;  %v773_v20 = vand.u32 2147483647, %v9154_v24 }
  0x81   : > { %v762_v8 = vsel %vm9158_vm14, %v761_v36, %v757_v1  ;;  %v647_v45 = vmul.f32 %v7657_v51, %v646_v63  ;;  %vm770_vm9 = vweird.f32 %v7661_v15  ;;  %vm784_vm10 = vweird.f32 %v9163_v55  ;;  %v7282_v36 = vld [vmem:[#allocation11 + $0x30] sm:$0xff] }
  0x82   : > { %v807_v13 = vmul.f32 %v762_v8, %v9033_v14  ;;  %v662_v39 = vmul.f32 %v7659_v56, %v661_v7  ;;  %v776_v14 = vor.u32 1.1754944e-38, %v775_v6  ;;  %v766_v22 = vsub.f32 1.0, %v765_v16  ;;  %vm771_vm11 = vmor %vm769_vm8, %vm770_vm9  ;;  %1332 = vmatpush.bf16.msra.mxu1 %v7282_v36  ;;  %7444 = vmatpush.bf16.msra.mxu3 %v7282_v36 }
  0x83   : > { %v648_v21 = vadd.f32 %v7657_v51, %v647_v45  ;;  %v7663_v59 = vpop.eup %7662  ;;  %v788_v30 = vand.u32 2147483647, %v9163_v55  ;;  %v790_v26 = vand.u32 2147483648, %v9163_v55  ;;  %vm774_vm13 = vcmp.eq.f32.partialorder %v773_v20, 8.507059e+37 }
  0x84   : > { %v816_v25 = vpack.c.bf16 %v807_v13, %v806_v4  ;;  %v663_v27 = vadd.f32 %v7659_v56, %v662_v39  ;;  %v780_v29 = vmul.f32 %v7663_v59, %v9163_v55  ;;  %v767_v37 = vmul.f32 %v7661_v15, %v766_v22  ;;  %v7276_v4 = vld [vmem:[#allocation11] sm:$0xff] }
  0x85   : > { %v652_v28 = vsel %vm9189_vm6, %v7657_v51, %v648_v21  ;;  %vm785_vm12 = vweird.f32 %v7663_v59  ;;  %v791_v19 = vor.u32 1.1754944e-38, %v790_v26  ;;  %vm789_vm15 = vcmp.eq.f32.partialorder %v788_v30, 8.507059e+37  ;;  %v9221_v51 = vld [vmem:[#allocation10] ss:$0 sm:$0xff] }
  0x86   : > { %924 = vmatmul.bf16.gmra.mxu2 %v816_v25  ;;  %v657_v33 = vsel %vm9173_vm3, %v656_v9, %v652_v28  ;;  %v667_v34 = vsel %vm9195_vm7, %v7659_v56, %v663_v27  ;;  %v781_v31 = vsub.f32 1.0, %v780_v29  ;;  %v768_v42 = vadd.f32 %v7661_v15, %v767_v37  ;;  %vm786_vm14 = vmor %vm784_vm10, %vm785_vm12  ;;  %1333 = vmatpush.bf16.msra.mxu1 %v7281_v50  ;;  %v7278_v56 = vld [vmem:[#allocation11 + $0x10] sm:$0xff] }
  0x87   : > { %v672_v38 = vsel %vm9183_vm5, %v671_v18, %v667_v34  ;;  %v800_v11 = vmul.f32 %v657_v33, %v9066_v10  ;;  %7445 = vmatpush.bf16.msra.mxu3 %v7281_v50 }
  0x88   : > { %v801_v41 = vmul.f32 %v672_v38, %v9074_v40  ;;  %v782_v44 = vmul.f32 %v7663_v59, %v781_v31  ;;  %v772_v43 = vsel %vm771_vm11, %v7661_v15, %v768_v42 }
  0x89   : > { %v777_v35 = vsel %vm774_vm13, %v776_v14, %v772_v43 }
  0x8a   : > { %v813_v46 = vpack.c.bf16 %v801_v41, %v800_v11  ;;  %v783_v47 = vadd.f32 %v7663_v59, %v782_v44  ;;  %v808_v49 = vmul.f32 %v777_v35, %v9086_v48  ;;  %1334 = vmatpush.bf16.msra.mxu1 %v7280_v52 }
  0x8b   : > { %7446 = vmatpush.bf16.msra.mxu3 %v7280_v52 }
  0x8c   : > { %v787_v10 = vsel %vm786_vm14, %v7663_v59, %v783_v47 }
  0x8d   : > { %v792_v24 = vsel %vm789_vm15, %v791_v19, %v787_v10 }
  0x8e   : > { %v809_v32 = vmul.f32 %v792_v24, %v9113_v5  ;;  %v7279_v5 = vld [vmem:[#allocation11 + $0x18] sm:$0xff] }
  0x8f   : > { %909 = vmatmul.bf16.gmra.mxu0 %v813_v46  ;;  %1335 = vmatpush.bf16.msra.mxu1 %v7279_v5 }
  0x90   : > { %v817_v40 = vpack.c.bf16 %v809_v32, %v808_v49  ;;  %7447 = vmatpush.bf16.msra.mxu3 %v7279_v5 }
  0x93   : > { %1336 = vmatpush.bf16.msra.mxu1 %v7278_v56 }
  0x94   : > { %7448 = vmatpush.bf16.msra.mxu3 %v7278_v56 }
  0x96   : > { %929 = vmatmul.bf16.gmra.mxu2 %v817_v40 }
  0x97   : > { %1337 = vmatpush.bf16.msra.mxu1 %v7277_v3 }
  0x98   : > { %7449 = vmatpush.bf16.msra.mxu3 %v7277_v3 }
  0x9b   : > { %1338 = vmatpush.bf16.msra.mxu1 %v7276_v4 }
  0x9c   : > { %7450 = vmatpush.bf16.msra.mxu3 %v7276_v4 }
  0xdc   : > { %v895_v53 = vpop.f32.mrf.mxu0 }
  0xdd   : > { %v9224_v48 = vadd.f32 %v9221_v51, %v895_v53 }
  0xdf   : > { %v6584_v55 = vmul.f32 -1.442695, %v9224_v48 }
  0xe1   : > { %7664 = vpow2.f32 %v6584_v55 }
  0xe4   : > { %v897_v54 = vpop.f32.mrf.mxu0 }
  0xe5   : > { %v9228_v58 = vadd.f32 %v9221_v51, %v897_v54 }
  0xe6   : > { %v915_v60 = vpop.f32.mrf.mxu2 }
  0xe7   : > { %v7665_v62 = vpop.eup %7664  ;;  %v9231_v61 = vadd.f32 %v9221_v51, %v915_v60  ;;  %v6585_v57 = vmul.f32 -1.442695, %v9228_v58 }
  0xe8   : > { %v983_v63 = vadd.f32 1.0, %v7665_v62 }
  0xe9   : > { %v6592_v0 = vmul.f32 -1.442695, %v9231_v61  ;;  %7666 = vpow2.f32 %v6585_v57 }
  0xea   : > { %7668 = vrcp.f32 %v983_v63  ;;  %v1010_v21 = vand.u32 2147483648, %v983_v63  ;;  %vm1004_vm1 = vweird.f32 %v983_v63  ;;  %v1008_v22 = vand.u32 2147483647, %v983_v63 }
  0xeb   : > { %7670 = vpow2.f32 %v6592_v0 }
  0xec   : > { %v900_v6 = vpop.f32.mrf.mxu0  ;;  %v1011_v28 = vor.u32 1.1754944e-38, %v1010_v21  ;;  %vm1009_vm3 = vcmp.eq.f32.partialorder %v1008_v22, 8.507059e+37 }
  0xed   : > { %v9236_v1 = vadd.f32 %v9221_v51, %v900_v6 }
  0xee   : > { %v917_v7 = vpop.f32.mrf.mxu2 }
  0xef   : > { %v7667_v15 = vpop.eup %7666  ;;  %v9239_v8 = vadd.f32 %v9221_v51, %v917_v7  ;;  %v6586_v45 = vmul.f32 -1.442695, %v9236_v1 }
  0xf0   : > { %v7669_v9 = vpop.eup %7668  ;;  %v984_v12 = vadd.f32 1.0, %v7667_v15 }
  0xf1   : > { %v7671_v13 = vpop.eup %7670  ;;  %v1000_v17 = vmul.f32 %v7669_v9, %v983_v63  ;;  %v6593_v39 = vmul.f32 -1.442695, %v9239_v8  ;;  %7672 = vpow2.f32 %v6586_v45  ;;  %vm1005_vm0 = vweird.f32 %v7669_v9 }
  0xf2   : > { %v9243_v18 = vadd.f32 1.0, %v7671_v13  ;;  %7674 = vrcp.f32 %v984_v12  ;;  %vm9251_vm2 = vmor %vm1004_vm1, %vm1005_vm0  ;;  %v1023_v26 = vand.u32 2147483647, %v984_v12  ;;  %v1025_v38 = vand.u32 2147483648, %v984_v12 }
  0xf3   : > { %v1001_v16 = vsub.f32 1.0, %v1000_v17  ;;  %7676 = vpow2.f32 %v6593_v39  ;;  %vm1019_vm5 = vweird.f32 %v984_v12 }
  0xf4   : > { %7678 = vrcp.f32 %v9243_v18  ;;  %v902_v23 = vpop.f32.mrf.mxu0  ;;  %v1128_v43 = vand.u32 2147483647, %v9243_v18  ;;  %v1130_v19 = vand.u32 2147483648, %v9243_v18  ;;  %vm1124_vm4 = vweird.f32 %v9243_v18 }
  0xf5   : > { %v1002_v20 = vmul.f32 %v7669_v9, %v1001_v16  ;;  %v9247_v14 = vadd.f32 %v9221_v51, %v902_v23  ;;  %vm9272_vm7 = vcmp.eq.f32.partialorder %v1023_v26, 8.507059e+37  ;;  %v1026_v40 = vor.u32 1.1754944e-38, %v1025_v38 }
  0xf6   : > { %vm9278_vm8 = vcmp.eq.f32.partialorder %v1128_v43, 8.507059e+37  ;;  %v1131_v52 = vor.u32 1.1754944e-38, %v1130_v19 }
  0xf7   : > { %v7673_v59 = vpop.eup %7672  ;;  %v1003_v25 = vadd.f32 %v7669_v9, %v1002_v20  ;;  %v920_v30 = vpop.f32.mrf.mxu2  ;;  %v6587_v11 = vmul.f32 -1.442695, %v9247_v14 }
  0xf8   : > { %v7675_v27 = vpop.eup %7674  ;;  %v9249_v29 = vadd.f32 1.0, %v7673_v59  ;;  %v9264_v44 = vadd.f32 %v9221_v51, %v920_v30 }
  0xf9   : > { %v7677_v33 = vpop.eup %7676  ;;  %v1015_v37 = vmul.f32 %v7675_v27, %v984_v12  ;;  %v1007_v41 = vsel %vm9251_vm2, %v7669_v9, %v1003_v25  ;;  %vm1020_vm6 = vweird.f32 %v7675_v27 }
  0xfa   : > { %v9256_v31 = vpop.eup %7678  ;;  %v9260_v42 = vadd.f32 1.0, %v7677_v33  ;;  %7680 = vrcp.f32 %v9249_v29  ;;  %v1012_v10 = vsel %vm1009_vm3, %v1011_v28, %v1007_v41  ;;  %v6594_v2 = vmul.f32 -1.442695, %v9264_v44  ;;  %vm1021_vm10 = vmor %vm1019_vm5, %vm1020_vm6 }
  0xfb   : > { %v1120_v46 = vmul.f32 %v9256_v31, %v9243_v18  ;;  %v1016_v35 = vsub.f32 1.0, %v1015_v37  ;;  %v1239_v55 = vmul.f32 %v1012_v10, %v9224_v48  ;;  %vm1125_vm9 = vweird.f32 %v9256_v31 }
  0xfc   : > { %7682 = vrcp.f32 %v9260_v42  ;;  %v905_v47 = vpop.f32.mrf.mxu0  ;;  %vm1139_vm11 = vweird.f32 %v9260_v42  ;;  %v1143_v3 = vand.u32 2147483647, %v9260_v42  ;;  %vm9303_vm12 = vmor %vm1124_vm4, %vm1125_vm9  ;;  %v1145_v45 = vand.u32 2147483648, %v9260_v42 }
  0xfd   : > { %v1121_v24 = vsub.f32 1.0, %v1120_v46  ;;  %v1017_v49 = vmul.f32 %v7675_v27, %v1016_v35  ;;  %7684 = vpow2.f32 %v6587_v11  ;;  %v9288_v54 = vadd.f32 %v9221_v51, %v905_v47 }
  0xfe   : > { %7686 = vpow2.f32 %v6594_v2  ;;  %v1038_v9 = vand.u32 2147483647, %v9249_v29  ;;  %v1040_v17 = vand.u32 2147483648, %v9249_v29  ;;  %v1146_v28 = vor.u32 1.1754944e-38, %v1145_v45 }
  0xff   : > { %v1122_v36 = vmul.f32 %v9256_v31, %v1121_v24  ;;  %v1018_v53 = vadd.f32 %v7675_v27, %v1017_v49  ;;  %v922_v56 = vpop.f32.mrf.mxu2  ;;  %v6588_v6 = vmul.f32 -1.442695, %v9288_v54  ;;  %vm1034_vm0 = vweird.f32 %v9249_v29 }
 0x100   : > { %v9282_v5 = vpop.eup %7680  ;;  %v9298_v0 = vadd.f32 %v9221_v51, %v922_v56  ;;  %vm1144_vm1 = vcmp.eq.f32.partialorder %v1143_v3, 8.507059e+37  ;;  %vm1039_vm3 = vcmp.eq.f32.partialorder %v1038_v9, 8.507059e+37 }
 0x101   : > { %v1022_v60 = vsel %vm1021_vm10, %v7675_v27, %v1018_v53  ;;  %v1030_v62 = vmul.f32 %v9282_v5, %v9249_v29  ;;  %v1123_v48 = vadd.f32 %v9256_v31, %v1122_v36  ;;  %7688 = vpow2.f32 %v6588_v6 }
 0x102   : > { %v7683_v57 = vpop.eup %7682  ;;  %v1027_v63 = vsel %vm9272_vm7, %v1026_v40, %v1022_v60  ;;  %v6595_v39 = vmul.f32 -1.442695, %v9298_v0  ;;  %vm1035_vm14 = vweird.f32 %v9282_v5  ;;  %v1041_v29 = vor.u32 1.1754944e-38, %v1040_v17 }
 0x103   : > { %v1240_v7 = vmul.f32 %v1027_v63, %v9228_v58  ;;  %v1135_v15 = vmul.f32 %v7683_v57, %v9260_v42  ;;  %v7685_v12 = vpop.eup %7684  ;;  %v1031_v13 = vsub.f32 1.0, %v1030_v62  ;;  %vm1140_vm13 = vweird.f32 %v7683_v57  ;;  %vm9335_vm2 = vmor %vm1034_vm0, %vm1035_vm14 }
 0x104   : > { %v907_v18 = vpop.f32.mrf.mxu0  ;;  %v9314_v21 = vadd.f32 1.0, %v7685_v12  ;;  %v7687_v58 = vpop.eup %7686  ;;  %v1127_v23 = vsel %vm9303_vm12, %v9256_v31, %v1123_v48  ;;  %7690 = vpow2.f32 %v6595_v39  ;;  %vm9325_vm15 = vmor %vm1139_vm11, %vm1140_vm13 }
 0x105   : > { %v1136_v16 = vsub.f32 1.0, %v1135_v15  ;;  %v1032_v20 = vmul.f32 %v9282_v5, %v1031_v13  ;;  %v1255_v59 = vpack.c.bf16 %v1240_v7, %v1239_v55  ;;  %v9320_v27 = vadd.f32 1.0, %v7687_v58 }
 0x106   : > { %7692 = vrcp.f32 %v9314_v21  ;;  %v1132_v33 = vsel %vm9278_vm8, %v1131_v52, %v1127_v23  ;;  %v9344_v31 = vadd.f32 %v9221_v51, %v907_v18  ;;  %v1053_v42 = vand.u32 2147483647, %v9314_v21 }
 0x107   : > { %v1137_v25 = vmul.f32 %v7683_v57, %v1136_v16  ;;  %v1033_v30 = vadd.f32 %v9282_v5, %v1032_v20  ;;  %1339 = vmatmul.bf16.vlgmr.msra.gmra.mxu1 %v1255_v59  ;;  %7694 = vrcp.f32 %v9320_v27  ;;  %v7689_v26 = vpop.eup %7688  ;;  %v1055_v46 = vand.u32 2147483648, %v9314_v21 }
 0x108   : > { %v9350_v43 = vadd.f32 1.0, %v7689_v26  ;;  %v1247_v35 = vmul.f32 %v1132_v33, %v9231_v61  ;;  %v1158_v10 = vand.u32 2147483647, %v9320_v27  ;;  %v1160_v24 = vand.u32 2147483648, %v9320_v27 }
 0x109   : > { %v1138_v34 = vadd.f32 %v7683_v57, %v1137_v25  ;;  %v1037_v38 = vsel %vm9335_vm2, %v9282_v5, %v1033_v30  ;;  %v925_v11 = vpop.f32.mrf.mxu2  ;;  %vm1154_vm4 = vweird.f32 %v9320_v27  ;;  %vm1049_vm5 = vweird.f32 %v9314_v21 }
 0x10a   : > { %v7691_v19 = vpop.eup %7690  ;;  %v1042_v40 = vsel %vm1039_vm3, %v1041_v29, %v1037_v38  ;;  %7696 = vrcp.f32 %v9350_v43  ;;  %v9359_v36 = vadd.f32 %v9221_v51, %v925_v11  ;;  %v6589_v61 = vmul.f32 -1.442695, %v9344_v31 }
 0x10b   : > { %v1142_v41 = vsel %vm9325_vm15, %v7683_v57, %v1138_v34  ;;  %v9355_v2 = vadd.f32 1.0, %v7691_v19  ;;  %vm9366_vm6 = vcmp.eq.f32.partialorder %v1053_v42, 8.507059e+37  ;;  %v1056_v55 = vor.u32 1.1754944e-38, %v1055_v46 }
 0x10c   : > { %v1147_v47 = vsel %vm1144_vm1, %v1146_v28, %v1142_v41  ;;  %v910_v49 = vpop.f32.mrf.mxu0  ;;  %v7693_v32 = vpop.eup %7692  ;;  %v1241_v56 = vmul.f32 %v1042_v40, %v9236_v1  ;;  %vm9373_vm7 = vcmp.eq.f32.partialorder %v1158_v10, 8.507059e+37  ;;  %v1161_v57 = vor.u32 1.1754944e-38, %v1160_v24 }
 0x10d   : > { %v1045_v50 = vmul.f32 %v7693_v32, %v9314_v21  ;;  %v7695_v52 = vpop.eup %7694  ;;  %v1248_v53 = vmul.f32 %v1147_v47, %v9239_v8  ;;  %7698 = vrcp.f32 %v9355_v2  ;;  %vm1050_vm9 = vweird.f32 %v7693_v32 }
 0x10e   : > { %v1150_v60 = vmul.f32 %v7695_v52, %v9320_v27  ;;  %vm1155_vm8 = vweird.f32 %v7695_v52  ;;  %v6596_v8 = vmul.f32 -1.442695, %v9359_v36  ;;  %7700 = vpow2.f32 %v6589_v61  ;;  %vm9389_vm11 = vmor %vm1049_vm5, %vm1050_vm9 }
 0x10f   : > { %v1046_v62 = vsub.f32 1.0, %v1045_v50  ;;  %v9379_v4 = vadd.f32 %v9221_v51, %v910_v49  ;;  %vm1169_vm10 = vweird.f32 %v9355_v2  ;;  %v1259_v15 = vpack.c.bf16 %v1248_v53, %v1247_v35  ;;  %vm9399_vm12 = vmor %vm1154_vm4, %vm1155_vm8 }
 0x110   : > { %v1151_v48 = vsub.f32 1.0, %v1150_v60  ;;  %v9381_v1 = vpop.eup %7696  ;;  %7702 = vpow2.f32 %v6596_v8  ;;  %v1173_v13 = vand.u32 2147483647, %v9355_v2  ;;  %v1175_v21 = vand.u32 2147483648, %v9355_v2 }
 0x111   : > { %v1047_v63 = vmul.f32 %v7693_v32, %v1046_v62  ;;  %v927_v6 = vpop.f32.mrf.mxu2  ;;  %v1060_v17 = vmul.f32 %v9381_v1, %v9350_v43  ;;  %v6590_v23 = vmul.f32 -1.442695, %v9379_v4  ;;  %1359 = vmatmul.bf16.vlgmr.msra.gmra.mxu3 %v1259_v15  ;;  %v1068_v24 = vand.u32 2147483647, %v9350_v43 }
 0x112   : > { %v9385_v7 = vadd.f32 %v9221_v51, %v927_v6  ;;  %v1152_v45 = vmul.f32 %v7695_v52, %v1151_v48  ;;  %vm1174_vm15 = vcmp.eq.f32.partialorder %v1173_v13, 8.507059e+37  ;;  %vm1064_vm0 = vweird.f32 %v9350_v43 }
 0x113   : > { %v1048_v9 = vadd.f32 %v7693_v32, %v1047_v63  ;;  %v7699_v18 = vpop.eup %7698  ;;  %v1061_v28 = vsub.f32 1.0, %v1060_v17  ;;  %vm1065_vm1 = vweird.f32 %v9381_v1  ;;  %vm9445_vm2 = vcmp.eq.f32.partialorder %v1068_v24, 8.507059e+37 }
 0x114   : > { %v912_v39 = vpop.f32.mrf.mxu0  ;;  %v6597_v58 = vmul.f32 -1.442695, %v9385_v7  ;;  %v1153_v59 = vadd.f32 %v7695_v52, %v1152_v45  ;;  %v1165_v27 = vmul.f32 %v7699_v18, %v9355_v2  ;;  %vm1170_vm13 = vweird.f32 %v7699_v18  ;;  %v7701_v33 = vpop.eup %7700  ;;  %vm9458_vm3 = vmor %vm1064_vm0, %vm1065_vm1 }
 0x115   : > { %v9407_v20 = vadd.f32 %v9221_v51, %v912_v39  ;;  %v1052_v25 = vsel %vm9389_vm11, %v7693_v32, %v1048_v9  ;;  %v9418_v29 = vadd.f32 1.0, %v7701_v33  ;;  %vm9427_vm14 = vmor %vm1169_vm10, %vm1170_vm13  ;;  %v1062_v35 = vmul.f32 %v9381_v1, %v1061_v28 }
 0x116   : > { %v1057_v22 = vsel %vm9366_vm6, %v1056_v55, %v1052_v25  ;;  %7704 = vpow2.f32 %v6597_v58  ;;  %v1157_v34 = vsel %vm9399_vm12, %v7695_v52, %v1153_v59  ;;  %v1166_v26 = vsub.f32 1.0, %v1165_v27  ;;  %v7703_v38 = vpop.eup %7702 }
 0x117   : > { %v6591_v30 = vmul.f32 -1.442695, %v9407_v20  ;;  %v1242_v37 = vmul.f32 %v1057_v22, %v9247_v14  ;;  %7706 = vpow2.f32 %v6590_v23  ;;  %v9420_v41 = vadd.f32 1.0, %v7703_v38 }
 0x118   : > { %v1167_v11 = vmul.f32 %v7699_v18, %v1166_v26  ;;  %v1162_v46 = vsel %vm9373_vm7, %v1161_v57, %v1157_v34  ;;  %v1176_v14 = vor.u32 1.1754944e-38, %v1175_v21  ;;  %v1070_v32 = vand.u32 2147483648, %v9350_v43 }
 0x119   : > { %7708 = vpow2.f32 %v6591_v30  ;;  %v1256_v42 = vpack.c.bf16 %v1242_v37, %v1241_v56  ;;  %v930_v47 = vpop.f32.mrf.mxu2  ;;  %v1249_v2 = vmul.f32 %v1162_v46, %v9264_v44  ;;  %v1063_v5 = vadd.f32 %v9381_v1, %v1062_v35  ;;  %v7306_v56 = vld [vmem:[#allocation8 + $0xb0] sm:$0xff] }
 0x11a   : > { %7710 = vrcp.f32 %v9418_v29  ;;  %v1168_v10 = vadd.f32 %v7699_v18, %v1167_v11  ;;  %v1083_v44 = vand.u32 2147483647, %v9418_v29  ;;  %v1071_v3 = vor.u32 1.1754944e-38, %v1070_v32 }
 0x11b   : > { %7712 = vrcp.f32 %v9420_v41  ;;  %1344 = vmatmul.bf16.gmra.mxu1 %v1256_v42  ;;  %v9454_v57 = vadd.f32 %v9221_v51, %v930_v47  ;;  %v1190_v48 = vand.u32 2147483648, %v9420_v41  ;;  %vm1079_vm4 = vweird.f32 %v9418_v29  ;;  %v7291_v47 = vld [vmem:[#allocation8 + $0x78] sm:$0xff] }
 0x11c   : > { %v7705_v49 = vpop.eup %7704  ;;  %v1172_v50 = vsel %vm9427_vm14, %v7699_v18, %v1168_v10  ;;  %v1067_v15 = vsel %vm9458_vm3, %v9381_v1, %v1063_v5  ;;  %v1085_v9 = vand.u32 2147483648, %v9418_v29  ;;  %vm1184_vm5 = vweird.f32 %v9420_v41  ;;  %1794 = vmatpush.bf16.msrb.mxu2 %v7291_v47  ;;  %v7288_v10 = vld [vmem:[#allocation8 + $0x60] sm:$0xff] }
 0x11d   : > { %v7707_v40 = vpop.eup %7706  ;;  %v9439_v61 = vadd.f32 1.0, %v7705_v49  ;;  %v1177_v53 = vsel %vm1174_vm15, %v1176_v14, %v1172_v50  ;;  %v1188_v12 = vand.u32 2147483647, %v9420_v41  ;;  %vm9473_vm6 = vcmp.eq.f32.partialorder %v1083_v44, 8.507059e+37 }
 0x11e   : > { %v1250_v55 = vmul.f32 %v1177_v53, %v9298_v0  ;;  %v9451_v62 = vadd.f32 1.0, %v7707_v40  ;;  %v6598_v18 = vmul.f32 -1.442695, %v9454_v57  ;;  %v1072_v21 = vsel %vm9445_vm2, %v1071_v3, %v1067_v15  ;;  %v7307_v40 = vld [vmem:[#allocation8 + $0xb8] sm:$0xff] }
 0x11f   : > { %v7709_v52 = vpop.eup %7708  ;;  %7714 = vrcp.f32 %v9439_v61  ;;  %v1191_v58 = vor.u32 1.1754944e-38, %v1190_v48  ;;  %v1086_v25 = vor.u32 1.1754944e-38, %v1085_v9  ;;  %vm1199_vm10 = vweird.f32 %v9439_v61  ;;  %2392 = vmatpush.bf16.msrb.mxu0 %v7307_v40 }
 0x120   : > { %v7711_v60 = vpop.eup %7710  ;;  %v9456_v43 = vadd.f32 1.0, %v7709_v52  ;;  %v1260_v6 = vpack.c.bf16 %v1250_v55, %v1249_v2  ;;  %7716 = vrcp.f32 %v9451_v62  ;;  %v1205_v30 = vand.u32 2147483648, %v9439_v61 }
 0x121   : > { %v7713_v8 = vpop.eup %7712  ;;  %v1075_v63 = vmul.f32 %v7711_v60, %v9418_v29  ;;  %v932_v1 = vpop.f32.mrf.mxu2  ;;  %vm1080_vm8 = vweird.f32 %v7711_v60  ;;  %v1203_v38 = vand.u32 2147483647, %v9439_v61  ;;  %v1243_v11 = vmul.f32 %v1072_v21, %v9288_v54 }
 0x122   : > { %v1180_v45 = vmul.f32 %v7713_v8, %v9420_v41  ;;  %vm1185_vm7 = vweird.f32 %v7713_v8  ;;  %7718 = vrcp.f32 %v9456_v43  ;;  %1364 = vmatmul.bf16.gmra.mxu3 %v1260_v6  ;;  %v9491_v33 = vadd.f32 %v9221_v51, %v932_v1  ;;  %vm1081_vm11 = vmor %vm1079_vm4, %vm1080_vm8 }
 0x123   : > { %v1076_v13 = vsub.f32 1.0, %v1075_v63  ;;  %7720 = vpow2.f32 %v6598_v18  ;;  %vm9484_vm9 = vmor %vm1184_vm5, %vm1185_vm7  ;;  %vm9499_vm13 = vcmp.eq.f32.partialorder %v1188_v12, 8.507059e+37  ;;  %v1206_v24 = vor.u32 1.1754944e-38, %v1205_v30  ;;  %2393 = vmatpush.bf16.msrb.mxu0 %v7306_v56  ;;  %v7286_v56 = vld [vmem:[#allocation8 + $0x50] sm:$0xff] }
 0x124   : > { %v1181_v39 = vsub.f32 1.0, %v1180_v45  ;;  %v6599_v35 = vmul.f32 -1.442695, %v9491_v33  ;;  %vm1204_vm15 = vcmp.eq.f32.partialorder %v1203_v38, 8.507059e+37  ;;  %v1115_v3 = vand.u32 2147483648, %v9456_v43  ;;  %v7289_v45 = vld [vmem:[#allocation8 + $0x68] sm:$0xff] }
 0x125   : > { %v7715_v16 = vpop.eup %7714  ;;  %v1077_v23 = vmul.f32 %v7711_v60, %v1076_v13  ;;  %v1113_v15 = vand.u32 2147483647, %v9456_v43  ;;  %vm1094_vm2 = vweird.f32 %v9451_v62  ;;  %v1098_v9 = vand.u32 2147483647, %v9451_v62 }
 0x126   : > { %v1182_v59 = vmul.f32 %v7713_v8, %v1181_v39  ;;  %v1195_v27 = vmul.f32 %v7715_v16, %v9439_v61  ;;  %v9493_v34 = vpop.eup %7716  ;;  %vm1200_vm12 = vweird.f32 %v7715_v16  ;;  %7722 = vpow2.f32 %v6599_v35 }
 0x127   : > { %v1078_v28 = vadd.f32 %v7711_v60, %v1077_v23  ;;  %v1090_v51 = vmul.f32 %v9493_v34, %v9451_v62  ;;  %vm9513_vm14 = vmor %vm1199_vm10, %vm1200_vm12  ;;  %vm1095_vm0 = vweird.f32 %v9493_v34  ;;  %vm1109_vm4 = vweird.f32 %v9456_v43 }
 0x128   : > { %v1183_v37 = vadd.f32 %v7713_v8, %v1182_v59  ;;  %v1196_v26 = vsub.f32 1.0, %v1195_v27  ;;  %v7719_v46 = vpop.eup %7718  ;;  %vm9534_vm3 = vmor %vm1094_vm2, %vm1095_vm0  ;;  %v1116_v17 = vor.u32 1.1754944e-38, %v1115_v3  ;;  %vm1099_vm7 = vcmp.eq.f32.partialorder %v1098_v9, 8.507059e+37  ;;  %v7302_v3 = vld [vmem:[#allocation8 + $0x90] sm:$0xff]  ;;  %v7300_v9 = vld [vmem:[#allocation8 + $0x80] sm:$0xff] }
 0x129   : > { %v1082_v42 = vsel %vm1081_vm11, %v7711_v60, %v1078_v28  ;;  %v1091_v49 = vsub.f32 1.0, %v1090_v51  ;;  %v1105_v32 = vmul.f32 %v7719_v46, %v9456_v43  ;;  %v7721_v2 = vpop.eup %7720  ;;  %v1100_v60 = vand.u32 2147483648, %v9451_v62 }
 0x12a   : > { %v1187_v19 = vsel %vm9484_vm9, %v7713_v8, %v1183_v37  ;;  %v1087_v29 = vsel %vm9473_vm6, %v1086_v25, %v1082_v42  ;;  %v1197_v14 = vmul.f32 %v7715_v16, %v1196_v26  ;;  %v997_v53 = vadd.f32 1.0, %v7721_v2 }
 0x12b   : > { %v1244_v54 = vmul.f32 %v1087_v29, %v9344_v31  ;;  %v1192_v50 = vsel %vm9499_vm13, %v1191_v58, %v1187_v19  ;;  %v7290_v31 = vld [vmem:[#allocation8 + $0x70] sm:$0xff]  ;;  %v1092_v61 = vmul.f32 %v9493_v34, %v1091_v49  ;;  %v1106_v5 = vsub.f32 1.0, %v1105_v32  ;;  %v9549_v49 = vld [vmem:[%s12218_s7] ss:$0 sm:$0xff] }
 0x12c   : > { %v1198_v52 = vadd.f32 %v7715_v16, %v1197_v14  ;;  %v1251_v8 = vmul.f32 %v1192_v50, %v9359_v36  ;;  %7724 = vrcp.f32 %v997_v53  ;;  %vm1110_vm1 = vweird.f32 %v7719_v46  ;;  %1795 = vmatpush.bf16.msrb.mxu2 %v7290_v31  ;;  %v7723_v12 = vpop.eup %7722  ;;  %v7304_v50 = vld [vmem:[#allocation8 + $0xa0] sm:$0xff] }
 0x12d   : > { %v1257_v55 = vpack.c.bf16 %v1244_v54, %v1243_v11  ;;  %v1093_v48 = vadd.f32 %v9493_v34, %v1092_v61  ;;  %v1107_v6 = vmul.f32 %v7719_v46, %v1106_v5  ;;  %vm1111_vm5 = vmor %vm1109_vm4, %vm1110_vm1  ;;  %v998_v39 = vadd.f32 1.0, %v7723_v12  ;;  %v7921_v5 = vld [vmem:[%s12211_s0 + $0x8] sm:$0xff] }
 0x12e   : > { %v1202_v44 = vsel %vm9513_vm14, %v7715_v16, %v1198_v52  ;;  %v1101_v62 = vor.u32 1.1754944e-38, %v1100_v60  ;;  %vm1114_vm6 = vcmp.eq.f32.partialorder %v1113_v15, 8.507059e+37  ;;  %vm1214_vm8 = vweird.f32 %v997_v53 }
 0x12f   : > { %v1207_v0 = vsel %vm1204_vm15, %v1206_v24, %v1202_v44  ;;  %1349 = vmatmul.bf16.gmra.mxu1 %v1257_v55  ;;  %v1108_v13 = vadd.f32 %v7719_v46, %v1107_v6  ;;  %7726 = vrcp.f32 %v998_v39  ;;  %v1218_v27 = vand.u32 2147483647, %v997_v53  ;;  %v7305_v24 = vld [vmem:[#allocation8 + $0xa8] sm:$0xff] }
 0x130   : > { %v1252_v63 = vmul.f32 %v1207_v0, %v9385_v7  ;;  %v1097_v7 = vsel %vm9534_vm3, %v9493_v34, %v1093_v48  ;;  %1796 = vmatpush.bf16.msrb.mxu2 %v7289_v45  ;;  %v1220_v22 = vand.u32 2147483648, %v997_v53  ;;  %vm1229_vm12 = vweird.f32 %v998_v39  ;;  %2394 = vmatpush.bf16.msrb.mxu0 %v7305_v24  ;;  %v7285_v0 = vld [vmem:[#allocation8 + $0x48] sm:$0xff]  ;;  %v7284_v45 = vld [vmem:[#allocation8 + $0x40] sm:$0xff] }
 0x131   : > { %v1112_v1 = vsel %vm1111_vm5, %v7719_v46, %v1108_v13  ;;  %v1102_v58 = vsel %vm1099_vm7, %v1101_v62, %v1097_v7  ;;  %vm1219_vm11 = vcmp.eq.f32.partialorder %v1218_v27, 8.507059e+37  ;;  %v1235_v11 = vand.u32 2147483648, %v998_v39  ;;  %v7301_v48 = vld [vmem:[#allocation8 + $0x88] sm:$0xff] }
 0x132   : > { %v1261_v18 = vpack.c.bf16 %v1252_v63, %v1251_v8  ;;  %v7725_v16 = vpop.eup %7724  ;;  %v1117_v21 = vsel %vm1114_vm6, %v1116_v17, %v1112_v1  ;;  %v1245_v25 = vmul.f32 %v1102_v58, %v9379_v4  ;;  %v1221_v38 = vor.u32 1.1754944e-38, %v1220_v22  ;;  %v7922_v13 = vld [vmem:[%s12211_s0 + $0x10] sm:$0xff] }
 0x133   : > { %v1210_v23 = vmul.f32 %v7725_v16, %v997_v53  ;;  %v1246_v43 = vmul.f32 %v1117_v21, %v9407_v20  ;;  %vm1215_vm9 = vweird.f32 %v7725_v16  ;;  %v1233_v20 = vand.u32 2147483647, %v998_v39  ;;  %v7303_v53 = vld [vmem:[#allocation8 + $0x98] sm:$0xff] }
 0x134   : > { %1369 = vmatmul.bf16.gmra.mxu3 %v1261_v18  ;;  %vm1216_vm10 = vmor %vm1214_vm8, %vm1215_vm9  ;;  %v1236_v4 = vor.u32 1.1754944e-38, %v1235_v11  ;;  %1797 = vmatpush.bf16.msrb.mxu2 %v7288_v10 }
 0x135   : > { %v1211_v59 = vsub.f32 1.0, %v1210_v23  ;;  %v7727_v30 = vpop.eup %7726  ;;  %v1258_v34 = vpack.c.bf16 %v1246_v43, %v1245_v25  ;;  %vm1234_vm15 = vcmp.eq.f32.partialorder %v1233_v20, 8.507059e+37  ;;  %2395 = vmatpush.bf16.msrb.mxu0 %v7304_v50  ;;  %v7923_v23 = vld [vmem:[%s12211_s0 + $0x18] sm:$0xff] }
 0x136   : > { %v1225_v26 = vmul.f32 %v7727_v30, %v998_v39  ;;  %vm1230_vm13 = vweird.f32 %v7727_v30 }
 0x137   : > { %v1212_v28 = vmul.f32 %v7725_v16, %v1211_v59  ;;  %vm1231_vm14 = vmor %vm1229_vm12, %vm1230_vm13 }
 0x138   : > { %v1226_v42 = vsub.f32 1.0, %v1225_v26 }
 0x139   : > { %v1213_v37 = vadd.f32 %v7725_v16, %v1212_v28  ;;  %2396 = vmatpush.bf16.msrb.mxu0 %v7303_v53 }
 0x13a   : > { %v1227_v51 = vmul.f32 %v7727_v30, %v1226_v42 }
 0x13b   : > { %v1217_v41 = vsel %vm1216_vm10, %v7725_v16, %v1213_v37 }
 0x13c   : > { %v1222_v46 = vsel %vm1219_vm11, %v1221_v38, %v1217_v41  ;;  %v1228_v19 = vadd.f32 %v7727_v30, %v1227_v51 }
 0x13d   : > { %v1253_v29 = vmul.f32 %v1222_v46, %v9454_v57  ;;  %v7920_v57 = vld [vmem:[%s12211_s0] sm:$0xff]  ;;  %2397 = vmatpush.bf16.msrb.mxu0 %v7302_v3 }
 0x13e   : > { %v1232_v14 = vsel %vm1231_vm14, %v7727_v30, %v1228_v19 }
 0x13f   : > { %1354 = vmatmul.bf16.gmra.mxu1 %v1258_v34  ;;  %v1237_v35 = vsel %vm1234_vm15, %v1236_v4, %v1232_v14 }
 0x140   : > { %v1254_v47 = vmul.f32 %v1237_v35, %v9491_v33  ;;  %v7287_v33 = vld [vmem:[#allocation8 + $0x58] sm:$0xff] }
 0x141   : > { %1798 = vmatpush.bf16.msrb.mxu2 %v7287_v33  ;;  %2398 = vmatpush.bf16.msrb.mxu0 %v7301_v48 }
 0x142   : > { %v1262_v54 = vpack.c.bf16 %v1254_v47, %v1253_v29 }
 0x144   : > { %1374 = vmatmul.bf16.gmra.mxu3 %v1262_v54 }
 0x145   : > { %1799 = vmatpush.bf16.msrb.mxu2 %v7286_v56  ;;  %2399 = vmatpush.bf16.msrb.mxu0 %v7300_v9 }
 0x149   : > { %1800 = vmatpush.bf16.msrb.mxu2 %v7285_v0 }
 0x14d   : > { %1801 = vmatpush.bf16.msrb.mxu2 %v7284_v45  ;;  %v7926_v45 = vld [vmem:[%s12211_s0 + $0x40] sm:$0xff] }
 0x184   : > { %v1340_v32 = vpop.f32.mrf.mxu1 }
 0x185   : > { %v1341_v40 = vadd.f32 %v9549_v49, %v1340_v32  ;;  %v7924_v32 = vld [vmem:[%s12211_s0 + $0x20] sm:$0xff] }
 0x187   : > { %v9555_v2 = vadd.f32 %v7920_v57, %v1341_v40 }
 0x189   : > { %v6632_v52 = vmul.f32 -1.442695, %v9555_v2 }
 0x18b   : > { %7728 = vpow2.f32 %v6632_v52 }
 0x18c   : > { %v1342_v31 = vpop.f32.mrf.mxu1 }
 0x18d   : > { %v1343_v61 = vadd.f32 %v9549_v49, %v1342_v31 }
 0x18f   : > { %v9562_v55 = vadd.f32 %v7921_v5, %v1343_v61 }
 0x191   : > { %v7729_v44 = vpop.eup %7728  ;;  %v6633_v60 = vmul.f32 -1.442695, %v9562_v55 }
 0x192   : > { %v1444_v8 = vadd.f32 1.0, %v7729_v44 }
 0x193   : > { %7730 = vpow2.f32 %v6633_v60  ;;  %v7925_v60 = vld [vmem:[%s12211_s0 + $0x28] sm:$0xff] }
 0x194   : > { %7732 = vrcp.f32 %v1444_v8  ;;  %v1360_v58 = vpop.f32.mrf.mxu3  ;;  %v1471_v27 = vand.u32 2147483648, %v1444_v8  ;;  %vm1465_vm1 = vweird.f32 %v1444_v8  ;;  %v1469_v30 = vand.u32 2147483647, %v1444_v8 }
 0x195   : > { %v1361_v56 = vadd.f32 %v9549_v49, %v1360_v58 }
 0x196   : > { %v1472_v42 = vor.u32 1.1754944e-38, %v1471_v27  ;;  %vm1470_vm4 = vcmp.eq.f32.partialorder %v1469_v30, 8.507059e+37 }
 0x197   : > { %v9606_v9 = vadd.f32 %v7926_v45, %v1361_v56  ;;  %v7930_v45 = vld [vmem:[%s12211_s0 + $0x58] sm:$0xff] }
 0x198   : > { %v1345_v63 = vpop.f32.mrf.mxu1 }
 0x199   : > { %v7731_v6 = vpop.eup %7730  ;;  %v1346_v15 = vadd.f32 %v9549_v49, %v1345_v63 }
 0x19a   : > { %v7733_v12 = vpop.eup %7732  ;;  %v1445_v36 = vadd.f32 1.0, %v7731_v6 }
 0x19b   : > { %v9569_v7 = vadd.f32 %v7922_v13, %v1346_v15  ;;  %v1461_v17 = vmul.f32 %v7733_v12, %v1444_v8  ;;  %vm1466_vm0 = vweird.f32 %v7733_v12 }
 0x19c   : > { %7734 = vrcp.f32 %v1445_v36  ;;  %vm1467_vm2 = vmor %vm1465_vm1, %vm1466_vm0  ;;  %v1486_v26 = vand.u32 2147483648, %v1445_v36  ;;  %v1484_v41 = vand.u32 2147483647, %v1445_v36  ;;  %vm1480_vm5 = vweird.f32 %v1445_v36  ;;  %v1362_v19 = vpop.f32.mrf.mxu3 }
 0x19d   : > { %v6634_v39 = vmul.f32 -1.442695, %v9569_v7  ;;  %v1462_v18 = vsub.f32 1.0, %v1461_v17  ;;  %v1363_v0 = vadd.f32 %v9549_v49, %v1362_v19 }
 0x19e   : > { %v1487_v46 = vor.u32 1.1754944e-38, %v1486_v26  ;;  %vm1485_vm7 = vcmp.eq.f32.partialorder %v1484_v41, 8.507059e+37 }
 0x19f   : > { %7736 = vpow2.f32 %v6634_v39  ;;  %v1463_v62 = vmul.f32 %v7733_v12, %v1462_v18  ;;  %v7927_v39 = vld [vmem:[%s12211_s0 + $0x48] sm:$0xff] }
 0x1a0   : > { %v1347_v1 = vpop.f32.mrf.mxu1  ;;  %v9616_v18 = vadd.f32 %v7927_v39, %v1363_v0 }
 0x1a1   : > { %v1348_v16 = vadd.f32 %v9549_v49, %v1347_v1  ;;  %v1464_v59 = vadd.f32 %v7733_v12, %v1463_v62 }
 0x1a2   : > { %v7735_v21 = vpop.eup %7734 }
 0x1a3   : > { %v9576_v43 = vadd.f32 %v7923_v23, %v1348_v16  ;;  %v1476_v25 = vmul.f32 %v7735_v21, %v1445_v36  ;;  %v1468_v38 = vsel %vm1467_vm2, %v7733_v12, %v1464_v59  ;;  %vm1481_vm3 = vweird.f32 %v7735_v21 }
 0x1a4   : > { %v1473_v51 = vsel %vm1470_vm4, %v1472_v42, %v1468_v38  ;;  %vm1482_vm6 = vmor %vm1480_vm5, %vm1481_vm3 }
 0x1a5   : > { %v7737_v22 = vpop.eup %7736  ;;  %v6635_v28 = vmul.f32 -1.442695, %v9576_v43  ;;  %v1477_v34 = vsub.f32 1.0, %v1476_v25  ;;  %v1700_v47 = vmul.f32 %v1473_v51, %v9555_v2  ;;  %v9594_v44 = vpop.f32.mrf.mxu3  ;;  %v6640_v25 = vmul.f32 -1.442695, %v9606_v9 }
 0x1a6   : > { %v9579_v37 = vadd.f32 1.0, %v7737_v22  ;;  %v7928_v22 = vld [vmem:[%s12211_s0 + $0x30] sm:$0xff] }
 0x1a7   : > { %v1478_v11 = vmul.f32 %v7735_v21, %v1477_v34 }
 0x1a8   : > { %7738 = vrcp.f32 %v9579_v37  ;;  %v1501_v36 = vand.u32 2147483648, %v9579_v37  ;;  %vm1495_vm9 = vweird.f32 %v9579_v37  ;;  %v1499_v13 = vand.u32 2147483647, %v9579_v37 }
 0x1a9   : > { %7740 = vpow2.f32 %v6635_v28  ;;  %v1479_v20 = vadd.f32 %v7735_v21, %v1478_v11  ;;  %v6641_v11 = vmul.f32 -1.442695, %v9616_v18 }
 0x1aa   : > { %v1502_v27 = vor.u32 1.1754944e-38, %v1501_v36  ;;  %vm1500_vm12 = vcmp.eq.f32.partialorder %v1499_v13, 8.507059e+37  ;;  %v7933_v13 = vld [vmem:[%s12211_s0 + $0x60] sm:$0xff] }
 0x1ab   : > { %v1483_v4 = vsel %vm1482_vm6, %v7735_v21, %v1479_v20 }
 0x1ac   : > { %v1350_v29 = vpop.f32.mrf.mxu1  ;;  %v1488_v14 = vsel %vm1485_vm7, %v1487_v46, %v1483_v4 }
 0x1ad   : > { %v1351_v35 = vadd.f32 %v9549_v49, %v1350_v29  ;;  %v1701_v54 = vmul.f32 %v1488_v14, %v9562_v55  ;;  %v1367_v34 = vpop.f32.mrf.mxu3 }
 0x1ae   : > { %v7739_v10 = vpop.eup %7738 }
 0x1af   : > { %v7741_v24 = vpop.eup %7740  ;;  %v9588_v40 = vadd.f32 %v7924_v32, %v1351_v35  ;;  %v1716_v57 = vpack.c.bf16 %v1701_v54, %v1700_v47  ;;  %v1491_v33 = vmul.f32 %v7739_v10, %v9579_v37  ;;  %vm1496_vm8 = vweird.f32 %v7739_v10 }
 0x1b0   : > { %v1447_v50 = vadd.f32 1.0, %v7741_v24  ;;  %vm9619_vm10 = vmor %vm1495_vm9, %vm1496_vm8 }
 0x1b1   : > { %v6636_v52 = vmul.f32 -1.442695, %v9588_v40  ;;  %1802 = vmatmul.bf16.vlgmr.msrb.gmra.mxu2 %v1716_v57  ;;  %2400 = vmatmul.bf16.vlgmr.msrb.gmra.mxu0 %v1716_v57  ;;  %v1492_v31 = vsub.f32 1.0, %v1491_v33 }
 0x1b2   : > { %7742 = vrcp.f32 %v1447_v50  ;;  %v1514_v16 = vand.u32 2147483647, %v1447_v50  ;;  %v1516_v21 = vand.u32 2147483648, %v1447_v50  ;;  %vm1510_vm13 = vweird.f32 %v1447_v50 }
 0x1b3   : > { %7744 = vpow2.f32 %v6636_v52  ;;  %v1493_v5 = vmul.f32 %v7739_v10, %v1492_v31  ;;  %v1368_v31 = vadd.f32 %v9549_v49, %v1367_v34 }
 0x1b4   : > { %v1352_v61 = vpop.f32.mrf.mxu1  ;;  %v1517_v26 = vor.u32 1.1754944e-38, %v1516_v21  ;;  %vm1515_vm15 = vcmp.eq.f32.partialorder %v1514_v16, 8.507059e+37  ;;  %v7931_v16 = vld [vmem:[%s12211_s0 + $0x50] sm:$0xff] }
 0x1b5   : > { %v1353_v53 = vadd.f32 %v9549_v49, %v1352_v61  ;;  %v1494_v6 = vadd.f32 %v7739_v10, %v1493_v5  ;;  %v9662_v36 = vadd.f32 %v7930_v45, %v1368_v31 }
 0x1b7   : > { %v9599_v3 = vadd.f32 %v7925_v60, %v1353_v53  ;;  %v1498_v23 = vsel %vm9619_vm10, %v7739_v10, %v1494_v6  ;;  %v7929_v10 = vld [vmem:[%s12211_s0 + $0x38] sm:$0xff]  ;;  %v9645_v61 = vpop.f32.mrf.mxu3 }
 0x1b8   : > { %v7743_v8 = vpop.eup %7742  ;;  %v1503_v37 = vsel %vm1500_vm12, %v1502_v27, %v1498_v23 }
 0x1b9   : > { %v7745_v48 = vpop.eup %7744  ;;  %v6637_v63 = vmul.f32 -1.442695, %v9599_v3  ;;  %v1506_v15 = vmul.f32 %v7743_v8, %v1447_v50  ;;  %vm1511_vm11 = vweird.f32 %v7743_v8  ;;  %v1702_v4 = vmul.f32 %v1503_v37, %v9569_v7 }
 0x1ba   : > { %v9608_v12 = vadd.f32 1.0, %v7745_v48  ;;  %vm1512_vm14 = vmor %vm1510_vm13, %vm1511_vm11  ;;  %v1366_v48 = vadd.f32 %v9549_v49, %v9594_v44 }
 0x1bb   : > { %7746 = vpow2.f32 %v6637_v63  ;;  %v1507_v17 = vsub.f32 1.0, %v1506_v15 }
 0x1bc   : > { %7748 = vrcp.f32 %v9608_v12  ;;  %v1355_v62 = vpop.f32.mrf.mxu1  ;;  %v1531_v0 = vand.u32 2147483648, %v9608_v12  ;;  %vm1525_vm1 = vweird.f32 %v9608_v12  ;;  %v1529_v63 = vand.u32 2147483647, %v9608_v12 }
 0x1bd   : > { %v1356_v58 = vadd.f32 %v9549_v49, %v1355_v62  ;;  %v1508_v59 = vmul.f32 %v7743_v8, %v1507_v17  ;;  %7750 = vpow2.f32 %v6640_v25  ;;  %v9674_v21 = vadd.f32 %v7931_v16, %v1366_v48 }
 0x1be   : > { %v1532_v62 = vor.u32 1.1754944e-38, %v1531_v0  ;;  %vm1530_vm4 = vcmp.eq.f32.partialorder %v1529_v63, 8.507059e+37 }
 0x1bf   : > { %v9630_v28 = vadd.f32 %v7928_v22, %v1356_v58  ;;  %v1509_v30 = vadd.f32 %v7743_v8, %v1508_v59  ;;  %v6643_v22 = vmul.f32 -1.442695, %v9662_v36  ;;  %v1372_v37 = vpop.f32.mrf.mxu3 }
 0x1c1   : > { %v7747_v38 = vpop.eup %7746  ;;  %v6638_v41 = vmul.f32 -1.442695, %v9630_v28  ;;  %v1513_v42 = vsel %vm1512_vm14, %v7743_v8, %v1509_v30 }
 0x1c2   : > { %v7749_v20 = vpop.eup %7748  ;;  %v1449_v51 = vadd.f32 1.0, %v7747_v38  ;;  %v1518_v46 = vsel %vm1515_vm15, %v1517_v26, %v1513_v42  ;;  %v6642_v38 = vmul.f32 -1.442695, %v9674_v21 }
 0x1c3   : > { %7752 = vpow2.f32 %v6638_v41  ;;  %v1703_v19 = vmul.f32 %v1518_v46, %v9576_v43  ;;  %v1521_v29 = vmul.f32 %v7749_v20, %v9608_v12  ;;  %v7751_v57 = vpop.eup %7750  ;;  %vm1526_vm0 = vweird.f32 %v7749_v20 }
 0x1c4   : > { %7754 = vrcp.f32 %v1449_v51  ;;  %v1357_v14 = vpop.f32.mrf.mxu1  ;;  %v9649_v8 = vadd.f32 1.0, %v7751_v57  ;;  %vm9664_vm2 = vmor %vm1525_vm1, %vm1526_vm0  ;;  %v1546_v17 = vand.u32 2147483648, %v1449_v51  ;;  %v1544_v12 = vand.u32 2147483647, %v1449_v51 }
 0x1c5   : > { %7756 = vpow2.f32 %v6641_v11  ;;  %v1358_v35 = vadd.f32 %v9549_v49, %v1357_v14  ;;  %v1717_v47 = vpack.c.bf16 %v1703_v19, %v1702_v4  ;;  %v1522_v54 = vsub.f32 1.0, %v1521_v29 }
 0x1c6   : > { %vm1540_vm5 = vweird.f32 %v1449_v51  ;;  %v1547_v27 = vor.u32 1.1754944e-38, %v1546_v17  ;;  %vm1545_vm7 = vcmp.eq.f32.partialorder %v1544_v12, 8.507059e+37  ;;  %v1373_v29 = vadd.f32 %v9549_v49, %v1372_v37 }
 0x1c7   : > { %v9641_v24 = vadd.f32 %v7929_v10, %v1358_v35  ;;  %1807 = vmatmul.bf16.gmra.mxu2 %v1717_v47  ;;  %2405 = vmatmul.bf16.gmra.mxu0 %v1717_v47  ;;  %v1523_v32 = vmul.f32 %v7749_v20, %v1522_v54  ;;  %v1375_v31 = vpop.f32.mrf.mxu3  ;;  %vm1585_vm0 = vweird.f32 %v9649_v8 }
 0x1c9   : > { %v7753_v33 = vpop.eup %7752  ;;  %v6639_v50 = vmul.f32 -1.442695, %v9641_v24  ;;  %v1524_v56 = vadd.f32 %v7749_v20, %v1523_v32  ;;  %v1371_v32 = vadd.f32 %v9549_v49, %v9645_v61 }
 0x1ca   : > { %v7755_v52 = vpop.eup %7754  ;;  %v9647_v53 = vadd.f32 1.0, %v7753_v33 }
 0x1cb   : > { %v7757_v5 = vpop.eup %7756  ;;  %7758 = vpow2.f32 %v6639_v50  ;;  %v1536_v60 = vmul.f32 %v7755_v52, %v1449_v51  ;;  %v1528_v44 = vsel %vm9664_vm2, %v7749_v20, %v1524_v56  ;;  %vm1541_vm3 = vweird.f32 %v7755_v52  ;;  %v7932_v50 = vld [vmem:[%s12211_s0 + $0x68] sm:$0xff] }
 0x1cc   : > { %7760 = vrcp.f32 %v9647_v53  ;;  %v9657_v15 = vadd.f32 1.0, %v7757_v5  ;;  %v1533_v25 = vsel %vm1530_vm4, %v1532_v62, %v1528_v44  ;;  %vm1542_vm6 = vmor %vm1540_vm5, %vm1541_vm3  ;;  %v1561_v47 = vand.u32 2147483648, %v9647_v53 }
 0x1cd   : > { %v1537_v6 = vsub.f32 1.0, %v1536_v60  ;;  %7762 = vrcp.f32 %v9649_v8  ;;  %v1704_v11 = vmul.f32 %v1533_v25, %v9588_v40  ;;  %vm1555_vm9 = vweird.f32 %v9647_v53 }
 0x1ce   : > { %7764 = vrcp.f32 %v9657_v15  ;;  %v1559_v57 = vand.u32 2147483647, %v9647_v53  ;;  %v9712_v17 = vadd.f32 %v7933_v13, %v1371_v32  ;;  %vm1600_vm2 = vweird.f32 %v9657_v15 }
 0x1cf   : > { %v1538_v39 = vmul.f32 %v7755_v52, %v1537_v6  ;;  %v1562_v6 = vor.u32 1.1754944e-38, %v1561_v47  ;;  %v1377_v37 = vpop.f32.mrf.mxu3 }
 0x1d0   : > { %vm1560_vm12 = vcmp.eq.f32.partialorder %v1559_v57, 8.507059e+37  ;;  %v6644_v25 = vmul.f32 -1.442695, %v9712_v17 }
 0x1d1   : > { %v7759_v1 = vpop.eup %7758  ;;  %v1539_v58 = vadd.f32 %v7755_v52, %v1538_v39 }
 0x1d2   : > { %v7761_v23 = vpop.eup %7760  ;;  %v1451_v59 = vadd.f32 1.0, %v7759_v1 }
 0x1d3   : > { %v1543_v30 = vsel %vm1542_vm6, %v7755_v52, %v1539_v58  ;;  %v1551_v34 = vmul.f32 %v7761_v23, %v9647_v53  ;;  %v9682_v20 = vpop.eup %7762  ;;  %vm1556_vm8 = vweird.f32 %v7761_v23  ;;  %v9697_v52 = vadd.f32 %v7932_v50, %v1373_v29 }
 0x1d4   : > { %7766 = vrcp.f32 %v1451_v59  ;;  %v1548_v26 = vsel %vm1545_vm7, %v1547_v27, %v1543_v30  ;;  %v9684_v4 = vpop.eup %7764  ;;  %vm9699_vm10 = vmor %vm1555_vm9, %vm1556_vm8  ;;  %v1576_v56 = vand.u32 2147483648, %v1451_v59  ;;  %v1581_v61 = vmul.f32 %v9682_v20, %v9649_v8 }
 0x1d5   : > { %v1705_v41 = vmul.f32 %v1548_v26, %v9599_v3  ;;  %v1552_v42 = vsub.f32 1.0, %v1551_v34  ;;  %7768 = vpow2.f32 %v6643_v22  ;;  %v1596_v54 = vmul.f32 %v9684_v4, %v9657_v15 }
 0x1d6   : > { %7770 = vpow2.f32 %v6642_v38  ;;  %v1574_v48 = vand.u32 2147483647, %v1451_v59  ;;  %vm1570_vm13 = vweird.f32 %v1451_v59  ;;  %v1577_v62 = vor.u32 1.1754944e-38, %v1576_v56  ;;  %v7935_v56 = vld [vmem:[%s12211_s0 + $0x70] sm:$0xff] }
 0x1d7   : > { %v1718_v51 = vpack.c.bf16 %v1705_v41, %v1704_v11  ;;  %v1553_v46 = vmul.f32 %v7761_v23, %v1552_v42  ;;  %v1597_v45 = vsub.f32 1.0, %v1596_v54  ;;  %v6645_v1 = vmul.f32 -1.442695, %v9697_v52 }
 0x1d8   : > { %vm1575_vm15 = vcmp.eq.f32.partialorder %v1574_v48, 8.507059e+37  ;;  %v1582_v58 = vsub.f32 1.0, %v1581_v61  ;;  %vm1586_vm1 = vweird.f32 %v9682_v20  ;;  %vm1601_vm3 = vweird.f32 %v9684_v4 }
 0x1d9   : > { %1812 = vmatmul.bf16.gmra.mxu2 %v1718_v51  ;;  %2410 = vmatmul.bf16.gmra.mxu0 %v1718_v51  ;;  %v1554_v14 = vadd.f32 %v7761_v23, %v1553_v46  ;;  %v1589_v11 = vand.u32 2147483647, %v9649_v8  ;;  %v1591_v41 = vand.u32 2147483648, %v9649_v8  ;;  %v1606_v42 = vand.u32 2147483648, %v9657_v15  ;;  %vm9736_vm4 = vmor %vm1585_vm0, %vm1586_vm1 }
 0x1da   : > { %v7767_v19 = vpop.eup %7766  ;;  %v1583_v34 = vmul.f32 %v9682_v20, %v1582_v58  ;;  %v1378_v51 = vadd.f32 %v9549_v49, %v1377_v37  ;;  %v1604_v29 = vand.u32 2147483647, %v9657_v15  ;;  %vm9743_vm5 = vmor %vm1600_vm2, %vm1601_vm3  ;;  %v1376_v8 = vadd.f32 %v9549_v49, %v1375_v31 }
 0x1db   : > { %v1566_v35 = vmul.f32 %v7767_v19, %v1451_v59  ;;  %v7769_v10 = vpop.eup %7768  ;;  %v1558_v53 = vsel %vm9699_vm10, %v7761_v23, %v1554_v14  ;;  %vm1571_vm11 = vweird.f32 %v7767_v19  ;;  %v1598_v59 = vmul.f32 %v9684_v4, %v1597_v45 }
 0x1dc   : > { %v7771_v60 = vpop.eup %7770  ;;  %v9707_v63 = vadd.f32 1.0, %v7769_v10  ;;  %v1563_v12 = vsel %vm1560_vm12, %v1562_v6, %v1558_v53  ;;  %vm1572_vm14 = vmor %vm1570_vm13, %vm1571_vm11  ;;  %v1584_v46 = vadd.f32 %v9682_v20, %v1583_v34  ;;  %vm1590_vm6 = vcmp.eq.f32.partialorder %v1589_v11, 8.507059e+37 }
 0x1dd   : > { %v1567_v33 = vsub.f32 1.0, %v1566_v35  ;;  %v9714_v39 = vadd.f32 1.0, %v7771_v60  ;;  %v1706_v27 = vmul.f32 %v1563_v12, %v9630_v28  ;;  %v1599_v26 = vadd.f32 %v9684_v4, %v1598_v59 }
 0x1de   : > { %7772 = vrcp.f32 %v9707_v63  ;;  %v1592_v32 = vor.u32 1.1754944e-38, %v1591_v41  ;;  %v1607_v57 = vor.u32 1.1754944e-38, %v1606_v42  ;;  %v1588_v49 = vsel %vm9736_vm4, %v9682_v20, %v1584_v46 }
 0x1df   : > { %v1568_v0 = vmul.f32 %v7767_v19, %v1567_v33  ;;  %7774 = vrcp.f32 %v9714_v39  ;;  %v1603_v54 = vsel %vm9743_vm5, %v9684_v4, %v1599_v26  ;;  %v7934_v33 = vld [vmem:[%s12211_s0 + $0x78] sm:$0xff]  ;;  %vm1605_vm7 = vcmp.eq.f32.partialorder %v1604_v29, 8.507059e+37 }
 0x1e0   : > { %7776 = vpow2.f32 %v6645_v1  ;;  %v9756_v50 = vadd.f32 %v7934_v33, %v1378_v51  ;;  %v1608_v5 = vsel %vm1605_vm7, %v1607_v57, %v1603_v54  ;;  %v9768_v61 = vadd.f32 %v7935_v56, %v1376_v8  ;;  %v7298_v33 = vld [vmem:[#allocation11 + $0x70] sm:$0xff] }
 0x1e1   : > { %v1569_v44 = vadd.f32 %v7767_v19, %v1568_v0  ;;  %7778 = vpow2.f32 %v6644_v25  ;;  %v1593_v0 = vsel %vm1590_vm6, %v1592_v32, %v1588_v49  ;;  %v1709_v20 = vmul.f32 %v1608_v5, %v9616_v18 }
 0x1e2   : > { %v6647_v48 = vmul.f32 -1.442695, %v9756_v50  ;;  %v6646_v45 = vmul.f32 -1.442695, %v9768_v61  ;;  %v1708_v13 = vmul.f32 %v1593_v0, %v9606_v9  ;;  %vm1615_vm8 = vweird.f32 %v9714_v39 }
 0x1e3   : > { %v1573_v16 = vsel %vm1572_vm14, %v7767_v19, %v1569_v44  ;;  %vm1630_vm10 = vweird.f32 %v9707_v63  ;;  %v1636_v25 = vand.u32 2147483648, %v9707_v63  ;;  %v1619_v59 = vand.u32 2147483647, %v9714_v39 }
 0x1e4   : > { %v1578_v23 = vsel %vm1575_vm15, %v1577_v62, %v1573_v16  ;;  %v9729_v38 = vpop.eup %7772  ;;  %v1720_v12 = vpack.c.bf16 %v1709_v20, %v1708_v13  ;;  %v7299_v16 = vld [vmem:[#allocation11 + $0x78] sm:$0xff]  ;;  %v7314_v20 = vld [vmem:[#allocation11 + $0xb0] sm:$0xff] }
 0x1e5   : > { %v1707_v22 = vmul.f32 %v1578_v23, %v9641_v24  ;;  %v9741_v14 = vpop.eup %7774  ;;  %v1626_v10 = vmul.f32 %v9729_v38, %v9707_v63  ;;  %vm1631_vm11 = vweird.f32 %v9729_v38  ;;  %v1621_v23 = vand.u32 2147483648, %v9714_v39  ;;  %2241 = vmatpush.bf16.msrb.mxu3 %v7299_v16 }
 0x1e6   : > { %v7777_v47 = vpop.eup %7776  ;;  %v1611_v4 = vmul.f32 %v9741_v14, %v9714_v39  ;;  %vm1616_vm9 = vweird.f32 %v9741_v14  ;;  %vm1632_vm13 = vmor %vm1630_vm10, %vm1631_vm11  ;;  %v1637_v42 = vor.u32 1.1754944e-38, %v1636_v25  ;;  %vm1620_vm14 = vcmp.eq.f32.partialorder %v1619_v59, 8.507059e+37 }
 0x1e7   : > { %v1719_v30 = vpack.c.bf16 %v1707_v22, %v1706_v27  ;;  %v7779_v15 = vpop.eup %7778  ;;  %v9763_v31 = vadd.f32 1.0, %v7777_v47  ;;  %v1627_v60 = vsub.f32 1.0, %v1626_v10  ;;  %vm9790_vm12 = vmor %vm1615_vm8, %vm1616_vm9  ;;  %v1622_v41 = vor.u32 1.1754944e-38, %v1621_v23 }
 0x1e8   : > { %v9770_v53 = vadd.f32 1.0, %v7779_v15  ;;  %v1612_v6 = vsub.f32 1.0, %v1611_v4  ;;  %v7315_v15 = vld [vmem:[#allocation11 + $0xb8] sm:$0xff] }
 0x1e9   : > { %1817 = vmatmul.bf16.gmra.mxu2 %v1719_v30  ;;  %2415 = vmatmul.bf16.gmra.mxu0 %v1719_v30  ;;  %7780 = vrcp.f32 %v9763_v31  ;;  %v1628_v44 = vmul.f32 %v9729_v38, %v1627_v60  ;;  %v1634_v30 = vand.u32 2147483647, %v9707_v63  ;;  %vm1660_vm2 = vweird.f32 %v9763_v31 }
 0x1ea   : > { %7782 = vrcp.f32 %v9770_v53  ;;  %v1613_v62 = vmul.f32 %v9741_v14, %v1612_v6  ;;  %vm1645_vm0 = vweird.f32 %v9770_v53  ;;  %v1651_v4 = vand.u32 2147483648, %v9770_v53  ;;  %2839 = vmatpush.bf16.msrb.mxu1 %v7315_v15  ;;  %2242 = vmatpush.bf16.msrb.mxu3 %v7298_v33  ;;  %v7312_v15 = vld [vmem:[#allocation11 + $0xa0] sm:$0xff] }
 0x1eb   : > { %7784 = vpow2.f32 %v6647_v48  ;;  %v1629_v1 = vadd.f32 %v9729_v38, %v1628_v44  ;;  %vm1635_vm15 = vcmp.eq.f32.partialorder %v1634_v30, 8.507059e+37  ;;  %v1666_v5 = vand.u32 2147483648, %v9763_v31 }
 0x1ec   : > { %7786 = vpow2.f32 %v6646_v45  ;;  %v1614_v27 = vadd.f32 %v9741_v14, %v1613_v62  ;;  %v1649_v0 = vand.u32 2147483647, %v9770_v53  ;;  %v1664_v48 = vand.u32 2147483647, %v9763_v31 }
 0x1ed   : > { %v1633_v26 = vsel %vm1632_vm13, %v9729_v38, %v1629_v1  ;;  %v1652_v44 = vor.u32 1.1754944e-38, %v1651_v4 }
 0x1ee   : > { %v1618_v46 = vsel %vm9790_vm12, %v9741_v14, %v1614_v27  ;;  %v1638_v19 = vsel %vm1635_vm15, %v1637_v42, %v1633_v26  ;;  %vm1650_vm6 = vcmp.eq.f32.partialorder %v1649_v0, 8.507059e+37  ;;  %vm1665_vm7 = vcmp.eq.f32.partialorder %v1664_v48, 8.507059e+37  ;;  %2840 = vmatpush.bf16.msrb.mxu1 %v7314_v20  ;;  %v7311_v0 = vld [vmem:[#allocation11 + $0x98] sm:$0xff] }
 0x1ef   : > { %v9785_v58 = vpop.eup %7780  ;;  %v1623_v38 = vsel %vm1620_vm14, %v1622_v41, %v1618_v46  ;;  %v1711_v47 = vmul.f32 %v1638_v19, %v9662_v36 }
 0x1f0   : > { %v7783_v34 = vpop.eup %7782  ;;  %v1656_v11 = vmul.f32 %v9785_v58, %v9763_v31  ;;  %v1710_v54 = vmul.f32 %v1623_v38, %v9674_v21  ;;  %vm1661_vm3 = vweird.f32 %v9785_v58 }
 0x1f1   : > { %v7785_v37 = vpop.eup %7784  ;;  %v1641_v63 = vmul.f32 %v7783_v34, %v9770_v53  ;;  %vm1646_vm1 = vweird.f32 %v7783_v34  ;;  %vm1662_vm5 = vmor %vm1660_vm2, %vm1661_vm3 }
 0x1f2   : > { %v7787_v51 = vpop.eup %7786  ;;  %v9803_v39 = vadd.f32 1.0, %v7785_v37  ;;  %v1657_v29 = vsub.f32 1.0, %v1656_v11  ;;  %v1721_v10 = vpack.c.bf16 %v1711_v47, %v1710_v54  ;;  %vm9818_vm4 = vmor %vm1645_vm0, %vm1646_vm1  ;;  %v9841_v54 = vld [vmem:[#allocation10 + $0x2] ss:$0 sm:$0xff] }
 0x1f3   : > { %v9805_v35 = vadd.f32 1.0, %v7787_v51  ;;  %v1642_v8 = vsub.f32 1.0, %v1641_v63 }
 0x1f4   : > { %7788 = vrcp.f32 %v9803_v39  ;;  %v1658_v14 = vmul.f32 %v9785_v58, %v1657_v29  ;;  %vm1690_vm10 = vweird.f32 %v9803_v39  ;;  %v1696_v37 = vand.u32 2147483648, %v9803_v39 }
 0x1f5   : > { %7790 = vrcp.f32 %v9805_v35  ;;  %v1643_v32 = vmul.f32 %v7783_v34, %v1642_v8  ;;  %vm1675_vm8 = vweird.f32 %v9805_v35  ;;  %v1679_v11 = vand.u32 2147483647, %v9805_v35 }
 0x1f6   : > { %v1659_v57 = vadd.f32 %v9785_v58, %v1658_v14  ;;  %v1694_v41 = vand.u32 2147483647, %v9803_v39  ;;  %v1697_v46 = vor.u32 1.1754944e-38, %v1696_v37 }
 0x1f7   : > { %v1644_v56 = vadd.f32 %v7783_v34, %v1643_v32  ;;  %vm1680_vm14 = vcmp.eq.f32.partialorder %v1679_v11, 8.507059e+37 }
 0x1f8   : > { %v1663_v45 = vsel %vm1662_vm5, %v9785_v58, %v1659_v57  ;;  %vm1695_vm15 = vcmp.eq.f32.partialorder %v1694_v41, 8.507059e+37  ;;  %v9847_v57 = vld [vmem:[#allocation10 + $0x1] ss:$0 sm:$0xff] }
 0x1f9   : > { %1822 = vmatmul.bf16.gmra.mxu2 %v1720_v12  ;;  %2420 = vmatmul.bf16.gmra.mxu0 %v1720_v12  ;;  %v1667_v12 = vor.u32 1.1754944e-38, %v1666_v5  ;;  %v1648_v62 = vsel %vm9818_vm4, %v7783_v34, %v1644_v56  ;;  %v1681_v34 = vand.u32 2147483648, %v9805_v35  ;;  %v7296_v5 = vld [vmem:[#allocation11 + $0x60] sm:$0xff] }
 0x1fa   : > { %v7789_v49 = vpop.eup %7788  ;;  %v1653_v23 = vsel %vm1650_vm6, %v1652_v44, %v1648_v62 }
 0x1fb   : > { %v7791_v6 = vpop.eup %7790  ;;  %v1686_v13 = vmul.f32 %v7789_v49, %v9803_v39  ;;  %v1668_v1 = vsel %vm1665_vm7, %v1667_v12, %v1663_v45  ;;  %v1712_v58 = vmul.f32 %v1653_v23, %v9712_v17  ;;  %vm1691_vm11 = vweird.f32 %v7789_v49  ;;  %v7313_v39 = vld [vmem:[#allocation11 + $0xa8] sm:$0xff]  ;;  %v7310_v45 = vld [vmem:[#allocation11 + $0x90] sm:$0xff]  ;;  %v7295_v12 = vld [vmem:[#allocation11 + $0x58] sm:$0xff] }
 0x1fc   : > { %v1671_v53 = vmul.f32 %v7791_v6, %v9805_v35  ;;  %v1713_v31 = vmul.f32 %v1668_v1, %v9697_v52  ;;  %vm1676_vm9 = vweird.f32 %v7791_v6  ;;  %vm1692_vm13 = vmor %vm1690_vm10, %vm1691_vm11  ;;  %v1682_v51 = vor.u32 1.1754944e-38, %v1681_v34  ;;  %v7297_v35 = vld [vmem:[#allocation11 + $0x68] sm:$0xff]  ;;  %2841 = vmatpush.bf16.msrb.mxu1 %v7313_v39 }
 0x1fd   : > { %v1687_v16 = vsub.f32 1.0, %v1686_v13  ;;  %vm1677_vm12 = vmor %vm1675_vm8, %vm1676_vm9  ;;  %2243 = vmatpush.bf16.msrb.mxu3 %v7297_v35  ;;  %v7309_v1 = vld [vmem:[#allocation11 + $0x88] sm:$0xff] }
 0x1fe   : > { %v1672_v25 = vsub.f32 1.0, %v1671_v53  ;;  %v1722_v22 = vpack.c.bf16 %v1713_v31, %v1712_v58  ;;  %v7294_v31 = vld [vmem:[#allocation11 + $0x50] sm:$0xff]  ;;  %v7293_v34 = vld [vmem:[#allocation11 + $0x48] sm:$0xff] }
 0x1ff   : > { %v1688_v27 = vmul.f32 %v7789_v49, %v1687_v16 }
 0x200   : > { %v1673_v59 = vmul.f32 %v7791_v6, %v1672_v25  ;;  %2842 = vmatpush.bf16.msrb.mxu1 %v7312_v15 }
 0x201   : > { %v1689_v30 = vadd.f32 %v7789_v49, %v1688_v27  ;;  %2244 = vmatpush.bf16.msrb.mxu3 %v7296_v5 }
 0x202   : > { %v1674_v26 = vadd.f32 %v7791_v6, %v1673_v59 }
 0x203   : > { %v1693_v42 = vsel %vm1692_vm13, %v7789_v49, %v1689_v30 }
 0x204   : > { %v1678_v63 = vsel %vm1677_vm12, %v7791_v6, %v1674_v26  ;;  %v1698_v19 = vsel %vm1695_vm15, %v1697_v46, %v1693_v42  ;;  %2843 = vmatpush.bf16.msrb.mxu1 %v7311_v0 }
 0x205   : > { %v1683_v29 = vsel %vm1680_vm14, %v1682_v51, %v1678_v63  ;;  %v1715_v38 = vmul.f32 %v1698_v19, %v9756_v50  ;;  %2245 = vmatpush.bf16.msrb.mxu3 %v7295_v12 }
 0x206   : > { %v1714_v47 = vmul.f32 %v1683_v29, %v9768_v61  ;;  %v7292_v29 = vld [vmem:[#allocation11 + $0x40] sm:$0xff] }
 0x208   : > { %v1723_v8 = vpack.c.bf16 %v1715_v38, %v1714_v47  ;;  %2844 = vmatpush.bf16.msrb.mxu1 %v7310_v45 }
 0x209   : > { %1827 = vmatmul.bf16.gmra.mxu2 %v1721_v10  ;;  %2425 = vmatmul.bf16.gmra.mxu0 %v1721_v10 }
 0x20a   : > { %2246 = vmatpush.bf16.msrb.mxu3 %v7294_v31 }
 0x20c   : > { %2845 = vmatpush.bf16.msrb.mxu1 %v7309_v1 }
 0x20e   : > { %2247 = vmatpush.bf16.msrb.mxu3 %v7293_v34 }
 0x212   : > { %2248 = vmatpush.bf16.msrb.mxu3 %v7292_v29 }
 0x219   : > { %1832 = vmatmul.bf16.gmra.mxu2 %v1722_v22  ;;  %2430 = vmatmul.bf16.gmra.mxu0 %v1722_v22  ;;  %v7308_v22 = vld [vmem:[#allocation11 + $0x80] sm:$0xff] }
 0x21a   : > { %2846 = vmatpush.bf16.msrb.mxu1 %v7308_v22 }
 0x229   : > { %1837 = vmatmul.bf16.gmra.mxu2 %v1723_v8  ;;  %2435 = vmatmul.bf16.gmra.mxu0 %v1723_v8 }
 0x22e   : > { %v2401_v14 = vpop.f32.mrf.mxu0 }
 0x22f   : > { %v9844_v10 = vadd.f32 %v9841_v54, %v2401_v14 }
 0x231   : > { %v6761_v32 = vmul.f32 -1.442695, %v9844_v10 }
 0x233   : > { %7792 = vpow2.f32 %v6761_v32 }
 0x234   : > { %v1803_v33 = vpop.f32.mrf.mxu2 }
 0x235   : > { %v9850_v49 = vadd.f32 %v9847_v57, %v1803_v33 }
 0x236   : > { %v2403_v4 = vpop.f32.mrf.mxu0 }
 0x237   : > { %v6680_v56 = vmul.f32 -1.442695, %v9850_v49  ;;  %v9854_v60 = vadd.f32 %v9841_v54, %v2403_v4 }
 0x239   : > { %v7793_v48 = vpop.eup %7792  ;;  %7794 = vpow2.f32 %v6680_v56  ;;  %v6762_v20 = vmul.f32 -1.442695, %v9854_v60 }
 0x23a   : > { %v9857_v6 = vadd.f32 1.0, %v7793_v48 }
 0x23b   : > { %7796 = vpow2.f32 %v6762_v20 }
 0x23c   : > { %7798 = vrcp.f32 %v9857_v6  ;;  %v1805_v13 = vpop.f32.mrf.mxu2  ;;  %v2514_v41 = vand.u32 2147483647, %v9857_v6  ;;  %v2516_v42 = vand.u32 2147483648, %v9857_v6  ;;  %vm2510_vm0 = vweird.f32 %v9857_v6 }
 0x23d   : > { %v9861_v44 = vadd.f32 %v9847_v57, %v1805_v13 }
 0x23e   : > { %vm9891_vm2 = vcmp.eq.f32.partialorder %v2514_v41, 8.507059e+37  ;;  %v2517_v32 = vor.u32 1.1754944e-38, %v2516_v42 }
 0x23f   : > { %v7795_v62 = vpop.eup %7794  ;;  %v6681_v53 = vmul.f32 -1.442695, %v9861_v44 }
 0x240   : > { %v9864_v16 = vadd.f32 1.0, %v7795_v62 }
 0x241   : > { %v7797_v23 = vpop.eup %7796  ;;  %7800 = vpow2.f32 %v6681_v53 }
 0x242   : > { %v9866_v25 = vpop.eup %7798  ;;  %7802 = vrcp.f32 %v9864_v16  ;;  %v2490_v27 = vadd.f32 1.0, %v7797_v23  ;;  %v1916_v35 = vand.u32 2147483647, %v9864_v16  ;;  %vm1912_vm3 = vweird.f32 %v9864_v16 }
 0x243   : > { %v2506_v58 = vmul.f32 %v9866_v25, %v9857_v6  ;;  %vm2511_vm1 = vweird.f32 %v9866_v25  ;;  %v1918_v12 = vand.u32 2147483648, %v9864_v16 }
 0x244   : > { %v2406_v59 = vpop.f32.mrf.mxu0  ;;  %7804 = vrcp.f32 %v2490_v27  ;;  %v2529_v56 = vand.u32 2147483647, %v2490_v27  ;;  %v2531_v20 = vand.u32 2147483648, %v2490_v27  ;;  %vm9903_vm5 = vcmp.eq.f32.partialorder %v1916_v35, 8.507059e+37  ;;  %vm9912_vm6 = vmor %vm2510_vm0, %vm2511_vm1 }
 0x245   : > { %v2507_v30 = vsub.f32 1.0, %v2506_v58  ;;  %v9872_v37 = vadd.f32 %v9841_v54, %v2406_v59  ;;  %vm2525_vm8 = vweird.f32 %v2490_v27 }
 0x246   : > { %vm9921_vm9 = vcmp.eq.f32.partialorder %v2529_v56, 8.507059e+37 }
 0x247   : > { %v7801_v26 = vpop.eup %7800  ;;  %v6763_v46 = vmul.f32 -1.442695, %v9872_v37  ;;  %v2508_v63 = vmul.f32 %v9866_v25, %v2507_v30 }
 0x248   : > { %v9874_v11 = vpop.eup %7802  ;;  %v9878_v51 = vadd.f32 1.0, %v7801_v26  ;;  %v2532_v26 = vor.u32 1.1754944e-38, %v2531_v20 }
 0x249   : > { %v1908_v19 = vmul.f32 %v9874_v11, %v9864_v16  ;;  %v2509_v4 = vadd.f32 %v9866_v25, %v2508_v63  ;;  %vm1913_vm4 = vweird.f32 %v9874_v11 }
 0x24a   : > { %7806 = vrcp.f32 %v9878_v51  ;;  %v1808_v38 = vpop.f32.mrf.mxu2  ;;  %v7805_v47 = vpop.eup %7804  ;;  %vm9930_vm10 = vmor %vm1912_vm3, %vm1913_vm4  ;;  %v1931_v42 = vand.u32 2147483647, %v9878_v51  ;;  %vm1927_vm13 = vweird.f32 %v9878_v51 }
 0x24b   : > { %v1909_v8 = vsub.f32 1.0, %v1908_v19  ;;  %7808 = vpow2.f32 %v6763_v46  ;;  %v9888_v39 = vadd.f32 %v9847_v57, %v1808_v38  ;;  %v2521_v15 = vmul.f32 %v7805_v47, %v2490_v27 }
 0x24c   : > { %v2408_v33 = vpop.f32.mrf.mxu0  ;;  %vm2526_vm7 = vweird.f32 %v7805_v47  ;;  %v2513_v22 = vsel %vm9912_vm6, %v9866_v25, %v2509_v4  ;;  %v1933_v46 = vand.u32 2147483648, %v9878_v51  ;;  %vm1932_vm15 = vcmp.eq.f32.partialorder %v1931_v42, 8.507059e+37 }
 0x24d   : > { %v1910_v5 = vmul.f32 %v9874_v11, %v1909_v8  ;;  %v6682_v0 = vmul.f32 -1.442695, %v9888_v39  ;;  %v2522_v48 = vsub.f32 1.0, %v2521_v15  ;;  %v9900_v45 = vadd.f32 %v9841_v54, %v2408_v33  ;;  %vm2527_vm11 = vmor %vm2525_vm8, %vm2526_vm7 }
 0x24e   : > { %v2518_v16 = vsel %vm9891_vm2, %v2517_v32, %v2513_v22  ;;  %v1919_v33 = vor.u32 1.1754944e-38, %v1918_v12 }
 0x24f   : > { %7810 = vpow2.f32 %v6682_v0  ;;  %v1911_v1 = vadd.f32 %v9874_v11, %v1910_v5  ;;  %v2523_v23 = vmul.f32 %v7805_v47, %v2522_v48  ;;  %v6764_v31 = vmul.f32 -1.442695, %v9900_v45 }
 0x250   : > { %v7807_v62 = vpop.eup %7806  ;;  %v1934_v48 = vor.u32 1.1754944e-38, %v1933_v46 }
 0x251   : > { %v7809_v58 = vpop.eup %7808  ;;  %v1923_v6 = vmul.f32 %v7807_v62, %v9878_v51  ;;  %v2524_v34 = vadd.f32 %v7805_v47, %v2523_v23  ;;  %7812 = vpow2.f32 %v6764_v31  ;;  %v1915_v19 = vsel %vm9930_vm10, %v9874_v11, %v1911_v1 }
 0x252   : > { %v9934_v41 = vadd.f32 1.0, %v7809_v58  ;;  %v1810_v25 = vpop.f32.mrf.mxu2  ;;  %vm1928_vm12 = vweird.f32 %v7807_v62  ;;  %v2745_v11 = vmul.f32 %v2518_v16, %v9844_v10  ;;  %v1920_v0 = vsel %vm9903_vm5, %v1919_v33, %v1915_v19 }
 0x253   : > { %v1924_v27 = vsub.f32 1.0, %v1923_v6  ;;  %v9939_v63 = vadd.f32 %v9847_v57, %v1810_v25  ;;  %v2528_v29 = vsel %vm2527_vm11, %v7805_v47, %v2524_v34  ;;  %vm1929_vm14 = vmor %vm1927_vm13, %vm1928_vm12  ;;  %v2147_v1 = vmul.f32 %v1920_v0, %v9850_v49 }
 0x254   : > { %7814 = vrcp.f32 %v9934_v41  ;;  %v2533_v8 = vsel %vm9921_vm9, %v2532_v26, %v2528_v29  ;;  %v2544_v26 = vand.u32 2147483647, %v9934_v41  ;;  %v2546_v25 = vand.u32 2147483648, %v9934_v41 }
 0x255   : > { %v7811_v38 = vpop.eup %7810  ;;  %v1925_v35 = vmul.f32 %v7807_v62, %v1924_v27  ;;  %v6683_v15 = vmul.f32 -1.442695, %v9939_v63  ;;  %v2746_v4 = vmul.f32 %v2533_v8, %v9854_v60  ;;  %vm2540_vm0 = vweird.f32 %v9934_v41 }
 0x256   : > { %v9952_v14 = vadd.f32 1.0, %v7811_v38  ;;  %v2411_v32 = vpop.f32.mrf.mxu0  ;;  %vm9996_vm1 = vcmp.eq.f32.partialorder %v2544_v26, 8.507059e+37 }
 0x257   : > { %v1926_v47 = vadd.f32 %v7807_v62, %v1925_v35  ;;  %7816 = vpow2.f32 %v6683_v15  ;;  %v9956_v5 = vadd.f32 %v9841_v54, %v2411_v32  ;;  %v7813_v56 = vpop.eup %7812  ;;  %v2761_v10 = vpack.c.bf16 %v2746_v4, %v2745_v11 }
 0x258   : > { %7818 = vrcp.f32 %v9952_v14  ;;  %v9961_v51 = vadd.f32 1.0, %v7813_v56  ;;  %v1948_v46 = vand.u32 2147483648, %v9952_v14  ;;  %v1946_v38 = vand.u32 2147483647, %v9952_v14 }
 0x259   : > { %v1930_v60 = vsel %vm1929_vm14, %v7807_v62, %v1926_v47  ;;  %v6765_v20 = vmul.f32 -1.442695, %v9956_v5  ;;  %2847 = vmatmul.bf16.vlgmr.msrb.gmra.mxu1 %v2761_v10  ;;  %v2547_v32 = vor.u32 1.1754944e-38, %v2546_v25  ;;  %vm1942_vm2 = vweird.f32 %v9952_v14 }
 0x25a   : > { %v9964_v12 = vpop.eup %7814  ;;  %v1935_v53 = vsel %vm1932_vm15, %v1934_v48, %v1930_v60  ;;  %7820 = vrcp.f32 %v9961_v51  ;;  %v2559_v35 = vand.u32 2147483647, %v9961_v51  ;;  %v1949_v0 = vor.u32 1.1754944e-38, %v1948_v46 }
 0x25b   : > { %v2148_v23 = vmul.f32 %v1935_v53, %v9861_v44  ;;  %v2536_v13 = vmul.f32 %v9964_v12, %v9934_v41  ;;  %7822 = vpow2.f32 %v6765_v20  ;;  %vm2541_vm3 = vweird.f32 %v9964_v12 }
 0x25c   : > { %v1813_v62 = vpop.f32.mrf.mxu2  ;;  %v2561_v48 = vand.u32 2147483648, %v9961_v51  ;;  %vm10006_vm4 = vcmp.eq.f32.partialorder %v1946_v38, 8.507059e+37  ;;  %vm2555_vm6 = vweird.f32 %v9961_v51  ;;  %vm10011_vm7 = vcmp.eq.f32.partialorder %v2559_v35, 8.507059e+37  ;;  %vm10023_vm8 = vmor %vm2540_vm0, %vm2541_vm3 }
 0x25d   : > { %v7817_v31 = vpop.eup %7816  ;;  %v9972_v58 = vadd.f32 %v9847_v57, %v1813_v62  ;;  %v2163_v22 = vpack.c.bf16 %v2148_v23, %v2147_v1  ;;  %v2537_v6 = vsub.f32 1.0, %v2536_v13 }
 0x25e   : > { %v9974_v59 = vpop.eup %7818  ;;  %v9976_v30 = vadd.f32 1.0, %v7817_v31  ;;  %v2413_v49 = vpop.f32.mrf.mxu0 }
 0x25f   : > { %v1938_v44 = vmul.f32 %v9974_v59, %v9952_v14  ;;  %v6684_v34 = vmul.f32 -1.442695, %v9972_v58  ;;  %2249 = vmatmul.bf16.vlgmr.msrb.gmra.mxu3 %v2163_v22  ;;  %v9986_v16 = vadd.f32 %v9841_v54, %v2413_v49  ;;  %v2538_v29 = vmul.f32 %v9964_v12, %v2537_v6 }
 0x260   : > { %7824 = vrcp.f32 %v9976_v30  ;;  %v7821_v27 = vpop.eup %7820  ;;  %vm1943_vm9 = vweird.f32 %v9974_v59  ;;  %v1961_v49 = vand.u32 2147483647, %v9976_v30  ;;  %vm1957_vm12 = vweird.f32 %v9976_v30 }
 0x261   : > { %v1939_v42 = vsub.f32 1.0, %v1938_v44  ;;  %7826 = vpow2.f32 %v6684_v34  ;;  %v7823_v19 = vpop.eup %7822  ;;  %v2551_v8 = vmul.f32 %v7821_v27, %v9961_v51  ;;  %v6766_v33 = vmul.f32 -1.442695, %v9986_v16  ;;  %vm10050_vm11 = vmor %vm1942_vm2, %vm1943_vm9 }
 0x262   : > { %v9993_v15 = vadd.f32 1.0, %v7823_v19  ;;  %v2539_v20 = vadd.f32 %v9964_v12, %v2538_v29  ;;  %vm2556_vm5 = vweird.f32 %v7821_v27  ;;  %v2562_v34 = vor.u32 1.1754944e-38, %v2561_v48 }
 0x263   : > { %v1940_v11 = vmul.f32 %v9974_v59, %v1939_v42  ;;  %v2552_v47 = vsub.f32 1.0, %v2551_v8  ;;  %vm10030_vm10 = vmor %vm2555_vm6, %vm2556_vm5  ;;  %v1963_v19 = vand.u32 2147483648, %v9976_v30  ;;  %vm10061_vm14 = vcmp.eq.f32.partialorder %v1961_v49, 8.507059e+37 }
 0x264   : > { %v1815_v56 = vpop.f32.mrf.mxu2  ;;  %7828 = vrcp.f32 %v9993_v15  ;;  %v2543_v42 = vsel %vm10023_vm8, %v9964_v12, %v2539_v20  ;;  %v2574_v44 = vand.u32 2147483647, %v9993_v15 }
 0x265   : > { %v2553_v53 = vmul.f32 %v7821_v27, %v2552_v47  ;;  %7830 = vpow2.f32 %v6766_v33  ;;  %v10017_v31 = vadd.f32 %v9847_v57, %v1815_v56  ;;  %v1941_v6 = vadd.f32 %v9974_v59, %v1940_v11 }
 0x266   : > { %v7825_v60 = vpop.eup %7824  ;;  %v2416_v1 = vpop.f32.mrf.mxu0  ;;  %vm10109_vm2 = vcmp.eq.f32.partialorder %v2574_v44, 8.507059e+37 }
 0x267   : > { %v7827_v23 = vpop.eup %7826  ;;  %v1953_v62 = vmul.f32 %v7825_v60, %v9976_v30  ;;  %v2554_v51 = vadd.f32 %v7821_v27, %v2553_v53  ;;  %v6685_v41 = vmul.f32 -1.442695, %v10017_v31  ;;  %v10044_v29 = vadd.f32 %v9841_v54, %v2416_v1 }
 0x268   : > { %v10034_v25 = vadd.f32 1.0, %v7827_v23  ;;  %vm1958_vm13 = vweird.f32 %v7825_v60  ;;  %v2548_v30 = vsel %vm9996_vm1, %v2547_v32, %v2543_v42  ;;  %vm2570_vm1 = vweird.f32 %v9993_v15 }
 0x269   : > { %v1954_v26 = vsub.f32 1.0, %v1953_v62  ;;  %v2558_v46 = vsel %vm10030_vm10, %v7821_v27, %v2554_v51  ;;  %v1945_v27 = vsel %vm10050_vm11, %v9974_v59, %v1941_v6  ;;  %vm1959_vm15 = vmor %vm1957_vm12, %vm1958_vm13  ;;  %v1964_v59 = vor.u32 1.1754944e-38, %v1963_v19 }
 0x26a   : > { %v10046_v38 = vpop.eup %7828  ;;  %7832 = vrcp.f32 %v10034_v25  ;;  %v2563_v33 = vsel %vm10011_vm7, %v2562_v34, %v2558_v46  ;;  %v6767_v53 = vmul.f32 -1.442695, %v10044_v29  ;;  %v1950_v13 = vsel %vm10006_vm4, %v1949_v0, %v1945_v27 }
 0x26b   : > { %v1955_v35 = vmul.f32 %v7825_v60, %v1954_v26  ;;  %v7831_v12 = vpop.eup %7830  ;;  %v2566_v11 = vmul.f32 %v10046_v38, %v9993_v15  ;;  %7834 = vpow2.f32 %v6685_v41  ;;  %v2748_v62 = vmul.f32 %v2563_v33, %v9900_v45 }
 0x26c   : > { %v1818_v47 = vpop.f32.mrf.mxu2  ;;  %v10069_v48 = vadd.f32 1.0, %v7831_v12  ;;  %v2747_v32 = vmul.f32 %v2548_v30, %v9872_v37  ;;  %v2149_v45 = vmul.f32 %v1950_v13, %v9888_v39  ;;  %v2576_v26 = vand.u32 2147483648, %v9993_v15 }
 0x26d   : > { %v1956_v56 = vadd.f32 %v7825_v60, %v1955_v35  ;;  %v2567_v20 = vsub.f32 1.0, %v2566_v11  ;;  %v10073_v1 = vadd.f32 %v9847_v57, %v1818_v47  ;;  %vm2571_vm0 = vweird.f32 %v10046_v38 }
 0x26e   : > { %v2418_v23 = vpop.f32.mrf.mxu0  ;;  %7836 = vrcp.f32 %v10069_v48  ;;  %v2577_v47 = vor.u32 1.1754944e-38, %v2576_v26  ;;  %vm10117_vm3 = vmor %vm2570_vm1, %vm2571_vm0  ;;  %vm1972_vm4 = vweird.f32 %v10034_v25  ;;  %v1976_v15 = vand.u32 2147483647, %v10034_v25 }
 0x26f   : > { %v1960_v4 = vsel %vm1959_vm15, %v7825_v60, %v1956_v56  ;;  %7838 = vpow2.f32 %v6767_v53  ;;  %v6686_v49 = vmul.f32 -1.442695, %v10073_v1  ;;  %v10087_v10 = vadd.f32 %v9841_v54, %v2418_v23 }
 0x270   : > { %v1965_v22 = vsel %vm10061_vm14, %v1964_v59, %v1960_v4  ;;  %v10082_v6 = vpop.eup %7832  ;;  %v2568_v0 = vmul.f32 %v10046_v38, %v2567_v20  ;;  %v1978_v23 = vand.u32 2147483648, %v10034_v25  ;;  %vm2585_vm6 = vweird.f32 %v10069_v48 }
 0x271   : > { %v2150_v51 = vmul.f32 %v1965_v22, %v9939_v63  ;;  %v1968_v37 = vmul.f32 %v10082_v6, %v10034_v25  ;;  %v7835_v60 = vpop.eup %7834  ;;  %7840 = vpow2.f32 %v6686_v49  ;;  %v6768_v34 = vmul.f32 -1.442695, %v10087_v10 }
 0x272   : > { %v2762_v63 = vpack.c.bf16 %v2748_v62, %v2747_v32  ;;  %v10096_v42 = vadd.f32 1.0, %v7835_v60  ;;  %v2569_v35 = vadd.f32 %v10046_v38, %v2568_v0  ;;  %vm1973_vm5 = vweird.f32 %v10082_v6 }
 0x273   : > { %v1969_v41 = vsub.f32 1.0, %v1968_v37  ;;  %v2164_v19 = vpack.c.bf16 %v2150_v51, %v2149_v45  ;;  %7842 = vpow2.f32 %v6768_v34  ;;  %v2589_v22 = vand.u32 2147483647, %v10069_v48  ;;  %vm10146_vm8 = vmor %vm1972_vm4, %vm1973_vm5 }
 0x274   : > { %v1820_v46 = vpop.f32.mrf.mxu2  ;;  %v10098_v39 = vpop.eup %7836  ;;  %2852 = vmatmul.bf16.gmra.mxu1 %v2762_v63  ;;  %7844 = vrcp.f32 %v10096_v42  ;;  %v2573_v13 = vsel %vm10117_vm3, %v10046_v38, %v2569_v35  ;;  %v2591_v45 = vand.u32 2147483648, %v10069_v48  ;;  %v1991_v34 = vand.u32 2147483647, %v10096_v42 }
 0x275   : > { %v10101_v8 = vadd.f32 %v9847_v57, %v1820_v46  ;;  %v1970_v12 = vmul.f32 %v10082_v6, %v1969_v41  ;;  %v2581_v27 = vmul.f32 %v10098_v39, %v10069_v48  ;;  %2254 = vmatmul.bf16.gmra.mxu3 %v2164_v19  ;;  %v7839_v14 = vpop.eup %7838  ;;  %vm2586_vm7 = vweird.f32 %v10098_v39 }
 0x276   : > { %v2421_v33 = vpop.f32.mrf.mxu0  ;;  %v10114_v56 = vadd.f32 1.0, %v7839_v14  ;;  %v2578_v60 = vsel %vm10109_vm2, %v2577_v47, %v2573_v13  ;;  %v1993_v63 = vand.u32 2147483648, %v10096_v42  ;;  %vm1977_vm9 = vcmp.eq.f32.partialorder %v1976_v15, 8.507059e+37  ;;  %vm10160_vm10 = vmor %vm2585_vm6, %vm2586_vm7 }
 0x277   : > { %v2582_v30 = vsub.f32 1.0, %v2581_v27  ;;  %v6687_v59 = vmul.f32 -1.442695, %v10101_v8  ;;  %v7841_v20 = vpop.eup %7840  ;;  %v1971_v62 = vadd.f32 %v10082_v6, %v1970_v12  ;;  %v10166_v46 = vadd.f32 %v9841_v54, %v2421_v33 }
 0x278   : > { %7846 = vrcp.f32 %v10114_v56  ;;  %v10134_v51 = vadd.f32 1.0, %v7841_v20  ;;  %v1979_v35 = vor.u32 1.1754944e-38, %v1978_v23  ;;  %vm2590_vm11 = vcmp.eq.f32.partialorder %v2589_v22, 8.507059e+37 }
 0x279   : > { %v2583_v4 = vmul.f32 %v10098_v39, %v2582_v30  ;;  %v7843_v32 = vpop.eup %7842  ;;  %7848 = vpow2.f32 %v6687_v59  ;;  %v1975_v26 = vsel %vm10146_vm8, %v10082_v6, %v1971_v62  ;;  %v2749_v48 = vmul.f32 %v2578_v60, %v9956_v5 }
 0x27a   : > { %v10138_v38 = vadd.f32 1.0, %v7843_v32  ;;  %v7845_v37 = vpop.eup %7844  ;;  %7850 = vrcp.f32 %v10134_v51  ;;  %v2592_v27 = vor.u32 1.1754944e-38, %v2591_v45  ;;  %vm1987_vm12 = vweird.f32 %v10096_v42 }
 0x27b   : > { %v2584_v49 = vadd.f32 %v10098_v39, %v2583_v4  ;;  %v1983_v41 = vmul.f32 %v7845_v37, %v10096_v42  ;;  %v1980_v11 = vsel %vm1977_vm9, %v1979_v35, %v1975_v26  ;;  %vm10176_vm13 = vcmp.eq.f32.partialorder %v1991_v34, 8.507059e+37 }
 0x27c   : > { %v1823_v0 = vpop.f32.mrf.mxu2  ;;  %7852 = vrcp.f32 %v10138_v38  ;;  %v1994_v47 = vor.u32 1.1754944e-38, %v1993_v63  ;;  %vm1988_vm14 = vweird.f32 %v7845_v37  ;;  %v6769_v53 = vmul.f32 -1.442695, %v10166_v46 }
 0x27d   : > { %v2588_v6 = vsel %vm10160_vm10, %v10098_v39, %v2584_v49  ;;  %v1984_v14 = vsub.f32 1.0, %v1983_v41  ;;  %v2604_v23 = vand.u32 2147483647, %v10114_v56  ;;  %v2606_v13 = vand.u32 2147483648, %v10114_v56  ;;  %vm10197_vm15 = vmor %vm1987_vm12, %vm1988_vm14 }
 0x27e   : > { %v2423_v19 = vpop.f32.mrf.mxu0  ;;  %v10172_v12 = vpop.eup %7846  ;;  %v2593_v59 = vsel %vm2590_vm11, %v2592_v27, %v2588_v6  ;;  %7854 = vpow2.f32 %v6769_v53  ;;  %v10192_v22 = vadd.f32 %v9847_v57, %v1823_v0  ;;  %v10207_v0 = vmul.f32 %v1980_v11, %v9972_v58 }
 0x27f   : > { %v2596_v39 = vmul.f32 %v10172_v12, %v10114_v56  ;;  %v7849_v30 = vpop.eup %7848  ;;  %v1985_v20 = vmul.f32 %v7845_v37, %v1984_v14  ;;  %v2750_v60 = vmul.f32 %v2593_v59, %v9986_v16  ;;  %v10204_v63 = vadd.f32 %v9841_v54, %v2423_v19 }
 0x280   : > { %v10183_v5 = vpop.eup %7850  ;;  %v10187_v62 = vadd.f32 1.0, %v7849_v30  ;;  %vm2600_vm0 = vweird.f32 %v10114_v56  ;;  %vm2601_vm1 = vweird.f32 %v10172_v12  ;;  %vm10214_vm2 = vcmp.eq.f32.partialorder %v2604_v23, 8.507059e+37 }
 0x281   : > { %v2597_v15 = vsub.f32 1.0, %v2596_v39  ;;  %v1986_v4 = vadd.f32 %v7845_v37, %v1985_v20  ;;  %v1998_v32 = vmul.f32 %v10183_v5, %v10134_v51  ;;  %v2607_v41 = vor.u32 1.1754944e-38, %v2606_v13  ;;  %vm10240_vm5 = vmor %vm2600_vm0, %vm2601_vm1 }
 0x282   : > { %v7853_v45 = vpop.eup %7852  ;;  %7856 = vrcp.f32 %v10187_v62  ;;  %v2006_v19 = vand.u32 2147483647, %v10134_v51  ;;  %v2621_v6 = vand.u32 2147483648, %v10138_v38  ;;  %v6770_v11 = vmul.f32 -1.442695, %v10204_v63 }
 0x283   : > { %v2598_v34 = vmul.f32 %v10172_v12, %v2597_v15  ;;  %v1990_v26 = vsel %vm10197_vm15, %v7845_v37, %v1986_v4  ;;  %v2611_v16 = vmul.f32 %v7853_v45, %v10138_v38  ;;  %v1999_v35 = vsub.f32 1.0, %v1998_v32 }
 0x284   : > { %v1825_v49 = vpop.f32.mrf.mxu2  ;;  %v6688_v37 = vmul.f32 -1.442695, %v10192_v22  ;;  %v1995_v27 = vsel %vm10176_vm13, %v1994_v47, %v1990_v26  ;;  %v2763_v39 = vpack.c.bf16 %v2750_v60, %v2749_v48  ;;  %v7855_v30 = vpop.eup %7854  ;;  %vm2616_vm3 = vweird.f32 %v7853_v45 }
 0x285   : > { %v2612_v58 = vsub.f32 1.0, %v2611_v16  ;;  %v2599_v14 = vadd.f32 %v10172_v12, %v2598_v34  ;;  %v2619_v20 = vand.u32 2147483647, %v10138_v38  ;;  %vm2002_vm4 = vweird.f32 %v10134_v51 }
 0x286   : > { %v2426_v42 = vpop.f32.mrf.mxu0  ;;  %7858 = vpow2.f32 %v6688_v37  ;;  %v2008_v15 = vand.u32 2147483648, %v10134_v51  ;;  %v10230_v23 = vadd.f32 1.0, %v7855_v30  ;;  %2857 = vmatmul.bf16.gmra.mxu1 %v2763_v39  ;;  %v10233_v33 = vadd.f32 %v9847_v57, %v1825_v49 }
 0x287   : > { %v2613_v59 = vmul.f32 %v7853_v45, %v2612_v58  ;;  %7860 = vpow2.f32 %v6770_v11  ;;  %v2152_v48 = vmul.f32 %v1995_v27, %v10017_v31  ;;  %vm2615_vm6 = vweird.f32 %v10138_v38 }
 0x288   : > { %v10226_v53 = vpop.eup %7856  ;;  %v2603_v49 = vsel %vm10240_vm5, %v10172_v12, %v2599_v14  ;;  %v2000_v31 = vmul.f32 %v10183_v5, %v1999_v35  ;;  %vm2617_vm7 = vmor %vm2615_vm6, %vm2616_vm3  ;;  %v2622_v56 = vor.u32 1.1754944e-38, %v2621_v6  ;;  %7862 = vrcp.f32 %v10230_v23 }
 0x289   : > { %v2614_v13 = vadd.f32 %v7853_v45, %v2613_v59  ;;  %v2013_v4 = vmul.f32 %v10226_v53, %v10187_v62  ;;  %vm2003_vm8 = vweird.f32 %v10183_v5  ;;  %vm2620_vm9 = vcmp.eq.f32.partialorder %v2619_v20, 8.507059e+37 }
 0x28a   : > { %vm2017_vm10 = vweird.f32 %v10187_v62  ;;  %v6689_v26 = vmul.f32 -1.442695, %v10233_v33  ;;  %v10257_v12 = vadd.f32 %v9841_v54, %v2426_v42  ;;  %v2608_v35 = vsel %vm10214_vm2, %v2607_v41, %v2603_v49  ;;  %vm10291_vm13 = vmor %vm2002_vm4, %vm2003_vm8 }
 0x28b   : > { %v2618_v60 = vsel %vm2617_vm7, %v7853_v45, %v2614_v13  ;;  %v2014_v38 = vsub.f32 1.0, %v2013_v4  ;;  %vm2018_vm11 = vweird.f32 %v10226_v53  ;;  %v2165_v45 = vpack.c.bf16 %v2152_v48, %v10207_v0 }
 0x28c   : > { %v1828_v32 = vpop.f32.mrf.mxu2  ;;  %v2623_v34 = vsel %vm2620_vm9, %v2622_v56, %v2618_v60  ;;  %v7859_v16 = vpop.eup %7858  ;;  %v2001_v37 = vadd.f32 %v10183_v5, %v2000_v31  ;;  %v2023_v27 = vand.u32 2147483648, %v10187_v62  ;;  %7864 = vpow2.f32 %v6689_v26  ;;  %vm10278_vm12 = vmor %vm2017_vm10, %vm2018_vm11 }
 0x28d   : > { %v2015_v58 = vmul.f32 %v10226_v53, %v2014_v38  ;;  %v7861_v6 = vpop.eup %7860  ;;  %v10266_v14 = vadd.f32 1.0, %v7859_v16  ;;  %v2752_v42 = vmul.f32 %v2623_v34, %v10087_v10  ;;  %v2021_v25 = vand.u32 2147483647, %v10187_v62  ;;  %2259 = vmatmul.bf16.gmra.mxu3 %v2165_v45 }
 0x28e   : > { %v2428_v44 = vpop.f32.mrf.mxu0  ;;  %v10271_v41 = vadd.f32 1.0, %v7861_v6  ;;  %v10273_v39 = vpop.eup %7862  ;;  %v2751_v0 = vmul.f32 %v2608_v35, %v10044_v29  ;;  %v6771_v10 = vmul.f32 -1.442695, %v10257_v12  ;;  %v10285_v59 = vadd.f32 %v9847_v57, %v1828_v32 }
 0x28f   : > { %v2016_v11 = vadd.f32 %v10226_v53, %v2015_v58  ;;  %7866 = vrcp.f32 %v10266_v14  ;;  %v2626_v62 = vmul.f32 %v10273_v39, %v10230_v23  ;;  %v10302_v48 = vadd.f32 %v9841_v54, %v2428_v44 }
 0x290   : > { %7868 = vrcp.f32 %v10271_v41  ;;  %v2005_v13 = vsel %vm10291_vm13, %v10183_v5, %v2001_v37  ;;  %vm2007_vm14 = vcmp.eq.f32.partialorder %v2006_v19, 8.507059e+37  ;;  %v2024_v4 = vor.u32 1.1754944e-38, %v2023_v27 }
 0x291   : > { %v2020_v29 = vsel %vm10278_vm12, %v10226_v53, %v2016_v11  ;;  %v2009_v32 = vor.u32 1.1754944e-38, %v2008_v15  ;;  %vm2022_vm15 = vcmp.eq.f32.partialorder %v2021_v25, 8.507059e+37  ;;  %v2636_v53 = vand.u32 2147483648, %v10230_v23 }
 0x292   : > { %v2764_v49 = vpack.c.bf16 %v2752_v42, %v2751_v0  ;;  %v7865_v31 = vpop.eup %7864  ;;  %v2025_v56 = vsel %vm2022_vm15, %v2024_v4, %v2020_v29  ;;  %7870 = vpow2.f32 %v6771_v10  ;;  %v6690_v60 = vmul.f32 -1.442695, %v10285_v59 }
 0x293   : > { %v2010_v44 = vsel %vm2007_vm14, %v2009_v32, %v2005_v13  ;;  %v2627_v34 = vsub.f32 1.0, %v2626_v62  ;;  %v10314_v5 = vadd.f32 1.0, %v7865_v31  ;;  %v6772_v51 = vmul.f32 -1.442695, %v10302_v48 }
 0x294   : > { %v1830_v47 = vpop.f32.mrf.mxu2  ;;  %7872 = vpow2.f32 %v6690_v60  ;;  %v2154_v35 = vmul.f32 %v2025_v56, %v10101_v8  ;;  %vm2630_vm0 = vweird.f32 %v10230_v23  ;;  %v2634_v58 = vand.u32 2147483647, %v10230_v23 }
 0x295   : > { %v10312_v38 = vadd.f32 %v9847_v57, %v1830_v47  ;;  %v10317_v15 = vpop.eup %7866  ;;  %7874 = vrcp.f32 %v10314_v5  ;;  %v2153_v6 = vmul.f32 %v2010_v44, %v10073_v1  ;;  %v10327_v37 = vor.u32 1.1754944e-38, %v2636_v53 }
 0x296   : > { %v2431_v19 = vpop.f32.mrf.mxu0  ;;  %v7869_v16 = vpop.eup %7868  ;;  %v2028_v45 = vmul.f32 %v10317_v15, %v10266_v14  ;;  %2862 = vmatmul.bf16.gmra.mxu1 %v2764_v49  ;;  %v2628_v8 = vmul.f32 %v10273_v39, %v2627_v34  ;;  %vm2032_vm1 = vweird.f32 %v10266_v14  ;;  %7876 = vpow2.f32 %v6772_v51 }
 0x297   : > { %v6691_v26 = vmul.f32 -1.442695, %v10312_v38  ;;  %v2641_v27 = vmul.f32 %v7869_v16, %v10271_v41  ;;  %v10331_v42 = vadd.f32 %v9841_v54, %v2431_v19  ;;  %v2036_v30 = vand.u32 2147483647, %v10266_v14 }
 0x298   : > { %v2029_v11 = vsub.f32 1.0, %v2028_v45  ;;  %v7871_v0 = vpop.eup %7870  ;;  %v2038_v1 = vand.u32 2147483648, %v10266_v14  ;;  %vm10337_vm2 = vcmp.eq.f32.partialorder %v2634_v58, 8.507059e+37  ;;  %v2649_v29 = vand.u32 2147483647, %v10271_v41 }
 0x299   : > { %v2642_v10 = vsub.f32 1.0, %v2641_v27  ;;  %7878 = vpow2.f32 %v6691_v26  ;;  %v10343_v62 = vadd.f32 1.0, %v7871_v0  ;;  %v2166_v47 = vpack.c.bf16 %v2154_v35, %v2153_v6 }
 0x29a   : > { %v2030_v54 = vmul.f32 %v10317_v15, %v2029_v11  ;;  %v7873_v13 = vpop.eup %7872  ;;  %vm2646_vm3 = vweird.f32 %v7869_v16  ;;  %v2651_v32 = vand.u32 2147483648, %v10271_v41  ;;  %v6773_v53 = vmul.f32 -1.442695, %v10331_v42 }
 0x29b   : > { %v2643_v4 = vmul.f32 %v7869_v16, %v2642_v10  ;;  %v10347_v49 = vpop.eup %7874  ;;  %v2629_v31 = vadd.f32 %v10273_v39, %v2628_v8  ;;  %vm2631_vm4 = vweird.f32 %v10273_v39  ;;  %vm2645_vm5 = vweird.f32 %v10271_v41 }
 0x29c   : > { %v1833_v25 = vpop.f32.mrf.mxu2  ;;  %7880 = vrcp.f32 %v10343_v62  ;;  %v2031_v56 = vadd.f32 %v10317_v15, %v2030_v54  ;;  %vm2033_vm6 = vweird.f32 %v10317_v15  ;;  %v2043_v44 = vmul.f32 %v10347_v49, %v10314_v5  ;;  %v7877_v34 = vpop.eup %7876  ;;  %vm10362_vm8 = vmor %vm2645_vm5, %vm2646_vm3 }
 0x29d   : > { %v2644_v60 = vadd.f32 %v7869_v16, %v2643_v4  ;;  %vm10357_vm7 = vcmp.eq.f32.partialorder %v2036_v30, 8.507059e+37  ;;  %v2039_v19 = vor.u32 1.1754944e-38, %v2038_v1  ;;  %vm10366_vm9 = vcmp.eq.f32.partialorder %v2649_v29, 8.507059e+37  ;;  %2264 = vmatmul.bf16.gmra.mxu3 %v2166_v47  ;;  %vm10376_vm10 = vmor %vm2630_vm0, %vm2631_vm4 }
 0x29e   : > { %v10370_v35 = vadd.f32 1.0, %v7873_v13  ;;  %v2652_v27 = vor.u32 1.1754944e-38, %v2651_v32  ;;  %v2044_v8 = vsub.f32 1.0, %v2043_v44  ;;  %7882 = vpow2.f32 %v6773_v53  ;;  %vm10389_vm11 = vmor %vm2032_vm1, %vm2033_vm6  ;;  %v2433_v0 = vpop.f32.mrf.mxu0 }
 0x29f   : > { %v7879_v58 = vpop.eup %7878  ;;  %v2648_v6 = vsel %vm10362_vm8, %v7869_v16, %v2644_v60  ;;  %v2633_v11 = vsel %vm10376_vm10, %v10273_v39, %v2629_v31  ;;  %vm2047_vm12 = vweird.f32 %v10314_v5  ;;  %v10396_v16 = vadd.f32 %v9847_v57, %v1833_v25 }
 0x2a0   : > { %7884 = vrcp.f32 %v10370_v35  ;;  %v2035_v39 = vsel %vm10389_vm11, %v10317_v15, %v2031_v56  ;;  %v2653_v30 = vsel %vm10366_vm9, %v2652_v27, %v2648_v6  ;;  %v2045_v14 = vmul.f32 %v10347_v49, %v2044_v8 }
 0x2a1   : > { %vm2048_vm13 = vweird.f32 %v10347_v49  ;;  %v2051_v10 = vand.u32 2147483647, %v10314_v5  ;;  %v2053_v54 = vand.u32 2147483648, %v10314_v5  ;;  %v10409_v57 = vadd.f32 1.0, %v7877_v34  ;;  %v10438_v34 = vld [vmem:[#allocation10 + $0x2] ss:$0 sm:$0xff] }
 0x2a2   : > { %v10405_v1 = vpop.eup %7880  ;;  %v10411_v25 = vadd.f32 1.0, %v7879_v58  ;;  %v2638_v15 = vsel %vm10337_vm2, %v10327_v37, %v2633_v11  ;;  %v2046_v47 = vadd.f32 %v10347_v49, %v2045_v14  ;;  %v2664_v4 = vand.u32 2147483647, %v10343_v62  ;;  %vm10425_vm14 = vmor %vm2047_vm12, %vm2048_vm13 }
 0x2a3   : > { %v2656_v13 = vmul.f32 %v10405_v1, %v10343_v62  ;;  %v2040_v32 = vsel %vm10357_vm7, %v2039_v19, %v2035_v39  ;;  %v2754_v53 = vmul.f32 %v2653_v30, %v10204_v63  ;;  %v2666_v37 = vand.u32 2147483648, %v10343_v62 }
 0x2a4   : > { %v1835_v29 = vpop.f32.mrf.mxu2  ;;  %7886 = vrcp.f32 %v10409_v57  ;;  %v7883_v20 = vpop.eup %7882  ;;  %v2050_v56 = vsel %vm10425_vm14, %v10347_v49, %v2046_v47  ;;  %v6692_v63 = vmul.f32 -1.442695, %v10396_v16  ;;  %vm2052_vm15 = vcmp.eq.f32.partialorder %v2051_v10, 8.507059e+37 }
 0x2a5   : > { %v2657_v60 = vsub.f32 1.0, %v2656_v13  ;;  %7888 = vrcp.f32 %v10411_v25  ;;  %v2054_v5 = vor.u32 1.1754944e-38, %v2053_v54  ;;  %v10441_v51 = vadd.f32 %v10438_v34, %v2433_v0 }
 0x2a6   : > { %v10436_v44 = vpop.eup %7884  ;;  %v2753_v19 = vmul.f32 %v2638_v15, %v10166_v46  ;;  %vm2660_vm0 = vweird.f32 %v10343_v62  ;;  %v2155_v41 = vmul.f32 %v2040_v32, %v10192_v22  ;;  %v2667_v45 = vor.u32 1.1754944e-38, %v2666_v37  ;;  %v2436_v39 = vpop.f32.mrf.mxu0 }
 0x2a7   : > { %v2658_v26 = vmul.f32 %v10405_v1, %v2657_v60  ;;  %v2058_v49 = vmul.f32 %v10436_v44, %v10370_v35  ;;  %v2055_v58 = vsel %vm2052_vm15, %v2054_v5, %v2050_v56  ;;  %v10449_v6 = vadd.f32 1.0, %v7883_v20  ;;  %v7937_v60 = vld [vmem:[#allocation10 + $0x1] ss:$0 sm:$0xff] }
 0x2a8   : > { %vm10451_vm1 = vcmp.eq.f32.partialorder %v2664_v4, 8.507059e+37  ;;  %v2066_v46 = vand.u32 2147483647, %v10370_v35  ;;  %7890 = vpow2.f32 %v6692_v63  ;;  %v2765_v11 = vpack.c.bf16 %v2754_v53, %v2753_v19 }
 0x2a9   : > { %v2059_v8 = vsub.f32 1.0, %v2058_v49  ;;  %v2659_v0 = vadd.f32 %v10405_v1, %v2658_v26  ;;  %vm2661_vm2 = vweird.f32 %v10405_v1  ;;  %7892 = vrcp.f32 %v10449_v6 }
 0x2aa   : > { %v7887_v23 = vpop.eup %7886  ;;  %v6774_v22 = vmul.f32 -1.442695, %v10441_v51  ;;  %v2156_v14 = vmul.f32 %v2055_v58, %v10233_v33  ;;  %vm2062_vm3 = vweird.f32 %v10370_v35  ;;  %v2068_v10 = vand.u32 2147483648, %v10370_v35  ;;  %2867 = vmatmul.bf16.gmra.mxu1 %v2765_v11  ;;  %vm10476_vm6 = vmor %vm2660_vm0, %vm2661_vm2 }
 0x2ab   : > { %v10460_v30 = vpop.eup %7888  ;;  %v2671_v54 = vmul.f32 %v7887_v23, %v10409_v57  ;;  %vm2675_vm4 = vweird.f32 %v10409_v57  ;;  %v2679_v15 = vand.u32 2147483647, %v10409_v57  ;;  %v2681_v47 = vand.u32 2147483648, %v10409_v57 }
 0x2ac   : > { %v2073_v13 = vmul.f32 %v10460_v30, %v10411_v25  ;;  %vm2077_vm5 = vweird.f32 %v10411_v25  ;;  %v1838_v4 = vpop.f32.mrf.mxu2  ;;  %v2060_v32 = vmul.f32 %v10436_v44, %v2059_v8  ;;  %v2081_v31 = vand.u32 2147483647, %v10411_v25 }
 0x2ad   : > { %v2672_v53 = vsub.f32 1.0, %v2671_v54  ;;  %v2083_v37 = vand.u32 2147483648, %v10411_v25  ;;  %v2663_v20 = vsel %vm10476_vm6, %v10405_v1, %v2659_v0  ;;  %7894 = vpow2.f32 %v6774_v22 }
 0x2ae   : > { %v2074_v56 = vsub.f32 1.0, %v2073_v13  ;;  %v10486_v63 = vadd.f32 %v7937_v60, %v1835_v29  ;;  %v7891_v62 = vpop.eup %7890  ;;  %vm2676_vm7 = vweird.f32 %v7887_v23  ;;  %vm2078_vm8 = vweird.f32 %v10460_v30 }
 0x2af   : > { %v2673_v5 = vmul.f32 %v7887_v23, %v2672_v53  ;;  %v2167_v19 = vpack.c.bf16 %v2156_v14, %v2155_v41  ;;  %v10489_v26 = vpop.eup %7892  ;;  %v10492_v58 = vadd.f32 1.0, %v7891_v62  ;;  %v10496_v1 = vadd.f32 %v10438_v34, %v2436_v39  ;;  %vm2677_vm10 = vmor %vm2675_vm4, %vm2676_vm7 }
 0x2b0   : > { %v2075_v49 = vmul.f32 %v10460_v30, %v2074_v56  ;;  %v6693_v8 = vmul.f32 -1.442695, %v10486_v63  ;;  %v2061_v29 = vadd.f32 %v10436_v44, %v2060_v32  ;;  %vm2063_vm9 = vweird.f32 %v10436_v44  ;;  %vm10512_vm12 = vmor %vm2077_vm5, %vm2078_vm8 }
 0x2b1   : > { %v2674_v11 = vadd.f32 %v7887_v23, %v2673_v5  ;;  %v2686_v0 = vmul.f32 %v10489_v26, %v10449_v6  ;;  %2269 = vmatmul.bf16.gmra.mxu3 %v2167_v19  ;;  %v2668_v41 = vsel %vm10451_vm1, %v2667_v45, %v2663_v20  ;;  %v2682_v22 = vor.u32 1.1754944e-38, %v2681_v47  ;;  %vm10520_vm13 = vmor %vm2062_vm3, %vm2063_vm9 }
 0x2b2   : > { %v2076_v14 = vadd.f32 %v10460_v30, %v2075_v49  ;;  %7896 = vrcp.f32 %v10492_v58  ;;  %v2069_v39 = vor.u32 1.1754944e-38, %v2068_v10  ;;  %vm2680_vm11 = vcmp.eq.f32.partialorder %v2679_v15, 8.507059e+37  ;;  %v2438_v15 = vpop.f32.mrf.mxu0 }
 0x2b3   : > { %v2678_v54 = vsel %vm2677_vm10, %v7887_v23, %v2674_v11  ;;  %7898 = vpow2.f32 %v6693_v8  ;;  %v7895_v45 = vpop.eup %7894  ;;  %v2084_v25 = vor.u32 1.1754944e-38, %v2083_v37  ;;  %v6775_v10 = vmul.f32 -1.442695, %v10496_v1 }
 0x2b4   : > { %v2683_v27 = vsel %vm2680_vm11, %v2682_v22, %v2678_v54  ;;  %v2080_v23 = vsel %vm10512_vm12, %v10460_v30, %v2076_v14  ;;  %v2755_v47 = vmul.f32 %v2668_v41, %v10257_v12  ;;  %v2065_v33 = vsel %vm10520_vm13, %v10436_v44, %v2061_v29  ;;  %v1840_v30 = vpop.f32.mrf.mxu2 }
 0x2b5   : > { %v2756_v32 = vmul.f32 %v2683_v27, %v10302_v48  ;;  %v2687_v53 = vsub.f32 1.0, %v2686_v0  ;;  %vm2082_vm14 = vcmp.eq.f32.partialorder %v2081_v31, 8.507059e+37  ;;  %v10533_v20 = vadd.f32 1.0, %v7895_v45 }
 0x2b6   : > { %7900 = vpow2.f32 %v6775_v10  ;;  %v10535_v56 = vadd.f32 %v7937_v60, %v1838_v4  ;;  %vm2067_vm15 = vcmp.eq.f32.partialorder %v2066_v46, 8.507059e+37  ;;  %v2085_v37 = vsel %vm2082_vm14, %v2084_v25, %v2080_v23 }
 0x2b7   : > { %v10540_v12 = vadd.f32 %v10438_v34, %v2438_v15  ;;  %v2766_v62 = vpack.c.bf16 %v2756_v32, %v2755_v47  ;;  %v2070_v44 = vsel %vm2067_vm15, %v2069_v39, %v2065_v33  ;;  %7902 = vrcp.f32 %v10533_v20 }
 0x2b8   : > { %v10542_v5 = vpop.eup %7896  ;;  %v2688_v31 = vmul.f32 %v10489_v26, %v2687_v53  ;;  %v6694_v19 = vmul.f32 -1.442695, %v10535_v56  ;;  %v10549_v35 = vadd.f32 %v7937_v60, %v1840_v30  ;;  %v2158_v46 = vmul.f32 %v2085_v37, %v10312_v38 }
 0x2b9   : > { %v7899_v48 = vpop.eup %7898  ;;  %v2088_v4 = vmul.f32 %v10542_v5, %v10492_v58  ;;  %v2694_v49 = vand.u32 2147483647, %v10449_v6  ;;  %v6776_v29 = vmul.f32 -1.442695, %v10540_v12  ;;  %v2157_v0 = vmul.f32 %v2070_v44, %v10285_v59 }
 0x2ba   : > { %v10552_v34 = vadd.f32 1.0, %v7899_v48  ;;  %7904 = vpow2.f32 %v6694_v19  ;;  %2872 = vmatmul.bf16.gmra.mxu1 %v2766_v62  ;;  %vm2691_vm0 = vweird.f32 %v10489_v26  ;;  %v2696_v41 = vand.u32 2147483648, %v10449_v6 }
 0x2bb   : > { %v2089_v8 = vsub.f32 1.0, %v2088_v4  ;;  %v2689_v38 = vadd.f32 %v10489_v26, %v2688_v31  ;;  %v6695_v22 = vmul.f32 -1.442695, %v10549_v35  ;;  %v2168_v54 = vpack.c.bf16 %v2158_v46, %v2157_v0 }
 0x2bc   : > { %v7901_v11 = vpop.eup %7900  ;;  %7906 = vrcp.f32 %v10552_v34  ;;  %vm2690_vm1 = vweird.f32 %v10449_v6  ;;  %v2098_v59 = vand.u32 2147483648, %v10492_v58  ;;  %vm10573_vm3 = vcmp.eq.f32.partialorder %v2694_v49, 8.507059e+37 }
 0x2bd   : > { %v10561_v60 = vadd.f32 1.0, %v7901_v11  ;;  %7908 = vpow2.f32 %v6776_v29  ;;  %v7903_v14 = vpop.eup %7902  ;;  %v2090_v39 = vmul.f32 %v10542_v5, %v2089_v8  ;;  %vm10569_vm2 = vmor %vm2690_vm1, %vm2691_vm0  ;;  %v2697_v27 = vor.u32 1.1754944e-38, %v2696_v41 }
 0x2be   : > { %v2701_v13 = vmul.f32 %v7903_v14, %v10533_v20  ;;  %v2709_v23 = vand.u32 2147483647, %v10533_v20  ;;  %v2693_v6 = vsel %vm10569_vm2, %v10489_v26, %v2689_v38  ;;  %vm2092_vm4 = vweird.f32 %v10492_v58 }
 0x2bf   : > { %7910 = vrcp.f32 %v10561_v60  ;;  %v2711_v15 = vand.u32 2147483648, %v10533_v20  ;;  %v2091_v33 = vadd.f32 %v10542_v5, %v2090_v39  ;;  %vm2093_vm5 = vweird.f32 %v10542_v5 }
 0x2c0   : > { %7912 = vpow2.f32 %v6695_v22  ;;  %v7905_v25 = vpop.eup %7904  ;;  %v2702_v10 = vsub.f32 1.0, %v2701_v13  ;;  %v2096_v32 = vand.u32 2147483647, %v10492_v58  ;;  %v2099_v37 = vor.u32 1.1754944e-38, %v2098_v59  ;;  %vm10601_vm9 = vmor %vm2092_vm4, %vm2093_vm5 }
 0x2c1   : > { %2274 = vmatmul.bf16.gmra.mxu3 %v2168_v54  ;;  %v10586_v53 = vadd.f32 1.0, %v7905_v25  ;;  %vm2706_vm6 = vweird.f32 %v7903_v14  ;;  %v2698_v44 = vsel %vm10573_vm3, %v2697_v27, %v2693_v6  ;;  %vm2705_vm7 = vweird.f32 %v10533_v20 }
 0x2c2   : > { %v7907_v47 = vpop.eup %7906  ;;  %v2703_v62 = vmul.f32 %v7903_v14, %v2702_v10  ;;  %vm10592_vm8 = vcmp.eq.f32.partialorder %v2709_v23, 8.507059e+37  ;;  %v2712_v46 = vor.u32 1.1754944e-38, %v2711_v15  ;;  %v2095_v29 = vsel %vm10601_vm9, %v10542_v5, %v2091_v33  ;;  %vm2707_vm10 = vmor %vm2705_vm7, %vm2706_vm6 }
 0x2c3   : > { %v7909_v30 = vpop.eup %7908  ;;  %v2103_v26 = vmul.f32 %v7907_v47, %v10552_v34  ;;  %7914 = vrcp.f32 %v10586_v53  ;;  %v2111_v11 = vand.u32 2147483647, %v10552_v34  ;;  %v2113_v0 = vand.u32 2147483648, %v10552_v34 }
 0x2c4   : > { %v2704_v19 = vadd.f32 %v7903_v14, %v2703_v62  ;;  %v10605_v8 = vadd.f32 1.0, %v7909_v30  ;;  %vm2108_vm11 = vweird.f32 %v7907_v47  ;;  %vm2097_vm12 = vcmp.eq.f32.partialorder %v2096_v32, 8.507059e+37 }
 0x2c5   : > { %v10597_v31 = vpop.eup %7910  ;;  %v2104_v49 = vsub.f32 1.0, %v2103_v26  ;;  %vm2107_vm13 = vweird.f32 %v10552_v34  ;;  %v2100_v39 = vsel %vm2097_vm12, %v2099_v37, %v2095_v29  ;;  %v2114_v57 = vor.u32 1.1754944e-38, %v2113_v0 }
 0x2c6   : > { %v7913_v20 = vpop.eup %7912  ;;  %v2716_v58 = vmul.f32 %v10597_v31, %v10561_v60  ;;  %v2708_v41 = vsel %vm2707_vm10, %v7903_v14, %v2704_v19  ;;  %7916 = vrcp.f32 %v10605_v8  ;;  %v2757_v14 = vmul.f32 %v2698_v44, %v10331_v42  ;;  %vm2109_vm14 = vmor %vm2107_vm13, %vm2108_vm11 }
 0x2c7   : > { %v2105_v38 = vmul.f32 %v7907_v47, %v2104_v49  ;;  %v2713_v22 = vsel %vm10592_vm8, %v2712_v46, %v2708_v41  ;;  %v10619_v13 = vadd.f32 1.0, %v7913_v20  ;;  %vm2112_vm15 = vcmp.eq.f32.partialorder %v2111_v11, 8.507059e+37 }
 0x2c8   : > { %v2717_v5 = vsub.f32 1.0, %v2716_v58  ;;  %v2758_v54 = vmul.f32 %v2713_v22, %v10441_v51  ;;  %v2159_v51 = vmul.f32 %v2100_v39, %v10396_v16  ;;  %vm2721_vm0 = vweird.f32 %v10597_v31 }
 0x2c9   : > { %v2106_v59 = vadd.f32 %v7907_v47, %v2105_v38  ;;  %v10621_v45 = vpop.eup %7914  ;;  %7918 = vrcp.f32 %v10619_v13  ;;  %v2724_v6 = vand.u32 2147483647, %v10561_v60  ;;  %vm2720_vm1 = vweird.f32 %v10561_v60 }
 0x2ca   : > { %v2718_v27 = vmul.f32 %v10597_v31, %v2717_v5  ;;  %v2118_v34 = vmul.f32 %v10621_v45, %v10586_v53  ;;  %v2726_v30 = vand.u32 2147483648, %v10561_v60  ;;  %vm10637_vm2 = vmor %vm2720_vm1, %vm2721_vm0  ;;  %vm2123_vm4 = vweird.f32 %v10621_v45 }
 0x2cb   : > { %v2110_v23 = vsel %vm2109_vm14, %v7907_v47, %v2106_v59  ;;  %v2767_v47 = vpack.c.bf16 %v2758_v54, %v2757_v14  ;;  %vm10645_vm3 = vcmp.eq.f32.partialorder %v2724_v6, 8.507059e+37  ;;  %v2741_v60 = vand.u32 2147483648, %v10605_v8 }
 0x2cc   : > { %v2115_v25 = vsel %vm2112_vm15, %v2114_v57, %v2110_v23  ;;  %v7917_v10 = vpop.eup %7916  ;;  %v2719_v15 = vadd.f32 %v10597_v31, %v2718_v27  ;;  %v2119_v33 = vsub.f32 1.0, %v2118_v34  ;;  %v2727_v20 = vor.u32 1.1754944e-38, %v2726_v30  ;;  %v10671_v57 = vld [vmem:[%s12218_s7 + $0x2] ss:$0 sm:$0xff] }
 0x2cd   : > { %v2160_v42 = vmul.f32 %v2115_v25, %v10486_v63  ;;  %v2731_v32 = vmul.f32 %v7917_v10, %v10605_v8  ;;  %2877 = vmatmul.bf16.gmra.mxu1 %v2767_v47  ;;  %v2739_v63 = vand.u32 2147483647, %v10605_v8  ;;  %vm2736_vm5 = vweird.f32 %v7917_v10 }
 0x2ce   : > { %v2120_v16 = vmul.f32 %v10621_v45, %v2119_v33  ;;  %v2723_v48 = vsel %vm10637_vm2, %v10597_v31, %v2719_v15  ;;  %vm2122_vm6 = vweird.f32 %v10586_v53  ;;  %v2126_v31 = vand.u32 2147483647, %v10586_v53  ;;  %v10680_v15 = vld [vmem:[%s12218_s7 + $0x1] ss:$0 sm:$0xff] }
 0x2cf   : > { %v2169_v37 = vpack.c.bf16 %v2160_v42, %v2159_v51  ;;  %v2732_v26 = vsub.f32 1.0, %v2731_v32  ;;  %v7919_v44 = vpop.eup %7918  ;;  %v2128_v29 = vand.u32 2147483648, %v10586_v53  ;;  %vm10656_vm7 = vmor %vm2122_vm6, %vm2123_vm4  ;;  %vm2735_vm8 = vweird.f32 %v10605_v8 }
 0x2d0   : > { %v2121_v19 = vadd.f32 %v10621_v45, %v2120_v16  ;;  %v2133_v49 = vmul.f32 %v7919_v44, %v10619_v13  ;;  %vm2740_vm9 = vcmp.eq.f32.partialorder %v2739_v63, 8.507059e+37  ;;  %v2728_v38 = vsel %vm10645_vm3, %v2727_v20, %v2723_v48  ;;  %vm2737_vm10 = vmor %vm2735_vm8, %vm2736_vm5 }
 0x2d1   : > { %2279 = vmatmul.bf16.gmra.mxu3 %v2169_v37  ;;  %v2733_v46 = vmul.f32 %v7917_v10, %v2732_v26  ;;  %v2742_v22 = vor.u32 1.1754944e-38, %v2741_v60  ;;  %v2141_v5 = vand.u32 2147483647, %v10619_v13  ;;  %v2143_v39 = vand.u32 2147483648, %v10619_v13 }
 0x2d2   : > { %v2134_v58 = vsub.f32 1.0, %v2133_v49  ;;  %v2125_v53 = vsel %vm10656_vm7, %v10621_v45, %v2121_v19  ;;  %vm2138_vm11 = vweird.f32 %v7919_v44  ;;  %v2129_v8 = vor.u32 1.1754944e-38, %v2128_v29 }
 0x2d3   : > { %v2734_v0 = vadd.f32 %v7917_v10, %v2733_v46  ;;  %vm2127_vm12 = vcmp.eq.f32.partialorder %v2126_v31, 8.507059e+37  ;;  %vm2137_vm13 = vweird.f32 %v10619_v13  ;;  %v2759_v34 = vmul.f32 %v2728_v38, %v10496_v1 }
 0x2d4   : > { %v2135_v59 = vmul.f32 %v7919_v44, %v2134_v58  ;;  %v2130_v51 = vsel %vm2127_vm12, %v2129_v8, %v2125_v53  ;;  %vm2139_vm14 = vmor %vm2137_vm13, %vm2138_vm11  ;;  %v2144_v45 = vor.u32 1.1754944e-38, %v2143_v39  ;;  %vm2142_vm15 = vcmp.eq.f32.partialorder %v2141_v5, 8.507059e+37 }
 0x2d5   : > { %v2738_v54 = vsel %vm2737_vm10, %v7917_v10, %v2734_v0 }
 0x2d6   : > { %v2848_v41 = vpop.f32.mrf.mxu1  ;;  %v2743_v14 = vsel %vm2740_vm9, %v2742_v22, %v2738_v54  ;;  %v2136_v23 = vadd.f32 %v7919_v44, %v2135_v59 }
 0x2d7   : > { %v2760_v27 = vmul.f32 %v2743_v14, %v10540_v12  ;;  %v2849_v42 = vadd.f32 %v10671_v57, %v2848_v41  ;;  %v2161_v12 = vmul.f32 %v2130_v51, %v10535_v56 }
 0x2d8   : > { %v2140_v25 = vsel %vm2139_vm14, %v7919_v44, %v2136_v23 }
 0x2d9   : > { %v2145_v6 = vsel %vm2142_vm15, %v2144_v45, %v2140_v25  ;;  %v2768_v10 = vpack.c.bf16 %v2760_v27, %v2759_v34  ;;  %v2888_v30 = vadd.f32 %v2849_v42, %v9555_v2 }
 0x2da   : > { %v2162_v13 = vmul.f32 %v2145_v6, %v10549_v35 }
 0x2dc   : > { %v2170_v47 = vpack.c.bf16 %v2162_v13, %v2161_v12 }
 0x2dd   : > { %2882 = vmatmul.bf16.gmra.mxu1 %v2768_v10 }
 0x2de   : > { %v2850_v33 = vpop.f32.mrf.mxu1 }
 0x2df   : > { %v2851_v1 = vadd.f32 %v10671_v57, %v2850_v33 }
 0x2e1   : > { %v2889_v16 = vadd.f32 %v2851_v1, %v9562_v55  ;;  %2284 = vmatmul.bf16.gmra.mxu3 %v2170_v47 }
 0x2e2   : > { %v2250_v32 = vpop.f32.mrf.mxu3 }
 0x2e3   : > { %v2251_v37 = vadd.f32 %v10680_v15, %v2250_v32  ;;  %v7391_v62 = vpack.c.bf16 %v2889_v16, %v2888_v30 }
 0x2e5   : > { %v2290_v26 = vadd.f32 %v2251_v37, %v9555_v2  ;;  %7392 = vst [vmem:[#allocation3 + $0x28] sm:$0xff] %v7391_v62  }
 0x2e7   : > { %2306 = vst [vmem:[#allocation2 + $0x30] sm:$0xff] %v2290_v26 }
 0x2ea   : > { %v2252_v56 = vpop.f32.mrf.mxu3 }
 0x2eb   : > { %v2253_v35 = vadd.f32 %v10680_v15, %v2252_v56 }
 0x2ed   : > { %v2291_v63 = vadd.f32 %v2253_v35, %v9562_v55 }
 0x2ef   : > { %2307 = vst [vmem:[#allocation2] sm:$0xff] %v2291_v63 }
 0x2f1   : > { %v2853_v44 = vpop.f32.mrf.mxu1 }
 0x2f2   : > { %v2854_v48 = vadd.f32 %v10671_v57, %v2853_v44 }
 0x2f4   : > { %v2890_v2 = vadd.f32 %v2854_v48, %v9569_v7 }
 0x2f8   : > { %v2255_v4 = vpop.f32.mrf.mxu3 }
 0x2f9   : > { %v2855_v60 = vpop.f32.mrf.mxu1  ;;  %v2256_v19 = vadd.f32 %v10680_v15, %v2255_v4 }
 0x2fa   : > { %v2856_v46 = vadd.f32 %v10671_v57, %v2855_v60 }
 0x2fb   : > { %v2292_v49 = vadd.f32 %v2256_v19, %v9569_v7 }
 0x2fc   : > { %v2891_v20 = vadd.f32 %v2856_v46, %v9576_v43 }
 0x2fd   : > { %2308 = vst [vmem:[#allocation2 + $0x58] sm:$0xff] %v2292_v49 }
 0x2fe   : > { %v7396_v31 = vpack.c.bf16 %v2891_v20, %v2890_v2 }
 0x300   : > { %7428 = vst [vmem:[#allocation3] sm:$0xff] %v7396_v31   ;;  %v2257_v55 = vpop.f32.mrf.mxu3 }
 0x301   : > { %v2258_v29 = vadd.f32 %v10680_v15, %v2257_v55  ;;  %v8614_v55 = vmov 0.0  }
 0x302   : > { %2936 = vst [vmem:[#allocation4 + $0x30] sm:$0xff] %v8614_v55 }
 0x303   : > { %v2293_v11 = vadd.f32 %v2258_v29, %v9576_v43  ;;  %v2858_v0 = vpop.f32.mrf.mxu1  ;;  %2937 = vst [vmem:[#allocation4] sm:$0xff] %v8614_v55 }
 0x304   : > { %v2859_v58 = vadd.f32 %v10671_v57, %v2858_v0  ;;  %2938 = vst [vmem:[#allocation4 + $0x40] sm:$0xff] %v8614_v55 }
 0x305   : > { %2309 = vst [vmem:[#allocation2 + $0x18] sm:$0xff] %v2293_v11 }
 0x306   : > { %v2892_v22 = vadd.f32 %v2859_v58, %v9588_v40  ;;  %2939 = vst [vmem:[#allocation4 + $0x58] sm:$0xff] %v8614_v55 }
 0x307   : > { %2940 = vst [vmem:[#allocation4 + $0x8] sm:$0xff] %v8614_v55 }
 0x308   : > { %2941 = vst [vmem:[#allocation4 + $0x28] sm:$0xff] %v8614_v55 }
 0x309   : > { %2942 = vst [vmem:[#allocation4 + $0x38] sm:$0xff] %v8614_v55 }
 0x30a   : > { %2943 = vst [vmem:[#allocation4 + $0x20] sm:$0xff] %v8614_v55 }
 0x30b   : > { %v2860_v41 = vpop.f32.mrf.mxu1  ;;  %2944 = vst [vmem:[#allocation4 + $0x78] sm:$0xff] %v8614_v55 }
 0x30c   : > { %v2861_v38 = vadd.f32 %v10671_v57, %v2860_v41  ;;  %2945 = vst [vmem:[#allocation4 + $0x50] sm:$0xff] %v8614_v55 }
 0x30d   : > { %2946 = vst [vmem:[#allocation4 + $0x18] sm:$0xff] %v8614_v55 }
 0x30e   : > { %v2893_v7 = vadd.f32 %v2861_v38, %v9599_v3  ;;  %2947 = vst [vmem:[#allocation4 + $0x70] sm:$0xff] %v8614_v55 }
 0x30f   : > { %2948 = vst [vmem:[#allocation4 + $0x60] sm:$0xff] %v8614_v55 }
 0x310   : > { %v7401_v5 = vpack.c.bf16 %v2893_v7, %v2892_v22  ;;  %v2260_v39 = vpop.f32.mrf.mxu3  ;;  %2949 = vst [vmem:[#allocation4 + $0x10] sm:$0xff] %v8614_v55 }
 0x311   : > { %v2261_v53 = vadd.f32 %v10680_v15, %v2260_v39  ;;  %2950 = vst [vmem:[#allocation4 + $0x68] sm:$0xff] %v8614_v55 }
 0x312   : > { %7429 = vst [vmem:[#allocation3 + $0x10] sm:$0xff] %v7401_v5  }
 0x313   : > { %v2294_v54 = vadd.f32 %v2261_v53, %v9588_v40  ;;  %v2863_v59 = vpop.f32.mrf.mxu1  ;;  %2951 = vst [vmem:[#allocation4 + $0x48] sm:$0xff] %v8614_v55 }
 0x314   : > { %v2864_v14 = vadd.f32 %v10671_v57, %v2863_v59 }
 0x315   : > { %2310 = vst [vmem:[#allocation2 + $0x50] sm:$0xff] %v2294_v54 }
 0x316   : > { %v2894_v51 = vadd.f32 %v2864_v14, %v9630_v28 }
 0x318   : > { %v2262_v43 = vpop.f32.mrf.mxu3 }
 0x319   : > { %v2263_v8 = vadd.f32 %v10680_v15, %v2262_v43 }
 0x31b   : > { %v2295_v27 = vadd.f32 %v2263_v8, %v9599_v3  ;;  %v2865_v23 = vpop.f32.mrf.mxu1 }
 0x31c   : > { %v2866_v34 = vadd.f32 %v10671_v57, %v2865_v23 }
 0x31d   : > { %2311 = vst [vmem:[#allocation2 + $0x68] sm:$0xff] %v2295_v27 }
 0x31e   : > { %v2895_v45 = vadd.f32 %v2866_v34, %v9641_v24 }
 0x320   : > { %v7406_v25 = vpack.c.bf16 %v2895_v45, %v2894_v51  ;;  %v2265_v6 = vpop.f32.mrf.mxu3 }
 0x321   : > { %v2266_v40 = vadd.f32 %v10680_v15, %v2265_v6 }
 0x322   : > { %7430 = vst [vmem:[#allocation3 + $0x20] sm:$0xff] %v7406_v25  }
 0x323   : > { %v2296_v10 = vadd.f32 %v2266_v40, %v9630_v28 }
 0x325   : > { %2312 = vst [vmem:[#allocation2 + $0x8] sm:$0xff] %v2296_v10 }
 0x327   : > { %v2868_v42 = vpop.f32.mrf.mxu1 }
 0x328   : > { %v2267_v12 = vpop.f32.mrf.mxu3  ;;  %v2869_v33 = vadd.f32 %v10671_v57, %v2868_v42 }
 0x329   : > { %v2268_v3 = vadd.f32 %v10680_v15, %v2267_v12 }
 0x32a   : > { %v2896_v32 = vadd.f32 %v2869_v33, %v9606_v9 }
 0x32b   : > { %v2297_v13 = vadd.f32 %v2268_v3, %v9641_v24 }
 0x32d   : > { %2313 = vst [vmem:[#allocation2 + $0x48] sm:$0xff] %v2297_v13 }
 0x32f   : > { %v2870_v1 = vpop.f32.mrf.mxu1 }
 0x330   : > { %v2871_v47 = vadd.f32 %v10671_v57, %v2870_v1 }
 0x332   : > { %v2897_v30 = vadd.f32 %v2871_v47, %v9616_v18 }
 0x334   : > { %v2270_v16 = vpop.f32.mrf.mxu3  ;;  %v7411_v37 = vpack.c.bf16 %v2897_v30, %v2896_v32 }
 0x335   : > { %v2271_v28 = vadd.f32 %v10680_v15, %v2270_v16 }
 0x336   : > { %7431 = vst [vmem:[#allocation3 + $0x18] sm:$0xff] %v7411_v37  }
 0x337   : > { %v2298_v62 = vadd.f32 %v2271_v28, %v9606_v9  ;;  %v2873_v26 = vpop.f32.mrf.mxu1 }
 0x338   : > { %v2874_v35 = vadd.f32 %v10671_v57, %v2873_v26 }
 0x339   : > { %2314 = vst [vmem:[#allocation2 + $0x40] sm:$0xff] %v2298_v62 }
 0x33a   : > { %v2898_v4 = vadd.f32 %v2874_v35, %v9674_v21 }
 0x33c   : > { %v2272_v24 = vpop.f32.mrf.mxu3 }
 0x33d   : > { %v2273_v56 = vadd.f32 %v10680_v15, %v2272_v24 }
 0x33f   : > { %v2299_v63 = vadd.f32 %v2273_v56, %v9616_v18  ;;  %v2875_v44 = vpop.f32.mrf.mxu1 }
 0x340   : > { %v2876_v48 = vadd.f32 %v10671_v57, %v2875_v44 }
 0x341   : > { %2315 = vst [vmem:[#allocation2 + $0x20] sm:$0xff] %v2299_v63 }
 0x342   : > { %v2899_v60 = vadd.f32 %v2876_v48, %v9662_v36 }
 0x344   : > { %v2275_v19 = vpop.f32.mrf.mxu3  ;;  %v7416_v46 = vpack.c.bf16 %v2899_v60, %v2898_v4 }
 0x345   : > { %v2276_v9 = vadd.f32 %v10680_v15, %v2275_v19 }
 0x346   : > { %7432 = vst [vmem:[#allocation3 + $0x8] sm:$0xff] %v7416_v46  }
 0x347   : > { %v2300_v49 = vadd.f32 %v2276_v9, %v9674_v21 }
 0x349   : > { %2316 = vst [vmem:[#allocation2 + $0x10] sm:$0xff] %v2300_v49 }
 0x34a   : > { %v2878_v2 = vpop.f32.mrf.mxu1 }
 0x34b   : > { %v2879_v29 = vadd.f32 %v10671_v57, %v2878_v2 }
 0x34c   : > { %v2277_v20 = vpop.f32.mrf.mxu3 }
 0x34d   : > { %v2278_v18 = vadd.f32 %v10680_v15, %v2277_v20  ;;  %v2900_v41 = vadd.f32 %v2879_v29, %v9712_v17 }
 0x34f   : > { %v2301_v31 = vadd.f32 %v2278_v18, %v9662_v36 }
 0x351   : > { %2317 = vst [vmem:[#allocation2 + $0x38] sm:$0xff] %v2301_v31 }
 0x352   : > { %v2880_v11 = vpop.f32.mrf.mxu1 }
 0x353   : > { %v2881_v58 = vadd.f32 %v10671_v57, %v2880_v11 }
 0x354   : > { %v2280_v0 = vpop.f32.mrf.mxu3 }
 0x355   : > { %v2281_v21 = vadd.f32 %v10680_v15, %v2280_v0  ;;  %v2901_v38 = vadd.f32 %v2881_v58, %v9697_v52 }
 0x357   : > { %v2302_v36 = vadd.f32 %v2281_v21, %v9712_v17  ;;  %v7421_v22 = vpack.c.bf16 %v2901_v38, %v2900_v41 }
 0x359   : > { %2318 = vst [vmem:[#allocation2 + $0x60] sm:$0xff] %v2302_v36 }
 0x35a   : > { %7433 = vst [vmem:[#allocation3 + $0x38] sm:$0xff] %v7421_v22   ;;  %v2883_v7 = vpop.f32.mrf.mxu1 }
 0x35b   : > { %v2884_v17 = vadd.f32 %v10671_v57, %v2883_v7 }
 0x35c   : > { %v2282_v5 = vpop.f32.mrf.mxu3 }
 0x35d   : > { %v2283_v39 = vadd.f32 %v10680_v15, %v2282_v5  ;;  %v2902_v14 = vadd.f32 %v2884_v17, %v9768_v61 }
 0x35f   : > { %v2303_v53 = vadd.f32 %v2283_v39, %v9697_v52 }
 0x361   : > { %2319 = vst [vmem:[#allocation2 + $0x70] sm:$0xff] %v2303_v53 }
 0x362   : > { %v2885_v54 = vpop.f32.mrf.mxu1 }
 0x363   : > { %v2886_v43 = vadd.f32 %v10671_v57, %v2885_v54 }
 0x364   : > { %v2285_v59 = vpop.f32.mrf.mxu3 }
 0x365   : > { %v2286_v8 = vadd.f32 %v10680_v15, %v2285_v59  ;;  %v2903_v27 = vadd.f32 %v2886_v43, %v9756_v50 }
 0x367   : > { %v2304_v52 = vadd.f32 %v2286_v8, %v9768_v61  ;;  %v7426_v23 = vpack.c.bf16 %v2903_v27, %v2902_v14 }
 0x369   : > { %2320 = vst [vmem:[#allocation2 + $0x78] sm:$0xff] %v2304_v52 }
 0x36a   : > { %7434 = vst [vmem:[#allocation3 + $0x30] sm:$0xff] %v7426_v23  }
 0x36c   : > { %v2287_v34 = vpop.f32.mrf.mxu3 }
 0x36d   : > { %v2288_v51 = vadd.f32 %v10680_v15, %v2287_v34 }
 0x36f   : > { %v2305_v45 = vadd.f32 %v2288_v51, %v9756_v50 }
 0x371   : > { %2321 = vst [vmem:[#allocation2 + $0x28] sm:$0xff] %v2305_v45 }
 0x372 PF: > { %v3133_v57 = vld [vmem:[%s8801_s25 + $0x10] sm:$0xff]  ;;  %v3131_v25 = vld [vmem:[%s8801_s25] sm:$0xff]  ;;  %v8615_v6 = vmov 0   ;;  %v3134_v50 = vld [vmem:[%s8801_s25 + $0x18] sm:$0xff]  ;;  %v3129_v29 = vlaneseq  ;;  %v8616_v38 = vmov 1.0|1.0  }
 0x373   : > { %7939 = vset.pattern.permute.xlu1 %v8615_v6  ;;  %7938 = vset.pattern.permute.xlu0 %v8615_v6  ;;  %v3135_v61 = vld [vmem:[%s8801_s25 + $0x20] sm:$0xff]  ;;  %v3132_v15 = vld [vmem:[%s8801_s25 + $0x8] sm:$0xff]  ;;  %v7330_v42 = vld [vmem:[#allocation13 + $0x30] sm:$0xff]  ;;  %p6970_p1 = scmp.ne.s32.totalorder %s8700_s20, 1 }
 0x374   : > { %3154 = vperm.xlu1 %7939, %v3133_v57   ;;  %3148 = vperm.xlu0 %7938, %v3131_v25   ;;  %v3136_v40 = vld [vmem:[%s8801_s25 + $0x28] sm:$0xff]  ;;  %v7331_v10 = vld [vmem:[#allocation13 + $0x38] sm:$0xff]  ;;  %v7339_v12 = vld [vmem:[#allocation3 + $0x30] sm:$0xff]  ;;  %v3130_v58 = vand.u32 127, %v3129_v29 }
 0x375   : > { %7940 = vset.pattern.permute.xlu2 %v8615_v6  ;;  %7451 = vmatpush.bf16.msra.mxu3 %v7331_v10  ;;  %v3138_v3 = vld [vmem:[%s8801_s25 + $0x38] sm:$0xff]  ;;  %v3137_v13 = vld [vmem:[%s8801_s25 + $0x30] sm:$0xff]  ;;  %v3143_v47 = vld [vmem:[%s8801_s25 + $0x60] sm:$0xff] }
 0x376   : > { %3160 = vperm.xlu2 %7940, %v3135_v61   ;;  %3080 = vmatpush.bf16.msra.mxu0 %v7331_v10  ;;  %v7338_v33 = vld [vmem:[#allocation3 + $0x38] sm:$0xff]  ;;  %v7329_v1 = vld [vmem:[#allocation13 + $0x28] sm:$0xff]  ;;  %v7337_v32 = vld [vmem:[#allocation3 + $0x8] sm:$0xff] }
 0x377   : > { %3315 = vmatpush.bf16.msra.mxu1 %v7339_v12  ;;  %v7328_v30 = vld [vmem:[#allocation13 + $0x20] sm:$0xff]  ;;  %v3139_v16 = vld [vmem:[%s8801_s25 + $0x40] sm:$0xff]  ;;  %v7336_v28 = vld [vmem:[#allocation3 + $0x18] sm:$0xff] }
 0x378   : > { %v3144_v37 = vld [vmem:[%s8801_s25 + $0x68] sm:$0xff]  ;;  %v7327_v62 = vld [vmem:[#allocation13 + $0x18] sm:$0xff]  ;;  %v7326_v56 = vld [vmem:[#allocation13 + $0x10] sm:$0xff] }
 0x379   : > { %7452 = vmatpush.bf16.msra.mxu3 %v7330_v42  ;;  %v3140_v26 = vld [vmem:[%s8801_s25 + $0x48] sm:$0xff]  ;;  %v7335_v24 = vld [vmem:[#allocation3 + $0x20] sm:$0xff]  ;;  %v3146_v35 = vld [vmem:[%s8801_s25 + $0x78] sm:$0xff] }
 0x37a   : > { %3081 = vmatpush.bf16.msra.mxu0 %v7330_v42  ;;  %v3145_v63 = vld [vmem:[%s8801_s25 + $0x70] sm:$0xff]  ;;  %v7324_v60 = vld [vmem:[#allocation13] sm:$0xff]  ;;  %v3142_v19 = vld [vmem:[%s8801_s25 + $0x58] sm:$0xff] }
 0x37b   : > { %3316 = vmatpush.bf16.msra.mxu1 %v7338_v33  ;;  %v7334_v44 = vld [vmem:[#allocation3 + $0x10] sm:$0xff]  ;;  %v7316_v9 = vld [vmem:[%s8796_s26] sm:$0xff]  ;;  %v7332_v2 = vld [vmem:[#allocation3 + $0x28] sm:$0xff] }
 0x37c   : > { %3157 = vperm.xlu1 %7939, %v3134_v50   ;;  %3151 = vperm.xlu0 %7938, %v3132_v15   ;;  %v7325_v48 = vld [vmem:[#allocation13 + $0x8] sm:$0xff]  ;;  %v7333_v49 = vld [vmem:[#allocation3] sm:$0xff]  ;;  %v7323_v20 = vld [vmem:[%s8796_s26 + $0x38] sm:$0xff] }
 0x37d   : > { %7453 = vmatpush.bf16.msra.mxu3 %v7329_v1  ;;  %v3141_v4 = vld [vmem:[%s8801_s25 + $0x50] sm:$0xff]  ;;  %v7317_v18 = vld [vmem:[%s8796_s26 + $0x8] sm:$0xff]  ;;  %v7319_v7 = vld [vmem:[%s8796_s26 + $0x18] sm:$0xff] }
 0x37e   : > { %3163 = vperm.xlu2 %7940, %v3136_v40   ;;  %3082 = vmatpush.bf16.msra.mxu0 %v7329_v1  ;;  %v7322_v46 = vld [vmem:[%s8796_s26 + $0x30] sm:$0xff]  ;;  %v7320_v54 = vld [vmem:[%s8796_s26 + $0x20] sm:$0xff]  ;;  %v7321_v8 = vld [vmem:[%s8796_s26 + $0x28] sm:$0xff] }
 0x37f   : > { %3317 = vmatpush.bf16.msra.mxu1 %v7337_v32  ;;  %v7318_v11 = vld [vmem:[%s8796_s26 + $0x10] sm:$0xff] }
 0x381   : > { %7454 = vmatpush.bf16.msra.mxu3 %v7328_v30 }
 0x382   : > { %3083 = vmatpush.bf16.msra.mxu0 %v7328_v30 }
 0x383   : > { %3318 = vmatpush.bf16.msra.mxu1 %v7336_v28 }
 0x384   : > { %3169 = vperm.xlu1 %7939, %v3138_v3   ;;  %3166 = vperm.xlu0 %7938, %v3137_v13  }
 0x385   : > { %7455 = vmatpush.bf16.msra.mxu3 %v7327_v62 }
 0x386   : > { %3184 = vperm.xlu2 %7940, %v3143_v47   ;;  %3084 = vmatpush.bf16.msra.mxu0 %v7327_v62 }
 0x387   : > { %3319 = vmatpush.bf16.msra.mxu1 %v7335_v24 }
 0x389   : > { %7456 = vmatpush.bf16.msra.mxu3 %v7326_v56 }
 0x38a   : > { %3085 = vmatpush.bf16.msra.mxu0 %v7326_v56 }
 0x38b   : > { %3320 = vmatpush.bf16.msra.mxu1 %v7334_v44 }
 0x38c   : > { %3172 = vperm.xlu1 %7939, %v3139_v16   ;;  %3187 = vperm.xlu0 %7938, %v3144_v37  }
 0x38d   : > { %7457 = vmatpush.bf16.msra.mxu3 %v7325_v48 }
 0x38e   : > { %3175 = vperm.xlu2 %7940, %v3140_v26   ;;  %3086 = vmatpush.bf16.msra.mxu0 %v7325_v48 }
 0x38f   : > { %3321 = vmatpush.bf16.msra.mxu1 %v7333_v49 }
 0x391   : > { %7458 = vmatpush.bf16.msra.mxu3 %v7324_v60 }
 0x392   : > { %3087 = vmatpush.bf16.msra.mxu0 %v7324_v60 }
 0x393   : > { %3322 = vmatpush.bf16.msra.mxu1 %v7332_v2 }
 0x394   : > { %3193 = vperm.xlu1 %7939, %v3146_v35   ;;  %3190 = vperm.xlu0 %7938, %v3145_v63  }
 0x395   : > { %7459 = vmatpush.bf16.msrb.mxu3 %v7339_v12  ;;  %3088 = vmatmul.bf16.vlgmr.msra.gmra.mxu0 %v7316_v9 }
 0x396   : > { %3178 = vperm.xlu2 %7940, %v3141_v4   ;;  %3118 = vmatmul.bf16.vlgmr.msra.gmra.mxu3 %v7322_v46 }
 0x399   : > { %7460 = vmatpush.bf16.msrb.mxu3 %v7338_v33 }
 0x39c   : > { %3181 = vperm.xlu0 %7938, %v3142_v19  }
 0x39d   : > { %7461 = vmatpush.bf16.msrb.mxu3 %v7337_v32 }
 0x3a1   : > { %7462 = vmatpush.bf16.msrb.mxu3 %v7336_v28 }
 0x3a5   : > { %7463 = vmatpush.bf16.msrb.mxu3 %v7335_v24  ;;  %3093 = vmatmul.bf16.gmra.mxu0 %v7317_v18 }
 0x3a6   : > { %3123 = vmatmul.bf16.gmra.mxu3 %v7323_v20 }
 0x3a9   : > { %7464 = vmatpush.bf16.msrb.mxu3 %v7334_v44 }
 0x3ad   : > { %7465 = vmatpush.bf16.msrb.mxu3 %v7333_v49 }
 0x3b1   : > { %7466 = vmatpush.bf16.msrb.mxu3 %v7332_v2 }
 0x3b5   : > { %3098 = vmatmul.bf16.gmra.mxu0 %v7318_v11 }
 0x3c5   : > { %3103 = vmatmul.bf16.gmra.mxu0 %v7319_v7 }
 0x3d0   : > { %v3161_v0 = vpop.permute.xlu2 %3160 }
 0x3d1   : > { %vm3199_vm9 = vcmp.eq.s32.totalorder %v3130_v58, %v3161_v0 }
 0x3d5   : > { %3108 = vmatmul.bf16.gmra.mxu0 %v7320_v54  ;;  %v3389_v54 = vshrl.u32 %v3129_v29, 7 }
 0x3d7   : > { %v3401_v29 = vadd.s32 96, %v3389_v54 }
 0x3d8   : > { %v3164_v36 = vpop.permute.xlu2 %3163 }
 0x3d9   : > { %vm3200_vm10 = vcmp.eq.s32.totalorder %v3130_v58, %v3164_v36 }
 0x3da   : > { %vm6926_vm13 = vmpackc.low %vm3200_vm10, %vm3199_vm9 }
 0x3e0   : > { %v3185_v39 = vpop.permute.xlu2 %3184 }
 0x3e1   : > { %vm3207_vm5 = vcmp.eq.s32.totalorder %v3130_v58, %v3185_v39 }
 0x3e5   : > { %3113 = vmatmul.bf16.gmra.mxu0 %v7321_v8  ;;  %v7941_v8 = vld [vmem:[%s8778_s16] ss:$0 sm:$0xff] }
 0x3e6   : > { %v3155_v31 = vpop.permute.xlu1 %3154  ;;  %v3149_v55 = vpop.permute.xlu0 %3148 }
 0x3e7   : > { %vm3195_vm1 = vcmp.eq.s32.totalorder %v3130_v58, %v3149_v55  ;;  %vm3197_vm3 = vcmp.eq.s32.totalorder %v3130_v58, %v3155_v31 }
 0x3e8   : > { %v3176_v14 = vpop.permute.xlu2 %3175 }
 0x3ee   : > { %v3158_v21 = vpop.permute.xlu1 %3157  ;;  %v3152_v41 = vpop.permute.xlu0 %3151 }
 0x3ef   : > { %vm3196_vm0 = vcmp.eq.s32.totalorder %v3130_v58, %v3152_v41  ;;  %vm3198_vm4 = vcmp.eq.s32.totalorder %v3130_v58, %v3158_v21 }
 0x3f0   : > { %vm6922_vm2 = vmpackc.low %vm3196_vm0, %vm3195_vm1  ;;  %v3179_v52 = vpop.permute.xlu2 %3178 }
 0x3f1   : > { %6923 = vmatmul.msk.bf16.vlgmr.msra.gmra.mxu1 %vm6922_vm2, %v8616_v38  ;;  %vm6924_vm7 = vmpackc.low %vm3198_vm4, %vm3197_vm3  ;;  %vm3204_vm2 = vcmp.eq.s32.totalorder %v3130_v58, %v3176_v14  ;;  %v3391_v14 = vadd.s32 16, %v3389_v54 }
 0x3f6   : > { %v3167_v22 = vpop.permute.xlu0 %3166  ;;  %v3170_v5 = vpop.permute.xlu1 %3169 }
 0x3f7   : > { %vm3202_vm15 = vcmp.eq.s32.totalorder %v3130_v58, %v3170_v5  ;;  %vm3201_vm0 = vcmp.eq.s32.totalorder %v3130_v58, %v3167_v22 }
 0x3f8   : > { %vm6928_vm1 = vmpackc.low %vm3202_vm15, %vm3201_vm0 }
 0x3fe   : > { %v3188_v53 = vpop.permute.xlu0 %3187  ;;  %v3173_v17 = vpop.permute.xlu1 %3172 }
 0x3ff   : > { %vm3208_vm6 = vcmp.eq.s32.totalorder %v3130_v58, %v3188_v53  ;;  %vm3203_vm3 = vcmp.eq.s32.totalorder %v3130_v58, %v3173_v17 }
 0x400   : > { %vm6934_vm8 = vmpackc.low %vm3208_vm6, %vm3207_vm5  ;;  %vm3205_vm6 = vcmp.eq.s32.totalorder %v3130_v58, %v3179_v52  ;;  %v3402_v52 = vadd.s32 104, %v3389_v54 }
 0x401   : > { %6925 = vmatmul.msk.bf16.gmra.mxu1 %vm6924_vm7, %v8616_v38  ;;  %6935 = vmatmul.msk.bf16.vlgmr.msrb.gmra.mxu3 %vm6934_vm8, %v8616_v38  ;;  %vm6930_vm4 = vmpackc.low %vm3204_vm2, %vm3203_vm3  ;;  %vm3407_vm8 = vcmp.eq.s32.totalorder %v3389_v54, %v7941_v8 }
 0x402   : > { %vm3420_vm15 = vcmp.eq.s32.totalorder %v3402_v52, %v7941_v8 }
 0x406   : > { %v3194_v59 = vpop.permute.xlu1 %3193  ;;  %v3191_v43 = vpop.permute.xlu0 %3190 }
 0x407   : > { %vm3210_vm11 = vcmp.eq.s32.totalorder %v3130_v58, %v3194_v59  ;;  %vm3209_vm12 = vcmp.eq.s32.totalorder %v3130_v58, %v3191_v43  ;;  %v3390_v43 = vadd.s32 8, %v3389_v54 }
 0x408   : > { %vm6936_vm14 = vmpackc.low %vm3210_vm11, %vm3209_vm12  ;;  %vm3409_vm11 = vcmp.eq.s32.totalorder %v3391_v14, %v7941_v8 }
 0x409   : > { %vm3408_vm9 = vcmp.eq.s32.totalorder %v3390_v43, %v7941_v8 }
 0x40a   : > { %vm6954_vm10 = vmpackc.low %vm3408_vm9, %vm3407_vm8 }
 0x40e   : > { %v3182_v27 = vpop.permute.xlu0 %3181 }
 0x40f   : > { %vm3206_vm5 = vcmp.eq.s32.totalorder %v3130_v58, %v3182_v27  ;;  %v3392_v27 = vadd.s32 24, %v3389_v54 }
 0x410   : > { %vm6932_vm7 = vmpackc.low %vm3206_vm5, %vm3205_vm6 }
 0x411   : > { %6927 = vmatmul.msk.bf16.gmra.mxu1 %vm6926_vm13, %v8616_v38  ;;  %6937 = vmatmul.msk.bf16.gmra.mxu3 %vm6936_vm14, %v8616_v38  ;;  %vm3410_vm12 = vcmp.eq.s32.totalorder %v3392_v27, %v7941_v8  ;;  %vm3419_vm14 = vcmp.eq.s32.totalorder %v3401_v29, %v7941_v8 }
 0x412   : > { %v3089_v23 = vpop.f32.mrf.mxu0  ;;  %vm6956_vm13 = vmpackc.low %vm3410_vm12, %vm3409_vm11 }
 0x413   : > { %vm6966_vm0 = vmpackc.low %vm3420_vm15, %vm3419_vm14 }
 0x419   : > { %v3119_v34 = vpop.f32.mrf.mxu3 }
 0x41a   : > { %v3091_v51 = vpop.f32.mrf.mxu0 }
 0x421   : > { %6929 = vmatmul.msk.bf16.gmra.mxu1 %vm6928_vm1, %v8616_v38  ;;  %v3121_v45 = vpop.f32.mrf.mxu3 }
 0x422   : > { %v3094_v57 = vpop.f32.mrf.mxu0 }
 0x429   : > { %v3124_v61 = vpop.f32.mrf.mxu3 }
 0x42a   : > { %v3096_v15 = vpop.f32.mrf.mxu0 }
 0x431   : > { %6931 = vmatmul.msk.bf16.gmra.mxu1 %vm6930_vm4, %v8616_v38  ;;  %v3126_v42 = vpop.f32.mrf.mxu3 }
 0x432   : > { %v3099_v13 = vpop.f32.mrf.mxu0 }
 0x43a   : > { %v3101_v30 = vpop.f32.mrf.mxu0 }
 0x441   : > { %6933 = vmatmul.msk.bf16.gmra.mxu1 %vm6932_vm7, %v8616_v38 }
 0x442   : > { %v3104_v26 = vpop.f32.mrf.mxu0 }
 0x44a   : > { %v3106_v44 = vpop.f32.mrf.mxu0 }
 0x452   : > { %v3109_v49 = vpop.f32.mrf.mxu0 }
 0x45a   : > { %v3111_v20 = vpop.f32.mrf.mxu0 }
 0x462   : > { %v3114_v31 = vpop.f32.mrf.mxu0 }
 0x46a   : > { %v3116_v11 = vpop.f32.mrf.mxu0 }
 0x46e   : > { %v3324_v25 = vpop.f32.mrf.mxu1 }
 0x46f   : > { %v3364_v6 = vmul.f32 %v3324_v25, %v3089_v23  ;;  %v3393_v23 = vadd.s32 32, %v3389_v54  ;;  %v3396_v25 = vadd.s32 56, %v3389_v54 }
 0x471   : > { %vm3411_vm1 = vcmp.eq.s32.totalorder %v3393_v23, %v7941_v8  ;;  %vm3414_vm8 = vcmp.eq.s32.totalorder %v3396_v25, %v7941_v8 }
 0x476   : > { %v3326_v50 = vpop.f32.mrf.mxu1 }
 0x477   : > { %v3365_v40 = vmul.f32 %v3326_v50, %v3091_v51  ;;  %v3403_v51 = vadd.s32 112, %v3389_v54  ;;  %v3399_v50 = vadd.s32 80, %v3389_v54 }
 0x479   : > { %v10780_v10 = vpack.c.bf16 %v3365_v40, %v3364_v6  ;;  %vm3421_vm4 = vcmp.eq.s32.totalorder %v3403_v51, %v7941_v8  ;;  %v3397_v6 = vadd.s32 64, %v3389_v54  ;;  %v3463_v40 = vld [vmem:[#allocation4 + $0x30] sm:$0xff] }
 0x47e   : > { %v3329_v12 = vpop.f32.mrf.mxu1 }
 0x47f   : > { %v3366_v3 = vmul.f32 %v3329_v12, %v3094_v57  ;;  %v3395_v57 = vadd.s32 48, %v3389_v54  ;;  %v3464_v12 = vld [vmem:[#allocation4] sm:$0xff] }
 0x481   : > { %vm3413_vm7 = vcmp.eq.s32.totalorder %v3395_v57, %v7941_v8 }
 0x482   : > { %vm6960_vm9 = vmpackc.low %vm3414_vm8, %vm3413_vm7 }
 0x484   : > { %v3354_v33 = vpop.f32.mrf.mxu3 }
 0x485   : > { %v3376_v19 = vmul.f32 %v3354_v33, %v3119_v34  ;;  %v3394_v34 = vadd.s32 40, %v3389_v54  ;;  %v3465_v33 = vld [vmem:[#allocation4 + $0x40] sm:$0xff] }
 0x486   : > { %v3331_v1 = vpop.f32.mrf.mxu1 }
 0x487   : > { %v3367_v47 = vmul.f32 %v3331_v1, %v3096_v15  ;;  %vm3412_vm2 = vcmp.eq.s32.totalorder %v3394_v34, %v7941_v8  ;;  %v3400_v15 = vadd.s32 88, %v3389_v54 }
 0x488   : > { %vm6958_vm3 = vmpackc.low %vm3412_vm2, %vm3411_vm1 }
 0x489   : > { %v3381_v32 = vpack.c.bf16 %v3367_v47, %v3366_v3  ;;  %vm3418_vm14 = vcmp.eq.s32.totalorder %v3400_v15, %v7941_v8 }
 0x48c   : > { %v3356_v16 = vpop.f32.mrf.mxu3 }
 0x48d   : > { %v3377_v4 = vmul.f32 %v3356_v16, %v3121_v45  ;;  %v3404_v45 = vadd.s32 120, %v3389_v54 }
 0x48e   : > { %v3334_v37 = vpop.f32.mrf.mxu1 }
 0x48f   : > { %v3368_v28 = vmul.f32 %v3334_v37, %v3099_v13  ;;  %v3386_v46 = vpack.c.bf16 %v3377_v4, %v3376_v19  ;;  %vm3422_vm5 = vcmp.eq.s32.totalorder %v3404_v45, %v7941_v8  ;;  %v3477_v19 = vld [vmem:[#allocation4 + $0x68] sm:$0xff] }
 0x490   : > { %vm6968_vm6 = vmpackc.low %vm3422_vm5, %vm3421_vm4 }
 0x494   : > { %v3359_v62 = vpop.f32.mrf.mxu3 }
 0x495   : > { %v3378_v35 = vmul.f32 %v3359_v62, %v3124_v61  ;;  %v3398_v61 = vadd.s32 72, %v3389_v54 }
 0x496   : > { %v3336_v24 = vpop.f32.mrf.mxu1 }
 0x497   : > { %v3369_v53 = vmul.f32 %v3336_v24, %v3101_v30  ;;  %vm3416_vm11 = vcmp.eq.s32.totalorder %v3398_v61, %v7941_v8  ;;  %v3476_v24 = vld [vmem:[#allocation4 + $0x10] sm:$0xff] }
 0x499   : > { %v3382_v59 = vpack.c.bf16 %v3369_v53, %v3368_v28  ;;  %v3475_v28 = vld [vmem:[#allocation4 + $0x60] sm:$0xff] }
 0x49c   : > { %v3361_v56 = vpop.f32.mrf.mxu3 }
 0x49d   : > { %v3379_v63 = vmul.f32 %v3361_v56, %v3126_v42 }
 0x49e   : > { %v3339_v48 = vpop.f32.mrf.mxu1 }
 0x49f   : > { %v3387_v60 = vpack.c.bf16 %v3379_v63, %v3378_v35  ;;  %v3370_v39 = vmul.f32 %v3339_v48, %v3104_v26 }
 0x4a1   : > { %3479 = vmatpush.bf16.msra.mxu2 %v3387_v60  ;;  %7467 = vmatpush.bf16.msra.mxu3 %v3387_v60 }
 0x4a5   : > { %3480 = vmatpush.bf16.msra.mxu2 %v3386_v46  ;;  %7468 = vmatpush.bf16.msra.mxu3 %v3386_v46 }
 0x4a6   : > { %v3341_v9 = vpop.f32.mrf.mxu1 }
 0x4a7   : > { %v3371_v7 = vmul.f32 %v3341_v9, %v3106_v44  ;;  %v3468_v44 = vld [vmem:[#allocation4 + $0x28] sm:$0xff]  ;;  %v3469_v9 = vld [vmem:[#allocation4 + $0x38] sm:$0xff] }
 0x4a9   : > { %v3383_v17 = vpack.c.bf16 %v3371_v7, %v3370_v39 }
 0x4ae   : > { %v3344_v2 = vpop.f32.mrf.mxu1 }
 0x4af   : > { %v3372_v22 = vmul.f32 %v3344_v2, %v3109_v49  ;;  %v3478_v2 = vld [vmem:[#allocation4 + $0x48] sm:$0xff] }
 0x4b6   : > { %v3346_v18 = vpop.f32.mrf.mxu1 }
 0x4b7   : > { %v3373_v41 = vmul.f32 %v3346_v18, %v3111_v20 }
 0x4b9   : > { %v3384_v5 = vpack.c.bf16 %v3373_v41, %v3372_v22 }
 0x4be   : > { %v3349_v55 = vpop.f32.mrf.mxu1 }
 0x4bf   : > { %v3374_v58 = vmul.f32 %v3349_v55, %v3114_v31  ;;  %v3470_v55 = vld [vmem:[#allocation4 + $0x20] sm:$0xff] }
 0x4c6   : > { %v3351_v0 = vpop.f32.mrf.mxu1 }
 0x4c7   : > { %v3375_v21 = vmul.f32 %v3351_v0, %v3116_v11 }
 0x4c9   : > { %v3385_v36 = vpack.c.bf16 %v3375_v21, %v3374_v58  ;;  %v3471_v58 = vld [vmem:[#allocation4 + $0x78] sm:$0xff] }
 0x4cb   : > { %3481 = vmatpush.bf16.msra.mxu2 %v3385_v36  ;;  %7469 = vmatpush.bf16.msra.mxu3 %v3385_v36  ;;  %v3472_v36 = vld [vmem:[#allocation4 + $0x50] sm:$0xff] }
 0x4cf   : > { %3482 = vmatpush.bf16.msra.mxu2 %v3384_v5  ;;  %7470 = vmatpush.bf16.msra.mxu3 %v3384_v5  ;;  %v3473_v5 = vld [vmem:[#allocation4 + $0x18] sm:$0xff] }
 0x4d3   : > { %3483 = vmatpush.bf16.msra.mxu2 %v3383_v17  ;;  %7471 = vmatpush.bf16.msra.mxu3 %v3383_v17  ;;  %v3474_v17 = vld [vmem:[#allocation4 + $0x70] sm:$0xff] }
 0x4d7   : > { %3484 = vmatpush.bf16.msra.mxu2 %v3382_v59  ;;  %7472 = vmatpush.bf16.msra.mxu3 %v3382_v59 }
 0x4db   : > { %3485 = vmatpush.bf16.msra.mxu2 %v3381_v32  ;;  %7473 = vmatpush.bf16.msra.mxu3 %v3381_v32  ;;  %v3466_v32 = vld [vmem:[#allocation4 + $0x58] sm:$0xff] }
 0x4df   : > { %3486 = vmatpush.bf16.msra.mxu2 %v10780_v10  ;;  %7474 = vmatpush.bf16.msra.mxu3 %v10780_v10 }
 0x4e2   : > { %6955 = vmatmul.msk.bf16.vlgmr.msra.gmra.mxu2 %vm6954_vm10, %v8616_v38  ;;  %6967 = vmatmul.msk.bf16.vlgmr.msra.gmra.mxu3 %vm6966_vm0, %v8616_v38  ;;  %vm3415_vm10 = vcmp.eq.s32.totalorder %v3397_v6, %v7941_v8 }
 0x4e3   : > { %vm6962_vm12 = vmpackc.low %vm3416_vm11, %vm3415_vm10 }
 0x4f2   : > { %6957 = vmatmul.msk.bf16.gmra.mxu2 %vm6956_vm13, %v8616_v38  ;;  %6969 = vmatmul.msk.bf16.gmra.mxu3 %vm6968_vm6, %v8616_v38  ;;  %vm3417_vm13 = vcmp.eq.s32.totalorder %v3399_v50, %v7941_v8 }
 0x4f3   : > { %vm6964_vm15 = vmpackc.low %vm3418_vm14, %vm3417_vm13 }
 0x502   : > { %6959 = vmatmul.msk.bf16.gmra.mxu2 %vm6958_vm3, %v8616_v38 }
 0x512   : > { %6961 = vmatmul.msk.bf16.gmra.mxu2 %vm6960_vm9, %v8616_v38 }
 0x522   : > { %6963 = vmatmul.msk.bf16.gmra.mxu2 %vm6962_vm12, %v8616_v38 }
 0x532   : > { %6965 = vmatmul.msk.bf16.gmra.mxu2 %vm6964_vm15, %v8616_v38  ;;  %v3467_v38 = vld [vmem:[#allocation4 + $0x8] sm:$0xff] }
 0x565   : > { %v3488_v10 = vpop.f32.mrf.mxu2  ;;  %v3518_v16 = vpop.f32.mrf.mxu3 }
 0x566   : > { %v3528_v42 = vadd.f32 %v3488_v10, %v3463_v40  ;;  %v3540_v62 = vadd.f32 %v3518_v16, %v3475_v28 }
 0x568   : > { %3544 = vst [vmem:[#allocation4 + $0x30] sm:$0xff] %v3528_v42 }
 0x569   : > { %3556 = vst [vmem:[#allocation4 + $0x60] sm:$0xff] %v3540_v62 }
 0x56d   : > { %v3490_v3 = vpop.f32.mrf.mxu2  ;;  %v3520_v56 = vpop.f32.mrf.mxu3 }
 0x56e   : > { %v3529_v13 = vadd.f32 %v3490_v3, %v3464_v12  ;;  %v3541_v63 = vadd.f32 %v3520_v56, %v3476_v24 }
 0x570   : > { %3545 = vst [vmem:[#allocation4] sm:$0xff] %v3529_v13 }
 0x571   : > { %3557 = vst [vmem:[#allocation4 + $0x10] sm:$0xff] %v3541_v63 }
 0x575   : > { %v3493_v1 = vpop.f32.mrf.mxu2  ;;  %v3523_v4 = vpop.f32.mrf.mxu3 }
 0x576   : > { %v3530_v47 = vadd.f32 %v3493_v1, %v3465_v33  ;;  %v3542_v46 = vadd.f32 %v3523_v4, %v3477_v19 }
 0x578   : > { %3546 = vst [vmem:[#allocation4 + $0x40] sm:$0xff] %v3530_v47 }
 0x579   : > { %3558 = vst [vmem:[#allocation4 + $0x68] sm:$0xff] %v3542_v46 }
 0x57d   : > { %v3495_v30 = vpop.f32.mrf.mxu2  ;;  %v3525_v20 = vpop.f32.mrf.mxu3 }
 0x57e   : > { %v3531_v37 = vadd.f32 %v3495_v30, %v3466_v32  ;;  %v3543_v31 = vadd.f32 %v3525_v20, %v3478_v2 }
 0x580   : > { %3547 = vst [vmem:[#allocation4 + $0x58] sm:$0xff] %v3531_v37 }
 0x581   : > { %3559 = vst [vmem:[#allocation4 + $0x48] sm:$0xff] %v3543_v31 }
 0x585   : > { %v3498_v26 = vpop.f32.mrf.mxu2 }
 0x586   : > { %v3532_v35 = vadd.f32 %v3498_v26, %v3467_v38 }
 0x588   : > { %3548 = vst [vmem:[#allocation4 + $0x8] sm:$0xff] %v3532_v35 }
 0x58d   : > { %v3500_v48 = vpop.f32.mrf.mxu2 }
 0x58e   : > { %v3533_v60 = vadd.f32 %v3500_v48, %v3468_v44 }
 0x590   : > { %3549 = vst [vmem:[#allocation4 + $0x28] sm:$0xff] %v3533_v60 }
 0x595   : > { %v3503_v49 = vpop.f32.mrf.mxu2 }
 0x596   : > { %v3534_v18 = vadd.f32 %v3503_v49, %v3469_v9 }
 0x598   : > { %3550 = vst [vmem:[#allocation4 + $0x38] sm:$0xff] %v3534_v18 }
 0x59d   : > { %v3505_v11 = vpop.f32.mrf.mxu2 }
 0x59e   : > { %v3535_v0 = vadd.f32 %v3505_v11, %v3470_v55 }
 0x5a0   : > { %3551 = vst [vmem:[#allocation4 + $0x20] sm:$0xff] %v3535_v0 }
 0x5a5   : > { %v3508_v21 = vpop.f32.mrf.mxu2 }
 0x5a6   : > { %v3536_v41 = vadd.f32 %v3508_v21, %v3471_v58 }
 0x5a8   : > { %3552 = vst [vmem:[#allocation4 + $0x78] sm:$0xff] %v3536_v41 }
 0x5ad   : > { %v3510_v22 = vpop.f32.mrf.mxu2 }
 0x5ae   : > { %v3537_v7 = vadd.f32 %v3510_v22, %v3472_v36 }
 0x5b0   : > { %3553 = vst [vmem:[#allocation4 + $0x50] sm:$0xff] %v3537_v7 }
 0x5b5   : > { %v3513_v39 = vpop.f32.mrf.mxu2 }
 0x5b6   : > { %v3538_v53 = vadd.f32 %v3513_v39, %v3473_v5 }
 0x5b8   : > { %3554 = vst [vmem:[#allocation4 + $0x18] sm:$0xff] %v3538_v53 }
 0x5bc   : > { %3563 = sbr.rel (%p6970_p1) target bundleno = 2626 (0xa42), region = 84 }
 0x5bd   : > { %v3515_v54 = vpop.f32.mrf.mxu2 }
 0x5be   : > { %v3539_v59 = vadd.f32 %v3515_v54, %v3474_v17 }
 0x5c0   : > { %3555 = vst [vmem:[#allocation4 + $0x70] sm:$0xff] %v3539_v59 }
 0x5c1   : > { %v7347_v43 = vld [vmem:[#allocation8 + $0xf8] sm:$0xff]  ;;  %v7346_v8 = vld [vmem:[#allocation8 + $0xf0] sm:$0xff]  ;;  %v7345_v23 = vld [vmem:[#allocation8 + $0xe8] sm:$0xff] }
 0x5c2   : > { %4010 = vmatpush.bf16.msra.mxu0 %v7347_v43  ;;  %7475 = vmatpush.bf16.msra.mxu2 %v7347_v43  ;;  %v3564_v14 = vld [vmem:[#allocation2 + $0x30] sm:$0xff]  ;;  %v3565_v27 = vld [vmem:[#allocation2] sm:$0xff]  ;;  %v3588_v25 = vld [vmem:[#allocation4 + $0x78] sm:$0xff] }
 0x5c3   : > { %v3580_v29 = vld [vmem:[#allocation4 + $0x30] sm:$0xff]  ;;  %v3581_v52 = vld [vmem:[#allocation4] sm:$0xff]  ;;  %v3566_v50 = vld [vmem:[#allocation2 + $0x58] sm:$0xff] }
 0x5c4   : > { %v10795_v34 = vadd.f32 %v3580_v29, %v3564_v14  ;;  %v10797_v51 = vadd.f32 %v3581_v52, %v3565_v27  ;;  %v3572_v45 = vld [vmem:[#allocation2 + $0x40] sm:$0xff]  ;;  %v3589_v6 = vld [vmem:[#allocation4 + $0x50] sm:$0xff]  ;;  %v3567_v15 = vld [vmem:[#allocation2 + $0x18] sm:$0xff] }
 0x5c5   : > { %v3573_v57 = vld [vmem:[#allocation2 + $0x20] sm:$0xff]  ;;  %v10799_v61 = vadd.f32 %v3588_v25, %v3572_v45  ;;  %v3583_v3 = vld [vmem:[#allocation4 + $0x58] sm:$0xff]  ;;  %v3574_v47 = vld [vmem:[#allocation2 + $0x10] sm:$0xff] }
 0x5c6   : > { %4011 = vmatpush.bf16.msra.mxu0 %v7346_v8  ;;  %7476 = vmatpush.bf16.msra.mxu2 %v7346_v8  ;;  %v6971_v40 = vmul.f32 -1.442695, %v10795_v34  ;;  %v6972_v10 = vmul.f32 -1.442695, %v10797_v51  ;;  %v10803_v42 = vadd.f32 %v3589_v6, %v3573_v57  ;;  %v3582_v12 = vld [vmem:[#allocation4 + $0x40] sm:$0xff]  ;;  %v10808_v1 = vadd.f32 %v3583_v3, %v3567_v15  ;;  %v3590_v32 = vld [vmem:[#allocation4 + $0x18] sm:$0xff] }
 0x5c7   : > { %v6979_v13 = vmul.f32 -1.442695, %v10799_v61  ;;  %v10806_v33 = vadd.f32 %v3582_v12, %v3566_v50  ;;  %v3575_v16 = vld [vmem:[#allocation2 + $0x38] sm:$0xff]  ;;  %v3591_v37 = vld [vmem:[#allocation4 + $0x70] sm:$0xff]  ;;  %v10811_v28 = vadd.f32 %v3590_v32, %v3574_v47  ;;  %v7344_v26 = vld [vmem:[#allocation8 + $0xe0] sm:$0xff] }
 0x5c8   : > { %7948 = vpow2.f32 %v6971_v40  ;;  %v6980_v30 = vmul.f32 -1.442695, %v10803_v42  ;;  %v6974_v38 = vmul.f32 -1.442695, %v10808_v1  ;;  %v3568_v24 = vld [vmem:[#allocation2 + $0x50] sm:$0xff]  ;;  %v3584_v56 = vld [vmem:[#allocation4 + $0x8] sm:$0xff]  ;;  %v10815_v35 = vadd.f32 %v3591_v37, %v3575_v16 }
 0x5c9   : > { %7950 = vpow2.f32 %v6972_v10  ;;  %v6973_v62 = vmul.f32 -1.442695, %v10806_v33  ;;  %v6981_v63 = vmul.f32 -1.442695, %v10811_v28  ;;  %v3569_v44 = vld [vmem:[#allocation2 + $0x68] sm:$0xff]  ;;  %v10818_v48 = vadd.f32 %v3584_v56, %v3568_v24  ;;  %v7343_v19 = vld [vmem:[#allocation8 + $0xd8] sm:$0xff] }
 0x5ca   : > { %4012 = vmatpush.bf16.msra.mxu0 %v7345_v23  ;;  %7477 = vmatpush.bf16.msra.mxu2 %v7345_v23  ;;  %7952 = vpow2.f32 %v6979_v13  ;;  %v3585_v4 = vld [vmem:[#allocation4 + $0x28] sm:$0xff]  ;;  %v6982_v49 = vmul.f32 -1.442695, %v10815_v35  ;;  %v3576_v2 = vld [vmem:[#allocation2 + $0x60] sm:$0xff]  ;;  %v7342_v21 = vld [vmem:[#allocation8 + $0xd0] sm:$0xff] }
 0x5cb   : > { %7954 = vpow2.f32 %v6980_v30  ;;  %v3592_v20 = vld [vmem:[#allocation4 + $0x60] sm:$0xff]  ;;  %v10825_v55 = vadd.f32 %v3585_v4, %v3569_v44  ;;  %v6975_v11 = vmul.f32 -1.442695, %v10818_v48  ;;  %v7341_v14 = vld [vmem:[#allocation8 + $0xc8] sm:$0xff] }
 0x5cc   : > { %7956 = vpow2.f32 %v6973_v62  ;;  %v10832_v22 = vadd.f32 %v3592_v20, %v3576_v2  ;;  %v7340_v30 = vld [vmem:[#allocation8 + $0xc0] sm:$0xff] }
 0x5cd   : > { %7958 = vpow2.f32 %v6974_v38  ;;  %v10843_v59 = vmul.f32 -1.442695, %v10825_v55  ;;  %v3594_v57 = vld [vmem:[#allocation4 + $0x68] sm:$0xff] }
 0x5ce   : > { %v7949_v60 = vpop.eup %7948  ;;  %4013 = vmatpush.bf16.msra.mxu0 %v7344_v26  ;;  %7478 = vmatpush.bf16.msra.mxu2 %v7344_v26  ;;  %7960 = vpow2.f32 %v6981_v63 }
 0x5cf   : > { %v7951_v46 = vpop.eup %7950  ;;  %v10820_v9 = vadd.f32 1.0, %v7949_v60 }
 0x5d0   : > { %v7953_v18 = vpop.eup %7952  ;;  %v10823_v31 = vadd.f32 1.0, %v7951_v46 }
 0x5d1   : > { %v7955_v0 = vpop.eup %7954  ;;  %7962 = vrcp.f32 %v10820_v9  ;;  %v3685_v41 = vand.u32 2147483647, %v10820_v9  ;;  %v3687_v36 = vand.u32 2147483648, %v10820_v9  ;;  %v10835_v39 = vadd.f32 1.0, %v7953_v18 }
 0x5d2   : > { %v7957_v58 = vpop.eup %7956  ;;  %4014 = vmatpush.bf16.msra.mxu0 %v7343_v19  ;;  %7479 = vmatpush.bf16.msra.mxu2 %v7343_v19  ;;  %7964 = vrcp.f32 %v10823_v31  ;;  %v3700_v5 = vand.u32 2147483647, %v10823_v31  ;;  %v10837_v53 = vadd.f32 1.0, %v7955_v0  ;;  %v3702_v17 = vand.u32 2147483648, %v10823_v31 }
 0x5d3   : > { %v7959_v7 = vpop.eup %7958  ;;  %7966 = vpow2.f32 %v6982_v49  ;;  %v10840_v54 = vadd.f32 1.0, %v7957_v58  ;;  %vm3681_vm0 = vweird.f32 %v10820_v9  ;;  %vm3696_vm1 = vweird.f32 %v10823_v31 }
 0x5d4   : > { %7968 = vpow2.f32 %v6975_v11  ;;  %v3807_v43 = vand.u32 2147483648, %v10835_v39  ;;  %v7961_v8 = vpop.eup %7960  ;;  %vm10849_vm2 = vcmp.eq.f32.partialorder %v3685_v41, 8.507059e+37  ;;  %v10853_v29 = vor.u32 1.1754944e-38, %v3687_v36 }
 0x5d5   : > { %7970 = vrcp.f32 %v10835_v39  ;;  %v3805_v52 = vand.u32 2147483647, %v10835_v39  ;;  %v10857_v23 = vadd.f32 1.0, %v7959_v7  ;;  %vm10859_vm3 = vcmp.eq.f32.partialorder %v3700_v5, 8.507059e+37 }
 0x5d6   : > { %4015 = vmatpush.bf16.msra.mxu0 %v7342_v21  ;;  %7480 = vmatpush.bf16.msra.mxu2 %v7342_v21  ;;  %7972 = vrcp.f32 %v10837_v53  ;;  %v3820_v25 = vand.u32 2147483647, %v10837_v53  ;;  %v3822_v6 = vand.u32 2147483648, %v10837_v53  ;;  %v3703_v40 = vor.u32 1.1754944e-38, %v3702_v17 }
 0x5d7   : > { %v7963_v45 = vpop.eup %7962  ;;  %7974 = vrcp.f32 %v10840_v54  ;;  %vm3801_vm4 = vweird.f32 %v10835_v39  ;;  %vm3816_vm5 = vweird.f32 %v10837_v53  ;;  %v10872_v3 = vor.u32 1.1754944e-38, %v3807_v43 }
 0x5d8   : > { %v7965_v50 = vpop.eup %7964  ;;  %v3677_v15 = vmul.f32 %v7963_v45, %v10820_v9  ;;  %v3715_v13 = vand.u32 2147483647, %v10840_v54  ;;  %v3717_v47 = vand.u32 2147483648, %v10840_v54  ;;  %vm3682_vm6 = vweird.f32 %v7963_v45 }
 0x5d9   : > { %v10869_v10 = vpop.eup %7966  ;;  %v3692_v12 = vmul.f32 %v7965_v50, %v10823_v31  ;;  %vm10878_vm7 = vcmp.eq.f32.partialorder %v3805_v52, 8.507059e+37  ;;  %vm3711_vm8 = vweird.f32 %v10840_v54  ;;  %7976 = vrcp.f32 %v10857_v23  ;;  %vm10894_vm12 = vmor %vm3681_vm0, %vm3682_vm6 }
 0x5da   : > { %v10876_v32 = vpop.eup %7968  ;;  %4016 = vmatpush.bf16.msra.mxu0 %v7341_v14  ;;  %7481 = vmatpush.bf16.msra.mxu2 %v7341_v14  ;;  %v3678_v16 = vsub.f32 1.0, %v3677_v15  ;;  %vm3697_vm9 = vweird.f32 %v7965_v50  ;;  %vm10884_vm10 = vcmp.eq.f32.partialorder %v3820_v25, 8.507059e+37  ;;  %v3823_v24 = vor.u32 1.1754944e-38, %v3822_v6 }
 0x5db   : > { %v7971_v62 = vpop.eup %7970  ;;  %v3693_v38 = vsub.f32 1.0, %v3692_v12  ;;  %vm3726_vm11 = vweird.f32 %v10857_v23  ;;  %v3718_v4 = vor.u32 1.1754944e-38, %v3717_v47  ;;  %v3730_v60 = vand.u32 2147483647, %v10857_v23  ;;  %vm10907_vm15 = vmor %vm3696_vm1, %vm3697_vm9  ;;  %v3593_v47 = vld [vmem:[#allocation4 + $0x10] sm:$0xff] }
 0x5dc   : > { %v7973_v56 = vpop.eup %7972  ;;  %v3679_v63 = vmul.f32 %v7963_v45, %v3678_v16  ;;  %v3797_v44 = vmul.f32 %v7971_v62, %v10835_v39  ;;  %vm3802_vm13 = vweird.f32 %v7971_v62  ;;  %vm10899_vm14 = vcmp.eq.f32.partialorder %v3715_v13, 8.507059e+37  ;;  %v3577_v13 = vld [vmem:[#allocation2 + $0x70] sm:$0xff] }
 0x5dd   : > { %v7975_v19 = vpop.eup %7974  ;;  %v3694_v49 = vmul.f32 %v7965_v50, %v3693_v38  ;;  %v3812_v2 = vmul.f32 %v7973_v56, %v10837_v53  ;;  %v3732_v18 = vand.u32 2147483648, %v10857_v23  ;;  %vm3817_vm0 = vweird.f32 %v7973_v56  ;;  %vm10925_vm1 = vmor %vm3801_vm4, %vm3802_vm13 }
 0x5de   : > { %4017 = vmatpush.bf16.msra.mxu0 %v7340_v30  ;;  %7482 = vmatpush.bf16.msra.mxu2 %v7340_v30  ;;  %v3680_v11 = vadd.f32 %v7963_v45, %v3679_v63  ;;  %v3798_v0 = vsub.f32 1.0, %v3797_v44  ;;  %v3707_v58 = vmul.f32 %v7975_v19, %v10840_v54  ;;  %vm3712_vm6 = vweird.f32 %v7975_v19 }
 0x5df   : > { %v3695_v21 = vadd.f32 %v7965_v50, %v3694_v49  ;;  %v3813_v41 = vsub.f32 1.0, %v3812_v2  ;;  %v10912_v36 = vadd.f32 1.0, %v7961_v8  ;;  %v7977_v7 = vpop.eup %7976  ;;  %7978 = vpow2.f32 %v10843_v59  ;;  %vm10944_vm4 = vmor %vm3711_vm8, %vm3712_vm6 }
 0x5e0   : > { %v3684_v5 = vsel %vm10894_vm12, %v7963_v45, %v3680_v11  ;;  %v3799_v17 = vmul.f32 %v7971_v62, %v3798_v0  ;;  %v3708_v43 = vsub.f32 1.0, %v3707_v58  ;;  %v3722_v45 = vmul.f32 %v7977_v7, %v10857_v23 }
 0x5e1   : > { %v3689_v31 = vsel %vm10849_vm2, %v10853_v29, %v3684_v5  ;;  %v3699_v14 = vsel %vm10907_vm15, %v7965_v50, %v3695_v21  ;;  %v3814_v52 = vmul.f32 %v7973_v56, %v3813_v41  ;;  %vm10936_vm2 = vmor %vm3816_vm5, %vm3817_vm0  ;;  %v10951_v12 = vadd.f32 1.0, %v10869_v10 }
 0x5e2   : > { %v3704_v59 = vsel %vm10859_vm3, %v3703_v40, %v3699_v14  ;;  %v3916_v25 = vmul.f32 %v3689_v31, %v10795_v34  ;;  %v3800_v27 = vadd.f32 %v7971_v62, %v3799_v17  ;;  %v3709_v39 = vmul.f32 %v7975_v19, %v3708_v43  ;;  %v3570_v43 = vld [vmem:[#allocation2 + $0x8] sm:$0xff]  ;;  %v3586_v31 = vld [vmem:[#allocation4 + $0x38] sm:$0xff] }
 0x5e3   : > { %v3917_v6 = vmul.f32 %v3704_v59, %v10797_v51  ;;  %v3815_v50 = vadd.f32 %v7973_v56, %v3814_v52  ;;  %v3723_v15 = vsub.f32 1.0, %v3722_v45  ;;  %vm3727_vm3 = vweird.f32 %v7977_v7  ;;  %v3571_v59 = vld [vmem:[#allocation2 + $0x48] sm:$0xff] }
 0x5e4   : > { %v3804_v53 = vsel %vm10925_vm1, %v7971_v62, %v3800_v27  ;;  %v3710_v40 = vadd.f32 %v7975_v19, %v3709_v39  ;;  %7980 = vrcp.f32 %v10912_v36  ;;  %vm10967_vm5 = vmor %vm3726_vm11, %vm3727_vm3  ;;  %v10972_v26 = vadd.f32 %v3593_v47, %v3577_v13 }
 0x5e5   : > { %v3932_v30 = vpack.c.bf16 %v3917_v6, %v3916_v25  ;;  %v3809_v54 = vsel %vm10878_vm7, %v10872_v3, %v3804_v53  ;;  %v3819_v16 = vsel %vm10936_vm2, %v7973_v56, %v3815_v50  ;;  %v3724_v38 = vmul.f32 %v7977_v7, %v3723_v15  ;;  %v7979_v63 = vpop.eup %7978  ;;  %v3587_v25 = vld [vmem:[#allocation4 + $0x20] sm:$0xff]  ;;  %v3578_v50 = vld [vmem:[#allocation2 + $0x78] sm:$0xff] }
 0x5e6   : > { %v3824_v62 = vsel %vm10884_vm10, %v3823_v24, %v3819_v16  ;;  %v3924_v10 = vmul.f32 %v3809_v54, %v10799_v61  ;;  %v3714_v44 = vsel %vm10944_vm4, %v7975_v19, %v3710_v40  ;;  %v3733_v3 = vor.u32 1.1754944e-38, %v3732_v18  ;;  %v3595_v54 = vld [vmem:[#allocation4 + $0x48] sm:$0xff] }
 0x5e7   : > { %4018 = vmatmul.bf16.vlgmr.msra.gmra.mxu0 %v3932_v30  ;;  %v3925_v37 = vmul.f32 %v3824_v62, %v10803_v42  ;;  %v3725_v56 = vadd.f32 %v7977_v7, %v3724_v38  ;;  %vm3731_vm7 = vcmp.eq.f32.partialorder %v3730_v60, 8.507059e+37  ;;  %v3719_v24 = vsel %vm10899_vm14, %v3718_v4, %v3714_v44 }
 0x5e8   : > { %v3835_v19 = vand.u32 2147483647, %v10912_v36  ;;  %7982 = vrcp.f32 %v10951_v12  ;;  %v6983_v23 = vmul.f32 -1.442695, %v10832_v22  ;;  %v3837_v18 = vand.u32 2147483648, %v10912_v36 }
 0x5e9   : > { %v3936_v49 = vpack.c.bf16 %v3925_v37, %v3924_v10  ;;  %v3729_v2 = vsel %vm10967_vm5, %v7977_v7, %v3725_v56  ;;  %v3850_v11 = vand.u32 2147483647, %v10951_v12  ;;  %v3852_v0 = vand.u32 2147483648, %v10951_v12 }
 0x5ea   : > { %v7981_v60 = vpop.eup %7980  ;;  %v3734_v9 = vsel %vm3731_vm7, %v3733_v3, %v3729_v2  ;;  %v10985_v4 = vadd.f32 1.0, %v10876_v32  ;;  %v10987_v20 = vadd.f32 1.0, %v7979_v63  ;;  %v10990_v58 = vmul.f32 %v3719_v24, %v10806_v33 }
 0x5eb   : > { %4038 = vmatmul.bf16.vlgmr.msra.gmra.mxu2 %v3936_v49  ;;  %v10993_v21 = vmul.f32 %v3734_v9, %v10808_v1  ;;  %v3827_v41 = vmul.f32 %v7981_v60, %v10912_v36  ;;  %v6984_v7 = vmul.f32 -1.442695, %v10972_v26  ;;  %vm3831_vm8 = vweird.f32 %v10912_v36  ;;  %v3579_v36 = vld [vmem:[#allocation2 + $0x28] sm:$0xff] }
 0x5ec   : > { %vm10998_vm9 = vcmp.eq.f32.partialorder %v3835_v19, 8.507059e+37  ;;  %vm3846_vm10 = vweird.f32 %v10951_v12  ;;  %7984 = vrcp.f32 %v10985_v4  ;;  %vm3832_vm11 = vweird.f32 %v7981_v60 }
 0x5ed   : > { %v3828_v32 = vsub.f32 1.0, %v3827_v41  ;;  %v3745_v17 = vand.u32 2147483647, %v10985_v4  ;;  %7986 = vrcp.f32 %v10987_v20  ;;  %v3838_v8 = vor.u32 1.1754944e-38, %v3837_v18  ;;  %vm11018_vm14 = vmor %vm3831_vm8, %vm3832_vm11 }
 0x5ee   : > { %v7983_v14 = vpop.eup %7982  ;;  %vm11006_vm12 = vcmp.eq.f32.partialorder %v3850_v11, 8.507059e+37  ;;  %v3853_v45 = vor.u32 1.1754944e-38, %v3852_v0  ;;  %vm3741_vm13 = vweird.f32 %v10985_v4  ;;  %v3933_v27 = vpack.c.bf16 %v10993_v21, %v10990_v58 }
 0x5ef   : > { %v3829_v29 = vmul.f32 %v7981_v60, %v3828_v32  ;;  %v3842_v39 = vmul.f32 %v7983_v14, %v10951_v12  ;;  %v3747_v6 = vand.u32 2147483648, %v10985_v4  ;;  %vm3847_vm15 = vweird.f32 %v7983_v14 }
 0x5f0   : > { %vm3756_vm0 = vweird.f32 %v10987_v20  ;;  %7988 = vpow2.f32 %v6983_v23  ;;  %v11023_v53 = vadd.f32 %v3586_v31, %v3570_v43  ;;  %vm11025_vm6 = vcmp.eq.f32.partialorder %v3745_v17, 8.507059e+37  ;;  %vm11044_vm1 = vmor %vm3846_vm10, %vm3847_vm15 }
 0x5f1   : > { %v3830_v40 = vadd.f32 %v7981_v60, %v3829_v29  ;;  %v3843_v13 = vsub.f32 1.0, %v3842_v39  ;;  %7990 = vpow2.f32 %v6984_v7  ;;  %v11029_v30 = vadd.f32 %v3587_v25, %v3571_v59 }
 0x5f2   : > { %v7985_v16 = vpop.eup %7984  ;;  %v3760_v38 = vand.u32 2147483647, %v10987_v20  ;;  %v3762_v63 = vand.u32 2147483648, %v10987_v20  ;;  %v6977_v62 = vmul.f32 -1.442695, %v11023_v53  ;;  %v11034_v10 = vadd.f32 %v3594_v57, %v3578_v50 }
 0x5f3   : > { %v7987_v44 = vpop.eup %7986  ;;  %v3834_v46 = vsel %vm11018_vm14, %v7981_v60, %v3830_v40  ;;  %v3844_v3 = vmul.f32 %v7983_v14, %v3843_v13  ;;  %v3737_v37 = vmul.f32 %v7985_v16, %v10985_v4  ;;  %v3748_v56 = vor.u32 1.1754944e-38, %v3747_v6 }
 0x5f4   : > { %v3839_v24 = vsel %vm10998_vm9, %v3838_v8, %v3834_v46  ;;  %vm3742_vm2 = vweird.f32 %v7985_v16  ;;  %v3752_v23 = vmul.f32 %v7987_v44, %v10987_v20  ;;  %v11049_v49 = vadd.f32 %v3595_v54, %v3579_v36 }
 0x5f5   : > { %v3845_v2 = vadd.f32 %v7983_v14, %v3844_v3  ;;  %v3738_v18 = vsub.f32 1.0, %v3737_v37  ;;  %7992 = vpow2.f32 %v6977_v62  ;;  %v6978_v11 = vmul.f32 -1.442695, %v11029_v30  ;;  %vm11061_vm3 = vmor %vm3741_vm13, %vm3742_vm2 }
 0x5f6   : > { %v7989_v60 = vpop.eup %7988  ;;  %v3926_v9 = vmul.f32 %v3839_v24, %v10811_v28  ;;  %v3753_v0 = vsub.f32 1.0, %v3752_v23  ;;  %vm3757_vm4 = vweird.f32 %v7987_v44  ;;  %v6985_v12 = vmul.f32 -1.442695, %v11034_v10 }
 0x5f7   : > { %v7991_v58 = vpop.eup %7990  ;;  %4023 = vmatmul.bf16.gmra.mxu0 %v3933_v27  ;;  %v3849_v21 = vsel %vm11044_vm1, %v7983_v14, %v3845_v2  ;;  %v3739_v41 = vmul.f32 %v7985_v16, %v3738_v18  ;;  %v3672_v7 = vadd.f32 1.0, %v7989_v60  ;;  %7994 = vpow2.f32 %v6978_v11  ;;  %vm3758_vm5 = vmor %vm3756_vm0, %vm3757_vm4 }
 0x5f8   : > { %v3854_v5 = vsel %vm11006_vm12, %v3853_v45, %v3849_v21  ;;  %v3754_v17 = vmul.f32 %v7987_v44, %v3753_v0  ;;  %v3673_v43 = vadd.f32 1.0, %v7991_v58  ;;  %7996 = vpow2.f32 %v6985_v12 }
 0x5f9   : > { %v3927_v31 = vmul.f32 %v3854_v5, %v10815_v35  ;;  %v3740_v8 = vadd.f32 %v7985_v16, %v3739_v41  ;;  %v3763_v14 = vor.u32 1.1754944e-38, %v3762_v63  ;;  %7998 = vrcp.f32 %v3672_v7 }
 0x5fa   : > { %v3755_v52 = vadd.f32 %v7987_v44, %v3754_v17  ;;  %vm3761_vm7 = vcmp.eq.f32.partialorder %v3760_v38, 8.507059e+37  ;;  %8000 = vrcp.f32 %v3673_v43  ;;  %v6986_v4 = vmul.f32 -1.442695, %v11049_v49 }
 0x5fb   : > { %v7993_v45 = vpop.eup %7992  ;;  %v3937_v59 = vpack.c.bf16 %v3927_v31, %v3926_v9  ;;  %v3744_v25 = vsel %vm11061_vm3, %v7985_v16, %v3740_v8  ;;  %vm3861_vm8 = vweird.f32 %v3672_v7  ;;  %v3865_v36 = vand.u32 2147483647, %v3672_v7 }
 0x5fc   : > { %v3749_v27 = vsel %vm11025_vm6, %v3748_v56, %v3744_v25  ;;  %v3759_v29 = vsel %vm3758_vm5, %v7987_v44, %v3755_v52  ;;  %v11074_v50 = vadd.f32 1.0, %v7993_v45  ;;  %8002 = vpow2.f32 %v6986_v4 }
 0x5fd   : > { %v7995_v39 = vpop.eup %7994  ;;  %4043 = vmatmul.bf16.gmra.mxu2 %v3937_v59  ;;  %v3764_v20 = vsel %vm3761_vm7, %v3763_v14, %v3759_v29  ;;  %v3920_v40 = vmul.f32 %v3749_v27, %v10818_v48  ;;  %v3867_v16 = vand.u32 2147483648, %v3672_v7  ;;  %vm3876_vm9 = vweird.f32 %v3673_v43 }
 0x5fe   : > { %v7997_v6 = vpop.eup %7996  ;;  %v11076_v57 = vadd.f32 1.0, %v7995_v39  ;;  %v3921_v13 = vmul.f32 %v3764_v20, %v10825_v55  ;;  %8004 = vrcp.f32 %v11074_v50  ;;  %v3880_v62 = vand.u32 2147483647, %v3673_v43 }
 0x5ff   : > { %v7999_v15 = vpop.eup %7998  ;;  %v11081_v38 = vadd.f32 1.0, %v7997_v6  ;;  %v3882_v44 = vand.u32 2147483648, %v3673_v43  ;;  %v3775_v3 = vand.u32 2147483647, %v11074_v50  ;;  %vm11085_vm11 = vcmp.eq.f32.partialorder %v3865_v36, 8.507059e+37 }
 0x600   : > { %v8001_v54 = vpop.eup %8000  ;;  %v3857_v47 = vmul.f32 %v7999_v15, %v3672_v7  ;;  %vm3862_vm10 = vweird.f32 %v7999_v15  ;;  %8006 = vrcp.f32 %v11076_v57  ;;  %v3934_v37 = vpack.c.bf16 %v3921_v13, %v3920_v40  ;;  %v7349_v13 = vld [vmem:[#allocation11 + $0xc8] sm:$0xff] }
 0x601   : > { %v3872_v63 = vmul.f32 %v8001_v54, %v3673_v43  ;;  %vm3877_vm12 = vweird.f32 %v8001_v54  ;;  %v3868_v2 = vor.u32 1.1754944e-38, %v3867_v16  ;;  %v3777_v18 = vand.u32 2147483648, %v11074_v50  ;;  %vm11092_vm13 = vmor %vm3861_vm8, %vm3862_vm10 }
 0x602   : > { %v3858_v46 = vsub.f32 1.0, %v3857_v47  ;;  %v8003_v19 = vpop.eup %8002  ;;  %8008 = vrcp.f32 %v11081_v38  ;;  %vm11096_vm14 = vcmp.eq.f32.partialorder %v3880_v62, 8.507059e+37  ;;  %v3883_v0 = vor.u32 1.1754944e-38, %v3882_v44  ;;  %vm11103_vm15 = vmor %vm3876_vm9, %vm3877_vm12 }
 0x603   : > { %v3873_v24 = vsub.f32 1.0, %v3872_v63  ;;  %v11100_v12 = vadd.f32 1.0, %v8003_v19  ;;  %vm3771_vm0 = vweird.f32 %v11074_v50  ;;  %vm11108_vm6 = vcmp.eq.f32.partialorder %v3775_v3, 8.507059e+37 }
 0x604   : > { %v3859_v23 = vmul.f32 %v7999_v15, %v3858_v46  ;;  %v8005_v58 = vpop.eup %8004  ;;  %vm3786_vm1 = vweird.f32 %v11076_v57  ;;  %v3790_v17 = vand.u32 2147483647, %v11076_v57  ;;  %v3778_v8 = vor.u32 1.1754944e-38, %v3777_v18 }
 0x605   : > { %v3874_v60 = vmul.f32 %v8001_v54, %v3873_v24  ;;  %v3767_v32 = vmul.f32 %v8005_v58, %v11074_v50  ;;  %8010 = vrcp.f32 %v11100_v12  ;;  %vm3772_vm2 = vweird.f32 %v8005_v58  ;;  %v7348_v50 = vld [vmem:[#allocation11 + $0xc0] sm:$0xff] }
 0x606   : > { %v3860_v21 = vadd.f32 %v7999_v15, %v3859_v23  ;;  %v8007_v43 = vpop.eup %8006  ;;  %v3792_v14 = vand.u32 2147483648, %v11076_v57  ;;  %v3897_v39 = vand.u32 2147483648, %v11081_v38  ;;  %vm11133_vm3 = vmor %vm3771_vm0, %vm3772_vm2  ;;  %vm11137_vm5 = vcmp.eq.f32.partialorder %v3790_v17, 8.507059e+37 }
 0x607   : > { %4028 = vmatmul.bf16.gmra.mxu0 %v3934_v37  ;;  %v3875_v5 = vadd.f32 %v8001_v54, %v3874_v60  ;;  %v3768_v45 = vsub.f32 1.0, %v3767_v32  ;;  %v3782_v59 = vmul.f32 %v8007_v43, %v11076_v57  ;;  %vm3787_vm4 = vweird.f32 %v8007_v43 }
 0x608   : > { %v3864_v31 = vsel %vm11092_vm13, %v7999_v15, %v3860_v21  ;;  %v8009_v25 = vpop.eup %8008  ;;  %vm3891_vm7 = vweird.f32 %v11081_v38  ;;  %vm11146_vm9 = vmor %vm3786_vm1, %vm3787_vm4  ;;  %v3793_v46 = vor.u32 1.1754944e-38, %v3792_v14  ;;  %v3898_v3 = vor.u32 1.1754944e-38, %v3897_v39 }
 0x609   : > { %v3869_v52 = vsel %vm11085_vm11, %v3868_v2, %v3864_v31  ;;  %v3879_v4 = vsel %vm11103_vm15, %v8001_v54, %v3875_v5  ;;  %v3769_v6 = vmul.f32 %v8005_v58, %v3768_v45  ;;  %v3783_v15 = vsub.f32 1.0, %v3782_v59  ;;  %v11171_v45 = vld [vmem:[#allocation10 + $0x3] ss:$0 sm:$0xff]  ;;  %v7352_v59 = vld [vmem:[#allocation11 + $0xe0] sm:$0xff] }
 0x60a   : > { %v3884_v27 = vsel %vm11096_vm14, %v3883_v0, %v3879_v4  ;;  %v3928_v29 = vmul.f32 %v3869_v52, %v10832_v22  ;;  %v3887_v40 = vmul.f32 %v8009_v25, %v11081_v38  ;;  %vm3892_vm8 = vweird.f32 %v8009_v25  ;;  %v7355_v52 = vld [vmem:[#allocation11 + $0xf8] sm:$0xff]  ;;  %v7354_v4 = vld [vmem:[#allocation11 + $0xf0] sm:$0xff] }
 0x60b   : > { %v3929_v20 = vmul.f32 %v3884_v27, %v10972_v26  ;;  %v3895_v54 = vand.u32 2147483647, %v11081_v38  ;;  %v8011_v47 = vpop.eup %8010  ;;  %v3770_v63 = vadd.f32 %v8005_v58, %v3769_v6  ;;  %v3784_v62 = vmul.f32 %v8007_v43, %v3783_v15  ;;  %vm3893_vm11 = vmor %vm3891_vm7, %vm3892_vm8  ;;  %4457 = vmatpush.bf16.msra.mxu1 %v7355_v52  ;;  %7483 = vmatpush.bf16.msra.mxu3 %v7355_v52 }
 0x60c   : > { %v3888_v44 = vsub.f32 1.0, %v3887_v40  ;;  %v3902_v37 = vmul.f32 %v8011_v47, %v11100_v12  ;;  %vm3906_vm10 = vweird.f32 %v11100_v12  ;;  %v3912_v23 = vand.u32 2147483648, %v11100_v12 }
 0x60d   : > { %v3938_v16 = vpack.c.bf16 %v3929_v20, %v3928_v29  ;;  %v3774_v56 = vsel %vm11133_vm3, %v8005_v58, %v3770_v63  ;;  %v3785_v24 = vadd.f32 %v8007_v43, %v3784_v62  ;;  %vm3907_vm12 = vweird.f32 %v8011_v47  ;;  %v7351_v29 = vld [vmem:[#allocation11 + $0xd8] sm:$0xff]  ;;  %v7350_v20 = vld [vmem:[#allocation11 + $0xd0] sm:$0xff] }
 0x60e   : > { %v3889_v19 = vmul.f32 %v8009_v25, %v3888_v44  ;;  %v3779_v57 = vsel %vm11108_vm6, %v3778_v8, %v3774_v56  ;;  %v3903_v2 = vsub.f32 1.0, %v3902_v37  ;;  %v3910_v18 = vand.u32 2147483647, %v11100_v12  ;;  %vm3908_vm14 = vmor %vm3906_vm10, %vm3907_vm12  ;;  %v7353_v12 = vld [vmem:[#allocation11 + $0xe8] sm:$0xff] }
 0x60f   : > { %4048 = vmatmul.bf16.gmra.mxu2 %v3938_v16  ;;  %v3789_v11 = vsel %vm11146_vm9, %v8007_v43, %v3785_v24  ;;  %v3922_v60 = vmul.f32 %v3779_v57, %v11023_v53  ;;  %vm3896_vm13 = vcmp.eq.f32.partialorder %v3895_v54, 8.507059e+37  ;;  %v3913_v38 = vor.u32 1.1754944e-38, %v3912_v23  ;;  %4458 = vmatpush.bf16.msra.mxu1 %v7354_v4 }
 0x610   : > { %v3890_v9 = vadd.f32 %v8009_v25, %v3889_v19  ;;  %v3794_v0 = vsel %vm11137_vm5, %v3793_v46, %v3789_v11  ;;  %v3904_v58 = vmul.f32 %v8011_v47, %v3903_v2  ;;  %vm3911_vm15 = vcmp.eq.f32.partialorder %v3910_v18, 8.507059e+37  ;;  %7484 = vmatpush.bf16.msra.mxu3 %v7354_v4 }
 0x611   : > { %v3923_v21 = vmul.f32 %v3794_v0, %v11029_v30 }
 0x612   : > { %v3894_v41 = vsel %vm3893_vm11, %v8009_v25, %v3890_v9  ;;  %v3905_v5 = vadd.f32 %v8011_v47, %v3904_v58 }
 0x613   : > { %v3899_v7 = vsel %vm3896_vm13, %v3898_v3, %v3894_v41  ;;  %v3935_v32 = vpack.c.bf16 %v3923_v21, %v3922_v60  ;;  %4459 = vmatpush.bf16.msra.mxu1 %v7353_v12 }
 0x614   : > { %v3909_v17 = vsel %vm3908_vm14, %v8011_v47, %v3905_v5  ;;  %v3930_v31 = vmul.f32 %v3899_v7, %v11034_v10  ;;  %7485 = vmatpush.bf16.msra.mxu3 %v7353_v12 }
 0x615   : > { %v3914_v43 = vsel %vm3911_vm15, %v3913_v38, %v3909_v17 }
 0x616   : > { %v3931_v8 = vmul.f32 %v3914_v43, %v11049_v49 }
 0x617   : > { %4033 = vmatmul.bf16.gmra.mxu0 %v3935_v32  ;;  %4460 = vmatpush.bf16.msra.mxu1 %v7352_v59 }
 0x618   : > { %v3939_v14 = vpack.c.bf16 %v3931_v8, %v3930_v31  ;;  %7486 = vmatpush.bf16.msra.mxu3 %v7352_v59 }
 0x61b   : > { %4461 = vmatpush.bf16.msra.mxu1 %v7351_v29 }
 0x61c   : > { %7487 = vmatpush.bf16.msra.mxu3 %v7351_v29 }
 0x61f   : > { %4053 = vmatmul.bf16.gmra.mxu2 %v3939_v14  ;;  %4462 = vmatpush.bf16.msra.mxu1 %v7350_v20 }
 0x620   : > { %7488 = vmatpush.bf16.msra.mxu3 %v7350_v20 }
 0x623   : > { %4463 = vmatpush.bf16.msra.mxu1 %v7349_v13 }
 0x624   : > { %7489 = vmatpush.bf16.msra.mxu3 %v7349_v13 }
 0x627   : > { %4464 = vmatpush.bf16.msra.mxu1 %v7348_v50 }
 0x628   : > { %7490 = vmatpush.bf16.msra.mxu3 %v7348_v50 }
 0x664   : > { %v4019_v25 = vpop.f32.mrf.mxu0 }
 0x665   : > { %v11174_v27 = vadd.f32 %v11171_v45, %v4019_v25 }
 0x667   : > { %v7019_v39 = vmul.f32 -1.442695, %v11174_v27 }
 0x669   : > { %8012 = vpow2.f32 %v7019_v39 }
 0x66c   : > { %v4021_v6 = vpop.f32.mrf.mxu0 }
 0x66d   : > { %v11178_v15 = vadd.f32 %v11171_v45, %v4021_v6 }
 0x66e   : > { %v4039_v40 = vpop.f32.mrf.mxu2 }
 0x66f   : > { %v8013_v36 = vpop.eup %8012  ;;  %v11181_v54 = vadd.f32 %v11171_v45, %v4039_v40  ;;  %v7020_v47 = vmul.f32 -1.442695, %v11178_v15 }
 0x670   : > { %v4107_v16 = vadd.f32 1.0, %v8013_v36 }
 0x671   : > { %v7027_v63 = vmul.f32 -1.442695, %v11181_v54  ;;  %8014 = vpow2.f32 %v7020_v47 }
 0x672   : > { %8016 = vrcp.f32 %v4107_v16  ;;  %v4134_v60 = vand.u32 2147483648, %v4107_v16  ;;  %vm4128_vm6 = vweird.f32 %v4107_v16  ;;  %v4132_v7 = vand.u32 2147483647, %v4107_v16 }
 0x673   : > { %8018 = vpow2.f32 %v7027_v63 }
 0x674   : > { %v4024_v62 = vpop.f32.mrf.mxu0  ;;  %v4135_v5 = vor.u32 1.1754944e-38, %v4134_v60  ;;  %vm4133_vm2 = vcmp.eq.f32.partialorder %v4132_v7, 8.507059e+37 }
 0x675   : > { %v11186_v44 = vadd.f32 %v11171_v45, %v4024_v62 }
 0x676   : > { %v4041_v46 = vpop.f32.mrf.mxu2 }
 0x677   : > { %v8015_v3 = vpop.eup %8014  ;;  %v11189_v37 = vadd.f32 %v11171_v45, %v4041_v46  ;;  %v7021_v56 = vmul.f32 -1.442695, %v11186_v44 }
 0x678   : > { %v8017_v24 = vpop.eup %8016  ;;  %v4108_v19 = vadd.f32 1.0, %v8015_v3 }
 0x679   : > { %v8019_v23 = vpop.eup %8018  ;;  %v4124_v57 = vmul.f32 %v8017_v24, %v4107_v16  ;;  %v7028_v2 = vmul.f32 -1.442695, %v11189_v37  ;;  %8020 = vpow2.f32 %v7021_v56  ;;  %vm4129_vm0 = vweird.f32 %v8017_v24 }
 0x67a   : > { %v11193_v18 = vadd.f32 1.0, %v8019_v23  ;;  %8022 = vrcp.f32 %v4108_v19  ;;  %vm11201_vm1 = vmor %vm4128_vm6, %vm4129_vm0  ;;  %v4147_v14 = vand.u32 2147483647, %v4108_v19  ;;  %v4149_v52 = vand.u32 2147483648, %v4108_v19 }
 0x67b   : > { %v4125_v11 = vsub.f32 1.0, %v4124_v57  ;;  %8024 = vpow2.f32 %v7028_v2  ;;  %vm4143_vm3 = vweird.f32 %v4108_v19 }
 0x67c   : > { %8026 = vrcp.f32 %v11193_v18  ;;  %v4026_v9 = vpop.f32.mrf.mxu0  ;;  %v4252_v20 = vand.u32 2147483647, %v11193_v18  ;;  %v4254_v6 = vand.u32 2147483648, %v11193_v18  ;;  %vm4248_vm4 = vweird.f32 %v11193_v18 }
 0x67d   : > { %v4126_v0 = vmul.f32 %v8017_v24, %v4125_v11  ;;  %v11197_v58 = vadd.f32 %v11171_v45, %v4026_v9  ;;  %vm11222_vm7 = vcmp.eq.f32.partialorder %v4147_v14, 8.507059e+37  ;;  %v4150_v62 = vor.u32 1.1754944e-38, %v4149_v52 }
 0x67e   : > { %vm11228_vm8 = vcmp.eq.f32.partialorder %v4252_v20, 8.507059e+37  ;;  %v4255_v56 = vor.u32 1.1754944e-38, %v4254_v6 }
 0x67f   : > { %v8021_v21 = vpop.eup %8020  ;;  %v4127_v41 = vadd.f32 %v8017_v24, %v4126_v0  ;;  %v7022_v4 = vmul.f32 -1.442695, %v11197_v58 }
 0x680   : > { %v8023_v38 = vpop.eup %8022  ;;  %v11199_v32 = vadd.f32 1.0, %v8021_v21  ;;  %v4044_v17 = vpop.f32.mrf.mxu2 }
 0x681   : > { %v8025_v43 = vpop.eup %8024  ;;  %v4139_v8 = vmul.f32 %v8023_v38, %v4108_v19  ;;  %v4131_v59 = vsel %vm11201_vm1, %v8017_v24, %v4127_v41  ;;  %v11214_v29 = vadd.f32 %v11171_v45, %v4044_v17  ;;  %vm4144_vm5 = vweird.f32 %v8023_v38 }
 0x682   : > { %v11206_v12 = vpop.eup %8026  ;;  %v11210_v25 = vadd.f32 1.0, %v8025_v43  ;;  %8028 = vrcp.f32 %v11199_v32  ;;  %v4136_v36 = vsel %vm4133_vm2, %v4135_v5, %v4131_v59  ;;  %vm4145_vm10 = vmor %vm4143_vm3, %vm4144_vm5  ;;  %v4162_v31 = vand.u32 2147483647, %v11199_v32 }
 0x683   : > { %v4244_v39 = vmul.f32 %v11206_v12, %v11193_v18  ;;  %v4140_v40 = vsub.f32 1.0, %v4139_v8  ;;  %v7029_v50 = vmul.f32 -1.442695, %v11214_v29  ;;  %v4363_v57 = vmul.f32 %v4136_v36, %v11174_v27 }
 0x684   : > { %8030 = vrcp.f32 %v11210_v25  ;;  %v4029_v13 = vpop.f32.mrf.mxu0  ;;  %vm4249_vm9 = vweird.f32 %v11206_v12  ;;  %vm4263_vm11 = vweird.f32 %v11210_v25  ;;  %v4267_v9 = vand.u32 2147483647, %v11210_v25 }
 0x685   : > { %v4245_v47 = vsub.f32 1.0, %v4244_v39  ;;  %v4141_v16 = vmul.f32 %v8023_v38, %v4140_v40  ;;  %8032 = vpow2.f32 %v7022_v4  ;;  %v11238_v11 = vadd.f32 %v11171_v45, %v4029_v13  ;;  %vm11253_vm12 = vmor %vm4248_vm4, %vm4249_vm9 }
 0x686   : > { %8034 = vpow2.f32 %v7029_v50  ;;  %v4269_v43 = vand.u32 2147483648, %v11210_v25  ;;  %v4164_v52 = vand.u32 2147483648, %v11199_v32  ;;  %vm4158_vm0 = vweird.f32 %v11199_v32 }
 0x687   : > { %v4246_v46 = vmul.f32 %v11206_v12, %v4245_v47  ;;  %v4142_v24 = vadd.f32 %v8023_v38, %v4141_v16  ;;  %v7023_v7 = vmul.f32 -1.442695, %v11238_v11  ;;  %vm4268_vm6 = vcmp.eq.f32.partialorder %v4267_v9, 8.507059e+37 }
 0x688   : > { %v11232_v23 = vpop.eup %8028  ;;  %v4046_v2 = vpop.f32.mrf.mxu2  ;;  %v4270_v16 = vor.u32 1.1754944e-38, %v4269_v43  ;;  %vm4163_vm2 = vcmp.eq.f32.partialorder %v4162_v31, 8.507059e+37 }
 0x689   : > { %v4146_v60 = vsel %vm4145_vm10, %v8023_v38, %v4142_v24  ;;  %v4154_v0 = vmul.f32 %v11232_v23, %v11199_v32  ;;  %v4247_v27 = vadd.f32 %v11206_v12, %v4246_v46  ;;  %v11248_v41 = vadd.f32 %v11171_v45, %v4046_v2 }
 0x68a   : > { %v8031_v21 = vpop.eup %8030  ;;  %v4151_v19 = vsel %vm11222_vm7, %v4150_v62, %v4146_v60  ;;  %8036 = vpow2.f32 %v7023_v7  ;;  %vm4159_vm14 = vweird.f32 %v11232_v23  ;;  %v4165_v32 = vor.u32 1.1754944e-38, %v4164_v52 }
 0x68b   : > { %v4364_v5 = vmul.f32 %v4151_v19, %v11178_v15  ;;  %v4259_v17 = vmul.f32 %v8031_v21, %v11210_v25  ;;  %v8033_v8 = vpop.eup %8032  ;;  %v4155_v14 = vsub.f32 1.0, %v4154_v0  ;;  %v7030_v4 = vmul.f32 -1.442695, %v11248_v41  ;;  %vm11285_vm1 = vmor %vm4158_vm0, %vm4159_vm14 }
 0x68c   : > { %v4031_v18 = vpop.f32.mrf.mxu0  ;;  %vm4264_vm13 = vweird.f32 %v8031_v21  ;;  %v11264_v39 = vadd.f32 1.0, %v8033_v8  ;;  %v8035_v15 = vpop.eup %8034  ;;  %v4251_v20 = vsel %vm11253_vm12, %v11206_v12, %v4247_v27 }
 0x68d   : > { %v4260_v59 = vsub.f32 1.0, %v4259_v17  ;;  %v4156_v6 = vmul.f32 %v11232_v23, %v4155_v14  ;;  %8038 = vpow2.f32 %v7030_v4  ;;  %v4379_v40 = vpack.c.bf16 %v4364_v5, %v4363_v57  ;;  %vm11275_vm15 = vmor %vm4263_vm11, %vm4264_vm13 }
 0x68e   : > { %v11270_v36 = vadd.f32 1.0, %v8035_v15  ;;  %8040 = vrcp.f32 %v11264_v39  ;;  %v4256_v12 = vsel %vm11228_vm8, %v4255_v56, %v4251_v20  ;;  %v11294_v3 = vadd.f32 %v11171_v45, %v4031_v18 }
 0x68f   : > { %v4261_v13 = vmul.f32 %v8031_v21, %v4260_v59  ;;  %v4157_v63 = vadd.f32 %v11232_v23, %v4156_v6  ;;  %4465 = vmatmul.bf16.vlgmr.msra.gmra.mxu1 %v4379_v40  ;;  %v4177_v57 = vand.u32 2147483647, %v11264_v39  ;;  %v4179_v2 = vand.u32 2147483648, %v11264_v39 }
 0x690   : > { %8042 = vrcp.f32 %v11270_v36  ;;  %v8037_v25 = vpop.eup %8036  ;;  %v4371_v0 = vmul.f32 %v4256_v12, %v11181_v54  ;;  %v4284_v19 = vand.u32 2147483648, %v11270_v36  ;;  %vm4278_vm4 = vweird.f32 %v11270_v36 }
 0x691   : > { %v4262_v62 = vadd.f32 %v8031_v21, %v4261_v13  ;;  %v4161_v46 = vsel %vm11285_vm1, %v11232_v23, %v4157_v63  ;;  %v11300_v60 = vadd.f32 1.0, %v8037_v25  ;;  %v4282_v23 = vand.u32 2147483647, %v11270_v36 }
 0x692   : > { %v4049_v24 = vpop.f32.mrf.mxu2  ;;  %v4166_v5 = vsel %vm4163_vm2, %v4165_v32, %v4161_v46  ;;  %vm4173_vm3 = vweird.f32 %v11264_v39  ;;  %v7024_v54 = vmul.f32 -1.442695, %v11294_v3  ;;  %vm11316_vm5 = vcmp.eq.f32.partialorder %v4177_v57, 8.507059e+37 }
 0x693   : > { %v4266_v56 = vsel %vm11275_vm15, %v8031_v21, %v4262_v62  ;;  %v8039_v9 = vpop.eup %8038  ;;  %8044 = vrcp.f32 %v11300_v60  ;;  %v11309_v21 = vadd.f32 %v11171_v45, %v4049_v24  ;;  %v4180_v52 = vor.u32 1.1754944e-38, %v4179_v2 }
 0x694   : > { %v4271_v27 = vsel %vm4268_vm6, %v4270_v16, %v4266_v56  ;;  %v4034_v7 = vpop.f32.mrf.mxu0  ;;  %v8041_v38 = vpop.eup %8040  ;;  %v11305_v17 = vadd.f32 1.0, %v8039_v9  ;;  %v4365_v4 = vmul.f32 %v4166_v5, %v11186_v44  ;;  %vm11323_vm7 = vcmp.eq.f32.partialorder %v4282_v23, 8.507059e+37 }
 0x695   : > { %v4169_v43 = vmul.f32 %v8041_v38, %v11264_v39  ;;  %v4372_v8 = vmul.f32 %v4271_v27, %v11189_v37  ;;  %v4285_v20 = vor.u32 1.1754944e-38, %v4284_v19  ;;  %vm4174_vm9 = vweird.f32 %v8041_v38 }
 0x696   : > { %v8043_v31 = vpop.eup %8042  ;;  %8046 = vrcp.f32 %v11305_v17  ;;  %v7031_v37 = vmul.f32 -1.442695, %v11309_v21  ;;  %v11329_v47 = vadd.f32 %v11171_v45, %v4034_v7  ;;  %vm4293_vm10 = vweird.f32 %v11305_v17  ;;  %vm11339_vm11 = vmor %vm4173_vm3, %vm4174_vm9 }
 0x697   : > { %v4274_v18 = vmul.f32 %v8043_v31, %v11270_v36  ;;  %v4170_v15 = vsub.f32 1.0, %v4169_v43  ;;  %vm4279_vm8 = vweird.f32 %v8043_v31  ;;  %8048 = vpow2.f32 %v7024_v54 }
 0x698   : > { %8050 = vpow2.f32 %v7031_v37  ;;  %v4383_v63 = vpack.c.bf16 %v4372_v8, %v4371_v0  ;;  %v4297_v25 = vand.u32 2147483647, %v11305_v17  ;;  %vm11349_vm12 = vmor %vm4278_vm4, %vm4279_vm8  ;;  %v4299_v39 = vand.u32 2147483648, %v11305_v17 }
 0x699   : > { %v4275_v6 = vsub.f32 1.0, %v4274_v18  ;;  %v4171_v40 = vmul.f32 %v8041_v38, %v4170_v15  ;;  %v11331_v44 = vpop.eup %8044  ;;  %v7025_v2 = vmul.f32 -1.442695, %v11329_v47  ;;  %vm4188_vm0 = vweird.f32 %v11300_v60 }
 0x69a   : > { %v4051_v13 = vpop.f32.mrf.mxu2  ;;  %v4184_v46 = vmul.f32 %v11331_v44, %v11300_v60  ;;  %4485 = vmatmul.bf16.vlgmr.msra.gmra.mxu3 %v4383_v63  ;;  %vm4298_vm15 = vcmp.eq.f32.partialorder %v4297_v25, 8.507059e+37  ;;  %vm4189_vm6 = vweird.f32 %v11331_v44 }
 0x69b   : > { %v11335_v16 = vadd.f32 %v11171_v45, %v4051_v13  ;;  %v4276_v12 = vmul.f32 %v8043_v31, %v4275_v6  ;;  %v4172_v62 = vadd.f32 %v8041_v38, %v4171_v40  ;;  %vm11408_vm2 = vmor %vm4188_vm0, %vm4189_vm6 }
 0x69c   : > { %v4036_v32 = vpop.f32.mrf.mxu0  ;;  %v8047_v24 = vpop.eup %8046  ;;  %v4185_v19 = vsub.f32 1.0, %v4184_v46 }
 0x69d   : > { %v7032_v57 = vmul.f32 -1.442695, %v11335_v16  ;;  %v11357_v9 = vadd.f32 %v11171_v45, %v4036_v32  ;;  %v4277_v0 = vadd.f32 %v8043_v31, %v4276_v12  ;;  %v4176_v27 = vsel %vm11339_vm11, %v8041_v38, %v4172_v62  ;;  %v8049_v5 = vpop.eup %8048 }
 0x69e   : > { %v4289_v36 = vmul.f32 %v8047_v24, %v11305_v17  ;;  %vm4294_vm13 = vweird.f32 %v8047_v24  ;;  %v4181_v23 = vsel %vm11316_vm5, %v4180_v52, %v4176_v27  ;;  %v8051_v18 = vpop.eup %8050  ;;  %v11368_v38 = vadd.f32 1.0, %v8049_v5 }
 0x69f   : > { %8052 = vpow2.f32 %v7032_v57  ;;  %v7026_v7 = vmul.f32 -1.442695, %v11357_v9  ;;  %v4281_v43 = vsel %vm11349_vm12, %v8043_v31, %v4277_v0  ;;  %v4366_v54 = vmul.f32 %v4181_v23, %v11197_v58  ;;  %vm11377_vm14 = vmor %vm4293_vm10, %vm4294_vm13 }
 0x6a0   : > { %v4290_v8 = vsub.f32 1.0, %v4289_v36  ;;  %8054 = vpow2.f32 %v7025_v2  ;;  %v11370_v37 = vadd.f32 1.0, %v8051_v18  ;;  %v4286_v52 = vsel %vm11323_vm7, %v4285_v20, %v4281_v43 }
 0x6a1   : > { %8056 = vpow2.f32 %v7026_v7  ;;  %v4380_v14 = vpack.c.bf16 %v4366_v54, %v4365_v4  ;;  %v4300_v58 = vor.u32 1.1754944e-38, %v4299_v39  ;;  %v4186_v6 = vmul.f32 %v11331_v44, %v4185_v19 }
 0x6a2   : > { %v4291_v15 = vmul.f32 %v8047_v24, %v4290_v8  ;;  %8058 = vrcp.f32 %v11368_v38  ;;  %v4054_v40 = vpop.f32.mrf.mxu2  ;;  %v4192_v4 = vand.u32 2147483647, %v11300_v60  ;;  %v4194_v17 = vand.u32 2147483648, %v11300_v60 }
 0x6a3   : > { %8060 = vrcp.f32 %v11370_v37  ;;  %4470 = vmatmul.bf16.gmra.mxu1 %v4380_v14  ;;  %v4373_v63 = vmul.f32 %v4286_v52, %v11214_v29  ;;  %v4187_v25 = vadd.f32 %v11331_v44, %v4186_v6  ;;  %v4207_v29 = vand.u32 2147483647, %v11368_v38 }
 0x6a4   : > { %v4292_v13 = vadd.f32 %v8047_v24, %v4291_v15  ;;  %vm11395_vm1 = vcmp.eq.f32.partialorder %v4192_v4, 8.507059e+37  ;;  %v4195_v39 = vor.u32 1.1754944e-38, %v4194_v17  ;;  %v11404_v2 = vadd.f32 %v11171_v45, %v4054_v40 }
 0x6a5   : > { %v8053_v59 = vpop.eup %8052  ;;  %v4314_v27 = vand.u32 2147483648, %v11370_v37  ;;  %vm4203_vm4 = vweird.f32 %v11368_v38  ;;  %v4191_v19 = vsel %vm11408_vm2, %v11331_v44, %v4187_v25  ;;  %v4209_v5 = vand.u32 2147483648, %v11368_v38 }
 0x6a6   : > { %v8055_v20 = vpop.eup %8054  ;;  %v4296_v12 = vsel %vm11377_vm14, %v8047_v24, %v4292_v13  ;;  %v11389_v62 = vadd.f32 1.0, %v8053_v59  ;;  %vm4308_vm3 = vweird.f32 %v11370_v37  ;;  %v4312_v43 = vand.u32 2147483647, %v11370_v37 }
 0x6a7   : > { %v8057_v50 = vpop.eup %8056  ;;  %v4301_v46 = vsel %vm4298_vm15, %v4300_v58, %v4296_v12  ;;  %v11401_v57 = vadd.f32 1.0, %v8055_v20  ;;  %vm11423_vm5 = vcmp.eq.f32.partialorder %v4207_v29, 8.507059e+37  ;;  %v7033_v15 = vmul.f32 -1.442695, %v11404_v2 }
 0x6a8   : > { %v4374_v32 = vmul.f32 %v4301_v46, %v11248_v41  ;;  %8062 = vrcp.f32 %v11389_v62  ;;  %v8059_v24 = vpop.eup %8058  ;;  %v11406_v60 = vadd.f32 1.0, %v8057_v50  ;;  %v4196_v52 = vsel %vm11395_vm1, %v4195_v39, %v4191_v19  ;;  %v7363_v41 = vld [vmem:[#allocation8 + $0x138] sm:$0xff] }
 0x6a9   : > { %v8061_v0 = vpop.eup %8060  ;;  %v4199_v36 = vmul.f32 %v8059_v24, %v11368_v38  ;;  %8064 = vrcp.f32 %v11401_v57  ;;  %v4315_v31 = vor.u32 1.1754944e-38, %v4314_v27  ;;  %vm4204_vm8 = vweird.f32 %v8059_v24  ;;  %4920 = vmatpush.bf16.msrb.mxu2 %v7363_v41 }
 0x6aa   : > { %v4384_v23 = vpack.c.bf16 %v4374_v32, %v4373_v63  ;;  %v4304_v7 = vmul.f32 %v8061_v0, %v11370_v37  ;;  %vm4309_vm7 = vweird.f32 %v8061_v0  ;;  %8066 = vrcp.f32 %v11406_v60  ;;  %v4056_v44 = vpop.f32.mrf.mxu2  ;;  %vm4205_vm11 = vmor %vm4203_vm4, %vm4204_vm8 }
 0x6ab   : > { %v4200_v54 = vsub.f32 1.0, %v4199_v36  ;;  %v4210_v40 = vor.u32 1.1754944e-38, %v4209_v5  ;;  %8068 = vpow2.f32 %v7033_v15  ;;  %vm11434_vm9 = vmor %vm4308_vm3, %vm4309_vm7  ;;  %vm4323_vm10 = vweird.f32 %v11389_v62  ;;  %v7362_v5 = vld [vmem:[#allocation8 + $0x130] sm:$0xff] }
 0x6ac   : > { %v4305_v18 = vsub.f32 1.0, %v4304_v7  ;;  %4490 = vmatmul.bf16.gmra.mxu3 %v4384_v23  ;;  %v4329_v17 = vand.u32 2147483648, %v11389_v62  ;;  %v11441_v20 = vadd.f32 %v11171_v45, %v4056_v44  ;;  %v4327_v37 = vand.u32 2147483647, %v11389_v62 }
 0x6ad   : > { %v4201_v58 = vmul.f32 %v8059_v24, %v4200_v54  ;;  %v4367_v46 = vmul.f32 %v4196_v52, %v11238_v11  ;;  %vm4313_vm13 = vcmp.eq.f32.partialorder %v4312_v43, 8.507059e+37  ;;  %v4239_v15 = vand.u32 2147483648, %v11406_v60  ;;  %4921 = vmatpush.bf16.msrb.mxu2 %v7362_v5 }
 0x6ae   : > { %v8063_v14 = vpop.eup %8062  ;;  %v4306_v6 = vmul.f32 %v8061_v0, %v4305_v18  ;;  %v7034_v39 = vmul.f32 -1.442695, %v11441_v20  ;;  %vm4328_vm15 = vcmp.eq.f32.partialorder %v4327_v37, 8.507059e+37  ;;  %v4224_v18 = vand.u32 2147483648, %v11401_v57 }
 0x6af   : > { %v4319_v13 = vmul.f32 %v8063_v14, %v11389_v62  ;;  %v4202_v59 = vadd.f32 %v8059_v24, %v4201_v58  ;;  %v11443_v63 = vpop.eup %8064  ;;  %vm4324_vm12 = vweird.f32 %v8063_v14  ;;  %vm4218_vm1 = vweird.f32 %v11401_v57 }
 0x6b0   : > { %v4307_v12 = vadd.f32 %v8061_v0, %v4306_v6  ;;  %v4214_v32 = vmul.f32 %v11443_v63, %v11401_v57  ;;  %v8067_v56 = vpop.eup %8066  ;;  %vm11459_vm14 = vmor %vm4323_vm10, %vm4324_vm12  ;;  %8070 = vpow2.f32 %v7034_v39  ;;  %vm4219_vm0 = vweird.f32 %v11443_v63 }
 0x6b1   : > { %v4320_v50 = vsub.f32 1.0, %v4319_v13  ;;  %v4206_v25 = vsel %vm4205_vm11, %v8059_v24, %v4202_v59  ;;  %v4330_v24 = vor.u32 1.1754944e-38, %v4329_v17  ;;  %v4229_v23 = vmul.f32 %v8067_v56, %v11406_v60  ;;  %vm11478_vm2 = vmor %vm4218_vm1, %vm4219_vm0 }
 0x6b2   : > { %v4311_v45 = vsel %vm11434_vm9, %v8061_v0, %v4307_v12  ;;  %v4211_v29 = vsel %vm11423_vm5, %v4210_v40, %v4206_v25  ;;  %v4215_v36 = vsub.f32 1.0, %v4214_v32  ;;  %v8069_v0 = vpop.eup %8068  ;;  %vm4234_vm6 = vweird.f32 %v8067_v56 }
 0x6b3   : > { %v4321_v38 = vmul.f32 %v8063_v14, %v4320_v50  ;;  %v4368_v27 = vmul.f32 %v4211_v29, %v11294_v3  ;;  %v4316_v19 = vsel %vm4313_vm13, %v4315_v31, %v4311_v45  ;;  %v4121_v3 = vadd.f32 1.0, %v8069_v0 }
 0x6b4   : > { %v4216_v43 = vmul.f32 %v11443_v63, %v4215_v36  ;;  %v4230_v54 = vsub.f32 1.0, %v4229_v23  ;;  %v4375_v44 = vmul.f32 %v4316_v19, %v11309_v21  ;;  %v4237_v40 = vand.u32 2147483647, %v11406_v60 }
 0x6b5   : > { %v4322_v7 = vadd.f32 %v8063_v14, %v4321_v38  ;;  %v4381_v62 = vpack.c.bf16 %v4368_v27, %v4367_v46  ;;  %8072 = vrcp.f32 %v4121_v3  ;;  %v4222_v13 = vand.u32 2147483647, %v11401_v57 }
 0x6b6   : > { %v4217_v31 = vadd.f32 %v11443_v63, %v4216_v43  ;;  %v4231_v6 = vmul.f32 %v8067_v56, %v4230_v54  ;;  %v8071_v4 = vpop.eup %8070  ;;  %vm4233_vm4 = vweird.f32 %v11406_v60  ;;  %v4240_v17 = vor.u32 1.1754944e-38, %v4239_v15  ;;  %v7360_v15 = vld [vmem:[#allocation8 + $0x120] sm:$0xff] }
 0x6b7   : > { %v4326_v8 = vsel %vm11459_vm14, %v8063_v14, %v4322_v7  ;;  %4475 = vmatmul.bf16.gmra.mxu1 %v4381_v62  ;;  %v7361_v14 = vld [vmem:[#allocation8 + $0x128] sm:$0xff]  ;;  %vm4235_vm3 = vmor %vm4233_vm4, %vm4234_vm6  ;;  %v4122_v12 = vadd.f32 1.0, %v8071_v4  ;;  %v4225_v37 = vor.u32 1.1754944e-38, %v4224_v18  ;;  %vm4238_vm5 = vcmp.eq.f32.partialorder %v4237_v40, 8.507059e+37 }
 0x6b8   : > { %v4331_v52 = vsel %vm4328_vm15, %v4330_v24, %v4326_v8  ;;  %v4232_v59 = vadd.f32 %v8067_v56, %v4231_v6  ;;  %4922 = vmatpush.bf16.msrb.mxu2 %v7361_v14  ;;  %vm4223_vm7 = vcmp.eq.f32.partialorder %v4222_v13, 8.507059e+37  ;;  %vm4338_vm8 = vweird.f32 %v4121_v3  ;;  %v7358_v13 = vld [vmem:[#allocation8 + $0x110] sm:$0xff] }
 0x6b9   : > { %v4376_v58 = vmul.f32 %v4331_v52, %v11335_v16  ;;  %v4221_v16 = vsel %vm11478_vm2, %v11443_v63, %v4217_v31  ;;  %8074 = vrcp.f32 %v4122_v12  ;;  %v4342_v38 = vand.u32 2147483647, %v4121_v3 }
 0x6ba   : > { %v4236_v57 = vsel %vm4235_vm3, %v8067_v56, %v4232_v59  ;;  %v4226_v32 = vsel %vm4223_vm7, %v4225_v37, %v4221_v16  ;;  %v4344_v39 = vand.u32 2147483648, %v4121_v3  ;;  %vm4353_vm12 = vweird.f32 %v4122_v12 }
 0x6bb   : > { %v4385_v50 = vpack.c.bf16 %v4376_v58, %v4375_v44  ;;  %v8073_v46 = vpop.eup %8072  ;;  %v4241_v25 = vsel %vm4238_vm5, %v4240_v17, %v4236_v57  ;;  %v4369_v63 = vmul.f32 %v4226_v32, %v11329_v47  ;;  %vm4343_vm11 = vcmp.eq.f32.partialorder %v4342_v38, 8.507059e+37  ;;  %v11493_v44 = vld [vmem:[%s12218_s7 + $0x3] ss:$0 sm:$0xff] }
 0x6bc   : > { %v4334_v45 = vmul.f32 %v8073_v46, %v4121_v3  ;;  %v4370_v60 = vmul.f32 %v4241_v25, %v11357_v9  ;;  %vm4339_vm9 = vweird.f32 %v8073_v46  ;;  %v4345_v36 = vor.u32 1.1754944e-38, %v4344_v39  ;;  %4923 = vmatpush.bf16.msrb.mxu2 %v7360_v15 }
 0x6bd   : > { %4495 = vmatmul.bf16.gmra.mxu3 %v4385_v50  ;;  %vm4340_vm10 = vmor %vm4338_vm8, %vm4339_vm9  ;;  %v4359_v23 = vand.u32 2147483648, %v4122_v12  ;;  %v4357_v9 = vand.u32 2147483647, %v4122_v12  ;;  %v7356_v50 = vld [vmem:[#allocation8 + $0x100] sm:$0xff] }
 0x6be   : > { %v4335_v29 = vsub.f32 1.0, %v4334_v45  ;;  %v4382_v27 = vpack.c.bf16 %v4370_v60, %v4369_v63 }
 0x6bf   : > { %v8075_v56 = vpop.eup %8074  ;;  %v4360_v47 = vor.u32 1.1754944e-38, %v4359_v23  ;;  %vm4358_vm15 = vcmp.eq.f32.partialorder %v4357_v9, 8.507059e+37 }
 0x6c0   : > { %v4336_v41 = vmul.f32 %v8073_v46, %v4335_v29  ;;  %v4349_v24 = vmul.f32 %v8075_v56, %v4122_v12  ;;  %vm4354_vm13 = vweird.f32 %v8075_v56 }
 0x6c1   : > { %vm4355_vm14 = vmor %vm4353_vm12, %vm4354_vm13 }
 0x6c2   : > { %v4337_v11 = vadd.f32 %v8073_v46, %v4336_v41  ;;  %v4350_v19 = vsub.f32 1.0, %v4349_v24 }
 0x6c4   : > { %v4341_v0 = vsel %vm4340_vm10, %v8073_v46, %v4337_v11  ;;  %v4351_v7 = vmul.f32 %v8075_v56, %v4350_v19 }
 0x6c5   : > { %v4346_v5 = vsel %vm4343_vm11, %v4345_v36, %v4341_v0 }
 0x6c6   : > { %v4352_v43 = vadd.f32 %v8075_v56, %v4351_v7  ;;  %v4377_v3 = vmul.f32 %v4346_v5, %v11404_v2  ;;  %v7359_v2 = vld [vmem:[#allocation8 + $0x118] sm:$0xff] }
 0x6c7   : > { %4480 = vmatmul.bf16.gmra.mxu1 %v4382_v27  ;;  %4924 = vmatpush.bf16.msrb.mxu2 %v7359_v2 }
 0x6c8   : > { %v4356_v54 = vsel %vm4355_vm14, %v8075_v56, %v4352_v43 }
 0x6c9   : > { %v4361_v62 = vsel %vm4358_vm15, %v4360_v47, %v4356_v54 }
 0x6ca   : > { %v4378_v8 = vmul.f32 %v4361_v62, %v11441_v20 }
 0x6cb   : > { %4925 = vmatpush.bf16.msrb.mxu2 %v7358_v13 }
 0x6cc   : > { %v4386_v18 = vpack.c.bf16 %v4378_v8, %v4377_v3 }
 0x6ce   : > { %4500 = vmatmul.bf16.gmra.mxu3 %v4386_v18 }
 0x70c   : > { %v4466_v52 = vpop.f32.mrf.mxu1 }
 0x70d   : > { %v4467_v31 = vadd.f32 %v11493_v44, %v4466_v52 }
 0x70f   : > { %v11497_v58 = vadd.f32 %v4467_v31, %v10795_v34  ;;  %v7357_v34 = vld [vmem:[#allocation8 + $0x108] sm:$0xff] }
 0x710   : > { %4926 = vmatpush.bf16.msrb.mxu2 %v7357_v34 }
 0x711   : > { %v7068_v6 = vmul.f32 -1.442695, %v11497_v58 }
 0x713   : > { %8076 = vpow2.f32 %v7068_v6 }
 0x714   : > { %v4468_v20 = vpop.f32.mrf.mxu1  ;;  %4927 = vmatpush.bf16.msrb.mxu2 %v7356_v50 }
 0x715   : > { %v4469_v40 = vadd.f32 %v11493_v44, %v4468_v20 }
 0x717   : > { %v11502_v14 = vadd.f32 %v4469_v40, %v10797_v51 }
 0x719   : > { %v8077_v4 = vpop.eup %8076  ;;  %v7069_v21 = vmul.f32 -1.442695, %v11502_v14 }
 0x71a   : > { %v4570_v59 = vadd.f32 1.0, %v8077_v4 }
 0x71b   : > { %8078 = vpow2.f32 %v7069_v21 }
 0x71c   : > { %8080 = vrcp.f32 %v4570_v59  ;;  %v4597_v56 = vand.u32 2147483648, %v4570_v59  ;;  %vm4591_vm6 = vweird.f32 %v4570_v59  ;;  %v4595_v24 = vand.u32 2147483647, %v4570_v59 }
 0x71d   : > { %v4486_v38 = vpop.f32.mrf.mxu3 }
 0x71e   : > { %vm4596_vm4 = vcmp.eq.f32.partialorder %v4595_v24, 8.507059e+37 }
 0x720   : > { %v4471_v16 = vpop.f32.mrf.mxu1 }
 0x721   : > { %v8079_v17 = vpop.eup %8078  ;;  %v4472_v12 = vadd.f32 %v11493_v44, %v4471_v16 }
 0x722   : > { %v8081_v37 = vpop.eup %8080  ;;  %v4571_v57 = vadd.f32 1.0, %v8079_v17  ;;  %v4487_v17 = vadd.f32 %v11493_v44, %v4486_v38 }
 0x723   : > { %v11507_v51 = vadd.f32 %v4472_v12, %v10806_v33  ;;  %v4587_v46 = vmul.f32 %v8081_v37, %v4570_v59  ;;  %vm4592_vm0 = vweird.f32 %v8081_v37 }
 0x724   : > { %8082 = vrcp.f32 %v4571_v57  ;;  %vm4593_vm1 = vmor %vm4591_vm6, %vm4592_vm0  ;;  %v4612_v0 = vand.u32 2147483648, %v4571_v57  ;;  %v4610_v7 = vand.u32 2147483647, %v4571_v57  ;;  %vm4606_vm3 = vweird.f32 %v4571_v57 }
 0x725   : > { %v7070_v25 = vmul.f32 -1.442695, %v11507_v51  ;;  %v4588_v32 = vsub.f32 1.0, %v4587_v46  ;;  %v4488_v54 = vpop.f32.mrf.mxu3 }
 0x726   : > { %v4613_v43 = vor.u32 1.1754944e-38, %v4612_v0  ;;  %vm4611_vm7 = vcmp.eq.f32.partialorder %v4610_v7, 8.507059e+37 }
 0x727   : > { %8084 = vpow2.f32 %v7070_v25  ;;  %v4589_v45 = vmul.f32 %v8081_v37, %v4588_v32 }
 0x728   : > { %v4473_v60 = vpop.f32.mrf.mxu1 }
 0x729   : > { %v4474_v29 = vadd.f32 %v11493_v44, %v4473_v60  ;;  %v4590_v41 = vadd.f32 %v8081_v37, %v4589_v45  ;;  %v11536_v45 = vadd.f32 %v4487_v17, %v10799_v61 }
 0x72a   : > { %v8083_v63 = vpop.eup %8082 }
 0x72b   : > { %v11512_v39 = vadd.f32 %v4474_v29, %v10808_v1  ;;  %v4602_v33 = vmul.f32 %v8083_v63, %v4571_v57  ;;  %v4594_v19 = vsel %vm4593_vm1, %v8081_v37, %v4590_v41  ;;  %vm4607_vm2 = vweird.f32 %v8083_v63 }
 0x72c   : > { %v4598_v1 = vor.u32 1.1754944e-38, %v4597_v56  ;;  %vm4608_vm5 = vmor %vm4606_vm3, %vm4607_vm2  ;;  %v4489_v37 = vadd.f32 %v11493_v44, %v4488_v54  ;;  %v7076_v24 = vmul.f32 -1.442695, %v11536_v45 }
 0x72d   : > { %v8085_v27 = vpop.eup %8084  ;;  %v7071_v11 = vmul.f32 -1.442695, %v11512_v39  ;;  %v4603_v36 = vsub.f32 1.0, %v4602_v33 }
 0x72e   : > { %v11515_v23 = vadd.f32 1.0, %v8085_v27  ;;  %v4599_v47 = vsel %vm4596_vm4, %v4598_v1, %v4594_v19  ;;  %v11544_v38 = vadd.f32 %v4489_v37, %v10803_v42 }
 0x72f   : > { %v4604_v9 = vmul.f32 %v8083_v63, %v4603_v36  ;;  %v4826_v15 = vmul.f32 %v4599_v47, %v11497_v58  ;;  %v11528_v12 = vpop.f32.mrf.mxu3 }
 0x730   : > { %8086 = vrcp.f32 %v11515_v23  ;;  %v4627_v29 = vand.u32 2147483648, %v11515_v23  ;;  %vm4621_vm9 = vweird.f32 %v11515_v23  ;;  %v7077_v1 = vmul.f32 -1.442695, %v11544_v38 }
 0x731   : > { %8088 = vpow2.f32 %v7071_v11  ;;  %v4605_v5 = vadd.f32 %v8083_v63, %v4604_v9 }
 0x732   : > { %v4628_v36 = vor.u32 1.1754944e-38, %v4627_v29 }
 0x733   : > { %v4609_v3 = vsel %vm4608_vm5, %v8083_v63, %v4605_v5 }
 0x734   : > { %v4476_v62 = vpop.f32.mrf.mxu1  ;;  %v4614_v8 = vsel %vm4611_vm7, %v4613_v43, %v4609_v3 }
 0x735   : > { %v4477_v18 = vadd.f32 %v11493_v44, %v4476_v62  ;;  %v4827_v52 = vmul.f32 %v4614_v8, %v11502_v14 }
 0x736   : > { %v8087_v31 = vpop.eup %8086 }
 0x737   : > { %v8089_v2 = vpop.eup %8088  ;;  %v11522_v6 = vadd.f32 %v4477_v18, %v10818_v48  ;;  %v4842_v20 = vpack.c.bf16 %v4827_v52, %v4826_v15  ;;  %v4617_v40 = vmul.f32 %v8087_v31, %v11515_v23  ;;  %vm4622_vm8 = vweird.f32 %v8087_v31  ;;  %v4493_v0 = vpop.f32.mrf.mxu3 }
 0x738   : > { %v4573_v13 = vadd.f32 1.0, %v8089_v2  ;;  %vm4623_vm10 = vmor %vm4621_vm9, %vm4622_vm8 }
 0x739   : > { %v7072_v4 = vmul.f32 -1.442695, %v11522_v6  ;;  %4928 = vmatmul.bf16.vlgmr.msrb.gmra.mxu2 %v4842_v20  ;;  %v4618_v21 = vsub.f32 1.0, %v4617_v40 }
 0x73a   : > { %8090 = vrcp.f32 %v4573_v13  ;;  %v4640_v33 = vand.u32 2147483647, %v4573_v13  ;;  %v4642_v61 = vand.u32 2147483648, %v4573_v13  ;;  %vm4636_vm13 = vweird.f32 %v4573_v13 }
 0x73b   : > { %8092 = vpow2.f32 %v7072_v4  ;;  %v4619_v16 = vmul.f32 %v8087_v31, %v4618_v21 }
 0x73c   : > { %v4478_v59 = vpop.f32.mrf.mxu1  ;;  %v4643_v9 = vor.u32 1.1754944e-38, %v4642_v61  ;;  %vm4641_vm15 = vcmp.eq.f32.partialorder %v4640_v33, 8.507059e+37 }
 0x73d   : > { %v4479_v34 = vadd.f32 %v11493_v44, %v4478_v59  ;;  %v4620_v25 = vadd.f32 %v8087_v31, %v4619_v16  ;;  %v4494_v59 = vadd.f32 %v11493_v44, %v4493_v0 }
 0x73f   : > { %v11531_v48 = vadd.f32 %v4479_v34, %v10825_v55  ;;  %v4625_v55 = vand.u32 2147483647, %v11515_v23  ;;  %v4624_v27 = vsel %vm4623_vm10, %v8087_v31, %v4620_v25 }
 0x740   : > { %v8091_v50 = vpop.eup %8090  ;;  %v4496_v34 = vpop.f32.mrf.mxu3 }
 0x741   : > { %v8093_v57 = vpop.eup %8092  ;;  %v7073_v46 = vmul.f32 -1.442695, %v11531_v48  ;;  %v4632_v32 = vmul.f32 %v8091_v50, %v4573_v13  ;;  %vm4637_vm11 = vweird.f32 %v8091_v50  ;;  %vm4626_vm12 = vcmp.eq.f32.partialorder %v4625_v55, 8.507059e+37 }
 0x742   : > { %v11538_v60 = vadd.f32 1.0, %v8093_v57  ;;  %v4629_v19 = vsel %vm4626_vm12, %v4628_v36, %v4624_v27  ;;  %vm4638_vm14 = vmor %vm4636_vm13, %vm4637_vm11  ;;  %v11576_v55 = vadd.f32 %v4494_v59, %v10815_v35 }
 0x743   : > { %8094 = vpow2.f32 %v7073_v46  ;;  %v4633_v63 = vsub.f32 1.0, %v4632_v32  ;;  %v4492_v46 = vadd.f32 %v11493_v44, %v11528_v12 }
 0x744   : > { %8096 = vrcp.f32 %v11538_v60  ;;  %v4481_v41 = vpop.f32.mrf.mxu1  ;;  %vm4651_vm6 = vweird.f32 %v11538_v60  ;;  %v4655_v25 = vand.u32 2147483647, %v11538_v60  ;;  %v7079_v0 = vmul.f32 -1.442695, %v11576_v55 }
 0x745   : > { %v4482_v56 = vadd.f32 %v11493_v44, %v4481_v41  ;;  %v4634_v11 = vmul.f32 %v8091_v50, %v4633_v63  ;;  %8098 = vpow2.f32 %v7076_v24  ;;  %v11586_v27 = vadd.f32 %v4492_v46, %v10811_v28 }
 0x746   : > { %vm4656_vm4 = vcmp.eq.f32.partialorder %v4655_v25, 8.507059e+37 }
 0x747   : > { %v11550_v23 = vadd.f32 %v4482_v56, %v11023_v53  ;;  %v4635_v42 = vadd.f32 %v8091_v50, %v4634_v11  ;;  %v4828_v53 = vmul.f32 %v4629_v19, %v11507_v51 }
 0x749   : > { %v8095_v7 = vpop.eup %8094  ;;  %v7074_v5 = vmul.f32 -1.442695, %v11550_v23  ;;  %v4639_v47 = vsel %vm4638_vm14, %v8091_v50, %v4635_v42 }
 0x74a   : > { %v8097_v43 = vpop.eup %8096  ;;  %v4575_v3 = vadd.f32 1.0, %v8095_v7  ;;  %v4644_v54 = vsel %vm4641_vm15, %v4643_v9, %v4639_v47  ;;  %v4498_v7 = vpop.f32.mrf.mxu3 }
 0x74b   : > { %8100 = vpow2.f32 %v7074_v5  ;;  %v4829_v62 = vmul.f32 %v4644_v54, %v11512_v39  ;;  %v4647_v8 = vmul.f32 %v8097_v43, %v11538_v60  ;;  %v8099_v40 = vpop.eup %8098  ;;  %vm4652_vm0 = vweird.f32 %v8097_v43 }
 0x74c   : > { %8102 = vrcp.f32 %v4575_v3  ;;  %v4483_v18 = vpop.f32.mrf.mxu1  ;;  %v11565_v57 = vadd.f32 1.0, %v8099_v40  ;;  %vm11578_vm1 = vmor %vm4651_vm6, %vm4652_vm0  ;;  %v4672_v41 = vand.u32 2147483648, %v4575_v3  ;;  %v4670_v12 = vand.u32 2147483647, %v4575_v3 }
 0x74d   : > { %8104 = vpow2.f32 %v7077_v1  ;;  %v4484_v15 = vadd.f32 %v11493_v44, %v4483_v18  ;;  %v4843_v52 = vpack.c.bf16 %v4829_v62, %v4828_v53  ;;  %v4648_v31 = vsub.f32 1.0, %v4647_v8 }
 0x74e   : > { %vm4666_vm3 = vweird.f32 %v4575_v3  ;;  %v4673_v42 = vor.u32 1.1754944e-38, %v4672_v41  ;;  %vm4671_vm7 = vcmp.eq.f32.partialorder %v4670_v12, 8.507059e+37  ;;  %v7078_v1 = vmul.f32 -1.442695, %v11586_v27 }
 0x74f   : > { %v11559_v2 = vadd.f32 %v4484_v15, %v11029_v30  ;;  %4933 = vmatmul.bf16.gmra.mxu2 %v4843_v52  ;;  %v4649_v20 = vmul.f32 %v8097_v43, %v4648_v31  ;;  %v4657_v30 = vand.u32 2147483648, %v11538_v60  ;;  %v4499_v18 = vadd.f32 %v11493_v44, %v4498_v7 }
 0x750   : > { %vm4711_vm0 = vweird.f32 %v11565_v57 }
 0x751   : > { %v8101_v13 = vpop.eup %8100  ;;  %v7075_v4 = vmul.f32 -1.442695, %v11559_v2  ;;  %v4650_v50 = vadd.f32 %v8097_v43, %v4649_v20  ;;  %v4658_v60 = vor.u32 1.1754944e-38, %v4657_v30  ;;  %v11606_v59 = vadd.f32 %v4499_v18, %v10972_v26 }
 0x752   : > { %v8103_v21 = vpop.eup %8102  ;;  %v11563_v16 = vadd.f32 1.0, %v8101_v13  ;;  %v4497_v13 = vadd.f32 %v11493_v44, %v4496_v34 }
 0x753   : > { %v8105_v17 = vpop.eup %8104  ;;  %8106 = vpow2.f32 %v7075_v4  ;;  %v4662_v37 = vmul.f32 %v8103_v21, %v4575_v3  ;;  %v4654_v33 = vsel %vm11578_vm1, %v8097_v43, %v4650_v50  ;;  %vm4667_vm2 = vweird.f32 %v8103_v21 }
 0x754   : > { %8108 = vrcp.f32 %v11563_v16  ;;  %v11573_v29 = vadd.f32 1.0, %v8105_v17  ;;  %v4659_v36 = vsel %vm4656_vm4, %v4658_v60, %v4654_v33  ;;  %vm4668_vm5 = vmor %vm4666_vm3, %vm4667_vm2  ;;  %v4687_v31 = vand.u32 2147483648, %v11563_v16  ;;  %v4501_v17 = vpop.f32.mrf.mxu3 }
 0x755   : > { %v4663_v32 = vsub.f32 1.0, %v4662_v37  ;;  %8110 = vrcp.f32 %v11565_v57  ;;  %v4830_v5 = vmul.f32 %v4659_v36, %v11522_v6  ;;  %vm4681_vm9 = vweird.f32 %v11563_v16 }
 0x756   : > { %8112 = vrcp.f32 %v11573_v29  ;;  %v4685_v4 = vand.u32 2147483647, %v11563_v16  ;;  %v4688_v26 = vor.u32 1.1754944e-38, %v4687_v31  ;;  %v11619_v41 = vadd.f32 %v4497_v13, %v10832_v22 }
 0x757   : > { %v4664_v61 = vmul.f32 %v8103_v21, %v4663_v32  ;;  %vm4726_vm1 = vweird.f32 %v11573_v29  ;;  %v4730_v18 = vand.u32 2147483647, %v11573_v29  ;;  %v4502_v31 = vadd.f32 %v11493_v44, %v4501_v17 }
 0x758   : > { %vm4686_vm12 = vcmp.eq.f32.partialorder %v4685_v4, 8.507059e+37 }
 0x759   : > { %v8107_v56 = vpop.eup %8106  ;;  %v4665_v35 = vadd.f32 %v8103_v21, %v4664_v61  ;;  %v11665_v50 = vadd.f32 %v4502_v31, %v11034_v10 }
 0x75a   : > { %v8109_v11 = vpop.eup %8108  ;;  %v4577_v24 = vadd.f32 1.0, %v8107_v56  ;;  %v7081_v56 = vmul.f32 -1.442695, %v11606_v59 }
 0x75b   : > { %v4669_v19 = vsel %vm4668_vm5, %v8103_v21, %v4665_v35  ;;  %v4677_v9 = vmul.f32 %v8109_v11, %v11563_v16  ;;  %v11594_v3 = vpop.eup %8110  ;;  %vm4682_vm8 = vweird.f32 %v8109_v11 }
 0x75c   : > { %8114 = vrcp.f32 %v4577_v24  ;;  %v4674_v28 = vsel %vm4671_vm7, %v4673_v42, %v4669_v19  ;;  %v11596_v62 = vpop.eup %8112  ;;  %vm11608_vm10 = vmor %vm4681_vm9, %vm4682_vm8  ;;  %v4702_v37 = vand.u32 2147483648, %v4577_v24  ;;  %v4707_v30 = vmul.f32 %v11594_v3, %v11565_v57  ;;  %v4503_v7 = vpop.f32.mrf.mxu3 }
 0x75d   : > { %v4831_v47 = vmul.f32 %v4674_v28, %v11531_v48  ;;  %v4678_v43 = vsub.f32 1.0, %v4677_v9  ;;  %8116 = vpow2.f32 %v7079_v0  ;;  %v4722_v20 = vmul.f32 %v11596_v62, %v11573_v29 }
 0x75e   : > { %8118 = vpow2.f32 %v7078_v1  ;;  %v4700_v16 = vand.u32 2147483647, %v4577_v24  ;;  %vm4696_vm13 = vweird.f32 %v4577_v24  ;;  %v4703_v60 = vor.u32 1.1754944e-38, %v4702_v37 }
 0x75f   : > { %v4844_v54 = vpack.c.bf16 %v4831_v47, %v4830_v5  ;;  %v4679_v53 = vmul.f32 %v8109_v11, %v4678_v43  ;;  %v4723_v63 = vsub.f32 1.0, %v4722_v20  ;;  %v7080_v42 = vmul.f32 -1.442695, %v11619_v41 }
 0x760   : > { %vm4701_vm15 = vcmp.eq.f32.partialorder %v4700_v16, 8.507059e+37  ;;  %vm4712_vm6 = vweird.f32 %v11594_v3  ;;  %vm4727_vm2 = vweird.f32 %v11596_v62  ;;  %v4715_v5 = vand.u32 2147483647, %v11565_v57 }
 0x761   : > { %4938 = vmatmul.bf16.gmra.mxu2 %v4844_v54  ;;  %v4680_v15 = vadd.f32 %v8109_v11, %v4679_v53  ;;  %v4717_v47 = vand.u32 2147483648, %v11565_v57  ;;  %v4732_v43 = vand.u32 2147483648, %v11573_v29  ;;  %v4504_v54 = vadd.f32 %v11493_v44, %v4503_v7  ;;  %vm11643_vm4 = vmor %vm4711_vm0, %vm4712_vm6 }
 0x762   : > { %v8115_v8 = vpop.eup %8114  ;;  %vm4728_vm3 = vmor %vm4726_vm1, %vm4727_vm2  ;;  %vm4716_vm5 = vcmp.eq.f32.partialorder %v4715_v5, 8.507059e+37  ;;  %vm4731_vm7 = vcmp.eq.f32.partialorder %v4730_v18, 8.507059e+37 }
 0x763   : > { %v4692_v52 = vmul.f32 %v8115_v8, %v4577_v24  ;;  %v8117_v40 = vpop.eup %8116  ;;  %v4684_v34 = vsel %vm11608_vm10, %v8109_v11, %v4680_v15  ;;  %vm4697_vm11 = vweird.f32 %v8115_v8  ;;  %v4708_v11 = vsub.f32 1.0, %v4707_v30 }
 0x764   : > { %v8119_v46 = vpop.eup %8118  ;;  %v11616_v32 = vadd.f32 1.0, %v8117_v40  ;;  %v4689_v12 = vsel %vm4686_vm12, %v4688_v26, %v4684_v34  ;;  %vm4698_vm14 = vmor %vm4696_vm13, %vm4697_vm11  ;;  %v4724_v24 = vmul.f32 %v11596_v62, %v4723_v63  ;;  %v4718_v40 = vor.u32 1.1754944e-38, %v4717_v47 }
 0x765   : > { %v4693_v21 = vsub.f32 1.0, %v4692_v52  ;;  %v11621_v61 = vadd.f32 1.0, %v8119_v46  ;;  %v4832_v22 = vmul.f32 %v4689_v12, %v11550_v23  ;;  %v4709_v9 = vmul.f32 %v11594_v3, %v4708_v11  ;;  %v7371_v12 = vld [vmem:[#allocation11 + $0x138] sm:$0xff] }
 0x766   : > { %8120 = vrcp.f32 %v11616_v32  ;;  %v4725_v28 = vadd.f32 %v11596_v62, %v4724_v24  ;;  %v4733_v13 = vor.u32 1.1754944e-38, %v4732_v43  ;;  %vm4756_vm10 = vweird.f32 %v11616_v32  ;;  %5367 = vmatpush.bf16.msrb.mxu3 %v7371_v12 }
 0x767   : > { %v4694_v25 = vmul.f32 %v8115_v8, %v4693_v21  ;;  %8122 = vrcp.f32 %v11621_v61  ;;  %v4710_v53 = vadd.f32 %v11594_v3, %v4709_v9  ;;  %v11655_v21 = vadd.f32 %v4504_v54, %v11049_v49 }
 0x768   : > { %8124 = vpow2.f32 %v7081_v56  ;;  %v4729_v57 = vsel %vm4728_vm3, %v11596_v62, %v4725_v28  ;;  %vm4741_vm8 = vweird.f32 %v11621_v61  ;;  %v4747_v56 = vand.u32 2147483648, %v11621_v61 }
 0x769   : > { %v4695_v33 = vadd.f32 %v8115_v8, %v4694_v25  ;;  %8126 = vpow2.f32 %v7080_v42  ;;  %v4714_v29 = vsel %vm11643_vm4, %v11594_v3, %v4710_v53  ;;  %v4734_v62 = vsel %vm4731_vm7, %v4733_v13, %v4729_v57 }
 0x76a   : > { %v4719_v46 = vsel %vm4716_vm5, %v4718_v40, %v4714_v29  ;;  %v7083_v49 = vmul.f32 -1.442695, %v11655_v21  ;;  %v4835_v34 = vmul.f32 %v4734_v62, %v11544_v38  ;;  %v7082_v3 = vmul.f32 -1.442695, %v11665_v50  ;;  %v7370_v40 = vld [vmem:[#allocation11 + $0x130] sm:$0xff] }
 0x76b   : > { %v4699_v35 = vsel %vm4698_vm14, %v8115_v8, %v4695_v33  ;;  %v4834_v16 = vmul.f32 %v4719_v46, %v11536_v45  ;;  %v4745_v42 = vand.u32 2147483647, %v11621_v61  ;;  %v4748_v7 = vor.u32 1.1754944e-38, %v4747_v56  ;;  %5368 = vmatpush.bf16.msrb.mxu3 %v7370_v40 }
 0x76c   : > { %v4704_v36 = vsel %vm4701_vm15, %v4703_v60, %v4699_v35  ;;  %v11636_v1 = vpop.eup %8120  ;;  %v4762_v35 = vand.u32 2147483648, %v11616_v32 }
 0x76d   : > { %v4833_v0 = vmul.f32 %v4704_v36, %v11559_v2  ;;  %v11648_v15 = vpop.eup %8122  ;;  %v4752_v20 = vmul.f32 %v11636_v1, %v11616_v32  ;;  %v4846_v10 = vpack.c.bf16 %v4835_v34, %v4834_v16  ;;  %vm4757_vm11 = vweird.f32 %v11636_v1 }
 0x76e   : > { %v8125_v52 = vpop.eup %8124  ;;  %v4737_v44 = vmul.f32 %v11648_v15, %v11621_v61  ;;  %vm4742_vm9 = vweird.f32 %v11648_v15  ;;  %vm4758_vm13 = vmor %vm4756_vm10, %vm4757_vm11  ;;  %v4763_v28 = vor.u32 1.1754944e-38, %v4762_v35  ;;  %vm4746_vm14 = vcmp.eq.f32.partialorder %v4745_v42, 8.507059e+37 }
 0x76f   : > { %v4845_v19 = vpack.c.bf16 %v4833_v0, %v4832_v22  ;;  %v8127_v4 = vpop.eup %8126  ;;  %v11662_v17 = vadd.f32 1.0, %v8125_v52  ;;  %v4753_v37 = vsub.f32 1.0, %v4752_v20  ;;  %vm11685_vm12 = vmor %vm4741_vm8, %vm4742_vm9  ;;  %v4760_v22 = vand.u32 2147483647, %v11616_v32 }
 0x770   : > { %v11667_v30 = vadd.f32 1.0, %v8127_v4  ;;  %v4738_v25 = vsub.f32 1.0, %v4737_v44 }
 0x771   : > { %4943 = vmatmul.bf16.gmra.mxu2 %v4845_v19  ;;  %8128 = vrcp.f32 %v11662_v17  ;;  %v4754_v26 = vmul.f32 %v11636_v1, %v4753_v37  ;;  %vm4761_vm15 = vcmp.eq.f32.partialorder %v4760_v22, 8.507059e+37  ;;  %vm4786_vm1 = vweird.f32 %v11662_v17 }
 0x772   : > { %8130 = vrcp.f32 %v11667_v30  ;;  %v4739_v63 = vmul.f32 %v11648_v15, %v4738_v25  ;;  %vm4771_vm0 = vweird.f32 %v11667_v30  ;;  %v4777_v4 = vand.u32 2147483648, %v11667_v30 }
 0x773   : > { %8132 = vpow2.f32 %v7083_v49  ;;  %v4755_v33 = vadd.f32 %v11636_v1, %v4754_v26  ;;  %v4792_v29 = vand.u32 2147483648, %v11662_v17  ;;  %v4775_v37 = vand.u32 2147483647, %v11667_v30  ;;  %v7369_v49 = vld [vmem:[#allocation11 + $0x128] sm:$0xff] }
 0x774   : > { %8134 = vpow2.f32 %v7082_v3  ;;  %v4740_v11 = vadd.f32 %v11648_v15, %v4739_v63  ;;  %v4790_v46 = vand.u32 2147483647, %v11662_v17  ;;  %v4778_v16 = vor.u32 1.1754944e-38, %v4777_v4  ;;  %5369 = vmatpush.bf16.msrb.mxu3 %v7369_v49 }
 0x775   : > { %v4759_v19 = vsel %vm4758_vm13, %v11636_v1, %v4755_v33  ;;  %v4793_v26 = vor.u32 1.1754944e-38, %v4792_v29  ;;  %vm4776_vm5 = vcmp.eq.f32.partialorder %v4775_v37, 8.507059e+37  ;;  %v7366_v29 = vld [vmem:[#allocation11 + $0x110] sm:$0xff] }
 0x776   : > { %v4744_v47 = vsel %vm11685_vm12, %v11648_v15, %v4740_v11  ;;  %v4764_v43 = vsel %vm4761_vm15, %v4763_v28, %v4759_v19  ;;  %vm4791_vm7 = vcmp.eq.f32.partialorder %v4790_v46, 8.507059e+37 }
 0x777   : > { %v8129_v60 = vpop.eup %8128  ;;  %v4749_v1 = vsel %vm4746_vm14, %v4748_v7, %v4744_v47  ;;  %v4837_v8 = vmul.f32 %v4764_v43, %v11576_v55 }
 0x778   : > { %v8131_v0 = vpop.eup %8130  ;;  %v4782_v9 = vmul.f32 %v8129_v60, %v11662_v17  ;;  %v4836_v52 = vmul.f32 %v4749_v1, %v11586_v27  ;;  %vm4787_vm2 = vweird.f32 %v8129_v60 }
 0x779   : > { %v8133_v24 = vpop.eup %8132  ;;  %v4767_v61 = vmul.f32 %v8131_v0, %v11667_v30  ;;  %vm4772_vm6 = vweird.f32 %v8131_v0  ;;  %vm4788_vm3 = vmor %vm4786_vm1, %vm4787_vm2 }
 0x77a   : > { %v8135_v5 = vpop.eup %8134  ;;  %v11697_v32 = vadd.f32 1.0, %v8133_v24  ;;  %v4783_v54 = vsub.f32 1.0, %v4782_v9  ;;  %v4847_v15 = vpack.c.bf16 %v4837_v8, %v4836_v52  ;;  %vm11709_vm4 = vmor %vm4771_vm0, %vm4772_vm6 }
 0x77b   : > { %v11699_v53 = vadd.f32 1.0, %v8135_v5  ;;  %v4768_v18 = vsub.f32 1.0, %v4767_v61 }
 0x77c   : > { %8136 = vrcp.f32 %v11697_v32  ;;  %v4784_v31 = vmul.f32 %v8129_v60, %v4783_v54  ;;  %vm4816_vm10 = vweird.f32 %v11697_v32  ;;  %v4820_v9 = vand.u32 2147483647, %v11697_v32 }
 0x77d   : > { %8138 = vrcp.f32 %v11699_v53  ;;  %v4769_v57 = vmul.f32 %v8131_v0, %v4768_v18  ;;  %vm4801_vm8 = vweird.f32 %v11699_v53  ;;  %v4807_v22 = vand.u32 2147483648, %v11699_v53  ;;  %v11729_v18 = vld [vmem:[#allocation10 + $0x4] ss:$0 sm:$0xff] }
 0x77e   : > { %v4785_v20 = vadd.f32 %v8129_v60, %v4784_v31  ;;  %v4805_v19 = vand.u32 2147483647, %v11699_v53  ;;  %vm4821_vm15 = vcmp.eq.f32.partialorder %v4820_v9, 8.507059e+37 }
 0x77f   : > { %v4770_v44 = vadd.f32 %v8131_v0, %v4769_v57  ;;  %v4808_v28 = vor.u32 1.1754944e-38, %v4807_v22 }
 0x780   : > { %v4789_v25 = vsel %vm4788_vm3, %v8129_v60, %v4785_v20  ;;  %vm4806_vm14 = vcmp.eq.f32.partialorder %v4805_v19, 8.507059e+37 }
 0x781   : > { %4948 = vmatmul.bf16.gmra.mxu2 %v4846_v10  ;;  %v4774_v10 = vsel %vm11709_vm4, %v8131_v0, %v4770_v44  ;;  %v4794_v30 = vsel %vm4791_vm7, %v4793_v26, %v4789_v25  ;;  %v4822_v0 = vand.u32 2147483648, %v11697_v32  ;;  %v7365_v44 = vld [vmem:[#allocation11 + $0x108] sm:$0xff] }
 0x782   : > { %v8137_v13 = vpop.eup %8136  ;;  %v4779_v17 = vsel %vm4776_vm5, %v4778_v16, %v4774_v10  ;;  %v4839_v12 = vmul.f32 %v4794_v30, %v11606_v59 }
 0x783   : > { %v8139_v34 = vpop.eup %8138  ;;  %v4812_v3 = vmul.f32 %v8137_v13, %v11697_v32  ;;  %v4838_v60 = vmul.f32 %v4779_v17, %v11619_v41  ;;  %vm4817_vm11 = vweird.f32 %v8137_v13  ;;  %v4823_v5 = vor.u32 1.1754944e-38, %v4822_v0 }
 0x784   : > { %v4797_v63 = vmul.f32 %v8139_v34, %v11699_v53  ;;  %vm4802_vm9 = vweird.f32 %v8139_v34  ;;  %vm4818_vm13 = vmor %vm4816_vm10, %vm4817_vm11  ;;  %v7368_v53 = vld [vmem:[#allocation11 + $0x120] sm:$0xff] }
 0x785   : > { %v4813_v33 = vsub.f32 1.0, %v4812_v3  ;;  %v4848_v11 = vpack.c.bf16 %v4839_v12, %v4838_v60  ;;  %vm4803_vm12 = vmor %vm4801_vm8, %vm4802_vm9  ;;  %5370 = vmatpush.bf16.msrb.mxu3 %v7368_v53 }
 0x786   : > { %v4798_v56 = vsub.f32 1.0, %v4797_v63 }
 0x787   : > { %v4814_v35 = vmul.f32 %v8137_v13, %v4813_v33 }
 0x788   : > { %v4799_v36 = vmul.f32 %v8139_v34, %v4798_v56 }
 0x789   : > { %v4815_v42 = vadd.f32 %v8137_v13, %v4814_v35 }
 0x78a   : > { %v4800_v24 = vadd.f32 %v8139_v34, %v4799_v36 }
 0x78b   : > { %v4819_v7 = vsel %vm4818_vm13, %v8137_v13, %v4815_v42 }
 0x78c   : > { %v4804_v47 = vsel %vm4803_vm12, %v8139_v34, %v4800_v24  ;;  %v4824_v61 = vsel %vm4821_vm15, %v4823_v5, %v4819_v7  ;;  %v7364_v34 = vld [vmem:[#allocation11 + $0x100] sm:$0xff] }
 0x78d   : > { %v4809_v43 = vsel %vm4806_vm14, %v4808_v28, %v4804_v47  ;;  %v4841_v54 = vmul.f32 %v4824_v61, %v11655_v21 }
 0x78e   : > { %v4840_v1 = vmul.f32 %v4809_v43, %v11665_v50 }
 0x790   : > { %v4849_v8 = vpack.c.bf16 %v4841_v54, %v4840_v1 }
 0x791   : > { %4953 = vmatmul.bf16.gmra.mxu2 %v4847_v15  ;;  %v7367_v15 = vld [vmem:[#allocation11 + $0x118] sm:$0xff] }
 0x792   : > { %5371 = vmatpush.bf16.msrb.mxu3 %v7367_v15 }
 0x796   : > { %5372 = vmatpush.bf16.msrb.mxu3 %v7366_v29 }
 0x79a   : > { %5373 = vmatpush.bf16.msrb.mxu3 %v7365_v44 }
 0x79e   : > { %5374 = vmatpush.bf16.msrb.mxu3 %v7364_v34 }
 0x7a1   : > { %4958 = vmatmul.bf16.gmra.mxu2 %v4848_v11 }
 0x7b1   : > { %4963 = vmatmul.bf16.gmra.mxu2 %v4849_v8 }
 0x7bc   : > { %v4929_v52 = vpop.f32.mrf.mxu2 }
 0x7bd   : > { %v4930_v32 = vadd.f32 %v11729_v18, %v4929_v52 }
 0x7bf   : > { %v7116_v31 = vmul.f32 -1.442695, %v4930_v32 }
 0x7c1   : > { %8140 = vpow2.f32 %v7116_v31 }
 0x7c4   : > { %v4931_v57 = vpop.f32.mrf.mxu2 }
 0x7c5   : > { %v4932_v20 = vadd.f32 %v11729_v18, %v4931_v57 }
 0x7c7   : > { %v8141_v40 = vpop.eup %8140  ;;  %v7117_v13 = vmul.f32 -1.442695, %v4932_v20 }
 0x7c8   : > { %v5017_v4 = vadd.f32 1.0, %v8141_v40 }
 0x7c9   : > { %8142 = vpow2.f32 %v7117_v13 }
 0x7ca   : > { %8144 = vrcp.f32 %v5017_v4  ;;  %v5044_v17 = vand.u32 2147483648, %v5017_v4  ;;  %vm5038_vm6 = vweird.f32 %v5017_v4  ;;  %v5042_v56 = vand.u32 2147483647, %v5017_v4 }
 0x7cc   : > { %v5045_v19 = vor.u32 1.1754944e-38, %v5044_v17  ;;  %vm5043_vm4 = vcmp.eq.f32.partialorder %v5042_v56, 8.507059e+37 }
 0x7cf   : > { %v8143_v62 = vpop.eup %8142 }
 0x7d0   : > { %v8145_v37 = vpop.eup %8144  ;;  %v5018_v46 = vadd.f32 1.0, %v8143_v62 }
 0x7d1   : > { %v5034_v49 = vmul.f32 %v8145_v37, %v5017_v4  ;;  %vm5039_vm0 = vweird.f32 %v8145_v37 }
 0x7d2   : > { %8146 = vrcp.f32 %v5018_v46  ;;  %v4934_v25 = vpop.f32.mrf.mxu2  ;;  %vm5040_vm1 = vmor %vm5038_vm6, %vm5039_vm0  ;;  %v5057_v11 = vand.u32 2147483647, %v5018_v46  ;;  %v5059_v36 = vand.u32 2147483648, %v5018_v46  ;;  %vm5053_vm3 = vweird.f32 %v5018_v46 }
 0x7d3   : > { %v5035_v3 = vsub.f32 1.0, %v5034_v49  ;;  %v11734_v16 = vadd.f32 %v11729_v18, %v4934_v25 }
 0x7d4   : > { %v5060_v5 = vor.u32 1.1754944e-38, %v5059_v36  ;;  %vm5058_vm7 = vcmp.eq.f32.partialorder %v5057_v11, 8.507059e+37 }
 0x7d5   : > { %v5036_v26 = vmul.f32 %v8145_v37, %v5035_v3  ;;  %v7118_v10 = vmul.f32 -1.442695, %v11734_v16 }
 0x7d7   : > { %8148 = vpow2.f32 %v7118_v10  ;;  %v5037_v30 = vadd.f32 %v8145_v37, %v5036_v26 }
 0x7d8   : > { %v8147_v63 = vpop.eup %8146 }
 0x7d9   : > { %v5049_v33 = vmul.f32 %v8147_v63, %v5018_v46  ;;  %v5041_v22 = vsel %vm5040_vm1, %v8145_v37, %v5037_v30  ;;  %vm5054_vm2 = vweird.f32 %v8147_v63 }
 0x7da   : > { %v4936_v12 = vpop.f32.mrf.mxu2  ;;  %v5046_v28 = vsel %vm5043_vm4, %v5045_v19, %v5041_v22  ;;  %vm5055_vm5 = vmor %vm5053_vm3, %vm5054_vm2 }
 0x7db   : > { %v5050_v60 = vsub.f32 1.0, %v5049_v33  ;;  %v11738_v35 = vadd.f32 %v11729_v18, %v4936_v12  ;;  %v5273_v43 = vmul.f32 %v5046_v28, %v4930_v32 }
 0x7dd   : > { %v8149_v42 = vpop.eup %8148  ;;  %v5051_v0 = vmul.f32 %v8147_v63, %v5050_v60  ;;  %v7119_v24 = vmul.f32 -1.442695, %v11738_v35 }
 0x7de   : > { %v5019_v9 = vadd.f32 1.0, %v8149_v42 }
 0x7df   : > { %v5052_v7 = vadd.f32 %v8147_v63, %v5051_v0  ;;  %8150 = vpow2.f32 %v7119_v24 }
 0x7e0   : > { %8152 = vrcp.f32 %v5019_v9  ;;  %v5074_v49 = vand.u32 2147483648, %v5019_v9  ;;  %vm5068_vm9 = vweird.f32 %v5019_v9  ;;  %v5072_v25 = vand.u32 2147483647, %v5019_v9 }
 0x7e1   : > { %v5056_v47 = vsel %vm5055_vm5, %v8147_v63, %v5052_v7 }
 0x7e2   : > { %v5061_v61 = vsel %vm5058_vm7, %v5060_v5, %v5056_v47  ;;  %v5075_v33 = vor.u32 1.1754944e-38, %v5074_v49  ;;  %vm5073_vm12 = vcmp.eq.f32.partialorder %v5072_v25, 8.507059e+37 }
 0x7e3   : > { %v5274_v54 = vmul.f32 %v5061_v61, %v4932_v20 }
 0x7e4   : > { %v4939_v1 = vpop.f32.mrf.mxu2 }
 0x7e5   : > { %v8151_v8 = vpop.eup %8150  ;;  %v11742_v53 = vadd.f32 %v11729_v18, %v4939_v1  ;;  %v5289_v52 = vpack.c.bf16 %v5274_v54, %v5273_v43 }
 0x7e6   : > { %v8153_v31 = vpop.eup %8152  ;;  %v5020_v15 = vadd.f32 1.0, %v8151_v8 }
 0x7e7   : > { %v5064_v57 = vmul.f32 %v8153_v31, %v5019_v9  ;;  %v7120_v40 = vmul.f32 -1.442695, %v11742_v53  ;;  %5375 = vmatmul.bf16.vlgmr.msrb.gmra.mxu3 %v5289_v52  ;;  %vm5069_vm8 = vweird.f32 %v8153_v31 }
 0x7e8   : > { %8154 = vrcp.f32 %v5020_v15  ;;  %vm5070_vm10 = vmor %vm5068_vm9, %vm5069_vm8  ;;  %v5089_v26 = vand.u32 2147483648, %v5020_v15  ;;  %v5087_v30 = vand.u32 2147483647, %v5020_v15  ;;  %vm5083_vm13 = vweird.f32 %v5020_v15 }
 0x7e9   : > { %v5065_v13 = vsub.f32 1.0, %v5064_v57  ;;  %8156 = vpow2.f32 %v7120_v40 }
 0x7ea   : > { %v5090_v11 = vor.u32 1.1754944e-38, %v5089_v26  ;;  %vm5088_vm15 = vcmp.eq.f32.partialorder %v5087_v30, 8.507059e+37 }
 0x7eb   : > { %v5066_v4 = vmul.f32 %v8153_v31, %v5065_v13 }
 0x7ec   : > { %v4941_v29 = vpop.f32.mrf.mxu2 }
 0x7ed   : > { %v11746_v32 = vadd.f32 %v11729_v18, %v4941_v29  ;;  %v5067_v62 = vadd.f32 %v8153_v31, %v5066_v4 }
 0x7ee   : > { %v8155_v20 = vpop.eup %8154 }
 0x7ef   : > { %v8157_v44 = vpop.eup %8156  ;;  %v5079_v37 = vmul.f32 %v8155_v20, %v5020_v15  ;;  %v7121_v46 = vmul.f32 -1.442695, %v11746_v32  ;;  %v5071_v10 = vsel %vm5070_vm10, %v8153_v31, %v5067_v62  ;;  %vm5084_vm11 = vweird.f32 %v8155_v20 }
 0x7f0   : > { %v5021_v34 = vadd.f32 1.0, %v8157_v44  ;;  %v5076_v60 = vsel %vm5073_vm12, %v5075_v33, %v5071_v10  ;;  %vm5085_vm14 = vmor %vm5083_vm13, %vm5084_vm11 }
 0x7f1   : > { %v5080_v3 = vsub.f32 1.0, %v5079_v37  ;;  %8158 = vpow2.f32 %v7121_v46  ;;  %v5275_v9 = vmul.f32 %v5076_v60, %v11734_v16 }
 0x7f2   : > { %8160 = vrcp.f32 %v5021_v34  ;;  %v5104_v15 = vand.u32 2147483648, %v5021_v34  ;;  %vm5098_vm6 = vweird.f32 %v5021_v34  ;;  %v5102_v57 = vand.u32 2147483647, %v5021_v34 }
 0x7f3   : > { %v5081_v63 = vmul.f32 %v8155_v20, %v5080_v3 }
 0x7f4   : > { %v4944_v17 = vpop.f32.mrf.mxu2  ;;  %v5105_v46 = vor.u32 1.1754944e-38, %v5104_v15  ;;  %vm5103_vm4 = vcmp.eq.f32.partialorder %v5102_v57, 8.507059e+37 }
 0x7f5   : > { %v5082_v12 = vadd.f32 %v8155_v20, %v5081_v63  ;;  %v11750_v56 = vadd.f32 %v11729_v18, %v4944_v17 }
 0x7f7   : > { %v8159_v36 = vpop.eup %8158  ;;  %v5086_v42 = vsel %vm5085_vm14, %v8155_v20, %v5082_v12  ;;  %v7122_v22 = vmul.f32 -1.442695, %v11750_v56 }
 0x7f8   : > { %v8161_v0 = vpop.eup %8160  ;;  %v5091_v24 = vsel %vm5088_vm15, %v5090_v11, %v5086_v42  ;;  %v5022_v19 = vadd.f32 1.0, %v8159_v36 }
 0x7f9   : > { %v5276_v7 = vmul.f32 %v5091_v24, %v11738_v35  ;;  %v5094_v28 = vmul.f32 %v8161_v0, %v5021_v34  ;;  %8162 = vpow2.f32 %v7122_v22  ;;  %vm5099_vm0 = vweird.f32 %v8161_v0 }
 0x7fa   : > { %8164 = vrcp.f32 %v5022_v19  ;;  %vm11762_vm1 = vmor %vm5098_vm6, %vm5099_vm0  ;;  %v5117_v4 = vand.u32 2147483647, %v5022_v19  ;;  %v5119_v29 = vand.u32 2147483648, %v5022_v19  ;;  %vm5113_vm3 = vweird.f32 %v5022_v19 }
 0x7fb   : > { %v5095_v5 = vsub.f32 1.0, %v5094_v28  ;;  %v5290_v47 = vpack.c.bf16 %v5276_v7, %v5275_v9 }
 0x7fc   : > { %v4946_v61 = vpop.f32.mrf.mxu2  ;;  %v5120_v10 = vor.u32 1.1754944e-38, %v5119_v29  ;;  %vm5118_vm7 = vcmp.eq.f32.partialorder %v5117_v4, 8.507059e+37 }
 0x7fd   : > { %v5096_v43 = vmul.f32 %v8161_v0, %v5095_v5  ;;  %v11756_v54 = vadd.f32 %v11729_v18, %v4946_v61  ;;  %5380 = vmatmul.bf16.gmra.mxu3 %v5290_v47 }
 0x7ff   : > { %v8163_v1 = vpop.eup %8162  ;;  %v7123_v8 = vmul.f32 -1.442695, %v11756_v54  ;;  %v5097_v16 = vadd.f32 %v8161_v0, %v5096_v43 }
 0x800   : > { %v8165_v52 = vpop.eup %8164  ;;  %v11759_v31 = vadd.f32 1.0, %v8163_v1 }
 0x801   : > { %v5109_v35 = vmul.f32 %v8165_v52, %v5022_v19  ;;  %8166 = vpow2.f32 %v7123_v8  ;;  %v5101_v44 = vsel %vm11762_vm1, %v8161_v0, %v5097_v16  ;;  %vm5114_vm2 = vweird.f32 %v8165_v52 }
 0x802   : > { %8168 = vrcp.f32 %v11759_v31  ;;  %v5106_v26 = vsel %vm5103_vm4, %v5105_v46, %v5101_v44  ;;  %vm5115_vm5 = vmor %vm5113_vm3, %vm5114_vm2  ;;  %vm5128_vm9 = vweird.f32 %v11759_v31 }
 0x803   : > { %v5110_v40 = vsub.f32 1.0, %v5109_v35  ;;  %v5277_v12 = vmul.f32 %v5106_v26, %v11742_v53  ;;  %v5134_v53 = vand.u32 2147483648, %v11759_v31 }
 0x804   : > { %v4949_v20 = vpop.f32.mrf.mxu2 }
 0x805   : > { %v5111_v62 = vmul.f32 %v8165_v52, %v5110_v40  ;;  %v11769_v37 = vadd.f32 %v11729_v18, %v4949_v20  ;;  %v5135_v15 = vor.u32 1.1754944e-38, %v5134_v53 }
 0x807   : > { %v8167_v49 = vpop.eup %8166  ;;  %v5112_v34 = vadd.f32 %v8165_v52, %v5111_v62  ;;  %v7124_v25 = vmul.f32 -1.442695, %v11769_v37 }
 0x808   : > { %v8169_v3 = vpop.eup %8168  ;;  %v5024_v63 = vadd.f32 1.0, %v8167_v49 }
 0x809   : > { %v5116_v30 = vsel %vm5115_vm5, %v8165_v52, %v5112_v34  ;;  %v5124_v33 = vmul.f32 %v8169_v3, %v11759_v31  ;;  %8170 = vpow2.f32 %v7124_v25  ;;  %vm5129_vm8 = vweird.f32 %v8169_v3 }
 0x80a   : > { %v5121_v17 = vsel %vm5118_vm7, %v5120_v10, %v5116_v30  ;;  %8172 = vrcp.f32 %v5024_v63  ;;  %vm11785_vm10 = vmor %vm5128_vm9, %vm5129_vm8  ;;  %v5147_v43 = vand.u32 2147483647, %v5024_v63  ;;  %v5149_v1 = vand.u32 2147483648, %v5024_v63 }
 0x80b   : > { %v5278_v60 = vmul.f32 %v5121_v17, %v11746_v32  ;;  %v5125_v11 = vsub.f32 1.0, %v5124_v33  ;;  %v5132_v32 = vand.u32 2147483647, %v11759_v31  ;;  %vm5143_vm13 = vweird.f32 %v5024_v63 }
 0x80c   : > { %v4951_v36 = vpop.f32.mrf.mxu2  ;;  %v5150_v29 = vor.u32 1.1754944e-38, %v5149_v1  ;;  %vm5148_vm15 = vcmp.eq.f32.partialorder %v5147_v43, 8.507059e+37 }
 0x80d   : > { %v5126_v42 = vmul.f32 %v8169_v3, %v5125_v11  ;;  %v11776_v22 = vadd.f32 %v11729_v18, %v4951_v36  ;;  %v5291_v0 = vpack.c.bf16 %v5278_v60, %v5277_v12  ;;  %vm5133_vm12 = vcmp.eq.f32.partialorder %v5132_v32, 8.507059e+37 }
 0x80f   : > { %v8171_v24 = vpop.eup %8170  ;;  %v7125_v19 = vmul.f32 -1.442695, %v11776_v22  ;;  %5385 = vmatmul.bf16.gmra.mxu3 %v5291_v0  ;;  %v5127_v28 = vadd.f32 %v8169_v3, %v5126_v42 }
 0x810   : > { %v8173_v9 = vpop.eup %8172  ;;  %v11779_v7 = vadd.f32 1.0, %v8171_v24 }
 0x811   : > { %v5139_v5 = vmul.f32 %v8173_v9, %v5024_v63  ;;  %8174 = vpow2.f32 %v7125_v19  ;;  %v5131_v52 = vsel %vm11785_vm10, %v8169_v3, %v5127_v28  ;;  %vm5144_vm11 = vweird.f32 %v8173_v9 }
 0x812   : > { %8176 = vrcp.f32 %v11779_v7  ;;  %v5136_v4 = vsel %vm5133_vm12, %v5135_v15, %v5131_v52  ;;  %vm5145_vm14 = vmor %vm5143_vm13, %vm5144_vm11  ;;  %vm5158_vm6 = vweird.f32 %v11779_v7 }
 0x813   : > { %v5140_v47 = vsub.f32 1.0, %v5139_v5  ;;  %v5279_v49 = vmul.f32 %v5136_v4, %v11750_v56  ;;  %v5164_v56 = vand.u32 2147483648, %v11779_v7 }
 0x814   : > { %v4954_v8 = vpop.f32.mrf.mxu2 }
 0x815   : > { %v5141_v16 = vmul.f32 %v8173_v9, %v5140_v47  ;;  %v11792_v35 = vadd.f32 %v11729_v18, %v4954_v8  ;;  %v5165_v53 = vor.u32 1.1754944e-38, %v5164_v56 }
 0x817   : > { %v8175_v57 = vpop.eup %8174  ;;  %v5142_v31 = vadd.f32 %v8173_v9, %v5141_v16  ;;  %v7126_v40 = vmul.f32 -1.442695, %v11792_v35 }
 0x818   : > { %v8177_v13 = vpop.eup %8176  ;;  %v5026_v20 = vadd.f32 1.0, %v8175_v57 }
 0x819   : > { %v5146_v44 = vsel %vm5145_vm14, %v8173_v9, %v5142_v31  ;;  %v5154_v62 = vmul.f32 %v8177_v13, %v11779_v7  ;;  %8178 = vpow2.f32 %v7126_v40  ;;  %vm5159_vm0 = vweird.f32 %v8177_v13 }
 0x81a   : > { %v5151_v46 = vsel %vm5148_vm15, %v5150_v29, %v5146_v44  ;;  %8180 = vrcp.f32 %v5026_v20  ;;  %vm11808_vm1 = vmor %vm5158_vm6, %vm5159_vm0  ;;  %v5177_v0 = vand.u32 2147483647, %v5026_v20  ;;  %v5179_v24 = vand.u32 2147483648, %v5026_v20 }
 0x81b   : > { %v5280_v34 = vmul.f32 %v5151_v46, %v11756_v54  ;;  %v5155_v25 = vsub.f32 1.0, %v5154_v62  ;;  %v5162_v54 = vand.u32 2147483647, %v11779_v7  ;;  %vm5173_vm3 = vweird.f32 %v5026_v20 }
 0x81c   : > { %v4956_v3 = vpop.f32.mrf.mxu2  ;;  %v5180_v1 = vor.u32 1.1754944e-38, %v5179_v24  ;;  %vm5178_vm7 = vcmp.eq.f32.partialorder %v5177_v0, 8.507059e+37 }
 0x81d   : > { %v5156_v26 = vmul.f32 %v8177_v13, %v5155_v25  ;;  %v11799_v10 = vadd.f32 %v11729_v18, %v4956_v3  ;;  %v5292_v63 = vpack.c.bf16 %v5280_v34, %v5279_v49  ;;  %vm5163_vm4 = vcmp.eq.f32.partialorder %v5162_v54, 8.507059e+37 }
 0x81f   : > { %v8179_v30 = vpop.eup %8178  ;;  %v7127_v33 = vmul.f32 -1.442695, %v11799_v10  ;;  %5390 = vmatmul.bf16.gmra.mxu3 %v5292_v63  ;;  %v5157_v60 = vadd.f32 %v8177_v13, %v5156_v26 }
 0x820   : > { %v8181_v17 = vpop.eup %8180  ;;  %v11802_v12 = vadd.f32 1.0, %v8179_v30 }
 0x821   : > { %v5169_v11 = vmul.f32 %v8181_v17, %v5026_v20  ;;  %8182 = vpow2.f32 %v7127_v33  ;;  %v5161_v9 = vsel %vm11808_vm1, %v8177_v13, %v5157_v60  ;;  %vm5174_vm2 = vweird.f32 %v8181_v17 }
 0x822   : > { %8184 = vrcp.f32 %v11802_v12  ;;  %v5166_v43 = vsel %vm5163_vm4, %v5165_v53, %v5161_v9  ;;  %vm5175_vm5 = vmor %vm5173_vm3, %vm5174_vm2  ;;  %vm5188_vm9 = vweird.f32 %v11802_v12 }
 0x823   : > { %v5170_v36 = vsub.f32 1.0, %v5169_v11  ;;  %v5281_v57 = vmul.f32 %v5166_v43, %v11769_v37  ;;  %v5194_v37 = vand.u32 2147483648, %v11802_v12 }
 0x824   : > { %v4959_v19 = vpop.f32.mrf.mxu2 }
 0x825   : > { %v5171_v28 = vmul.f32 %v8181_v17, %v5170_v36  ;;  %v11815_v5 = vadd.f32 %v11729_v18, %v4959_v19  ;;  %v5195_v56 = vor.u32 1.1754944e-38, %v5194_v37 }
 0x827   : > { %v8183_v32 = vpop.eup %8182  ;;  %v5172_v7 = vadd.f32 %v8181_v17, %v5171_v28  ;;  %v7128_v47 = vmul.f32 -1.442695, %v11815_v5 }
 0x828   : > { %v8185_v61 = vpop.eup %8184  ;;  %v5028_v8 = vadd.f32 1.0, %v8183_v32 }
 0x829   : > { %v5176_v52 = vsel %vm5175_vm5, %v8181_v17, %v5172_v7  ;;  %v5184_v16 = vmul.f32 %v8185_v61, %v11802_v12  ;;  %8186 = vpow2.f32 %v7128_v47  ;;  %vm5189_vm8 = vweird.f32 %v8185_v61 }
 0x82a   : > { %v5181_v15 = vsel %vm5178_vm7, %v5180_v1, %v5176_v52  ;;  %8188 = vrcp.f32 %v5028_v8  ;;  %vm11831_vm10 = vmor %vm5188_vm9, %vm5189_vm8  ;;  %v5207_v63 = vand.u32 2147483647, %v5028_v8  ;;  %v5209_v30 = vand.u32 2147483648, %v5028_v8 }
 0x82b   : > { %v5282_v31 = vmul.f32 %v5181_v15, %v11776_v22  ;;  %v5185_v40 = vsub.f32 1.0, %v5184_v16  ;;  %v5192_v22 = vand.u32 2147483647, %v11802_v12  ;;  %vm5203_vm13 = vweird.f32 %v5028_v8  ;;  %v7379_v15 = vld [vmem:[#allocation8 + $0x178] sm:$0xff] }
 0x82c   : > { %v4961_v13 = vpop.f32.mrf.mxu2  ;;  %v5210_v24 = vor.u32 1.1754944e-38, %v5209_v30  ;;  %vm5208_vm15 = vcmp.eq.f32.partialorder %v5207_v63, 8.507059e+37  ;;  %5830 = vmatpush.bf16.msrb.mxu0 %v7379_v15 }
 0x82d   : > { %v5186_v4 = vmul.f32 %v8185_v61, %v5185_v40  ;;  %v11822_v29 = vadd.f32 %v11729_v18, %v4961_v13  ;;  %v5293_v20 = vpack.c.bf16 %v5282_v31, %v5281_v57  ;;  %vm5193_vm12 = vcmp.eq.f32.partialorder %v5192_v22, 8.507059e+37 }
 0x82f   : > { %v8187_v44 = vpop.eup %8186  ;;  %v7129_v62 = vmul.f32 -1.442695, %v11822_v29  ;;  %5395 = vmatmul.bf16.gmra.mxu3 %v5293_v20  ;;  %v5187_v34 = vadd.f32 %v8185_v61, %v5186_v4 }
 0x830   : > { %v8189_v46 = vpop.eup %8188  ;;  %v11825_v49 = vadd.f32 1.0, %v8187_v44 }
 0x831   : > { %v5199_v25 = vmul.f32 %v8189_v46, %v5028_v8  ;;  %8190 = vpow2.f32 %v7129_v62  ;;  %v5191_v17 = vsel %vm11831_vm10, %v8185_v61, %v5187_v34  ;;  %vm5204_vm11 = vweird.f32 %v8189_v46  ;;  %v7377_v34 = vld [vmem:[#allocation8 + $0x168] sm:$0xff] }
 0x832   : > { %8192 = vrcp.f32 %v11825_v49  ;;  %v5196_v0 = vsel %vm5193_vm12, %v5195_v56, %v5191_v17  ;;  %vm5205_vm14 = vmor %vm5203_vm13, %vm5204_vm11  ;;  %vm5218_vm6 = vweird.f32 %v11825_v49 }
 0x833   : > { %v5200_v3 = vsub.f32 1.0, %v5199_v25  ;;  %v5283_v32 = vmul.f32 %v5196_v0, %v11792_v35  ;;  %v7378_v35 = vld [vmem:[#allocation8 + $0x170] sm:$0xff] }
 0x834   : > { %v4964_v33 = vpop.f32.mrf.mxu2  ;;  %5831 = vmatpush.bf16.msrb.mxu0 %v7378_v35 }
 0x835   : > { %v5201_v60 = vmul.f32 %v8189_v46, %v5200_v3  ;;  %v11838_v11 = vadd.f32 %v11729_v18, %v4964_v33 }
 0x837   : > { %v8191_v54 = vpop.eup %8190  ;;  %v5202_v12 = vadd.f32 %v8189_v46, %v5201_v60  ;;  %v7130_v36 = vmul.f32 -1.442695, %v11838_v11 }
 0x838   : > { %v8193_v42 = vpop.eup %8192  ;;  %v5030_v19 = vadd.f32 1.0, %v8191_v54  ;;  %5832 = vmatpush.bf16.msrb.mxu0 %v7377_v34 }
 0x839   : > { %v5206_v9 = vsel %vm5205_vm14, %v8189_v46, %v5202_v12  ;;  %v5214_v28 = vmul.f32 %v8193_v42, %v11825_v49  ;;  %8194 = vpow2.f32 %v7130_v36  ;;  %vm5219_vm0 = vweird.f32 %v8193_v42 }
 0x83a   : > { %v5211_v53 = vsel %vm5208_vm15, %v5210_v24, %v5206_v9  ;;  %8196 = vrcp.f32 %v5030_v19  ;;  %vm5220_vm1 = vmor %vm5218_vm6, %vm5219_vm0  ;;  %v5239_v20 = vand.u32 2147483648, %v5030_v19  ;;  %v5237_v46 = vand.u32 2147483647, %v5030_v19 }
 0x83b   : > { %v5284_v7 = vmul.f32 %v5211_v53, %v11799_v10  ;;  %v5215_v47 = vsub.f32 1.0, %v5214_v28  ;;  %v5224_v10 = vand.u32 2147483648, %v11825_v49  ;;  %vm5233_vm3 = vweird.f32 %v5030_v19 }
 0x83c   : > { %v4966_v61 = vpop.f32.mrf.mxu2  ;;  %v5240_v63 = vor.u32 1.1754944e-38, %v5239_v20  ;;  %vm5238_vm7 = vcmp.eq.f32.partialorder %v5237_v46, 8.507059e+37 }
 0x83d   : > { %v5216_v43 = vmul.f32 %v8193_v42, %v5215_v47  ;;  %v11845_v1 = vadd.f32 %v11729_v18, %v4966_v61  ;;  %v5294_v8 = vpack.c.bf16 %v5284_v7, %v5283_v32  ;;  %v5222_v18 = vand.u32 2147483647, %v11825_v49 }
 0x83e   : > { %v5225_v25 = vor.u32 1.1754944e-38, %v5224_v10 }
 0x83f   : > { %v8195_v52 = vpop.eup %8194  ;;  %v7131_v16 = vmul.f32 -1.442695, %v11845_v1  ;;  %5400 = vmatmul.bf16.gmra.mxu3 %v5294_v8  ;;  %v5217_v40 = vadd.f32 %v8193_v42, %v5216_v43  ;;  %vm5223_vm4 = vcmp.eq.f32.partialorder %v5222_v18, 8.507059e+37 }
 0x840   : > { %v8197_v57 = vpop.eup %8196  ;;  %v5031_v31 = vadd.f32 1.0, %v8195_v52 }
 0x841   : > { %v5229_v13 = vmul.f32 %v8197_v57, %v5030_v19  ;;  %8198 = vpow2.f32 %v7131_v16  ;;  %v5221_v44 = vsel %vm5220_vm1, %v8193_v42, %v5217_v40  ;;  %vm5234_vm2 = vweird.f32 %v8197_v57  ;;  %v7376_v16 = vld [vmem:[#allocation8 + $0x160] sm:$0xff]  ;;  %v7375_v40 = vld [vmem:[#allocation8 + $0x158] sm:$0xff] }
 0x842   : > { %8200 = vrcp.f32 %v5031_v31  ;;  %v5226_v26 = vsel %vm5223_vm4, %v5225_v25, %v5221_v44  ;;  %vm5235_vm5 = vmor %vm5233_vm3, %vm5234_vm2  ;;  %v5254_v19 = vand.u32 2147483648, %v5031_v31  ;;  %vm5248_vm9 = vweird.f32 %v5031_v31  ;;  %5833 = vmatpush.bf16.msrb.mxu0 %v7376_v16  ;;  %v7373_v25 = vld [vmem:[#allocation8 + $0x148] sm:$0xff] }
 0x843   : > { %v5230_v4 = vsub.f32 1.0, %v5229_v13  ;;  %v5285_v60 = vmul.f32 %v5226_v26, %v11815_v5  ;;  %v5252_v9 = vand.u32 2147483647, %v5031_v31  ;;  %v11858_v13 = vld [vmem:[%s12218_s7 + $0x4] ss:$0 sm:$0xff] }
 0x844   : > { %v5255_v47 = vor.u32 1.1754944e-38, %v5254_v19 }
 0x845   : > { %v5231_v62 = vmul.f32 %v8197_v57, %v5230_v4  ;;  %vm5253_vm12 = vcmp.eq.f32.partialorder %v5252_v9, 8.507059e+37 }
 0x846   : > { %5834 = vmatpush.bf16.msrb.mxu0 %v7375_v40 }
 0x847   : > { %v8199_v37 = vpop.eup %8198  ;;  %v5232_v22 = vadd.f32 %v8197_v57, %v5231_v62 }
 0x848   : > { %v8201_v3 = vpop.eup %8200  ;;  %v5032_v30 = vadd.f32 1.0, %v8199_v37 }
 0x849   : > { %v5236_v49 = vsel %vm5235_vm5, %v8197_v57, %v5232_v22  ;;  %v5244_v33 = vmul.f32 %v8201_v3, %v5031_v31  ;;  %vm5249_vm8 = vweird.f32 %v8201_v3 }
 0x84a   : > { %v5241_v17 = vsel %vm5238_vm7, %v5240_v63, %v5236_v49  ;;  %8202 = vrcp.f32 %v5032_v30  ;;  %vm5250_vm10 = vmor %vm5248_vm9, %vm5249_vm8  ;;  %v5269_v53 = vand.u32 2147483648, %v5032_v30  ;;  %v5267_v5 = vand.u32 2147483647, %v5032_v30  ;;  %v7372_v63 = vld [vmem:[#allocation8 + $0x140] sm:$0xff] }
 0x84b   : > { %v5286_v56 = vmul.f32 %v5241_v17, %v11822_v29  ;;  %v5245_v54 = vsub.f32 1.0, %v5244_v33  ;;  %vm5263_vm13 = vweird.f32 %v5032_v30 }
 0x84c   : > { %v5270_v43 = vor.u32 1.1754944e-38, %v5269_v53  ;;  %vm5268_vm15 = vcmp.eq.f32.partialorder %v5267_v5, 8.507059e+37 }
 0x84d   : > { %v5246_v12 = vmul.f32 %v8201_v3, %v5245_v54  ;;  %v5295_v36 = vpack.c.bf16 %v5286_v56, %v5285_v60 }
 0x84f   : > { %5405 = vmatmul.bf16.gmra.mxu3 %v5295_v36  ;;  %v5247_v0 = vadd.f32 %v8201_v3, %v5246_v12 }
 0x850   : > { %v8203_v42 = vpop.eup %8202 }
 0x851   : > { %v5259_v24 = vmul.f32 %v8203_v42, %v5032_v30  ;;  %v5251_v32 = vsel %vm5250_vm10, %v8201_v3, %v5247_v0  ;;  %vm5264_vm11 = vweird.f32 %v8203_v42 }
 0x852   : > { %v5256_v61 = vsel %vm5253_vm12, %v5255_v47, %v5251_v32  ;;  %vm5265_vm14 = vmor %vm5263_vm13, %vm5264_vm11 }
 0x853   : > { %v5260_v28 = vsub.f32 1.0, %v5259_v24  ;;  %v5287_v15 = vmul.f32 %v5256_v61, %v11838_v11 }
 0x855   : > { %v5261_v7 = vmul.f32 %v8203_v42, %v5260_v28 }
 0x857   : > { %v5262_v29 = vadd.f32 %v8203_v42, %v5261_v7 }
 0x859   : > { %v5266_v8 = vsel %vm5265_vm14, %v8203_v42, %v5262_v29 }
 0x85a   : > { %v5271_v52 = vsel %vm5268_vm15, %v5270_v43, %v5266_v8 }
 0x85b   : > { %v5288_v57 = vmul.f32 %v5271_v52, %v11845_v1  ;;  %v7374_v1 = vld [vmem:[#allocation8 + $0x150] sm:$0xff] }
 0x85c   : > { %5835 = vmatpush.bf16.msrb.mxu0 %v7374_v1 }
 0x85d   : > { %v5296_v31 = vpack.c.bf16 %v5288_v57, %v5287_v15 }
 0x85f   : > { %5410 = vmatmul.bf16.gmra.mxu3 %v5296_v31 }
 0x860   : > { %5836 = vmatpush.bf16.msrb.mxu0 %v7373_v25 }
 0x864   : > { %5837 = vmatpush.bf16.msrb.mxu0 %v7372_v63 }
 0x86a   : > { %v5376_v35 = vpop.f32.mrf.mxu3 }
 0x86b   : > { %v5377_v10 = vadd.f32 %v11858_v13, %v5376_v35 }
 0x86d   : > { %v11862_v18 = vadd.f32 %v5377_v10, %v11497_v58 }
 0x86f   : > { %v7165_v11 = vmul.f32 -1.442695, %v11862_v18  ;;  %6342 = vst [vmem:[#allocation14] sm:$0xff] %v11862_v18 }
 0x871   : > { %8204 = vpow2.f32 %v7165_v11 }
 0x872   : > { %v5378_v4 = vpop.f32.mrf.mxu3 }
 0x873   : > { %v5379_v20 = vadd.f32 %v11858_v13, %v5378_v4 }
 0x875   : > { %v5417_v44 = vadd.f32 %v5379_v20, %v11502_v14 }
 0x877   : > { %v8205_v62 = vpop.eup %8204  ;;  %v7166_v46 = vmul.f32 -1.442695, %v5417_v44  ;;  %6343 = vst [vmem:[#allocation14 + $0x8] sm:$0xff] %v5417_v44 }
 0x878   : > { %v5480_v34 = vadd.f32 1.0, %v8205_v62 }
 0x879   : > { %8206 = vpow2.f32 %v7166_v46 }
 0x87a   : > { %8208 = vrcp.f32 %v5480_v34  ;;  %v5507_v42 = vand.u32 2147483648, %v5480_v34  ;;  %vm5501_vm6 = vweird.f32 %v5480_v34 }
 0x87c   : > { %v5508_v47 = vor.u32 1.1754944e-38, %v5507_v42 }
 0x87f   : > { %v8207_v58 = vpop.eup %8206 }
 0x880   : > { %v8209_v37 = vpop.eup %8208  ;;  %v5481_v22 = vadd.f32 1.0, %v8207_v58  ;;  %v5381_v3 = vpop.f32.mrf.mxu3 }
 0x881   : > { %v5382_v26 = vadd.f32 %v11858_v13, %v5381_v3  ;;  %v5497_v30 = vmul.f32 %v8209_v37, %v5480_v34  ;;  %vm5502_vm0 = vweird.f32 %v8209_v37 }
 0x882   : > { %8210 = vrcp.f32 %v5481_v22  ;;  %vm11878_vm1 = vmor %vm5501_vm6, %vm5502_vm0  ;;  %v5520_v9 = vand.u32 2147483647, %v5481_v22  ;;  %v5522_v28 = vand.u32 2147483648, %v5481_v22  ;;  %vm5516_vm3 = vweird.f32 %v5481_v22 }
 0x883   : > { %v11870_v49 = vadd.f32 %v5382_v26, %v11507_v51  ;;  %v5498_v14 = vsub.f32 1.0, %v5497_v30  ;;  %v5505_v51 = vand.u32 2147483647, %v5480_v34 }
 0x884   : > { %v5523_v43 = vor.u32 1.1754944e-38, %v5522_v28  ;;  %vm5521_vm7 = vcmp.eq.f32.partialorder %v5520_v9, 8.507059e+37 }
 0x885   : > { %v7167_v33 = vmul.f32 -1.442695, %v11870_v49  ;;  %6344 = vst [vmem:[#allocation14 + $0x10] sm:$0xff] %v11870_v49  ;;  %v5499_v17 = vmul.f32 %v8209_v37, %v5498_v14  ;;  %vm5506_vm4 = vcmp.eq.f32.partialorder %v5505_v51, 8.507059e+37 }
 0x887   : > { %8212 = vpow2.f32 %v7167_v33  ;;  %v5500_v12 = vadd.f32 %v8209_v37, %v5499_v17 }
 0x888   : > { %v8211_v60 = vpop.eup %8210  ;;  %v5383_v56 = vpop.f32.mrf.mxu3 }
 0x889   : > { %v5384_v54 = vadd.f32 %v11858_v13, %v5383_v56  ;;  %v5512_v36 = vmul.f32 %v8211_v60, %v5481_v22  ;;  %v5504_v7 = vsel %vm11878_vm1, %v8209_v37, %v5500_v12  ;;  %vm5517_vm2 = vweird.f32 %v8211_v60 }
 0x88a   : > { %v5509_v61 = vsel %vm5506_vm4, %v5508_v47, %v5504_v7  ;;  %vm5518_vm5 = vmor %vm5516_vm3, %vm5517_vm2 }
 0x88b   : > { %v11876_v0 = vadd.f32 %v5384_v54, %v11512_v39  ;;  %v5513_v24 = vsub.f32 1.0, %v5512_v36  ;;  %v5736_v57 = vmul.f32 %v5509_v61, %v11862_v18 }
 0x88d   : > { %v8213_v53 = vpop.eup %8212  ;;  %v7168_v32 = vmul.f32 -1.442695, %v11876_v0  ;;  %6345 = vst [vmem:[#allocation14 + $0x18] sm:$0xff] %v11876_v0  ;;  %v5514_v5 = vmul.f32 %v8211_v60, %v5513_v24 }
 0x88e   : > { %v5482_v39 = vadd.f32 1.0, %v8213_v53 }
 0x88f   : > { %8214 = vpow2.f32 %v7168_v32  ;;  %v5515_v29 = vadd.f32 %v8211_v60, %v5514_v5 }
 0x890   : > { %8216 = vrcp.f32 %v5482_v39  ;;  %v5537_v26 = vand.u32 2147483648, %v5482_v39  ;;  %vm5531_vm9 = vweird.f32 %v5482_v39  ;;  %v5535_v63 = vand.u32 2147483647, %v5482_v39 }
 0x891   : > { %v5519_v8 = vsel %vm5518_vm5, %v8211_v60, %v5515_v29 }
 0x892   : > { %v5386_v52 = vpop.f32.mrf.mxu3  ;;  %v5524_v16 = vsel %vm5521_vm7, %v5523_v43, %v5519_v8  ;;  %v5538_v54 = vor.u32 1.1754944e-38, %v5537_v26  ;;  %vm5536_vm12 = vcmp.eq.f32.partialorder %v5535_v63, 8.507059e+37 }
 0x893   : > { %v5387_v15 = vadd.f32 %v11858_v13, %v5386_v52  ;;  %v5737_v31 = vmul.f32 %v5524_v16, %v5417_v44 }
 0x895   : > { %v8215_v40 = vpop.eup %8214  ;;  %v11889_v35 = vadd.f32 %v5387_v15, %v11522_v6  ;;  %v5752_v10 = vpack.c.bf16 %v5737_v31, %v5736_v57 }
 0x896   : > { %v8217_v11 = vpop.eup %8216  ;;  %v5483_v1 = vadd.f32 1.0, %v8215_v40 }
 0x897   : > { %v7169_v4 = vmul.f32 -1.442695, %v11889_v35  ;;  %6346 = vst [vmem:[#allocation14 + $0x20] sm:$0xff] %v11889_v35  ;;  %5838 = vmatmul.bf16.vlgmr.msrb.gmra.mxu0 %v5752_v10  ;;  %v5527_v20 = vmul.f32 %v8217_v11, %v5482_v39  ;;  %vm5532_vm8 = vweird.f32 %v8217_v11 }
 0x898   : > { %8218 = vrcp.f32 %v5483_v1  ;;  %vm5533_vm10 = vmor %vm5531_vm9, %vm5532_vm8  ;;  %v5550_v14 = vand.u32 2147483647, %v5483_v1  ;;  %v5552_v33 = vand.u32 2147483648, %v5483_v1  ;;  %vm5546_vm13 = vweird.f32 %v5483_v1 }
 0x899   : > { %8220 = vpow2.f32 %v7169_v4  ;;  %v5528_v62 = vsub.f32 1.0, %v5527_v20 }
 0x89a   : > { %v5388_v46 = vpop.f32.mrf.mxu3  ;;  %v5553_v51 = vor.u32 1.1754944e-38, %v5552_v33  ;;  %vm5551_vm15 = vcmp.eq.f32.partialorder %v5550_v14, 8.507059e+37 }
 0x89b   : > { %v5389_v18 = vadd.f32 %v11858_v13, %v5388_v46  ;;  %v5529_v44 = vmul.f32 %v8217_v11, %v5528_v62 }
 0x89d   : > { %v11895_v34 = vadd.f32 %v5389_v18, %v11531_v48  ;;  %v5530_v37 = vadd.f32 %v8217_v11, %v5529_v44 }
 0x89e   : > { %v8219_v6 = vpop.eup %8218 }
 0x89f   : > { %v8221_v25 = vpop.eup %8220  ;;  %v7170_v58 = vmul.f32 -1.442695, %v11895_v34  ;;  %6347 = vst [vmem:[#allocation14 + $0x28] sm:$0xff] %v11895_v34  ;;  %v5542_v22 = vmul.f32 %v8219_v6, %v5483_v1  ;;  %v5534_v60 = vsel %vm5533_vm10, %v8217_v11, %v5530_v37  ;;  %vm5547_vm11 = vweird.f32 %v8219_v6 }
 0x8a0   : > { %v11899_v3 = vadd.f32 1.0, %v8221_v25  ;;  %v5539_v42 = vsel %vm5536_vm12, %v5538_v54, %v5534_v60  ;;  %vm5548_vm14 = vmor %vm5546_vm13, %vm5547_vm11 }
 0x8a1   : > { %8222 = vpow2.f32 %v7170_v58  ;;  %v5543_v30 = vsub.f32 1.0, %v5542_v22 }
 0x8a2   : > { %8224 = vrcp.f32 %v11899_v3  ;;  %v5391_v48 = vpop.f32.mrf.mxu3  ;;  %vm5561_vm6 = vweird.f32 %v11899_v3  ;;  %v5565_v10 = vand.u32 2147483647, %v11899_v3 }
 0x8a3   : > { %v5392_v17 = vadd.f32 %v11858_v13, %v5391_v48  ;;  %v5544_v56 = vmul.f32 %v8219_v6, %v5543_v30 }
 0x8a4   : > { %vm5566_vm4 = vcmp.eq.f32.partialorder %v5565_v10, 8.507059e+37 }
 0x8a5   : > { %v11904_v12 = vadd.f32 %v5392_v17, %v11550_v23  ;;  %v5545_v36 = vadd.f32 %v8219_v6, %v5544_v56  ;;  %v5738_v23 = vmul.f32 %v5539_v42, %v11870_v49 }
 0x8a7   : > { %v8223_v24 = vpop.eup %8222  ;;  %v7171_v19 = vmul.f32 -1.442695, %v11904_v12  ;;  %6348 = vst [vmem:[#allocation14 + $0x30] sm:$0xff] %v11904_v12  ;;  %v5549_v9 = vsel %vm5548_vm14, %v8219_v6, %v5545_v36 }
 0x8a8   : > { %v8225_v28 = vpop.eup %8224  ;;  %v5485_v53 = vadd.f32 1.0, %v8223_v24  ;;  %v5554_v32 = vsel %vm5551_vm15, %v5553_v51, %v5549_v9 }
 0x8a9   : > { %8226 = vpow2.f32 %v7171_v19  ;;  %v5739_v7 = vmul.f32 %v5554_v32, %v11876_v0  ;;  %v5557_v5 = vmul.f32 %v8225_v28, %v11899_v3  ;;  %vm5562_vm0 = vweird.f32 %v8225_v28 }
 0x8aa   : > { %8228 = vrcp.f32 %v5485_v53  ;;  %v5393_v39 = vpop.f32.mrf.mxu3  ;;  %vm11924_vm1 = vmor %vm5561_vm6, %vm5562_vm0  ;;  %v5580_v4 = vand.u32 2147483647, %v5485_v53  ;;  %v5582_v20 = vand.u32 2147483648, %v5485_v53  ;;  %vm5576_vm3 = vweird.f32 %v5485_v53 }
 0x8ab   : > { %v5394_v47 = vadd.f32 %v11858_v13, %v5393_v39  ;;  %v5753_v29 = vpack.c.bf16 %v5739_v7, %v5738_v23  ;;  %v5558_v61 = vsub.f32 1.0, %v5557_v5 }
 0x8ac   : > { %vm5581_vm7 = vcmp.eq.f32.partialorder %v5580_v4, 8.507059e+37 }
 0x8ad   : > { %v11913_v43 = vadd.f32 %v5394_v47, %v11559_v2  ;;  %5843 = vmatmul.bf16.gmra.mxu0 %v5753_v29  ;;  %v5559_v8 = vmul.f32 %v8225_v28, %v5558_v61  ;;  %v5567_v2 = vand.u32 2147483648, %v11899_v3 }
 0x8af   : > { %v8227_v52 = vpop.eup %8226  ;;  %v7172_v16 = vmul.f32 -1.442695, %v11913_v43  ;;  %6349 = vst [vmem:[#allocation14 + $0x38] sm:$0xff] %v11913_v43  ;;  %v5560_v15 = vadd.f32 %v8225_v28, %v5559_v8  ;;  %v5568_v44 = vor.u32 1.1754944e-38, %v5567_v2 }
 0x8b0   : > { %v8229_v49 = vpop.eup %8228  ;;  %v11917_v0 = vadd.f32 1.0, %v8227_v52 }
 0x8b1   : > { %8230 = vpow2.f32 %v7172_v16  ;;  %v5572_v57 = vmul.f32 %v8229_v49, %v5485_v53  ;;  %v5564_v46 = vsel %vm11924_vm1, %v8225_v28, %v5560_v15  ;;  %vm5577_vm2 = vweird.f32 %v8229_v49 }
 0x8b2   : > { %8232 = vrcp.f32 %v11917_v0  ;;  %v5396_v31 = vpop.f32.mrf.mxu3  ;;  %v5569_v3 = vsel %vm5566_vm4, %v5568_v44, %v5564_v46  ;;  %vm5578_vm5 = vmor %vm5576_vm3, %vm5577_vm2  ;;  %vm5591_vm9 = vweird.f32 %v11917_v0  ;;  %v5595_v53 = vand.u32 2147483647, %v11917_v0 }
 0x8b3   : > { %v5397_v40 = vadd.f32 %v11858_v13, %v5396_v31  ;;  %v5573_v11 = vsub.f32 1.0, %v5572_v57  ;;  %v5740_v33 = vmul.f32 %v5569_v3, %v11889_v35 }
 0x8b4   : > { %vm5596_vm12 = vcmp.eq.f32.partialorder %v5595_v53, 8.507059e+37 }
 0x8b5   : > { %v11929_v62 = vadd.f32 %v5397_v40, %v11536_v45  ;;  %v5574_v18 = vmul.f32 %v8229_v49, %v5573_v11  ;;  %v5583_v45 = vor.u32 1.1754944e-38, %v5582_v20 }
 0x8b7   : > { %v8231_v6 = vpop.eup %8230  ;;  %v7173_v25 = vmul.f32 -1.442695, %v11929_v62  ;;  %6350 = vst [vmem:[#allocation14 + $0x40] sm:$0xff] %v11929_v62  ;;  %v5575_v58 = vadd.f32 %v8229_v49, %v5574_v18 }
 0x8b8   : > { %v8233_v37 = vpop.eup %8232  ;;  %v5487_v22 = vadd.f32 1.0, %v8231_v6 }
 0x8b9   : > { %8234 = vpow2.f32 %v7173_v25  ;;  %v5579_v26 = vsel %vm5578_vm5, %v8229_v49, %v5575_v58  ;;  %v5587_v63 = vmul.f32 %v8233_v37, %v11917_v0  ;;  %vm5592_vm8 = vweird.f32 %v8233_v37 }
 0x8ba   : > { %8236 = vrcp.f32 %v5487_v22  ;;  %v5398_v30 = vpop.f32.mrf.mxu3  ;;  %v5584_v48 = vsel %vm5581_vm7, %v5583_v45, %v5579_v26  ;;  %vm11951_vm10 = vmor %vm5591_vm9, %vm5592_vm8  ;;  %v5610_v7 = vand.u32 2147483647, %v5487_v22  ;;  %v5612_v5 = vand.u32 2147483648, %v5487_v22 }
 0x8bb   : > { %v5399_v14 = vadd.f32 %v11858_v13, %v5398_v30  ;;  %v5741_v17 = vmul.f32 %v5584_v48, %v11895_v34  ;;  %v5588_v60 = vsub.f32 1.0, %v5587_v63  ;;  %vm5606_vm13 = vweird.f32 %v5487_v22 }
 0x8bc   : > { %vm5611_vm15 = vcmp.eq.f32.partialorder %v5610_v7, 8.507059e+37 }
 0x8bd   : > { %v11940_v56 = vadd.f32 %v5399_v14, %v11544_v38  ;;  %v5754_v54 = vpack.c.bf16 %v5741_v17, %v5740_v33  ;;  %v5589_v36 = vmul.f32 %v8233_v37, %v5588_v60  ;;  %v5597_v38 = vand.u32 2147483648, %v11917_v0 }
 0x8bf   : > { %v8235_v42 = vpop.eup %8234  ;;  %v7174_v51 = vmul.f32 -1.442695, %v11940_v56  ;;  %6351 = vst [vmem:[#allocation14 + $0x48] sm:$0xff] %v11940_v56  ;;  %5848 = vmatmul.bf16.gmra.mxu0 %v5754_v54  ;;  %v5590_v9 = vadd.f32 %v8233_v37, %v5589_v36  ;;  %v5598_v61 = vor.u32 1.1754944e-38, %v5597_v38 }
 0x8c0   : > { %v8237_v24 = vpop.eup %8236  ;;  %v11944_v19 = vadd.f32 1.0, %v8235_v42 }
 0x8c1   : > { %8238 = vpow2.f32 %v7174_v51  ;;  %v5602_v35 = vmul.f32 %v8237_v24, %v5487_v22  ;;  %v5594_v47 = vsel %vm11951_vm10, %v8233_v37, %v5590_v9  ;;  %vm5607_vm11 = vweird.f32 %v8237_v24 }
 0x8c2   : > { %8240 = vrcp.f32 %v11944_v19  ;;  %v5401_v34 = vpop.f32.mrf.mxu3  ;;  %v5599_v15 = vsel %vm5596_vm12, %v5598_v61, %v5594_v47  ;;  %vm5608_vm14 = vmor %vm5606_vm13, %vm5607_vm11  ;;  %vm5621_vm6 = vweird.f32 %v11944_v19  ;;  %v5625_v3 = vand.u32 2147483647, %v11944_v19  ;;  %v7387_v61 = vld [vmem:[#allocation11 + $0x178] sm:$0xff] }
 0x8c3   : > { %v5402_v28 = vadd.f32 %v11858_v13, %v5401_v34  ;;  %v5603_v32 = vsub.f32 1.0, %v5602_v35  ;;  %v5742_v11 = vmul.f32 %v5599_v15, %v11904_v12  ;;  %6277 = vmatpush.bf16.msrb.mxu1 %v7387_v61 }
 0x8c4   : > { %vm5626_vm4 = vcmp.eq.f32.partialorder %v5625_v3, 8.507059e+37 }
 0x8c5   : > { %v11956_v39 = vadd.f32 %v5402_v28, %v11586_v27  ;;  %v5604_v29 = vmul.f32 %v8237_v24, %v5603_v32  ;;  %v5613_v27 = vor.u32 1.1754944e-38, %v5612_v5 }
 0x8c7   : > { %v8239_v8 = vpop.eup %8238  ;;  %v7175_v52 = vmul.f32 -1.442695, %v11956_v39  ;;  %6352 = vst [vmem:[#allocation14 + $0x50] sm:$0xff] %v11956_v39  ;;  %v5605_v16 = vadd.f32 %v8237_v24, %v5604_v29 }
 0x8c8   : > { %v8241_v49 = vpop.eup %8240  ;;  %v5489_v0 = vadd.f32 1.0, %v8239_v8 }
 0x8c9   : > { %8242 = vpow2.f32 %v7175_v52  ;;  %v5609_v57 = vsel %vm5608_vm14, %v8237_v24, %v5605_v16  ;;  %v5617_v31 = vmul.f32 %v8241_v49, %v11944_v19  ;;  %vm5622_vm0 = vweird.f32 %v8241_v49 }
 0x8ca   : > { %8244 = vrcp.f32 %v5489_v0  ;;  %v5403_v2 = vpop.f32.mrf.mxu3  ;;  %v5614_v40 = vsel %vm5611_vm15, %v5613_v27, %v5609_v57  ;;  %vm11978_vm1 = vmor %vm5621_vm6, %vm5622_vm0  ;;  %v5640_v63 = vand.u32 2147483647, %v5489_v0  ;;  %v5642_v30 = vand.u32 2147483648, %v5489_v0 }
 0x8cb   : > { %v5404_v10 = vadd.f32 %v11858_v13, %v5403_v2  ;;  %v5743_v1 = vmul.f32 %v5614_v40, %v11913_v43  ;;  %v5618_v4 = vsub.f32 1.0, %v5617_v31  ;;  %vm5636_vm3 = vweird.f32 %v5489_v0 }
 0x8cc   : > { %vm5641_vm7 = vcmp.eq.f32.partialorder %v5640_v63, 8.507059e+37 }
 0x8cd   : > { %v11967_v20 = vadd.f32 %v5404_v10, %v11576_v55  ;;  %v5755_v46 = vpack.c.bf16 %v5743_v1, %v5742_v11  ;;  %v5619_v18 = vmul.f32 %v8241_v49, %v5618_v4  ;;  %v5627_v55 = vand.u32 2147483648, %v11944_v19 }
 0x8cf   : > { %v8243_v44 = vpop.eup %8242  ;;  %v7176_v6 = vmul.f32 -1.442695, %v11967_v20  ;;  %6353 = vst [vmem:[#allocation14 + $0x58] sm:$0xff] %v11967_v20  ;;  %5853 = vmatmul.bf16.gmra.mxu0 %v5755_v46  ;;  %v5620_v37 = vadd.f32 %v8241_v49, %v5619_v18  ;;  %v5628_v17 = vor.u32 1.1754944e-38, %v5627_v55 }
 0x8d0   : > { %v8245_v25 = vpop.eup %8244  ;;  %v11971_v58 = vadd.f32 1.0, %v8243_v44 }
 0x8d1   : > { %8246 = vpow2.f32 %v7176_v6  ;;  %v5632_v12 = vmul.f32 %v8245_v25, %v5489_v0  ;;  %v5624_v14 = vsel %vm11978_vm1, %v8241_v49, %v5620_v37  ;;  %vm5637_vm2 = vweird.f32 %v8245_v25 }
 0x8d2   : > { %8248 = vrcp.f32 %v11971_v58  ;;  %v5406_v43 = vpop.f32.mrf.mxu3  ;;  %v5629_v24 = vsel %vm5626_vm4, %v5628_v17, %v5624_v14  ;;  %vm5638_vm5 = vmor %vm5636_vm3, %vm5637_vm2  ;;  %v5657_v16 = vand.u32 2147483648, %v11971_v58  ;;  %vm5651_vm9 = vweird.f32 %v11971_v58 }
 0x8d3   : > { %v5407_v22 = vadd.f32 %v11858_v13, %v5406_v43  ;;  %v5633_v45 = vsub.f32 1.0, %v5632_v12  ;;  %v5744_v28 = vmul.f32 %v5629_v24, %v11929_v62  ;;  %v5655_v0 = vand.u32 2147483647, %v11971_v58 }
 0x8d4   : > { %v5658_v11 = vor.u32 1.1754944e-38, %v5657_v16 }
 0x8d5   : > { %v11983_v48 = vadd.f32 %v5407_v22, %v11619_v41  ;;  %v5634_v33 = vmul.f32 %v8245_v25, %v5633_v45  ;;  %v5643_v41 = vor.u32 1.1754944e-38, %v5642_v30  ;;  %vm5656_vm12 = vcmp.eq.f32.partialorder %v5655_v0, 8.507059e+37 }
 0x8d7   : > { %v8247_v60 = vpop.eup %8246  ;;  %v7177_v54 = vmul.f32 -1.442695, %v11983_v48  ;;  %6354 = vst [vmem:[#allocation14 + $0x60] sm:$0xff] %v11983_v48  ;;  %v5635_v36 = vadd.f32 %v8245_v25, %v5634_v33  ;;  %v7386_v33 = vld [vmem:[#allocation11 + $0x170] sm:$0xff] }
 0x8d8   : > { %v8249_v42 = vpop.eup %8248  ;;  %v5491_v51 = vadd.f32 1.0, %v8247_v60  ;;  %6278 = vmatpush.bf16.msrb.mxu1 %v7386_v33  ;;  %v7380_v33 = vld [vmem:[#allocation11 + $0x140] sm:$0xff] }
 0x8d9   : > { %8250 = vpow2.f32 %v7177_v54  ;;  %v5639_v19 = vsel %vm5638_vm5, %v8245_v25, %v5635_v36  ;;  %v5647_v9 = vmul.f32 %v8249_v42, %v11971_v58  ;;  %vm5652_vm8 = vweird.f32 %v8249_v42 }
 0x8da   : > { %8252 = vrcp.f32 %v5491_v51  ;;  %v5408_v35 = vpop.f32.mrf.mxu3  ;;  %v5644_v34 = vsel %vm5641_vm7, %v5643_v41, %v5639_v19  ;;  %vm12005_vm10 = vmor %vm5651_vm9, %vm5652_vm8  ;;  %v5670_v57 = vand.u32 2147483647, %v5491_v51  ;;  %v5672_v31 = vand.u32 2147483648, %v5491_v51 }
 0x8db   : > { %v5409_v38 = vadd.f32 %v11858_v13, %v5408_v35  ;;  %v5745_v53 = vmul.f32 %v5644_v34, %v11940_v56  ;;  %v5648_v32 = vsub.f32 1.0, %v5647_v9  ;;  %vm5666_vm13 = vweird.f32 %v5491_v51 }
 0x8dc   : > { %vm5671_vm15 = vcmp.eq.f32.partialorder %v5670_v57, 8.507059e+37 }
 0x8dd   : > { %v11994_v23 = vadd.f32 %v5409_v38, %v11606_v59  ;;  %v5756_v7 = vpack.c.bf16 %v5745_v53, %v5744_v28  ;;  %v5649_v5 = vmul.f32 %v8249_v42, %v5648_v32 }
 0x8df   : > { %v8251_v47 = vpop.eup %8250  ;;  %v7178_v29 = vmul.f32 -1.442695, %v11994_v23  ;;  %6355 = vst [vmem:[#allocation14 + $0x68] sm:$0xff] %v11994_v23  ;;  %5858 = vmatmul.bf16.gmra.mxu0 %v5756_v7  ;;  %v5650_v62 = vadd.f32 %v8249_v42, %v5649_v5 }
 0x8e0   : > { %v8253_v8 = vpop.eup %8252  ;;  %v11998_v52 = vadd.f32 1.0, %v8251_v47 }
 0x8e1   : > { %8254 = vpow2.f32 %v7178_v29  ;;  %v5662_v56 = vmul.f32 %v8253_v8, %v5491_v51  ;;  %v5654_v40 = vsel %vm12005_vm10, %v8249_v42, %v5650_v62  ;;  %vm5667_vm11 = vweird.f32 %v8253_v8 }
 0x8e2   : > { %8256 = vrcp.f32 %v11998_v52  ;;  %v5411_v59 = vpop.f32.mrf.mxu3  ;;  %v5659_v6 = vsel %vm5656_vm12, %v5658_v11, %v5654_v40  ;;  %vm5668_vm14 = vmor %vm5666_vm13, %vm5667_vm11  ;;  %vm5681_vm6 = vweird.f32 %v11998_v52  ;;  %v5685_v54 = vand.u32 2147483647, %v11998_v52 }
 0x8e3   : > { %v5412_v49 = vadd.f32 %v11858_v13, %v5411_v59  ;;  %v5663_v15 = vsub.f32 1.0, %v5662_v56  ;;  %v5746_v55 = vmul.f32 %v5659_v6, %v11956_v39  ;;  %v7384_v6 = vld [vmem:[#allocation11 + $0x160] sm:$0xff] }
 0x8e4   : > { %vm5686_vm4 = vcmp.eq.f32.partialorder %v5685_v54, 8.507059e+37 }
 0x8e5   : > { %v12010_v2 = vadd.f32 %v5412_v49, %v11665_v50  ;;  %v5664_v10 = vmul.f32 %v8253_v8, %v5663_v15  ;;  %v5673_v50 = vor.u32 1.1754944e-38, %v5672_v31 }
 0x8e7   : > { %v8255_v1 = vpop.eup %8254  ;;  %v7179_v4 = vmul.f32 -1.442695, %v12010_v2  ;;  %6356 = vst [vmem:[#allocation14 + $0x70] sm:$0xff] %v12010_v2  ;;  %v5665_v46 = vadd.f32 %v8253_v8, %v5664_v10 }
 0x8e8   : > { %v8257_v18 = vpop.eup %8256  ;;  %v5493_v44 = vadd.f32 1.0, %v8255_v1 }
 0x8e9   : > { %8258 = vpow2.f32 %v7179_v4  ;;  %v5669_v25 = vsel %vm5668_vm14, %v8253_v8, %v5665_v46  ;;  %v5677_v58 = vmul.f32 %v8257_v18, %v11998_v52  ;;  %vm5682_vm0 = vweird.f32 %v8257_v18 }
 0x8ea   : > { %8260 = vrcp.f32 %v5493_v44  ;;  %v5413_v37 = vpop.f32.mrf.mxu3  ;;  %v5674_v12 = vsel %vm5671_vm15, %v5673_v50, %v5669_v25  ;;  %vm5683_vm1 = vmor %vm5681_vm6, %vm5682_vm0  ;;  %v5702_v42 = vand.u32 2147483648, %v5493_v44  ;;  %v5700_v41 = vand.u32 2147483647, %v5493_v44 }
 0x8eb   : > { %v5414_v43 = vadd.f32 %v11858_v13, %v5413_v37  ;;  %v5747_v22 = vmul.f32 %v5674_v12, %v11967_v20  ;;  %v5678_v3 = vsub.f32 1.0, %v5677_v58  ;;  %v7385_v20 = vld [vmem:[#allocation11 + $0x168] sm:$0xff]  ;;  %vm5696_vm3 = vweird.f32 %v5493_v44  ;;  %v7383_v37 = vld [vmem:[#allocation11 + $0x158] sm:$0xff] }
 0x8ec   : > { %6279 = vmatpush.bf16.msrb.mxu1 %v7385_v20  ;;  %v5703_v53 = vor.u32 1.1754944e-38, %v5702_v42  ;;  %vm5701_vm7 = vcmp.eq.f32.partialorder %v5700_v41, 8.507059e+37 }
 0x8ed   : > { %v12021_v45 = vadd.f32 %v5414_v43, %v11655_v21  ;;  %v5757_v26 = vpack.c.bf16 %v5747_v22, %v5746_v55  ;;  %v5679_v63 = vmul.f32 %v8257_v18, %v5678_v3  ;;  %v5687_v21 = vand.u32 2147483648, %v11998_v52  ;;  %v7382_v3 = vld [vmem:[#allocation11 + $0x150] sm:$0xff] }
 0x8ef   : > { %v8259_v30 = vpop.eup %8258  ;;  %v7180_v14 = vmul.f32 -1.442695, %v12021_v45  ;;  %6357 = vst [vmem:[#allocation14 + $0x78] sm:$0xff] %v12021_v45  ;;  %5863 = vmatmul.bf16.gmra.mxu0 %v5757_v26  ;;  %v5680_v13 = vadd.f32 %v8257_v18, %v5679_v63  ;;  %v5688_v19 = vor.u32 1.1754944e-38, %v5687_v21 }
 0x8f0   : > { %v8261_v17 = vpop.eup %8260  ;;  %v5494_v60 = vadd.f32 1.0, %v8259_v30  ;;  %6280 = vmatpush.bf16.msrb.mxu1 %v7384_v6 }
 0x8f1   : > { %8262 = vpow2.f32 %v7180_v14  ;;  %v5692_v39 = vmul.f32 %v8261_v17, %v5493_v44  ;;  %v5684_v51 = vsel %vm5683_vm1, %v8257_v18, %v5680_v13  ;;  %vm5697_vm2 = vweird.f32 %v8261_v17  ;;  %v12032_v44 = vld [vmem:[#allocation10 + $0x5] ss:$0 sm:$0xff] }
 0x8f2   : > { %8264 = vrcp.f32 %v5494_v60  ;;  %v5689_v28 = vsel %vm5686_vm4, %v5688_v19, %v5684_v51  ;;  %vm5698_vm5 = vmor %vm5696_vm3, %vm5697_vm2  ;;  %v5717_v16 = vand.u32 2147483648, %v5494_v60  ;;  %vm5711_vm9 = vweird.f32 %v5494_v60 }
 0x8f3   : > { %v5693_v36 = vsub.f32 1.0, %v5692_v39  ;;  %v5748_v47 = vmul.f32 %v5689_v28, %v11983_v48  ;;  %v5715_v49 = vand.u32 2147483647, %v5494_v60 }
 0x8f4   : > { %v5718_v31 = vor.u32 1.1754944e-38, %v5717_v16  ;;  %6281 = vmatpush.bf16.msrb.mxu1 %v7383_v37 }
 0x8f5   : > { %v5694_v24 = vmul.f32 %v8261_v17, %v5693_v36  ;;  %vm5716_vm12 = vcmp.eq.f32.partialorder %v5715_v49, 8.507059e+37 }
 0x8f7   : > { %v8263_v9 = vpop.eup %8262  ;;  %v5695_v35 = vadd.f32 %v8261_v17, %v5694_v24 }
 0x8f8   : > { %v8265_v34 = vpop.eup %8264  ;;  %v5495_v38 = vadd.f32 1.0, %v8263_v9  ;;  %6282 = vmatpush.bf16.msrb.mxu1 %v7382_v3 }
 0x8f9   : > { %v5699_v32 = vsel %vm5698_vm5, %v8261_v17, %v5695_v35  ;;  %v5707_v7 = vmul.f32 %v8265_v34, %v5494_v60  ;;  %vm5712_vm8 = vweird.f32 %v8265_v34 }
 0x8fa   : > { %8266 = vrcp.f32 %v5495_v38  ;;  %v5704_v5 = vsel %vm5701_vm7, %v5703_v53, %v5699_v32  ;;  %vm5713_vm10 = vmor %vm5711_vm9, %vm5712_vm8  ;;  %v5732_v15 = vand.u32 2147483648, %v5495_v38  ;;  %v5730_v48 = vand.u32 2147483647, %v5495_v38 }
 0x8fb   : > { %v5749_v29 = vmul.f32 %v5704_v5, %v11994_v23  ;;  %v5708_v61 = vsub.f32 1.0, %v5707_v7  ;;  %vm5726_vm13 = vweird.f32 %v5495_v38 }
 0x8fc   : > { %v5733_v10 = vor.u32 1.1754944e-38, %v5732_v15  ;;  %vm5731_vm15 = vcmp.eq.f32.partialorder %v5730_v48, 8.507059e+37 }
 0x8fd   : > { %v5758_v8 = vpack.c.bf16 %v5749_v29, %v5748_v47  ;;  %v5709_v52 = vmul.f32 %v8265_v34, %v5708_v61 }
 0x8ff   : > { %5868 = vmatmul.bf16.gmra.mxu0 %v5758_v8  ;;  %v5710_v56 = vadd.f32 %v8265_v34, %v5709_v52 }
 0x900   : > { %v8267_v62 = vpop.eup %8266 }
 0x901   : > { %v5722_v59 = vmul.f32 %v8267_v62, %v5495_v38  ;;  %v5714_v27 = vsel %vm5713_vm10, %v8265_v34, %v5710_v56  ;;  %vm5727_vm11 = vweird.f32 %v8267_v62 }
 0x902   : > { %v5719_v40 = vsel %vm5716_vm12, %v5718_v31, %v5714_v27  ;;  %vm5728_vm14 = vmor %vm5726_vm13, %vm5727_vm11 }
 0x903   : > { %v5723_v0 = vsub.f32 1.0, %v5722_v59  ;;  %v5750_v4 = vmul.f32 %v5719_v40, %v12010_v2 }
 0x905   : > { %v5724_v57 = vmul.f32 %v8267_v62, %v5723_v0 }
 0x907   : > { %v5725_v23 = vadd.f32 %v8267_v62, %v5724_v57 }
 0x909   : > { %v5729_v11 = vsel %vm5728_vm14, %v8267_v62, %v5725_v23 }
 0x90a   : > { %v5734_v1 = vsel %vm5731_vm15, %v5733_v10, %v5729_v11 }
 0x90b   : > { %v5751_v46 = vmul.f32 %v5734_v1, %v12021_v45  ;;  %v7381_v45 = vld [vmem:[#allocation11 + $0x148] sm:$0xff] }
 0x90c   : > { %6283 = vmatpush.bf16.msrb.mxu1 %v7381_v45 }
 0x90d   : > { %v5759_v18 = vpack.c.bf16 %v5751_v46, %v5750_v4 }
 0x90f   : > { %5873 = vmatmul.bf16.gmra.mxu0 %v5759_v18 }
 0x910   : > { %6284 = vmatpush.bf16.msrb.mxu1 %v7380_v33 }
 0x914   : > { %v5839_v50 = vpop.f32.mrf.mxu0 }
 0x915   : > { %v5840_v25 = vadd.f32 %v12032_v44, %v5839_v50 }
 0x917   : > { %v7213_v58 = vmul.f32 -1.442695, %v5840_v25 }
 0x919   : > { %8268 = vpow2.f32 %v7213_v58 }
 0x91c   : > { %v5841_v12 = vpop.f32.mrf.mxu0 }
 0x91d   : > { %v5842_v43 = vadd.f32 %v12032_v44, %v5841_v12 }
 0x91f   : > { %v8269_v55 = vpop.eup %8268  ;;  %v7214_v2 = vmul.f32 -1.442695, %v5842_v43 }
 0x920   : > { %v5927_v22 = vadd.f32 1.0, %v8269_v55 }
 0x921   : > { %8270 = vpow2.f32 %v7214_v2 }
 0x922   : > { %8272 = vrcp.f32 %v5927_v22  ;;  %v5954_v42 = vand.u32 2147483648, %v5927_v22  ;;  %vm5948_vm6 = vweird.f32 %v5927_v22  ;;  %v5952_v24 = vand.u32 2147483647, %v5927_v22 }
 0x924   : > { %v5955_v32 = vor.u32 1.1754944e-38, %v5954_v42  ;;  %vm5953_vm4 = vcmp.eq.f32.partialorder %v5952_v24, 8.507059e+37 }
 0x927   : > { %v8271_v26 = vpop.eup %8270 }
 0x928   : > { %v8273_v63 = vpop.eup %8272  ;;  %v5928_v30 = vadd.f32 1.0, %v8271_v26 }
 0x929   : > { %v5944_v14 = vmul.f32 %v8273_v63, %v5927_v22  ;;  %vm5949_vm0 = vweird.f32 %v8273_v63 }
 0x92a   : > { %8274 = vrcp.f32 %v5928_v30  ;;  %v5844_v17 = vpop.f32.mrf.mxu0  ;;  %vm5950_vm1 = vmor %vm5948_vm6, %vm5949_vm0  ;;  %v5967_v9 = vand.u32 2147483647, %v5928_v30  ;;  %v5969_v35 = vand.u32 2147483648, %v5928_v30  ;;  %vm5963_vm3 = vweird.f32 %v5928_v30 }
 0x92b   : > { %v5945_v60 = vsub.f32 1.0, %v5944_v14  ;;  %v12037_v13 = vadd.f32 %v12032_v44, %v5844_v17 }
 0x92c   : > { %v5970_v29 = vor.u32 1.1754944e-38, %v5969_v35  ;;  %vm5968_vm7 = vcmp.eq.f32.partialorder %v5967_v9, 8.507059e+37 }
 0x92d   : > { %v5946_v39 = vmul.f32 %v8273_v63, %v5945_v60  ;;  %v7215_v20 = vmul.f32 -1.442695, %v12037_v13 }
 0x92f   : > { %8276 = vpow2.f32 %v7215_v20  ;;  %v5947_v54 = vadd.f32 %v8273_v63, %v5946_v39 }
 0x930   : > { %v8275_v21 = vpop.eup %8274 }
 0x931   : > { %v5959_v36 = vmul.f32 %v8275_v21, %v5928_v30  ;;  %v5951_v38 = vsel %vm5950_vm1, %v8273_v63, %v5947_v54  ;;  %vm5964_vm2 = vweird.f32 %v8275_v21 }
 0x932   : > { %v5846_v51 = vpop.f32.mrf.mxu0  ;;  %v5956_v47 = vsel %vm5953_vm4, %v5955_v32, %v5951_v38  ;;  %vm5965_vm5 = vmor %vm5963_vm3, %vm5964_vm2 }
 0x933   : > { %v5960_v41 = vsub.f32 1.0, %v5959_v36  ;;  %v12041_v19 = vadd.f32 %v12032_v44, %v5846_v51  ;;  %v6183_v52 = vmul.f32 %v5956_v47, %v5840_v25 }
 0x935   : > { %v8277_v34 = vpop.eup %8276  ;;  %v5961_v28 = vmul.f32 %v8275_v21, %v5960_v41  ;;  %v7216_v53 = vmul.f32 -1.442695, %v12041_v19 }
 0x936   : > { %v5929_v7 = vadd.f32 1.0, %v8277_v34 }
 0x937   : > { %v5962_v5 = vadd.f32 %v8275_v21, %v5961_v28  ;;  %8278 = vpow2.f32 %v7216_v53 }
 0x938   : > { %8280 = vrcp.f32 %v5929_v7  ;;  %v5984_v18 = vand.u32 2147483648, %v5929_v7  ;;  %vm5978_vm9 = vweird.f32 %v5929_v7  ;;  %v5982_v50 = vand.u32 2147483647, %v5929_v7 }
 0x939   : > { %v5966_v61 = vsel %vm5965_vm5, %v8275_v21, %v5962_v5 }
 0x93a   : > { %v5971_v8 = vsel %vm5968_vm7, %v5970_v29, %v5966_v61  ;;  %v5985_v55 = vor.u32 1.1754944e-38, %v5984_v18  ;;  %vm5983_vm12 = vcmp.eq.f32.partialorder %v5982_v50, 8.507059e+37 }
 0x93b   : > { %v6184_v62 = vmul.f32 %v5971_v8, %v5842_v43 }
 0x93c   : > { %v5849_v56 = vpop.f32.mrf.mxu0 }
 0x93d   : > { %v8279_v59 = vpop.eup %8278  ;;  %v12045_v16 = vadd.f32 %v12032_v44, %v5849_v56  ;;  %v6199_v49 = vpack.c.bf16 %v6184_v62, %v6183_v52 }
 0x93e   : > { %v8281_v0 = vpop.eup %8280  ;;  %v5930_v15 = vadd.f32 1.0, %v8279_v59 }
 0x93f   : > { %v5974_v27 = vmul.f32 %v8281_v0, %v5929_v7  ;;  %v7217_v57 = vmul.f32 -1.442695, %v12045_v16  ;;  %6285 = vmatmul.bf16.vlgmr.msrb.gmra.mxu1 %v6199_v49  ;;  %vm5979_vm8 = vweird.f32 %v8281_v0 }
 0x940   : > { %8282 = vrcp.f32 %v5930_v15  ;;  %vm5980_vm10 = vmor %vm5978_vm9, %vm5979_vm8  ;;  %v5999_v58 = vand.u32 2147483648, %v5930_v15  ;;  %v5997_v43 = vand.u32 2147483647, %v5930_v15  ;;  %vm5993_vm13 = vweird.f32 %v5930_v15 }
 0x941   : > { %v5975_v48 = vsub.f32 1.0, %v5974_v27  ;;  %8284 = vpow2.f32 %v7217_v57 }
 0x942   : > { %v6000_v26 = vor.u32 1.1754944e-38, %v5999_v58  ;;  %vm5998_vm15 = vcmp.eq.f32.partialorder %v5997_v43, 8.507059e+37 }
 0x943   : > { %v5976_v31 = vmul.f32 %v8281_v0, %v5975_v48 }
 0x944   : > { %v5851_v23 = vpop.f32.mrf.mxu0 }
 0x945   : > { %v12049_v40 = vadd.f32 %v12032_v44, %v5851_v23  ;;  %v5977_v1 = vadd.f32 %v8281_v0, %v5976_v31 }
 0x946   : > { %v8283_v10 = vpop.eup %8282 }
 0x947   : > { %v8285_v11 = vpop.eup %8284  ;;  %v5989_v4 = vmul.f32 %v8283_v10, %v5930_v15  ;;  %v7218_v46 = vmul.f32 -1.442695, %v12049_v40  ;;  %v5981_v37 = vsel %vm5980_vm10, %v8281_v0, %v5977_v1  ;;  %vm5994_vm11 = vweird.f32 %v8283_v10 }
 0x948   : > { %v5931_v6 = vadd.f32 1.0, %v8285_v11  ;;  %v5986_v45 = vsel %vm5983_vm12, %v5985_v55, %v5981_v37  ;;  %vm5995_vm14 = vmor %vm5993_vm13, %vm5994_vm11 }
 0x949   : > { %v5990_v25 = vsub.f32 1.0, %v5989_v4  ;;  %8286 = vpow2.f32 %v7218_v46  ;;  %v6185_v39 = vmul.f32 %v5986_v45, %v12037_v13 }
 0x94a   : > { %8288 = vrcp.f32 %v5931_v6  ;;  %v6014_v38 = vand.u32 2147483648, %v5931_v6  ;;  %vm6008_vm6 = vweird.f32 %v5931_v6  ;;  %v6012_v28 = vand.u32 2147483647, %v5931_v6 }
 0x94b   : > { %v5991_v12 = vmul.f32 %v8283_v10, %v5990_v25 }
 0x94c   : > { %v5854_v2 = vpop.f32.mrf.mxu0  ;;  %v6015_v52 = vor.u32 1.1754944e-38, %v6014_v38  ;;  %vm6013_vm4 = vcmp.eq.f32.partialorder %v6012_v28, 8.507059e+37 }
 0x94d   : > { %v5992_v22 = vadd.f32 %v8283_v10, %v5991_v12  ;;  %v12053_v3 = vadd.f32 %v12032_v44, %v5854_v2 }
 0x94f   : > { %v8287_v63 = vpop.eup %8286  ;;  %v5996_v30 = vsel %vm5995_vm14, %v8283_v10, %v5992_v22  ;;  %v7219_v14 = vmul.f32 -1.442695, %v12053_v3 }
 0x950   : > { %v8289_v33 = vpop.eup %8288  ;;  %v6001_v17 = vsel %vm5998_vm15, %v6000_v26, %v5996_v30  ;;  %v5932_v60 = vadd.f32 1.0, %v8287_v63 }
 0x951   : > { %v6186_v20 = vmul.f32 %v6001_v17, %v12041_v19  ;;  %v6004_v21 = vmul.f32 %v8289_v33, %v5931_v6  ;;  %8290 = vpow2.f32 %v7219_v14  ;;  %vm6009_vm0 = vweird.f32 %v8289_v33 }
 0x952   : > { %8292 = vrcp.f32 %v5932_v60  ;;  %vm12065_vm1 = vmor %vm6008_vm6, %vm6009_vm0  ;;  %v6027_v7 = vand.u32 2147483647, %v5932_v60  ;;  %v6029_v5 = vand.u32 2147483648, %v5932_v60  ;;  %vm6023_vm3 = vweird.f32 %v5932_v60 }
 0x953   : > { %v6005_v54 = vsub.f32 1.0, %v6004_v21  ;;  %v6200_v36 = vpack.c.bf16 %v6186_v20, %v6185_v39 }
 0x954   : > { %v5856_v42 = vpop.f32.mrf.mxu0  ;;  %v6030_v15 = vor.u32 1.1754944e-38, %v6029_v5  ;;  %vm6028_vm7 = vcmp.eq.f32.partialorder %v6027_v7, 8.507059e+37 }
 0x955   : > { %v6006_v51 = vmul.f32 %v8289_v33, %v6005_v54  ;;  %v12059_v24 = vadd.f32 %v12032_v44, %v5856_v42  ;;  %6290 = vmatmul.bf16.gmra.mxu1 %v6200_v36 }
 0x957   : > { %v8291_v41 = vpop.eup %8290  ;;  %v7220_v9 = vmul.f32 -1.442695, %v12059_v24  ;;  %v6007_v13 = vadd.f32 %v8289_v33, %v6006_v51 }
 0x958   : > { %v8293_v35 = vpop.eup %8292  ;;  %v12062_v34 = vadd.f32 1.0, %v8291_v41 }
 0x959   : > { %v6019_v19 = vmul.f32 %v8293_v35, %v5932_v60  ;;  %8294 = vpow2.f32 %v7220_v9  ;;  %v6011_v29 = vsel %vm12065_vm1, %v8289_v33, %v6007_v13  ;;  %vm6024_vm2 = vweird.f32 %v8293_v35 }
 0x95a   : > { %8296 = vrcp.f32 %v12062_v34  ;;  %v6016_v0 = vsel %vm6013_vm4, %v6015_v52, %v6011_v29  ;;  %vm6025_vm5 = vmor %vm6023_vm3, %vm6024_vm2  ;;  %vm6038_vm9 = vweird.f32 %v12062_v34 }
 0x95b   : > { %v6020_v53 = vsub.f32 1.0, %v6019_v19  ;;  %v6187_v23 = vmul.f32 %v6016_v0, %v12045_v16  ;;  %v6044_v16 = vand.u32 2147483648, %v12062_v34 }
 0x95c   : > { %v5859_v47 = vpop.f32.mrf.mxu0 }
 0x95d   : > { %v6021_v61 = vmul.f32 %v8293_v35, %v6020_v53  ;;  %v12072_v8 = vadd.f32 %v12032_v44, %v5859_v47  ;;  %v6045_v14 = vor.u32 1.1754944e-38, %v6044_v16 }
 0x95f   : > { %v8295_v62 = vpop.eup %8294  ;;  %v6022_v56 = vadd.f32 %v8293_v35, %v6021_v61  ;;  %v7221_v59 = vmul.f32 -1.442695, %v12072_v8 }
 0x960   : > { %v8297_v49 = vpop.eup %8296  ;;  %v5934_v27 = vadd.f32 1.0, %v8295_v62 }
 0x961   : > { %v6026_v57 = vsel %vm6025_vm5, %v8293_v35, %v6022_v56  ;;  %v6034_v48 = vmul.f32 %v8297_v49, %v12062_v34  ;;  %8298 = vpow2.f32 %v7221_v59  ;;  %vm6039_vm8 = vweird.f32 %v8297_v49 }
 0x962   : > { %v6031_v31 = vsel %vm6028_vm7, %v6030_v15, %v6026_v57  ;;  %8300 = vrcp.f32 %v5934_v27  ;;  %vm12088_vm10 = vmor %vm6038_vm9, %vm6039_vm8  ;;  %v6057_v2 = vand.u32 2147483647, %v5934_v27  ;;  %v6059_v22 = vand.u32 2147483648, %v5934_v27 }
 0x963   : > { %v6188_v10 = vmul.f32 %v6031_v31, %v12049_v40  ;;  %v6035_v11 = vsub.f32 1.0, %v6034_v48  ;;  %v6042_v40 = vand.u32 2147483647, %v12062_v34  ;;  %vm6053_vm13 = vweird.f32 %v5934_v27 }
 0x964   : > { %v5861_v1 = vpop.f32.mrf.mxu0  ;;  %v6060_v21 = vor.u32 1.1754944e-38, %v6059_v22  ;;  %vm6058_vm15 = vcmp.eq.f32.partialorder %v6057_v2, 8.507059e+37 }
 0x965   : > { %v6036_v4 = vmul.f32 %v8297_v49, %v6035_v11  ;;  %v12079_v46 = vadd.f32 %v12032_v44, %v5861_v1  ;;  %v6201_v18 = vpack.c.bf16 %v6188_v10, %v6187_v23  ;;  %vm6043_vm12 = vcmp.eq.f32.partialorder %v6042_v40, 8.507059e+37 }
 0x967   : > { %v8299_v6 = vpop.eup %8298  ;;  %v7222_v50 = vmul.f32 -1.442695, %v12079_v46  ;;  %6295 = vmatmul.bf16.gmra.mxu1 %v6201_v18  ;;  %v6037_v37 = vadd.f32 %v8297_v49, %v6036_v4 }
 0x968   : > { %v8301_v25 = vpop.eup %8300  ;;  %v12082_v58 = vadd.f32 1.0, %v8299_v6 }
 0x969   : > { %v6049_v12 = vmul.f32 %v8301_v25, %v5934_v27  ;;  %8302 = vpow2.f32 %v7222_v50  ;;  %v6041_v26 = vsel %vm12088_vm10, %v8297_v49, %v6037_v37  ;;  %vm6054_vm11 = vweird.f32 %v8301_v25 }
 0x96a   : > { %8304 = vrcp.f32 %v12082_v58  ;;  %v6046_v20 = vsel %vm6043_vm12, %v6045_v14, %v6041_v26  ;;  %vm6055_vm14 = vmor %vm6053_vm13, %vm6054_vm11  ;;  %vm6068_vm6 = vweird.f32 %v12082_v58 }
 0x96b   : > { %v6050_v43 = vsub.f32 1.0, %v6049_v12  ;;  %v6189_v41 = vmul.f32 %v6046_v20, %v12053_v3  ;;  %v6074_v3 = vand.u32 2147483648, %v12082_v58 }
 0x96c   : > { %v5864_v45 = vpop.f32.mrf.mxu0 }
 0x96d   : > { %v6051_v63 = vmul.f32 %v8301_v25, %v6050_v43  ;;  %v12095_v30 = vadd.f32 %v12032_v44, %v5864_v45  ;;  %v6075_v15 = vor.u32 1.1754944e-38, %v6074_v3 }
 0x96f   : > { %v8303_v33 = vpop.eup %8302  ;;  %v6052_v17 = vadd.f32 %v8301_v25, %v6051_v63  ;;  %v7223_v60 = vmul.f32 -1.442695, %v12095_v30 }
 0x970   : > { %v8305_v39 = vpop.eup %8304  ;;  %v5936_v54 = vadd.f32 1.0, %v8303_v33 }
 0x971   : > { %v6056_v36 = vsel %vm6055_vm14, %v8301_v25, %v6052_v17  ;;  %v6064_v42 = vmul.f32 %v8305_v39, %v12082_v58  ;;  %8306 = vpow2.f32 %v7223_v60  ;;  %vm6069_vm0 = vweird.f32 %v8305_v39 }
 0x972   : > { %v6061_v51 = vsel %vm6058_vm15, %v6060_v21, %v6056_v36  ;;  %8308 = vrcp.f32 %v5936_v54  ;;  %vm12111_vm1 = vmor %vm6068_vm6, %vm6069_vm0  ;;  %v6087_v52 = vand.u32 2147483647, %v5936_v54  ;;  %v6089_v62 = vand.u32 2147483648, %v5936_v54 }
 0x973   : > { %v6190_v9 = vmul.f32 %v6061_v51, %v12059_v24  ;;  %v6065_v35 = vsub.f32 1.0, %v6064_v42  ;;  %v6072_v24 = vand.u32 2147483647, %v12082_v58  ;;  %vm6083_vm3 = vweird.f32 %v5936_v54 }
 0x974   : > { %v5866_v34 = vpop.f32.mrf.mxu0  ;;  %v6090_v10 = vor.u32 1.1754944e-38, %v6089_v62  ;;  %vm6088_vm7 = vcmp.eq.f32.partialorder %v6087_v52, 8.507059e+37 }
 0x975   : > { %v6066_v13 = vmul.f32 %v8305_v39, %v6065_v35  ;;  %v12102_v19 = vadd.f32 %v12032_v44, %v5866_v34  ;;  %v6202_v38 = vpack.c.bf16 %v6190_v9, %v6189_v41  ;;  %vm6073_vm4 = vcmp.eq.f32.partialorder %v6072_v24, 8.507059e+37 }
 0x977   : > { %v8307_v28 = vpop.eup %8306  ;;  %v7224_v53 = vmul.f32 -1.442695, %v12102_v19  ;;  %6300 = vmatmul.bf16.gmra.mxu1 %v6202_v38  ;;  %v6067_v5 = vadd.f32 %v8305_v39, %v6066_v13 }
 0x978   : > { %v8309_v32 = vpop.eup %8308  ;;  %v12105_v7 = vadd.f32 1.0, %v8307_v28 }
 0x979   : > { %v6079_v47 = vmul.f32 %v8309_v32, %v5936_v54  ;;  %8310 = vpow2.f32 %v7224_v53  ;;  %v6071_v59 = vsel %vm12111_vm1, %v8305_v39, %v6067_v5  ;;  %vm6084_vm2 = vweird.f32 %v8309_v32 }
 0x97a   : > { %8312 = vrcp.f32 %v12105_v7  ;;  %v6076_v23 = vsel %vm6073_vm4, %v6075_v15, %v6071_v59  ;;  %vm6085_vm5 = vmor %vm6083_vm3, %vm6084_vm2  ;;  %vm6098_vm9 = vweird.f32 %v12105_v7 }
 0x97b   : > { %v6080_v29 = vsub.f32 1.0, %v6079_v47  ;;  %v6191_v6 = vmul.f32 %v6076_v23, %v12072_v8  ;;  %v6104_v8 = vand.u32 2147483648, %v12105_v7 }
 0x97c   : > { %v5869_v56 = vpop.f32.mrf.mxu0 }
 0x97d   : > { %v6081_v49 = vmul.f32 %v8309_v32, %v6080_v29  ;;  %v12118_v0 = vadd.f32 %v12032_v44, %v5869_v56  ;;  %v6105_v21 = vor.u32 1.1754944e-38, %v6104_v8 }
 0x97f   : > { %v8311_v27 = vpop.eup %8310  ;;  %v6082_v57 = vadd.f32 %v8309_v32, %v6081_v49  ;;  %v7225_v48 = vmul.f32 -1.442695, %v12118_v0 }
 0x980   : > { %v8313_v31 = vpop.eup %8312  ;;  %v5938_v11 = vadd.f32 1.0, %v8311_v27 }
 0x981   : > { %v6086_v1 = vsel %vm6085_vm5, %v8309_v32, %v6082_v57  ;;  %v6094_v4 = vmul.f32 %v8313_v31, %v12105_v7  ;;  %8314 = vpow2.f32 %v7225_v48  ;;  %vm6099_vm8 = vweird.f32 %v8313_v31 }
 0x982   : > { %v6091_v18 = vsel %vm6088_vm7, %v6090_v10, %v6086_v1  ;;  %8316 = vrcp.f32 %v5938_v11  ;;  %vm12134_vm10 = vmor %vm6098_vm9, %vm6099_vm8  ;;  %v6117_v14 = vand.u32 2147483647, %v5938_v11  ;;  %v6119_v33 = vand.u32 2147483648, %v5938_v11 }
 0x983   : > { %v6192_v50 = vmul.f32 %v6091_v18, %v12079_v46  ;;  %v6095_v25 = vsub.f32 1.0, %v6094_v4  ;;  %v6102_v46 = vand.u32 2147483647, %v12105_v7  ;;  %vm6113_vm13 = vweird.f32 %v5938_v11 }
 0x984   : > { %v5871_v58 = vpop.f32.mrf.mxu0  ;;  %v6120_v9 = vor.u32 1.1754944e-38, %v6119_v33  ;;  %vm6118_vm15 = vcmp.eq.f32.partialorder %v6117_v14, 8.507059e+37 }
 0x985   : > { %v6096_v37 = vmul.f32 %v8313_v31, %v6095_v25  ;;  %v12125_v12 = vadd.f32 %v12032_v44, %v5871_v58  ;;  %v6203_v16 = vpack.c.bf16 %v6192_v50, %v6191_v6  ;;  %vm6103_vm12 = vcmp.eq.f32.partialorder %v6102_v46, 8.507059e+37 }
 0x987   : > { %v8315_v40 = vpop.eup %8314  ;;  %v7226_v43 = vmul.f32 -1.442695, %v12125_v12  ;;  %6305 = vmatmul.bf16.gmra.mxu1 %v6203_v16  ;;  %v6097_v22 = vadd.f32 %v8313_v31, %v6096_v37 }
 0x988   : > { %v8317_v55 = vpop.eup %8316  ;;  %v12128_v2 = vadd.f32 1.0, %v8315_v40 }
 0x989   : > { %v6109_v45 = vmul.f32 %v8317_v55, %v5938_v11  ;;  %8318 = vpow2.f32 %v7226_v43  ;;  %v6101_v60 = vsel %vm12134_vm10, %v8313_v31, %v6097_v22  ;;  %vm6114_vm11 = vweird.f32 %v8317_v55 }
 0x98a   : > { %8320 = vrcp.f32 %v12128_v2  ;;  %v6106_v41 = vsel %vm6103_vm12, %v6105_v21, %v6101_v60  ;;  %vm6115_vm14 = vmor %vm6113_vm13, %vm6114_vm11  ;;  %vm6128_vm6 = vweird.f32 %v12128_v2 }
 0x98b   : > { %v6110_v26 = vsub.f32 1.0, %v6109_v45  ;;  %v6193_v28 = vmul.f32 %v6106_v41, %v12095_v30  ;;  %v6134_v30 = vand.u32 2147483648, %v12128_v2  ;;  %v8332_v41 = vld [vmem:[#allocation14] sm:$0xff] }
 0x98c   : > { %v5874_v17 = vpop.f32.mrf.mxu0 }
 0x98d   : > { %v6111_v39 = vmul.f32 %v8317_v55, %v6110_v26  ;;  %v12141_v20 = vadd.f32 %v12032_v44, %v5874_v17  ;;  %v6135_v57 = vor.u32 1.1754944e-38, %v6134_v30  ;;  %v8337_v30 = vld [vmem:[#allocation14 + $0x28] sm:$0xff] }
 0x98f   : > { %v8319_v54 = vpop.eup %8318  ;;  %v6112_v36 = vadd.f32 %v8317_v55, %v6111_v39  ;;  %v7227_v42 = vmul.f32 -1.442695, %v12141_v20 }
 0x990   : > { %v8321_v51 = vpop.eup %8320  ;;  %v5940_v35 = vadd.f32 1.0, %v8319_v54 }
 0x991   : > { %v6116_v34 = vsel %vm6115_vm14, %v8317_v55, %v6112_v36  ;;  %v6124_v13 = vmul.f32 %v8321_v51, %v12128_v2  ;;  %8322 = vpow2.f32 %v7227_v42  ;;  %vm6129_vm0 = vweird.f32 %v8321_v51  ;;  %v12161_v36 = vld [vmem:[%s12218_s7 + $0x5] ss:$0 sm:$0xff] }
 0x992   : > { %v6121_v38 = vsel %vm6118_vm15, %v6120_v9, %v6116_v34  ;;  %8324 = vrcp.f32 %v5940_v35  ;;  %vm6130_vm1 = vmor %vm6128_vm6, %vm6129_vm0  ;;  %v6149_v59 = vand.u32 2147483648, %v5940_v35  ;;  %v6147_v27 = vand.u32 2147483647, %v5940_v35 }
 0x993   : > { %v6194_v53 = vmul.f32 %v6121_v38, %v12102_v19  ;;  %v6125_v32 = vsub.f32 1.0, %v6124_v13  ;;  %v6132_v19 = vand.u32 2147483647, %v12128_v2  ;;  %vm6143_vm3 = vweird.f32 %v5940_v35  ;;  %v8333_v13 = vld [vmem:[#allocation14 + $0x8] sm:$0xff] }
 0x994   : > { %v5876_v7 = vpop.f32.mrf.mxu0  ;;  %v6150_v11 = vor.u32 1.1754944e-38, %v6149_v59  ;;  %vm6148_vm7 = vcmp.eq.f32.partialorder %v6147_v27, 8.507059e+37 }
 0x995   : > { %v6126_v5 = vmul.f32 %v8321_v51, %v6125_v32  ;;  %v12148_v47 = vadd.f32 %v12032_v44, %v5876_v7  ;;  %v6204_v3 = vpack.c.bf16 %v6194_v53, %v6193_v28  ;;  %vm6133_vm4 = vcmp.eq.f32.partialorder %v6132_v19, 8.507059e+37  ;;  %v8334_v53 = vld [vmem:[#allocation14 + $0x10] sm:$0xff] }
 0x997   : > { %v8323_v24 = vpop.eup %8322  ;;  %v7228_v29 = vmul.f32 -1.442695, %v12148_v47  ;;  %6310 = vmatmul.bf16.gmra.mxu1 %v6204_v3  ;;  %v6127_v62 = vadd.f32 %v8321_v51, %v6126_v5 }
 0x998   : > { %v8325_v61 = vpop.eup %8324  ;;  %v5941_v52 = vadd.f32 1.0, %v8323_v24 }
 0x999   : > { %v6139_v56 = vmul.f32 %v8325_v61, %v5940_v35  ;;  %8326 = vpow2.f32 %v7228_v29  ;;  %v6131_v49 = vsel %vm6130_vm1, %v8321_v51, %v6127_v62  ;;  %vm6144_vm2 = vweird.f32 %v8325_v61 }
 0x99a   : > { %8328 = vrcp.f32 %v5941_v52  ;;  %v6136_v10 = vsel %vm6133_vm4, %v6135_v57, %v6131_v49  ;;  %vm6145_vm5 = vmor %vm6143_vm3, %vm6144_vm2  ;;  %v6164_v2 = vand.u32 2147483648, %v5941_v52  ;;  %vm6158_vm9 = vweird.f32 %v5941_v52  ;;  %v8338_v49 = vld [vmem:[#allocation14 + $0x30] sm:$0xff] }
 0x99b   : > { %v6140_v44 = vsub.f32 1.0, %v6139_v56  ;;  %v6195_v50 = vmul.f32 %v6136_v10, %v12118_v0  ;;  %v6162_v22 = vand.u32 2147483647, %v5941_v52 }
 0x99c   : > { %v6165_v63 = vor.u32 1.1754944e-38, %v6164_v2 }
 0x99d   : > { %v6141_v15 = vmul.f32 %v8325_v61, %v6140_v44  ;;  %vm6163_vm12 = vcmp.eq.f32.partialorder %v6162_v22, 8.507059e+37 }
 0x99f   : > { %v8327_v48 = vpop.eup %8326  ;;  %v6142_v31 = vadd.f32 %v8325_v61, %v6141_v15 }
 0x9a0   : > { %v8329_v23 = vpop.eup %8328  ;;  %v5942_v1 = vadd.f32 1.0, %v8327_v48  ;;  %v8339_v48 = vld [vmem:[#allocation14 + $0x38] sm:$0xff] }
 0x9a1   : > { %v6146_v4 = vsel %vm6145_vm5, %v8325_v61, %v6142_v31  ;;  %v6154_v18 = vmul.f32 %v8329_v23, %v5941_v52  ;;  %vm6159_vm8 = vweird.f32 %v8329_v23  ;;  %v8336_v61 = vld [vmem:[#allocation14 + $0x20] sm:$0xff] }
 0x9a2   : > { %v6151_v6 = vsel %vm6148_vm7, %v6150_v11, %v6146_v4  ;;  %8330 = vrcp.f32 %v5942_v1  ;;  %vm6160_vm10 = vmor %vm6158_vm9, %vm6159_vm8  ;;  %v6179_v8 = vand.u32 2147483648, %v5942_v1  ;;  %v6177_v0 = vand.u32 2147483647, %v5942_v1  ;;  %v8340_v11 = vld [vmem:[#allocation14 + $0x40] sm:$0xff] }
 0x9a3   : > { %v6196_v25 = vmul.f32 %v6151_v6, %v12125_v12  ;;  %v6155_v58 = vsub.f32 1.0, %v6154_v18  ;;  %vm6173_vm13 = vweird.f32 %v5942_v1  ;;  %v8341_v6 = vld [vmem:[#allocation14 + $0x48] sm:$0xff] }
 0x9a4   : > { %v6180_v33 = vor.u32 1.1754944e-38, %v6179_v8  ;;  %vm6178_vm15 = vcmp.eq.f32.partialorder %v6177_v0, 8.507059e+37  ;;  %v8344_v8 = vld [vmem:[#allocation14 + $0x60] sm:$0xff] }
 0x9a5   : > { %v6156_v37 = vmul.f32 %v8329_v23, %v6155_v58  ;;  %v6205_v16 = vpack.c.bf16 %v6196_v25, %v6195_v50 }
 0x9a7   : > { %6315 = vmatmul.bf16.gmra.mxu1 %v6205_v16  ;;  %v6157_v43 = vadd.f32 %v8329_v23, %v6156_v37  ;;  %v8342_v37 = vld [vmem:[#allocation14 + $0x50] sm:$0xff] }
 0x9a8   : > { %v8331_v40 = vpop.eup %8330 }
 0x9a9   : > { %v6169_v55 = vmul.f32 %v8331_v40, %v5942_v1  ;;  %v6161_v46 = vsel %vm6160_vm10, %v8329_v23, %v6157_v43  ;;  %vm6174_vm11 = vweird.f32 %v8331_v40 }
 0x9aa   : > { %v6166_v14 = vsel %vm6163_vm12, %v6165_v63, %v6161_v46  ;;  %vm6175_vm14 = vmor %vm6173_vm13, %vm6174_vm11  ;;  %v8345_v63 = vld [vmem:[#allocation14 + $0x68] sm:$0xff] }
 0x9ab   : > { %v6170_v45 = vsub.f32 1.0, %v6169_v55  ;;  %v6197_v39 = vmul.f32 %v6166_v14, %v12141_v20  ;;  %v8343_v55 = vld [vmem:[#allocation14 + $0x58] sm:$0xff] }
 0x9ad   : > { %v6171_v26 = vmul.f32 %v8331_v40, %v6170_v45 }
 0x9af   : > { %v6172_v12 = vadd.f32 %v8331_v40, %v6171_v26 }
 0x9b1   : > { %v6176_v17 = vsel %vm6175_vm14, %v8331_v40, %v6172_v12 }
 0x9b2   : > { %v6181_v60 = vsel %vm6178_vm15, %v6180_v33, %v6176_v17  ;;  %v8346_v17 = vld [vmem:[#allocation14 + $0x70] sm:$0xff] }
 0x9b3   : > { %v6198_v21 = vmul.f32 %v6181_v60, %v12148_v47  ;;  %v8335_v47 = vld [vmem:[#allocation14 + $0x18] sm:$0xff] }
 0x9b5   : > { %v6206_v54 = vpack.c.bf16 %v6198_v21, %v6197_v39 }
 0x9b7   : > { %6320 = vmatmul.bf16.gmra.mxu1 %v6206_v54  ;;  %v8347_v54 = vld [vmem:[#allocation14 + $0x78] sm:$0xff] }
 0x9bc   : > { %v6286_v42 = vpop.f32.mrf.mxu1 }
 0x9bd   : > { %v6287_v51 = vadd.f32 %v12161_v36, %v6286_v42 }
 0x9bf   : > { %v6326_v9 = vadd.f32 %v8332_v41, %v6287_v51 }
 0x9c1   : > { %6358 = vst [vmem:[#allocation15] sm:$0xff] %v6326_v9 }
 0x9c4   : > { %v6288_v35 = vpop.f32.mrf.mxu1 }
 0x9c5   : > { %v6289_v34 = vadd.f32 %v12161_v36, %v6288_v35 }
 0x9c7   : > { %v6327_v20 = vadd.f32 %v8333_v13, %v6289_v34 }
 0x9c9   : > { %6359 = vst [vmem:[#allocation15 + $0x8] sm:$0xff] %v6327_v20 }
 0x9d2   : > { %v6291_v38 = vpop.f32.mrf.mxu1 }
 0x9d3   : > { %v6292_v28 = vadd.f32 %v12161_v36, %v6291_v38 }
 0x9d5   : > { %v6328_v32 = vadd.f32 %v8334_v53, %v6292_v28 }
 0x9d7   : > { %6360 = vst [vmem:[#allocation15 + $0x10] sm:$0xff] %v6328_v32 }
 0x9da   : > { %v6293_v7 = vpop.f32.mrf.mxu1 }
 0x9db   : > { %v6294_v5 = vadd.f32 %v12161_v36, %v6293_v7 }
 0x9dd   : > { %v6329_v3 = vadd.f32 %v8335_v47, %v6294_v5 }
 0x9df   : > { %6361 = vst [vmem:[#allocation15 + $0x18] sm:$0xff] %v6329_v3 }
 0x9e4   : > { %v6296_v24 = vpop.f32.mrf.mxu1 }
 0x9e5   : > { %v6297_v29 = vadd.f32 %v12161_v36, %v6296_v24 }
 0x9e7   : > { %v6330_v52 = vadd.f32 %v8336_v61, %v6297_v29 }
 0x9e9   : > { %6362 = vst [vmem:[#allocation15 + $0x20] sm:$0xff] %v6330_v52 }
 0x9ec   : > { %v6298_v62 = vpop.f32.mrf.mxu1 }
 0x9ed   : > { %v6299_v56 = vadd.f32 %v12161_v36, %v6298_v62 }
 0x9ef   : > { %v6331_v19 = vadd.f32 %v8337_v30, %v6299_v56 }
 0x9f1   : > { %6363 = vst [vmem:[#allocation15 + $0x28] sm:$0xff] %v6331_v19 }
 0x9f4   : > { %v6301_v44 = vpop.f32.mrf.mxu1 }
 0x9f5   : > { %v6302_v59 = vadd.f32 %v12161_v36, %v6301_v44 }
 0x9f7   : > { %v6332_v15 = vadd.f32 %v8338_v49, %v6302_v59 }
 0x9f9   : > { %6364 = vst [vmem:[#allocation15 + $0x30] sm:$0xff] %v6332_v15 }
 0x9fc   : > { %v6303_v27 = vpop.f32.mrf.mxu1 }
 0x9fd   : > { %v6304_v57 = vadd.f32 %v12161_v36, %v6303_v27 }
 0x9ff   : > { %v6333_v31 = vadd.f32 %v8339_v48, %v6304_v57 }
 0xa01   : > { %6365 = vst [vmem:[#allocation15 + $0x38] sm:$0xff] %v6333_v31 }
 0xa04   : > { %v6306_v23 = vpop.f32.mrf.mxu1 }
 0xa05   : > { %v6307_v10 = vadd.f32 %v12161_v36, %v6306_v23 }
 0xa07   : > { %v6334_v1 = vadd.f32 %v8340_v11, %v6307_v10 }
 0xa09   : > { %6366 = vst [vmem:[#allocation15 + $0x40] sm:$0xff] %v6334_v1 }
 0xa0c   : > { %v6308_v4 = vpop.f32.mrf.mxu1 }
 0xa0d   : > { %v6309_v18 = vadd.f32 %v12161_v36, %v6308_v4 }
 0xa0f   : > { %v6335_v50 = vadd.f32 %v8341_v6, %v6309_v18 }
 0xa11   : > { %6367 = vst [vmem:[#allocation15 + $0x48] sm:$0xff] %v6335_v50 }
 0xa14   : > { %v6311_v25 = vpop.f32.mrf.mxu1 }
 0xa15   : > { %v6312_v58 = vadd.f32 %v12161_v36, %v6311_v25 }
 0xa17   : > { %v6336_v16 = vadd.f32 %v8342_v37, %v6312_v58 }
 0xa19   : > { %6368 = vst [vmem:[#allocation15 + $0x50] sm:$0xff] %v6336_v16 }
 0xa1c   : > { %v6313_v40 = vpop.f32.mrf.mxu1 }
 0xa1d   : > { %v6314_v43 = vadd.f32 %v12161_v36, %v6313_v40 }
 0xa1f   : > { %v6337_v2 = vadd.f32 %v8343_v55, %v6314_v43 }
 0xa21   : > { %6369 = vst [vmem:[#allocation15 + $0x58] sm:$0xff] %v6337_v2 }
 0xa24   : > { %v6316_v22 = vpop.f32.mrf.mxu1 }
 0xa25   : > { %v6317_v45 = vadd.f32 %v12161_v36, %v6316_v22 }
 0xa27   : > { %v6338_v46 = vadd.f32 %v8344_v8, %v6317_v45 }
 0xa29   : > { %6370 = vst [vmem:[#allocation15 + $0x60] sm:$0xff] %v6338_v46 }
 0xa2c   : > { %v6318_v26 = vpop.f32.mrf.mxu1 }
 0xa2d   : > { %v6319_v0 = vadd.f32 %v12161_v36, %v6318_v26 }
 0xa2f   : > { %v6339_v12 = vadd.f32 %v8345_v63, %v6319_v0 }
 0xa31   : > { %6371 = vst [vmem:[#allocation15 + $0x68] sm:$0xff] %v6339_v12 }
 0xa34   : > { %v6321_v14 = vpop.f32.mrf.mxu1 }
 0xa35   : > { %v6322_v33 = vadd.f32 %v12161_v36, %v6321_v14 }
 0xa37   : > { %v6340_v60 = vadd.f32 %v8346_v17, %v6322_v33 }
 0xa39   : > { %6372 = vst [vmem:[#allocation15 + $0x70] sm:$0xff] %v6340_v60 }
 0xa3c   : > { %v6323_v39 = vpop.f32.mrf.mxu1 }
 0xa3d   : > { %v6324_v21 = vadd.f32 %v12161_v36, %v6323_v39 }
 0xa3f   : > { %v6341_v42 = vadd.f32 %v8347_v54, %v6324_v21 }
 0xa41   : > { %6373 = vst [vmem:[#allocation15 + $0x78] sm:$0xff] %v6341_v42 }
 0xa42 PF: > { %p7543_p3 = scmp.eq.s32.totalorder %s8700_s20, 1  ;;  %s8617_s18 = smov [#allocation14]  }
 0xa43   : > { %s6379_s28 = sshll.u32 %s8617_s18, 4  ;;  %s6381_s21 = sshll.u32 %s12220_s9, 4  ;;  %s6380_s28 = int_to_ptr.vmem [resolvable:$true] %s6379_s28  ;;  %s6382_s21 = int_to_ptr.hbm [resolvable:$true] %s6381_s21 }
 0xa44   : > { %s8618_s29 = smov 128   ;;  %s8619_s23 = smov 8  }
 0xa45   : > { %7510 = dma.vmem_to_hbm [thread:$0]  (%p7543_p3), %s6380_s28, 2048, %s6382_s21, [#allocation7], %s8618_s29, %s8618_s29, %s8619_s23  }
 0xa46   : > { %s6395_s16 = sshll.u32 %s12221_s10, 4  ;;  %s8620_s26 = smov [#allocation15]   ;;  %s6396_s16 = int_to_ptr.hbm [resolvable:$true] %s6395_s16 }
 0xa47   : > { %s6393_s25 = sshll.u32 %s8620_s26, 4  ;;  %s6394_s25 = int_to_ptr.vmem [resolvable:$true] %s6393_s25 }
 0xa48   : > { %7512 = dma.vmem_to_hbm [thread:$0]  (%p7543_p3), %s6394_s25, 2048, %s6396_s16, [#allocation16], %s8618_s29, %s8618_s29, %s8619_s23  }
 0xa49   : > { %8583 = dma.done.wait (%p7543_p3), [#allocation7], 2048  }
 0xa4a   : > { %8585 = vsyncadd (%p7543_p3), [#allocation7], 4294965248 }
 0xa4b   : > { %8587 = dma.done.wait (%p7543_p3), [#allocation16], 2048  }
 0xa4c   : > { %8589 = vsyncadd (%p7543_p3), [#allocation16], 4294965248 }
 0xa4d PF: > { %p25_p12 = scmp.ge.s32.totalorder %s8736_s12, 4   ;;  %s12528_s13 = smov %s8596_s14 }
 0xa4e   : > { %s12529_s14 = smov %s8600_s15  ;;  %s12530_s15 = smov %s8748_s30 }
 0xa4f   : > { %s12531_s16 = smov %s8736_s12  ;;  %27 = sbr.rel (!%p25_p12) target bundleno = 7 (0x7), region = 151 }
 0xa54   :  { %6417 = vsyncpa [#allocation6], 1 }
 0xa55   :  { %6419 = vsyncpa [#allocation6 + $0x1], 1 }
 0xa56   :  { %6420 = vsyncpa [#allocation9], 1 }
 0xa57   :  { %6421 = vsyncpa [#allocation12], 1 }
 0xa58   :  { %6422 = vsyncpa [#allocation7], 1 }
 0xa59   :  { %6424 = vsyncpa [#allocation7 + $0x1], 1 }
 0xa5a   :  { %6425 = vsyncpa [#allocation16], 1 }

</bundles_post_ra>
